<compile_context>
chip_gen: v5e
topology: v5e:2x2
jax: 0.10.0
libtpu: 0.0.40
codegen_flags: <defaults>
</compile_context>

<pallas_src>
import math

import jax
import jax.numpy as jnp
from jax.experimental import pallas as pl
from jax.experimental.pallas import tpu as pltpu


def _round_up(x, m):
    return ((x + m - 1) // m) * m


def _choose_row_tile(R, in_row_bytes, out_row_bytes):
    """Pick the row tile from a VMEM budget; prefer >=2 grid steps (megacore)."""
    budget = 4 << 20                       # per set of buffers; x/out double-buffered
    tr = budget // max(in_row_bytes + out_row_bytes, 1)
    tr = max(8, min(512, int(tr)))
    if R >= 16:
        tr = min(tr, _round_up((R + 1) // 2, 8))
    return _round_up(min(tr, max(R, 1)), 8)


# ---------------------------------------------------------------------------
# Fused kernel: 3-tap conv (accumulated matmuls) + folded-BN shift + LeakyReLU
# ---------------------------------------------------------------------------
def _make_conv_kernel(*, stride, wout, cin, cout, tr):
    # Tap k reads padded W position stride*wo + k  ->  phase k%stride, offset k//stride.
    taps = tuple((k % stride, k // stride) for k in range(3))

    def kernel(x_ref, w_ref, shift_ref, o_ref):
        # x_ref:     (tr, stride, Wq, cin)  bf16   (w = stride*q + phase)
        # w_ref:     (3, cin, cout)         bf16   (BN scale already folded in)
        # shift_ref: (1, cout)              f32
        # o_ref:     (tr, wout, cout)
        if cin == 1:
            # First layer: three VPU broadcast-FMAs; a K=1 matmul would waste the MXU.
            acc = jnp.zeros((tr, wout, cout), jnp.float32)
            for k, (ph, q0) in enumerate(taps):
                tap = x_ref[:, ph, q0:q0 + wout, :].astype(jnp.float32)  # (tr, wout, 1)
                acc = acc + tap * w_ref[k].astype(jnp.float32)           # (1, cout) bcast
        else:
            acc = jnp.zeros((tr * wout, cout), jnp.float32)
            for k, (ph, q0) in enumerate(taps):
                tap = x_ref[:, ph, q0:q0 + wout, :]                      # (tr, wout, cin)
                acc = acc + jnp.dot(tap.reshape(tr * wout, cin), w_ref[k],
                                    preferred_element_type=jnp.float32)
            acc = acc.reshape(tr, wout, cout)
        y = acc + shift_ref[...].astype(jnp.float32)
        o_ref[...] = jnp.where(y >= 0.0, y, 0.2 * y).astype(o_ref.dtype)

    return kernel


def conv1x3_bn_lrelu(x, lp, *, stride, pad_h, pad_w=1, eps=1e-5,
                     out_dtype=jnp.bfloat16):
    """Conv2d(k=(1,3), stride, padding=(pad_h, pad_w)) + BatchNorm2d(eval) + LeakyReLU(0.2).

    x: (N, H, W, Cin) NHWC. Returns (N, Hout, Wout, Cout) in out_dtype.
    """
    weight, bias = lp["weight"], lp["bias"]
    gamma, beta, mean, var = lp["gamma"], lp["beta"], lp["mean"], lp["var"]

    N, H, W, Cin = x.shape
    Cout = weight.shape[0]

    Hp = H + 2 * pad_h
    Wp = W + 2 * pad_w
    Hout = (Hp - 1) // stride + 1          # kernel height = 1
    Wout = (Wp - 3) // stride + 1          # kernel width  = 3
    Wq = -(-Wp // stride)                  # W positions per stride phase
    Wtot = Wq * stride                     # padded-W, rounded up to stride

    # Eval-mode BatchNorm folded: scale goes into the weights (f32 math, then
    # bf16); the per-channel shift stays f32 and is added in-kernel.
    inv_std = 1.0 / jnp.sqrt(var + eps)
    scale = gamma * inv_std
    shift = (beta + (bias - mean) * scale).astype(jnp.float32).reshape(1, Cout)
    w_taps = (jnp.transpose(weight[:, :, 0, :], (2, 1, 0))
              * scale[None, None, :]).astype(jnp.bfloat16)           # (3, Cin, Cout)

    # Glue (fuses into ~one XLA pass, bf16): zero-pad H/W, select the strided
    # conv rows (kernel height 1), de-interleave W into `stride` phases so the
    # taps are contiguous static slices in the kernel, flatten (N, Hout) rows.
    xp = jnp.pad(x.astype(jnp.bfloat16),
                 ((0, 0), (pad_h, pad_h), (pad_w, pad_w + Wtot - Wp), (0, 0)))
    rows = xp[:, 0:stride * (Hout - 1) + 1:stride, :, :]             # (N,Hout,Wtot,Cin)
    rows = rows.reshape(N * Hout, Wq, stride, Cin)
    rows = jnp.transpose(rows, (0, 2, 1, 3))                         # (R, S, Wq, Cin)

    R = N * Hout
    out_isz = jnp.dtype(out_dtype).itemsize
    in_row_bytes = stride * _round_up(Wq, 8) * _round_up(Cin, 128) * 2
    out_row_bytes = _round_up(Wout, 8) * _round_up(Cout, 128) * out_isz
    tr = _choose_row_tile(R, in_row_bytes, out_row_bytes)
    R_pad = _round_up(R, tr)
    if R_pad != R:
        rows = jnp.pad(rows, ((0, R_pad - R), (0, 0), (0, 0), (0, 0)))

    kernel = _make_conv_kernel(stride=stride, wout=Wout, cin=Cin, cout=Cout, tr=tr)

    bytes_accessed = (rows.size * 2 + w_taps.size * 2 + shift.size * 4
                      + R_pad * Wout * Cout * out_isz)

    out = pl.pallas_call(
        kernel,
        out_shape=jax.ShapeDtypeStruct((R_pad, Wout, Cout), out_dtype),
        grid_spec=pltpu.PrefetchScalarGridSpec(
            num_scalar_prefetch=0,
            grid=(R_pad // tr,),
            in_specs=[
                pl.BlockSpec((tr, stride, Wq, Cin), lambda i: (i, 0, 0, 0)),
                pl.BlockSpec((3, Cin, Cout), lambda i: (0, 0, 0)),
                pl.BlockSpec((1, Cout), lambda i: (0, 0)),
            ],
            out_specs=pl.BlockSpec((tr, Wout, Cout), lambda i: (i, 0, 0)),
        ),
        compiler_params=pltpu.CompilerParams(
            dimension_semantics=("parallel",),
            vmem_limit_bytes=32 * 1024 * 1024),
        cost_estimate=pl.CostEstimate(
            flops=2 * R_pad * Wout * 3 * Cin * Cout,
            transcendentals=0,
            bytes_accessed=int(bytes_accessed)),
    )(rows, w_taps, shift)

    return out[:R].reshape(N, Hout, Wout, Cout)


# ---------------------------------------------------------------------------
# Deterministic synthetic parameters
# ---------------------------------------------------------------------------
def _make_block_params(key, cin, cout):
    kw, kb, kg, kbe, km, kv = jax.random.split(key, 6)
    return dict(
        weight=0.1 * jax.random.normal(kw, (cout, cin, 1, 3), jnp.float32),
        bias=0.05 * jax.random.normal(kb, (cout,), jnp.float32),
        gamma=1.0 + 0.1 * jax.random.normal(kg, (cout,), jnp.float32),
        beta=0.05 * jax.random.normal(kbe, (cout,), jnp.float32),
        mean=0.05 * jax.random.normal(km, (cout,), jnp.float32),
        var=1.0 + 0.1 * jax.random.uniform(kv, (cout,), jnp.float32),
    )


def make_encoder_params(key, ngf=32, input_nc=1):
    keys = jax.random.split(key, 7)
    return dict(
        inlayer=_make_block_params(keys[0], input_nc, ngf),
        d1_c1=_make_block_params(keys[1], ngf, ngf * 2),
        d1_c2=_make_block_params(keys[2], ngf * 2, ngf * 2),
        d2_c1=_make_block_params(keys[3], ngf * 2, ngf * 4),
        d2_c2=_make_block_params(keys[4], ngf * 4, ngf * 4),
        d3_c1=_make_block_params(keys[5], ngf * 4, ngf * 8),
        d3_c2=_make_block_params(keys[6], ngf * 8, ngf * 8),
    )


# ---------------------------------------------------------------------------
# ultrasoundEncoder.forward
# ---------------------------------------------------------------------------
def ultrasound_encoder_forward(params, x_nchw):
    """x_nchw: (N, C=1, D2, D3) float32, NCHW like PyTorch. Returns NCHW f32."""
    time_downsample_ratio = 2 ** 3

    # .permute(0, 1, 3, 2)
    x = jnp.transpose(x_nchw, (0, 1, 3, 2))
    origin_len = x.shape[-1]
    if origin_len % time_downsample_ratio != 0:
        pad_len = (int(math.ceil(origin_len / time_downsample_ratio))
                   * time_downsample_ratio - origin_len)
        x = jnp.pad(x, ((0, 0), (0, 0), (0, 0), (0, pad_len)))  # F.pad(..., (0, pad_len, 0, 0))

    # NCHW -> NHWC for the kernels; intermediate activations in bf16.
    x = jnp.transpose(x, (0, 2, 3, 1)).astype(jnp.bfloat16)

    # in_conv
    x = conv1x3_bn_lrelu(x, params["inlayer"], stride=1, pad_h=2, pad_w=1)
    # en_down_conv x 3
    x = conv1x3_bn_lrelu(x, params["d1_c1"], stride=2, pad_h=4, pad_w=1)
    x = conv1x3_bn_lrelu(x, params["d1_c2"], stride=1, pad_h=2, pad_w=1)
    x = conv1x3_bn_lrelu(x, params["d2_c1"], stride=2, pad_h=4, pad_w=1)
    x = conv1x3_bn_lrelu(x, params["d2_c2"], stride=1, pad_h=2, pad_w=1)
    x = conv1x3_bn_lrelu(x, params["d3_c1"], stride=2, pad_h=4, pad_w=1)
    x = conv1x3_bn_lrelu(x, params["d3_c2"], stride=1, pad_h=2, pad_w=1,
                         out_dtype=jnp.float32)

    # NHWC -> NCHW (match PyTorch output layout)
    return jnp.transpose(x, (0, 3, 1, 2))


if __name__ == "__main__":
    key = jax.random.PRNGKey(0)
    kp, kx = jax.random.split(key)

    params = make_encoder_params(kp, ngf=32, input_nc=1)

    # Input (N=2, C=1, 13, 12): after permute, time axis = 13 -> padded to 16,
    # exercising the time_downsample_ratio padding branch.
    x = jax.random.normal(kx, (2, 1, 13, 12), jnp.float32)

    forward = jax.jit(ultrasound_encoder_forward)
    out = jax.block_until_ready(forward(params, x))

    assert out.shape == (2, 256, 16, 2), out.shape
    assert out.dtype == jnp.float32
    assert bool(jnp.all(jnp.isfinite(out)))
    print("KERNEL_OK")
</pallas_src>

<mosaic_0001>
module attributes {stable_mosaic.version = 11 : i64} {
  func.func @kernel(%arg0: i32, %arg1: memref<16x1x18x1xbf16, #tpu.memory_space<vmem>>, %arg2: memref<3x1x32xbf16, #tpu.memory_space<vmem>>, %arg3: memref<1x32xf32, #tpu.memory_space<vmem>>, %arg4: memref<16x16x32xbf16, #tpu.memory_space<vmem>>) attributes {dimension_semantics = [#tpu.dimension_semantics<parallel>], iteration_bounds = array<i64: 2>, scalar_prefetch = 0 : i64, scratch_operands = 0 : i64, tpu.core_type = #tpu.core_type<tc>, window_params = [{transform_indices = @transform_0, window_bounds = array<i64: 16, 1, 18, 1>}, {pipeline_mode = #tpu.pipeline_mode<synchronous>, transform_indices = @transform_1, window_bounds = array<i64: 3, 1, 32>}, {pipeline_mode = #tpu.pipeline_mode<synchronous>, transform_indices = @transform_2, window_bounds = array<i64: 1, 32>}, {transform_indices = @transform_3, window_bounds = array<i64: 16, 16, 32>}]} {
    %cst = arith.constant 0.000000e+00 : f32
    %0 = vector.broadcast %cst : f32 to vector<16x16x32xf32>
    %c0 = arith.constant 0 : index
    %c0_0 = arith.constant 0 : index
    %c0_1 = arith.constant 0 : index
    %c0_2 = arith.constant 0 : index
    %1 = vector.load %arg1[%c0, %c0_0, %c0_1, %c0_2] : memref<16x1x18x1xbf16, #tpu.memory_space<vmem>>, vector<16x1x16x1xbf16>
    %2 = vector.shape_cast %1 : vector<16x1x16x1xbf16> to vector<16x16x1xbf16>
    %3 = arith.extf %2 : vector<16x16x1xbf16> to vector<16x16x1xf32>
    %c0_3 = arith.constant 0 : index
    %c0_4 = arith.constant 0 : index
    %c0_5 = arith.constant 0 : index
    %4 = vector.load %arg2[%c0_3, %c0_4, %c0_5] : memref<3x1x32xbf16, #tpu.memory_space<vmem>>, vector<1x1x32xbf16>
    %5 = vector.shape_cast %4 : vector<1x1x32xbf16> to vector<1x32xbf16>
    %6 = arith.extf %5 : vector<1x32xbf16> to vector<1x32xf32>
    %7 = vector.shape_cast %6 : vector<1x32xf32> to vector<1x1x32xf32>
    %8 = vector.broadcast %3 : vector<16x16x1xf32> to vector<16x16x32xf32>
    %9 = vector.broadcast %7 : vector<1x1x32xf32> to vector<16x16x32xf32>
    %10 = arith.mulf %8, %9 : vector<16x16x32xf32>
    %11 = arith.addf %0, %10 : vector<16x16x32xf32>
    %c0_6 = arith.constant 0 : index
    %c0_7 = arith.constant 0 : index
    %c1 = arith.constant 1 : index
    %c0_8 = arith.constant 0 : index
    %12 = vector.load %arg1[%c0_6, %c0_7, %c1, %c0_8] : memref<16x1x18x1xbf16, #tpu.memory_space<vmem>>, vector<16x1x16x1xbf16>
    %13 = vector.shape_cast %12 : vector<16x1x16x1xbf16> to vector<16x16x1xbf16>
    %14 = arith.extf %13 : vector<16x16x1xbf16> to vector<16x16x1xf32>
    %c1_9 = arith.constant 1 : index
    %c0_10 = arith.constant 0 : index
    %c0_11 = arith.constant 0 : index
    %15 = vector.load %arg2[%c1_9, %c0_10, %c0_11] : memref<3x1x32xbf16, #tpu.memory_space<vmem>>, vector<1x1x32xbf16>
    %16 = vector.shape_cast %15 : vector<1x1x32xbf16> to vector<1x32xbf16>
    %17 = arith.extf %16 : vector<1x32xbf16> to vector<1x32xf32>
    %18 = vector.shape_cast %17 : vector<1x32xf32> to vector<1x1x32xf32>
    %19 = vector.broadcast %14 : vector<16x16x1xf32> to vector<16x16x32xf32>
    %20 = vector.broadcast %18 : vector<1x1x32xf32> to vector<16x16x32xf32>
    %21 = arith.mulf %19, %20 : vector<16x16x32xf32>
    %22 = arith.addf %11, %21 : vector<16x16x32xf32>
    %c0_12 = arith.constant 0 : index
    %c0_13 = arith.constant 0 : index
    %c2 = arith.constant 2 : index
    %c0_14 = arith.constant 0 : index
    %23 = vector.load %arg1[%c0_12, %c0_13, %c2, %c0_14] : memref<16x1x18x1xbf16, #tpu.memory_space<vmem>>, vector<16x1x16x1xbf16>
    %24 = vector.shape_cast %23 : vector<16x1x16x1xbf16> to vector<16x16x1xbf16>
    %25 = arith.extf %24 : vector<16x16x1xbf16> to vector<16x16x1xf32>
    %c2_15 = arith.constant 2 : index
    %c0_16 = arith.constant 0 : index
    %c0_17 = arith.constant 0 : index
    %26 = vector.load %arg2[%c2_15, %c0_16, %c0_17] : memref<3x1x32xbf16, #tpu.memory_space<vmem>>, vector<1x1x32xbf16>
    %27 = vector.shape_cast %26 : vector<1x1x32xbf16> to vector<1x32xbf16>
    %28 = arith.extf %27 : vector<1x32xbf16> to vector<1x32xf32>
    %29 = vector.shape_cast %28 : vector<1x32xf32> to vector<1x1x32xf32>
    %30 = vector.broadcast %25 : vector<16x16x1xf32> to vector<16x16x32xf32>
    %31 = vector.broadcast %29 : vector<1x1x32xf32> to vector<16x16x32xf32>
    %32 = arith.mulf %30, %31 : vector<16x16x32xf32>
    %33 = arith.addf %22, %32 : vector<16x16x32xf32>
    %c0_18 = arith.constant 0 : index
    %c0_19 = arith.constant 0 : index
    %34 = vector.load %arg3[%c0_18, %c0_19] : memref<1x32xf32, #tpu.memory_space<vmem>>, vector<1x32xf32>
    %35 = vector.shape_cast %34 : vector<1x32xf32> to vector<1x1x32xf32>
    %36 = vector.broadcast %35 : vector<1x1x32xf32> to vector<16x16x32xf32>
    %37 = arith.addf %33, %36 : vector<16x16x32xf32>
    %cst_20 = arith.constant 0.000000e+00 : f32
    %38 = vector.broadcast %cst_20 : f32 to vector<16x16x32xf32>
    %39 = arith.cmpf oge, %37, %38 : vector<16x16x32xf32>
    %cst_21 = arith.constant 2.000000e-01 : f32
    %40 = vector.broadcast %cst_21 : f32 to vector<16x16x32xf32>
    %41 = arith.mulf %40, %37 : vector<16x16x32xf32>
    %42 = arith.select %39, %37, %41 : vector<16x16x32xi1>, vector<16x16x32xf32>
    %43 = arith.truncf %42 : vector<16x16x32xf32> to vector<16x16x32xbf16>
    %c0_22 = arith.constant 0 : index
    %c0_23 = arith.constant 0 : index
    %c0_24 = arith.constant 0 : index
    %44 = vector.load %arg4[%c0_22, %c0_23, %c0_24] : memref<16x16x32xbf16, #tpu.memory_space<vmem>>, vector<16x16x32xbf16>
    tpu.vector_store %arg4[%c0_22, %c0_23, %c0_24], %43 {strides = array<i32>} : memref<16x16x32xbf16, #tpu.memory_space<vmem>>, vector<16x16x32xbf16>,
    return
  }
  func.func @transform_0(%arg0: i32) -> (i32, i32, i32, i32) {
    %c0_i32 = arith.constant 0 : i32
    %c0_i32_0 = arith.constant 0 : i32
    %c0_i32_1 = arith.constant 0 : i32
    %c0_i32_2 = arith.constant 0 : i32
    return %arg0, %c0_i32, %c0_i32_0, %c0_i32_1 : i32, i32, i32, i32
  }
  func.func @transform_1(%arg0: i32) -> (i32, i32, i32) {
    %c0_i32 = arith.constant 0 : i32
    %c0_i32_0 = arith.constant 0 : i32
    %c0_i32_1 = arith.constant 0 : i32
    %c0_i32_2 = arith.constant 0 : i32
    return %c0_i32, %c0_i32_0, %c0_i32_1 : i32, i32, i32
  }
  func.func @transform_2(%arg0: i32) -> (i32, i32) {
    %c0_i32 = arith.constant 0 : i32
    %c0_i32_0 = arith.constant 0 : i32
    %c0_i32_1 = arith.constant 0 : i32
    return %c0_i32, %c0_i32_0 : i32, i32
  }
  func.func @transform_3(%arg0: i32) -> (i32, i32, i32) {
    %c0_i32 = arith.constant 0 : i32
    %c0_i32_0 = arith.constant 0 : i32
    %c0_i32_1 = arith.constant 0 : i32
    return %arg0, %c0_i32, %c0_i32_0 : i32, i32, i32
  }
}

module attributes {stable_mosaic.version = 11 : i64} {
  func.func @kernel(%arg0: i32, %arg1: memref<16x2x9x32xbf16, #tpu.memory_space<vmem>>, %arg2: memref<3x32x64xbf16, #tpu.memory_space<vmem>>, %arg3: memref<1x64xf32, #tpu.memory_space<vmem>>, %arg4: memref<16x8x64xbf16, #tpu.memory_space<vmem>>) attributes {dimension_semantics = [#tpu.dimension_semantics<parallel>], iteration_bounds = array<i64: 2>, scalar_prefetch = 0 : i64, scratch_operands = 0 : i64, tpu.core_type = #tpu.core_type<tc>, window_params = [{transform_indices = @transform_0, window_bounds = array<i64: 16, 2, 9, 32>}, {pipeline_mode = #tpu.pipeline_mode<synchronous>, transform_indices = @transform_1, window_bounds = array<i64: 3, 32, 64>}, {pipeline_mode = #tpu.pipeline_mode<synchronous>, transform_indices = @transform_2, window_bounds = array<i64: 1, 64>}, {transform_indices = @transform_3, window_bounds = array<i64: 16, 8, 64>}]} {
    %cst = arith.constant 0.000000e+00 : f32
    %0 = vector.broadcast %cst : f32 to vector<128x64xf32>
    %c0 = arith.constant 0 : index
    %c0_0 = arith.constant 0 : index
    %c0_1 = arith.constant 0 : index
    %c0_2 = arith.constant 0 : index
    %1 = vector.load %arg1[%c0, %c0_0, %c0_1, %c0_2] : memref<16x2x9x32xbf16, #tpu.memory_space<vmem>>, vector<16x1x8x32xbf16>
    %2 = vector.shape_cast %1 : vector<16x1x8x32xbf16> to vector<16x8x32xbf16>
    %3 = vector.shape_cast %2 : vector<16x8x32xbf16> to vector<128x32xbf16>
    %c0_3 = arith.constant 0 : index
    %c0_4 = arith.constant 0 : index
    %c0_5 = arith.constant 0 : index
    %4 = vector.load %arg2[%c0_3, %c0_4, %c0_5] : memref<3x32x64xbf16, #tpu.memory_space<vmem>>, vector<1x32x64xbf16>
    %5 = vector.shape_cast %4 : vector<1x32x64xbf16> to vector<32x64xbf16>
    %cst_6 = arith.constant dense<0.000000e+00> : vector<128x64xf32>
    %6 = tpu.matmul %3, %5, %cst_6 {dimension_numbers = #tpu.dot_dimension_numbers<[1], [0], [0], [1], [0, 0, 1, 1], [], []>} : vector<128x32xbf16>, vector<32x64xbf16>, vector<128x64xf32> -> vector<128x64xf32>
    %7 = arith.addf %0, %6 : vector<128x64xf32>
    %c0_7 = arith.constant 0 : index
    %c1 = arith.constant 1 : index
    %c0_8 = arith.constant 0 : index
    %c0_9 = arith.constant 0 : index
    %8 = vector.load %arg1[%c0_7, %c1, %c0_8, %c0_9] : memref<16x2x9x32xbf16, #tpu.memory_space<vmem>>, vector<16x1x8x32xbf16>
    %9 = vector.shape_cast %8 : vector<16x1x8x32xbf16> to vector<16x8x32xbf16>
    %10 = vector.shape_cast %9 : vector<16x8x32xbf16> to vector<128x32xbf16>
    %c1_10 = arith.constant 1 : index
    %c0_11 = arith.constant 0 : index
    %c0_12 = arith.constant 0 : index
    %11 = vector.load %arg2[%c1_10, %c0_11, %c0_12] : memref<3x32x64xbf16, #tpu.memory_space<vmem>>, vector<1x32x64xbf16>
    %12 = vector.shape_cast %11 : vector<1x32x64xbf16> to vector<32x64xbf16>
    %cst_13 = arith.constant dense<0.000000e+00> : vector<128x64xf32>
    %13 = tpu.matmul %10, %12, %cst_13 {dimension_numbers = #tpu.dot_dimension_numbers<[1], [0], [0], [1], [0, 0, 1, 1], [], []>} : vector<128x32xbf16>, vector<32x64xbf16>, vector<128x64xf32> -> vector<128x64xf32>
    %14 = arith.addf %7, %13 : vector<128x64xf32>
    %c0_14 = arith.constant 0 : index
    %c0_15 = arith.constant 0 : index
    %c1_16 = arith.constant 1 : index
    %c0_17 = arith.constant 0 : index
    %15 = vector.load %arg1[%c0_14, %c0_15, %c1_16, %c0_17] : memref<16x2x9x32xbf16, #tpu.memory_space<vmem>>, vector<16x1x8x32xbf16>
    %16 = vector.shape_cast %15 : vector<16x1x8x32xbf16> to vector<16x8x32xbf16>
    %17 = vector.shape_cast %16 : vector<16x8x32xbf16> to vector<128x32xbf16>
    %c2 = arith.constant 2 : index
    %c0_18 = arith.constant 0 : index
    %c0_19 = arith.constant 0 : index
    %18 = vector.load %arg2[%c2, %c0_18, %c0_19] : memref<3x32x64xbf16, #tpu.memory_space<vmem>>, vector<1x32x64xbf16>
    %19 = vector.shape_cast %18 : vector<1x32x64xbf16> to vector<32x64xbf16>
    %cst_20 = arith.constant dense<0.000000e+00> : vector<128x64xf32>
    %20 = tpu.matmul %17, %19, %cst_20 {dimension_numbers = #tpu.dot_dimension_numbers<[1], [0], [0], [1], [0, 0, 1, 1], [], []>} : vector<128x32xbf16>, vector<32x64xbf16>, vector<128x64xf32> -> vector<128x64xf32>
    %21 = arith.addf %14, %20 : vector<128x64xf32>
    %22 = vector.shape_cast %21 : vector<128x64xf32> to vector<16x8x64xf32>
    %c0_21 = arith.constant 0 : index
    %c0_22 = arith.constant 0 : index
    %23 = vector.load %arg3[%c0_21, %c0_22] : memref<1x64xf32, #tpu.memory_space<vmem>>, vector<1x64xf32>
    %24 = vector.shape_cast %23 : vector<1x64xf32> to vector<1x1x64xf32>
    %25 = vector.broadcast %24 : vector<1x1x64xf32> to vector<16x8x64xf32>
    %26 = arith.addf %22, %25 : vector<16x8x64xf32>
    %cst_23 = arith.constant 0.000000e+00 : f32
    %27 = vector.broadcast %cst_23 : f32 to vector<16x8x64xf32>
    %28 = arith.cmpf oge, %26, %27 : vector<16x8x64xf32>
    %cst_24 = arith.constant 2.000000e-01 : f32
    %29 = vector.broadcast %cst_24 : f32 to vector<16x8x64xf32>
    %30 = arith.mulf %29, %26 : vector<16x8x64xf32>
    %31 = arith.select %28, %26, %30 : vector<16x8x64xi1>, vector<16x8x64xf32>
    %32 = arith.truncf %31 : vector<16x8x64xf32> to vector<16x8x64xbf16>
    %c0_25 = arith.constant 0 : index
    %c0_26 = arith.constant 0 : index
    %c0_27 = arith.constant 0 : index
    %33 = vector.load %arg4[%c0_25, %c0_26, %c0_27] : memref<16x8x64xbf16, #tpu.memory_space<vmem>>, vector<16x8x64xbf16>
    tpu.vector_store %arg4[%c0_25, %c0_26, %c0_27], %32 {strides = array<i32>} : memref<16x8x64xbf16, #tpu.memory_space<vmem>>, vector<16x8x64xbf16>,
    return
  }
  func.func @transform_0(%arg0: i32) -> (i32, i32, i32, i32) {
    %c0_i32 = arith.constant 0 : i32
    %c0_i32_0 = arith.constant 0 : i32
    %c0_i32_1 = arith.constant 0 : i32
    %c0_i32_2 = arith.constant 0 : i32
    return %arg0, %c0_i32, %c0_i32_0, %c0_i32_1 : i32, i32, i32, i32
  }
  func.func @transform_1(%arg0: i32) -> (i32, i32, i32) {
    %c0_i32 = arith.constant 0 : i32
    %c0_i32_0 = arith.constant 0 : i32
    %c0_i32_1 = arith.constant 0 : i32
    %c0_i32_2 = arith.constant 0 : i32
    return %c0_i32, %c0_i32_0, %c0_i32_1 : i32, i32, i32
  }
  func.func @transform_2(%arg0: i32) -> (i32, i32) {
    %c0_i32 = arith.constant 0 : i32
    %c0_i32_0 = arith.constant 0 : i32
    %c0_i32_1 = arith.constant 0 : i32
    return %c0_i32, %c0_i32_0 : i32, i32
  }
  func.func @transform_3(%arg0: i32) -> (i32, i32, i32) {
    %c0_i32 = arith.constant 0 : i32
    %c0_i32_0 = arith.constant 0 : i32
    %c0_i32_1 = arith.constant 0 : i32
    return %arg0, %c0_i32, %c0_i32_0 : i32, i32, i32
  }
}

module attributes {stable_mosaic.version = 11 : i64} {
  func.func @kernel(%arg0: i32, %arg1: memref<16x1x10x64xbf16, #tpu.memory_space<vmem>>, %arg2: memref<3x64x64xbf16, #tpu.memory_space<vmem>>, %arg3: memref<1x64xf32, #tpu.memory_space<vmem>>, %arg4: memref<16x8x64xbf16, #tpu.memory_space<vmem>>) attributes {dimension_semantics = [#tpu.dimension_semantics<parallel>], iteration_bounds = array<i64: 2>, scalar_prefetch = 0 : i64, scratch_operands = 0 : i64, tpu.core_type = #tpu.core_type<tc>, window_params = [{transform_indices = @transform_0, window_bounds = array<i64: 16, 1, 10, 64>}, {pipeline_mode = #tpu.pipeline_mode<synchronous>, transform_indices = @transform_1, window_bounds = array<i64: 3, 64, 64>}, {pipeline_mode = #tpu.pipeline_mode<synchronous>, transform_indices = @transform_2, window_bounds = array<i64: 1, 64>}, {transform_indices = @transform_3, window_bounds = array<i64: 16, 8, 64>}]} {
    %cst = arith.constant 0.000000e+00 : f32
    %0 = vector.broadcast %cst : f32 to vector<128x64xf32>
    %c0 = arith.constant 0 : index
    %c0_0 = arith.constant 0 : index
    %c0_1 = arith.constant 0 : index
    %c0_2 = arith.constant 0 : index
    %1 = vector.load %arg1[%c0, %c0_0, %c0_1, %c0_2] : memref<16x1x10x64xbf16, #tpu.memory_space<vmem>>, vector<16x1x8x64xbf16>
    %2 = vector.shape_cast %1 : vector<16x1x8x64xbf16> to vector<16x8x64xbf16>
    %3 = vector.shape_cast %2 : vector<16x8x64xbf16> to vector<128x64xbf16>
    %c0_3 = arith.constant 0 : index
    %c0_4 = arith.constant 0 : index
    %c0_5 = arith.constant 0 : index
    %4 = vector.load %arg2[%c0_3, %c0_4, %c0_5] : memref<3x64x64xbf16, #tpu.memory_space<vmem>>, vector<1x64x64xbf16>
    %5 = vector.shape_cast %4 : vector<1x64x64xbf16> to vector<64x64xbf16>
    %cst_6 = arith.constant dense<0.000000e+00> : vector<128x64xf32>
    %6 = tpu.matmul %3, %5, %cst_6 {dimension_numbers = #tpu.dot_dimension_numbers<[1], [0], [0], [1], [0, 0, 1, 1], [], []>} : vector<128x64xbf16>, vector<64x64xbf16>, vector<128x64xf32> -> vector<128x64xf32>
    %7 = arith.addf %0, %6 : vector<128x64xf32>
    %c0_7 = arith.constant 0 : index
    %c0_8 = arith.constant 0 : index
    %c1 = arith.constant 1 : index
    %c0_9 = arith.constant 0 : index
    %8 = vector.load %arg1[%c0_7, %c0_8, %c1, %c0_9] : memref<16x1x10x64xbf16, #tpu.memory_space<vmem>>, vector<16x1x8x64xbf16>
    %9 = vector.shape_cast %8 : vector<16x1x8x64xbf16> to vector<16x8x64xbf16>
    %10 = vector.shape_cast %9 : vector<16x8x64xbf16> to vector<128x64xbf16>
    %c1_10 = arith.constant 1 : index
    %c0_11 = arith.constant 0 : index
    %c0_12 = arith.constant 0 : index
    %11 = vector.load %arg2[%c1_10, %c0_11, %c0_12] : memref<3x64x64xbf16, #tpu.memory_space<vmem>>, vector<1x64x64xbf16>
    %12 = vector.shape_cast %11 : vector<1x64x64xbf16> to vector<64x64xbf16>
    %cst_13 = arith.constant dense<0.000000e+00> : vector<128x64xf32>
    %13 = tpu.matmul %10, %12, %cst_13 {dimension_numbers = #tpu.dot_dimension_numbers<[1], [0], [0], [1], [0, 0, 1, 1], [], []>} : vector<128x64xbf16>, vector<64x64xbf16>, vector<128x64xf32> -> vector<128x64xf32>
    %14 = arith.addf %7, %13 : vector<128x64xf32>
    %c0_14 = arith.constant 0 : index
    %c0_15 = arith.constant 0 : index
    %c2 = arith.constant 2 : index
    %c0_16 = arith.constant 0 : index
    %15 = vector.load %arg1[%c0_14, %c0_15, %c2, %c0_16] : memref<16x1x10x64xbf16, #tpu.memory_space<vmem>>, vector<16x1x8x64xbf16>
    %16 = vector.shape_cast %15 : vector<16x1x8x64xbf16> to vector<16x8x64xbf16>
    %17 = vector.shape_cast %16 : vector<16x8x64xbf16> to vector<128x64xbf16>
    %c2_17 = arith.constant 2 : index
    %c0_18 = arith.constant 0 : index
    %c0_19 = arith.constant 0 : index
    %18 = vector.load %arg2[%c2_17, %c0_18, %c0_19] : memref<3x64x64xbf16, #tpu.memory_space<vmem>>, vector<1x64x64xbf16>
    %19 = vector.shape_cast %18 : vector<1x64x64xbf16> to vector<64x64xbf16>
    %cst_20 = arith.constant dense<0.000000e+00> : vector<128x64xf32>
    %20 = tpu.matmul %17, %19, %cst_20 {dimension_numbers = #tpu.dot_dimension_numbers<[1], [0], [0], [1], [0, 0, 1, 1], [], []>} : vector<128x64xbf16>, vector<64x64xbf16>, vector<128x64xf32> -> vector<128x64xf32>
    %21 = arith.addf %14, %20 : vector<128x64xf32>
    %22 = vector.shape_cast %21 : vector<128x64xf32> to vector<16x8x64xf32>
    %c0_21 = arith.constant 0 : index
    %c0_22 = arith.constant 0 : index
    %23 = vector.load %arg3[%c0_21, %c0_22] : memref<1x64xf32, #tpu.memory_space<vmem>>, vector<1x64xf32>
    %24 = vector.shape_cast %23 : vector<1x64xf32> to vector<1x1x64xf32>
    %25 = vector.broadcast %24 : vector<1x1x64xf32> to vector<16x8x64xf32>
    %26 = arith.addf %22, %25 : vector<16x8x64xf32>
    %cst_23 = arith.constant 0.000000e+00 : f32
    %27 = vector.broadcast %cst_23 : f32 to vector<16x8x64xf32>
    %28 = arith.cmpf oge, %26, %27 : vector<16x8x64xf32>
    %cst_24 = arith.constant 2.000000e-01 : f32
    %29 = vector.broadcast %cst_24 : f32 to vector<16x8x64xf32>
    %30 = arith.mulf %29, %26 : vector<16x8x64xf32>
    %31 = arith.select %28, %26, %30 : vector<16x8x64xi1>, vector<16x8x64xf32>
    %32 = arith.truncf %31 : vector<16x8x64xf32> to vector<16x8x64xbf16>
    %c0_25 = arith.constant 0 : index
    %c0_26 = arith.constant 0 : index
    %c0_27 = arith.constant 0 : index
    %33 = vector.load %arg4[%c0_25, %c0_26, %c0_27] : memref<16x8x64xbf16, #tpu.memory_space<vmem>>, vector<16x8x64xbf16>
    tpu.vector_store %arg4[%c0_25, %c0_26, %c0_27], %32 {strides = array<i32>} : memref<16x8x64xbf16, #tpu.memory_space<vmem>>, vector<16x8x64xbf16>,
    return
  }
  func.func @transform_0(%arg0: i32) -> (i32, i32, i32, i32) {
    %c0_i32 = arith.constant 0 : i32
    %c0_i32_0 = arith.constant 0 : i32
    %c0_i32_1 = arith.constant 0 : i32
    %c0_i32_2 = arith.constant 0 : i32
    return %arg0, %c0_i32, %c0_i32_0, %c0_i32_1 : i32, i32, i32, i32
  }
  func.func @transform_1(%arg0: i32) -> (i32, i32, i32) {
    %c0_i32 = arith.constant 0 : i32
    %c0_i32_0 = arith.constant 0 : i32
    %c0_i32_1 = arith.constant 0 : i32
    %c0_i32_2 = arith.constant 0 : i32
    return %c0_i32, %c0_i32_0, %c0_i32_1 : i32, i32, i32
  }
  func.func @transform_2(%arg0: i32) -> (i32, i32) {
    %c0_i32 = arith.constant 0 : i32
    %c0_i32_0 = arith.constant 0 : i32
    %c0_i32_1 = arith.constant 0 : i32
    return %c0_i32, %c0_i32_0 : i32, i32
  }
  func.func @transform_3(%arg0: i32) -> (i32, i32, i32) {
    %c0_i32 = arith.constant 0 : i32
    %c0_i32_0 = arith.constant 0 : i32
    %c0_i32_1 = arith.constant 0 : i32
    return %arg0, %c0_i32, %c0_i32_0 : i32, i32, i32
  }
}

module attributes {stable_mosaic.version = 11 : i64} {
  func.func @kernel(%arg0: i32, %arg1: memref<16x2x5x64xbf16, #tpu.memory_space<vmem>>, %arg2: memref<3x64x128xbf16, #tpu.memory_space<vmem>>, %arg3: memref<1x128xf32, #tpu.memory_space<vmem>>, %arg4: memref<16x4x128xbf16, #tpu.memory_space<vmem>>) attributes {dimension_semantics = [#tpu.dimension_semantics<parallel>], iteration_bounds = array<i64: 2>, scalar_prefetch = 0 : i64, scratch_operands = 0 : i64, tpu.core_type = #tpu.core_type<tc>, window_params = [{transform_indices = @transform_0, window_bounds = array<i64: 16, 2, 5, 64>}, {pipeline_mode = #tpu.pipeline_mode<synchronous>, transform_indices = @transform_1, window_bounds = array<i64: 3, 64, 128>}, {pipeline_mode = #tpu.pipeline_mode<synchronous>, transform_indices = @transform_2, window_bounds = array<i64: 1, 128>}, {transform_indices = @transform_3, window_bounds = array<i64: 16, 4, 128>}]} {
    %cst = arith.constant 0.000000e+00 : f32
    %0 = vector.broadcast %cst : f32 to vector<64x128xf32>
    %c0 = arith.constant 0 : index
    %c0_0 = arith.constant 0 : index
    %c0_1 = arith.constant 0 : index
    %c0_2 = arith.constant 0 : index
    %1 = vector.load %arg1[%c0, %c0_0, %c0_1, %c0_2] : memref<16x2x5x64xbf16, #tpu.memory_space<vmem>>, vector<16x1x4x64xbf16>
    %2 = vector.shape_cast %1 : vector<16x1x4x64xbf16> to vector<16x4x64xbf16>
    %3 = vector.shape_cast %2 : vector<16x4x64xbf16> to vector<64x64xbf16>
    %c0_3 = arith.constant 0 : index
    %c0_4 = arith.constant 0 : index
    %c0_5 = arith.constant 0 : index
    %4 = vector.load %arg2[%c0_3, %c0_4, %c0_5] : memref<3x64x128xbf16, #tpu.memory_space<vmem>>, vector<1x64x128xbf16>
    %5 = vector.shape_cast %4 : vector<1x64x128xbf16> to vector<64x128xbf16>
    %cst_6 = arith.constant dense<0.000000e+00> : vector<64x128xf32>
    %6 = tpu.matmul %3, %5, %cst_6 {dimension_numbers = #tpu.dot_dimension_numbers<[1], [0], [0], [1], [0, 0, 1, 1], [], []>} : vector<64x64xbf16>, vector<64x128xbf16>, vector<64x128xf32> -> vector<64x128xf32>
    %7 = arith.addf %0, %6 : vector<64x128xf32>
    %c0_7 = arith.constant 0 : index
    %c1 = arith.constant 1 : index
    %c0_8 = arith.constant 0 : index
    %c0_9 = arith.constant 0 : index
    %8 = vector.load %arg1[%c0_7, %c1, %c0_8, %c0_9] : memref<16x2x5x64xbf16, #tpu.memory_space<vmem>>, vector<16x1x4x64xbf16>
    %9 = vector.shape_cast %8 : vector<16x1x4x64xbf16> to vector<16x4x64xbf16>
    %10 = vector.shape_cast %9 : vector<16x4x64xbf16> to vector<64x64xbf16>
    %c1_10 = arith.constant 1 : index
    %c0_11 = arith.constant 0 : index
    %c0_12 = arith.constant 0 : index
    %11 = vector.load %arg2[%c1_10, %c0_11, %c0_12] : memref<3x64x128xbf16, #tpu.memory_space<vmem>>, vector<1x64x128xbf16>
    %12 = vector.shape_cast %11 : vector<1x64x128xbf16> to vector<64x128xbf16>
    %cst_13 = arith.constant dense<0.000000e+00> : vector<64x128xf32>
    %13 = tpu.matmul %10, %12, %cst_13 {dimension_numbers = #tpu.dot_dimension_numbers<[1], [0], [0], [1], [0, 0, 1, 1], [], []>} : vector<64x64xbf16>, vector<64x128xbf16>, vector<64x128xf32> -> vector<64x128xf32>
    %14 = arith.addf %7, %13 : vector<64x128xf32>
    %c0_14 = arith.constant 0 : index
    %c0_15 = arith.constant 0 : index
    %c1_16 = arith.constant 1 : index
    %c0_17 = arith.constant 0 : index
    %15 = vector.load %arg1[%c0_14, %c0_15, %c1_16, %c0_17] : memref<16x2x5x64xbf16, #tpu.memory_space<vmem>>, vector<16x1x4x64xbf16>
    %16 = vector.shape_cast %15 : vector<16x1x4x64xbf16> to vector<16x4x64xbf16>
    %17 = vector.shape_cast %16 : vector<16x4x64xbf16> to vector<64x64xbf16>
    %c2 = arith.constant 2 : index
    %c0_18 = arith.constant 0 : index
    %c0_19 = arith.constant 0 : index
    %18 = vector.load %arg2[%c2, %c0_18, %c0_19] : memref<3x64x128xbf16, #tpu.memory_space<vmem>>, vector<1x64x128xbf16>
    %19 = vector.shape_cast %18 : vector<1x64x128xbf16> to vector<64x128xbf16>
    %cst_20 = arith.constant dense<0.000000e+00> : vector<64x128xf32>
    %20 = tpu.matmul %17, %19, %cst_20 {dimension_numbers = #tpu.dot_dimension_numbers<[1], [0], [0], [1], [0, 0, 1, 1], [], []>} : vector<64x64xbf16>, vector<64x128xbf16>, vector<64x128xf32> -> vector<64x128xf32>
    %21 = arith.addf %14, %20 : vector<64x128xf32>
    %22 = vector.shape_cast %21 : vector<64x128xf32> to vector<16x4x128xf32>
    %c0_21 = arith.constant 0 : index
    %c0_22 = arith.constant 0 : index
    %23 = vector.load %arg3[%c0_21, %c0_22] : memref<1x128xf32, #tpu.memory_space<vmem>>, vector<1x128xf32>
    %24 = vector.shape_cast %23 : vector<1x128xf32> to vector<1x1x128xf32>
    %25 = vector.broadcast %24 : vector<1x1x128xf32> to vector<16x4x128xf32>
    %26 = arith.addf %22, %25 : vector<16x4x128xf32>
    %cst_23 = arith.constant 0.000000e+00 : f32
    %27 = vector.broadcast %cst_23 : f32 to vector<16x4x128xf32>
    %28 = arith.cmpf oge, %26, %27 : vector<16x4x128xf32>
    %cst_24 = arith.constant 2.000000e-01 : f32
    %29 = vector.broadcast %cst_24 : f32 to vector<16x4x128xf32>
    %30 = arith.mulf %29, %26 : vector<16x4x128xf32>
    %31 = arith.select %28, %26, %30 : vector<16x4x128xi1>, vector<16x4x128xf32>
    %32 = arith.truncf %31 : vector<16x4x128xf32> to vector<16x4x128xbf16>
    %c0_25 = arith.constant 0 : index
    %c0_26 = arith.constant 0 : index
    %c0_27 = arith.constant 0 : index
    %33 = vector.load %arg4[%c0_25, %c0_26, %c0_27] : memref<16x4x128xbf16, #tpu.memory_space<vmem>>, vector<16x4x128xbf16>
    tpu.vector_store %arg4[%c0_25, %c0_26, %c0_27], %32 {strides = array<i32>} : memref<16x4x128xbf16, #tpu.memory_space<vmem>>, vector<16x4x128xbf16>,
    return
  }
  func.func @transform_0(%arg0: i32) -> (i32, i32, i32, i32) {
    %c0_i32 = arith.constant 0 : i32
    %c0_i32_0 = arith.constant 0 : i32
    %c0_i32_1 = arith.constant 0 : i32
    %c0_i32_2 = arith.constant 0 : i32
    return %arg0, %c0_i32, %c0_i32_0, %c0_i32_1 : i32, i32, i32, i32
  }
  func.func @transform_1(%arg0: i32) -> (i32, i32, i32) {
    %c0_i32 = arith.constant 0 : i32
    %c0_i32_0 = arith.constant 0 : i32
    %c0_i32_1 = arith.constant 0 : i32
    %c0_i32_2 = arith.constant 0 : i32
    return %c0_i32, %c0_i32_0, %c0_i32_1 : i32, i32, i32
  }
  func.func @transform_2(%arg0: i32) -> (i32, i32) {
    %c0_i32 = arith.constant 0 : i32
    %c0_i32_0 = arith.constant 0 : i32
    %c0_i32_1 = arith.constant 0 : i32
    return %c0_i32, %c0_i32_0 : i32, i32
  }
  func.func @transform_3(%arg0: i32) -> (i32, i32, i32) {
    %c0_i32 = arith.constant 0 : i32
    %c0_i32_0 = arith.constant 0 : i32
    %c0_i32_1 = arith.constant 0 : i32
    return %arg0, %c0_i32, %c0_i32_0 : i32, i32, i32
  }
}

module attributes {stable_mosaic.version = 11 : i64} {
  func.func @kernel(%arg0: i32, %arg1: memref<16x1x6x128xbf16, #tpu.memory_space<vmem>>, %arg2: memref<3x128x128xbf16, #tpu.memory_space<vmem>>, %arg3: memref<1x128xf32, #tpu.memory_space<vmem>>, %arg4: memref<16x4x128xbf16, #tpu.memory_space<vmem>>) attributes {dimension_semantics = [#tpu.dimension_semantics<parallel>], iteration_bounds = array<i64: 2>, scalar_prefetch = 0 : i64, scratch_operands = 0 : i64, tpu.core_type = #tpu.core_type<tc>, window_params = [{transform_indices = @transform_0, window_bounds = array<i64: 16, 1, 6, 128>}, {pipeline_mode = #tpu.pipeline_mode<synchronous>, transform_indices = @transform_1, window_bounds = array<i64: 3, 128, 128>}, {pipeline_mode = #tpu.pipeline_mode<synchronous>, transform_indices = @transform_2, window_bounds = array<i64: 1, 128>}, {transform_indices = @transform_3, window_bounds = array<i64: 16, 4, 128>}]} {
    %cst = arith.constant 0.000000e+00 : f32
    %0 = vector.broadcast %cst : f32 to vector<64x128xf32>
    %c0 = arith.constant 0 : index
    %c0_0 = arith.constant 0 : index
    %c0_1 = arith.constant 0 : index
    %c0_2 = arith.constant 0 : index
    %1 = vector.load %arg1[%c0, %c0_0, %c0_1, %c0_2] : memref<16x1x6x128xbf16, #tpu.memory_space<vmem>>, vector<16x1x4x128xbf16>
    %2 = vector.shape_cast %1 : vector<16x1x4x128xbf16> to vector<16x4x128xbf16>
    %3 = vector.shape_cast %2 : vector<16x4x128xbf16> to vector<64x128xbf16>
    %c0_3 = arith.constant 0 : index
    %c0_4 = arith.constant 0 : index
    %c0_5 = arith.constant 0 : index
    %4 = vector.load %arg2[%c0_3, %c0_4, %c0_5] : memref<3x128x128xbf16, #tpu.memory_space<vmem>>, vector<1x128x128xbf16>
    %5 = vector.shape_cast %4 : vector<1x128x128xbf16> to vector<128x128xbf16>
    %cst_6 = arith.constant dense<0.000000e+00> : vector<64x128xf32>
    %6 = tpu.matmul %3, %5, %cst_6 {dimension_numbers = #tpu.dot_dimension_numbers<[1], [0], [0], [1], [0, 0, 1, 1], [], []>} : vector<64x128xbf16>, vector<128x128xbf16>, vector<64x128xf32> -> vector<64x128xf32>
    %7 = arith.addf %0, %6 : vector<64x128xf32>
    %c0_7 = arith.constant 0 : index
    %c0_8 = arith.constant 0 : index
    %c1 = arith.constant 1 : index
    %c0_9 = arith.constant 0 : index
    %8 = vector.load %arg1[%c0_7, %c0_8, %c1, %c0_9] : memref<16x1x6x128xbf16, #tpu.memory_space<vmem>>, vector<16x1x4x128xbf16>
    %9 = vector.shape_cast %8 : vector<16x1x4x128xbf16> to vector<16x4x128xbf16>
    %10 = vector.shape_cast %9 : vector<16x4x128xbf16> to vector<64x128xbf16>
    %c1_10 = arith.constant 1 : index
    %c0_11 = arith.constant 0 : index
    %c0_12 = arith.constant 0 : index
    %11 = vector.load %arg2[%c1_10, %c0_11, %c0_12] : memref<3x128x128xbf16, #tpu.memory_space<vmem>>, vector<1x128x128xbf16>
    %12 = vector.shape_cast %11 : vector<1x128x128xbf16> to vector<128x128xbf16>
    %cst_13 = arith.constant dense<0.000000e+00> : vector<64x128xf32>
    %13 = tpu.matmul %10, %12, %cst_13 {dimension_numbers = #tpu.dot_dimension_numbers<[1], [0], [0], [1], [0, 0, 1, 1], [], []>} : vector<64x128xbf16>, vector<128x128xbf16>, vector<64x128xf32> -> vector<64x128xf32>
    %14 = arith.addf %7, %13 : vector<64x128xf32>
    %c0_14 = arith.constant 0 : index
    %c0_15 = arith.constant 0 : index
    %c2 = arith.constant 2 : index
    %c0_16 = arith.constant 0 : index
    %15 = vector.load %arg1[%c0_14, %c0_15, %c2, %c0_16] : memref<16x1x6x128xbf16, #tpu.memory_space<vmem>>, vector<16x1x4x128xbf16>
    %16 = vector.shape_cast %15 : vector<16x1x4x128xbf16> to vector<16x4x128xbf16>
    %17 = vector.shape_cast %16 : vector<16x4x128xbf16> to vector<64x128xbf16>
    %c2_17 = arith.constant 2 : index
    %c0_18 = arith.constant 0 : index
    %c0_19 = arith.constant 0 : index
    %18 = vector.load %arg2[%c2_17, %c0_18, %c0_19] : memref<3x128x128xbf16, #tpu.memory_space<vmem>>, vector<1x128x128xbf16>
    %19 = vector.shape_cast %18 : vector<1x128x128xbf16> to vector<128x128xbf16>
    %cst_20 = arith.constant dense<0.000000e+00> : vector<64x128xf32>
    %20 = tpu.matmul %17, %19, %cst_20 {dimension_numbers = #tpu.dot_dimension_numbers<[1], [0], [0], [1], [0, 0, 1, 1], [], []>} : vector<64x128xbf16>, vector<128x128xbf16>, vector<64x128xf32> -> vector<64x128xf32>
    %21 = arith.addf %14, %20 : vector<64x128xf32>
    %22 = vector.shape_cast %21 : vector<64x128xf32> to vector<16x4x128xf32>
    %c0_21 = arith.constant 0 : index
    %c0_22 = arith.constant 0 : index
    %23 = vector.load %arg3[%c0_21, %c0_22] : memref<1x128xf32, #tpu.memory_space<vmem>>, vector<1x128xf32>
    %24 = vector.shape_cast %23 : vector<1x128xf32> to vector<1x1x128xf32>
    %25 = vector.broadcast %24 : vector<1x1x128xf32> to vector<16x4x128xf32>
    %26 = arith.addf %22, %25 : vector<16x4x128xf32>
    %cst_23 = arith.constant 0.000000e+00 : f32
    %27 = vector.broadcast %cst_23 : f32 to vector<16x4x128xf32>
    %28 = arith.cmpf oge, %26, %27 : vector<16x4x128xf32>
    %cst_24 = arith.constant 2.000000e-01 : f32
    %29 = vector.broadcast %cst_24 : f32 to vector<16x4x128xf32>
    %30 = arith.mulf %29, %26 : vector<16x4x128xf32>
    %31 = arith.select %28, %26, %30 : vector<16x4x128xi1>, vector<16x4x128xf32>
    %32 = arith.truncf %31 : vector<16x4x128xf32> to vector<16x4x128xbf16>
    %c0_25 = arith.constant 0 : index
    %c0_26 = arith.constant 0 : index
    %c0_27 = arith.constant 0 : index
    %33 = vector.load %arg4[%c0_25, %c0_26, %c0_27] : memref<16x4x128xbf16, #tpu.memory_space<vmem>>, vector<16x4x128xbf16>
    tpu.vector_store %arg4[%c0_25, %c0_26, %c0_27], %32 {strides = array<i32>} : memref<16x4x128xbf16, #tpu.memory_space<vmem>>, vector<16x4x128xbf16>,
    return
  }
  func.func @transform_0(%arg0: i32) -> (i32, i32, i32, i32) {
    %c0_i32 = arith.constant 0 : i32
    %c0_i32_0 = arith.constant 0 : i32
    %c0_i32_1 = arith.constant 0 : i32
    %c0_i32_2 = arith.constant 0 : i32
    return %arg0, %c0_i32, %c0_i32_0, %c0_i32_1 : i32, i32, i32, i32
  }
  func.func @transform_1(%arg0: i32) -> (i32, i32, i32) {
    %c0_i32 = arith.constant 0 : i32
    %c0_i32_0 = arith.constant 0 : i32
    %c0_i32_1 = arith.constant 0 : i32
    %c0_i32_2 = arith.constant 0 : i32
    return %c0_i32, %c0_i32_0, %c0_i32_1 : i32, i32, i32
  }
  func.func @transform_2(%arg0: i32) -> (i32, i32) {
    %c0_i32 = arith.constant 0 : i32
    %c0_i32_0 = arith.constant 0 : i32
    %c0_i32_1 = arith.constant 0 : i32
    return %c0_i32, %c0_i32_0 : i32, i32
  }
  func.func @transform_3(%arg0: i32) -> (i32, i32, i32) {
    %c0_i32 = arith.constant 0 : i32
    %c0_i32_0 = arith.constant 0 : i32
    %c0_i32_1 = arith.constant 0 : i32
    return %arg0, %c0_i32, %c0_i32_0 : i32, i32, i32
  }
}

module attributes {stable_mosaic.version = 11 : i64} {
  func.func @kernel(%arg0: i32, %arg1: memref<16x2x3x128xbf16, #tpu.memory_space<vmem>>, %arg2: memref<3x128x256xbf16, #tpu.memory_space<vmem>>, %arg3: memref<1x256xf32, #tpu.memory_space<vmem>>, %arg4: memref<16x2x256xbf16, #tpu.memory_space<vmem>>) attributes {dimension_semantics = [#tpu.dimension_semantics<parallel>], iteration_bounds = array<i64: 2>, scalar_prefetch = 0 : i64, scratch_operands = 0 : i64, tpu.core_type = #tpu.core_type<tc>, window_params = [{transform_indices = @transform_0, window_bounds = array<i64: 16, 2, 3, 128>}, {pipeline_mode = #tpu.pipeline_mode<synchronous>, transform_indices = @transform_1, window_bounds = array<i64: 3, 128, 256>}, {pipeline_mode = #tpu.pipeline_mode<synchronous>, transform_indices = @transform_2, window_bounds = array<i64: 1, 256>}, {transform_indices = @transform_3, window_bounds = array<i64: 16, 2, 256>}]} {
    %cst = arith.constant 0.000000e+00 : f32
    %0 = vector.broadcast %cst : f32 to vector<32x256xf32>
    %c0 = arith.constant 0 : index
    %c0_0 = arith.constant 0 : index
    %c0_1 = arith.constant 0 : index
    %c0_2 = arith.constant 0 : index
    %1 = vector.load %arg1[%c0, %c0_0, %c0_1, %c0_2] : memref<16x2x3x128xbf16, #tpu.memory_space<vmem>>, vector<16x1x2x128xbf16>
    %2 = vector.shape_cast %1 : vector<16x1x2x128xbf16> to vector<16x2x128xbf16>
    %3 = vector.shape_cast %2 : vector<16x2x128xbf16> to vector<32x128xbf16>
    %c0_3 = arith.constant 0 : index
    %c0_4 = arith.constant 0 : index
    %c0_5 = arith.constant 0 : index
    %4 = vector.load %arg2[%c0_3, %c0_4, %c0_5] : memref<3x128x256xbf16, #tpu.memory_space<vmem>>, vector<1x128x256xbf16>
    %5 = vector.shape_cast %4 : vector<1x128x256xbf16> to vector<128x256xbf16>
    %cst_6 = arith.constant dense<0.000000e+00> : vector<32x256xf32>
    %6 = tpu.matmul %3, %5, %cst_6 {dimension_numbers = #tpu.dot_dimension_numbers<[1], [0], [0], [1], [0, 0, 1, 1], [], []>} : vector<32x128xbf16>, vector<128x256xbf16>, vector<32x256xf32> -> vector<32x256xf32>
    %7 = arith.addf %0, %6 : vector<32x256xf32>
    %c0_7 = arith.constant 0 : index
    %c1 = arith.constant 1 : index
    %c0_8 = arith.constant 0 : index
    %c0_9 = arith.constant 0 : index
    %8 = vector.load %arg1[%c0_7, %c1, %c0_8, %c0_9] : memref<16x2x3x128xbf16, #tpu.memory_space<vmem>>, vector<16x1x2x128xbf16>
    %9 = vector.shape_cast %8 : vector<16x1x2x128xbf16> to vector<16x2x128xbf16>
    %10 = vector.shape_cast %9 : vector<16x2x128xbf16> to vector<32x128xbf16>
    %c1_10 = arith.constant 1 : index
    %c0_11 = arith.constant 0 : index
    %c0_12 = arith.constant 0 : index
    %11 = vector.load %arg2[%c1_10, %c0_11, %c0_12] : memref<3x128x256xbf16, #tpu.memory_space<vmem>>, vector<1x128x256xbf16>
    %12 = vector.shape_cast %11 : vector<1x128x256xbf16> to vector<128x256xbf16>
    %cst_13 = arith.constant dense<0.000000e+00> : vector<32x256xf32>
    %13 = tpu.matmul %10, %12, %cst_13 {dimension_numbers = #tpu.dot_dimension_numbers<[1], [0], [0], [1], [0, 0, 1, 1], [], []>} : vector<32x128xbf16>, vector<128x256xbf16>, vector<32x256xf32> -> vector<32x256xf32>
    %14 = arith.addf %7, %13 : vector<32x256xf32>
    %c0_14 = arith.constant 0 : index
    %c0_15 = arith.constant 0 : index
    %c1_16 = arith.constant 1 : index
    %c0_17 = arith.constant 0 : index
    %15 = vector.load %arg1[%c0_14, %c0_15, %c1_16, %c0_17] : memref<16x2x3x128xbf16, #tpu.memory_space<vmem>>, vector<16x1x2x128xbf16>
    %16 = vector.shape_cast %15 : vector<16x1x2x128xbf16> to vector<16x2x128xbf16>
    %17 = vector.shape_cast %16 : vector<16x2x128xbf16> to vector<32x128xbf16>
    %c2 = arith.constant 2 : index
    %c0_18 = arith.constant 0 : index
    %c0_19 = arith.constant 0 : index
    %18 = vector.load %arg2[%c2, %c0_18, %c0_19] : memref<3x128x256xbf16, #tpu.memory_space<vmem>>, vector<1x128x256xbf16>
    %19 = vector.shape_cast %18 : vector<1x128x256xbf16> to vector<128x256xbf16>
    %cst_20 = arith.constant dense<0.000000e+00> : vector<32x256xf32>
    %20 = tpu.matmul %17, %19, %cst_20 {dimension_numbers = #tpu.dot_dimension_numbers<[1], [0], [0], [1], [0, 0, 1, 1], [], []>} : vector<32x128xbf16>, vector<128x256xbf16>, vector<32x256xf32> -> vector<32x256xf32>
    %21 = arith.addf %14, %20 : vector<32x256xf32>
    %22 = vector.shape_cast %21 : vector<32x256xf32> to vector<16x2x256xf32>
    %c0_21 = arith.constant 0 : index
    %c0_22 = arith.constant 0 : index
    %23 = vector.load %arg3[%c0_21, %c0_22] : memref<1x256xf32, #tpu.memory_space<vmem>>, vector<1x256xf32>
    %24 = vector.shape_cast %23 : vector<1x256xf32> to vector<1x1x256xf32>
    %25 = vector.broadcast %24 : vector<1x1x256xf32> to vector<16x2x256xf32>
    %26 = arith.addf %22, %25 : vector<16x2x256xf32>
    %cst_23 = arith.constant 0.000000e+00 : f32
    %27 = vector.broadcast %cst_23 : f32 to vector<16x2x256xf32>
    %28 = arith.cmpf oge, %26, %27 : vector<16x2x256xf32>
    %cst_24 = arith.constant 2.000000e-01 : f32
    %29 = vector.broadcast %cst_24 : f32 to vector<16x2x256xf32>
    %30 = arith.mulf %29, %26 : vector<16x2x256xf32>
    %31 = arith.select %28, %26, %30 : vector<16x2x256xi1>, vector<16x2x256xf32>
    %32 = arith.truncf %31 : vector<16x2x256xf32> to vector<16x2x256xbf16>
    %c0_25 = arith.constant 0 : index
    %c0_26 = arith.constant 0 : index
    %c0_27 = arith.constant 0 : index
    %33 = vector.load %arg4[%c0_25, %c0_26, %c0_27] : memref<16x2x256xbf16, #tpu.memory_space<vmem>>, vector<16x2x256xbf16>
    tpu.vector_store %arg4[%c0_25, %c0_26, %c0_27], %32 {strides = array<i32>} : memref<16x2x256xbf16, #tpu.memory_space<vmem>>, vector<16x2x256xbf16>,
    return
  }
  func.func @transform_0(%arg0: i32) -> (i32, i32, i32, i32) {
    %c0_i32 = arith.constant 0 : i32
    %c0_i32_0 = arith.constant 0 : i32
    %c0_i32_1 = arith.constant 0 : i32
    %c0_i32_2 = arith.constant 0 : i32
    return %arg0, %c0_i32, %c0_i32_0, %c0_i32_1 : i32, i32, i32, i32
  }
  func.func @transform_1(%arg0: i32) -> (i32, i32, i32) {
    %c0_i32 = arith.constant 0 : i32
    %c0_i32_0 = arith.constant 0 : i32
    %c0_i32_1 = arith.constant 0 : i32
    %c0_i32_2 = arith.constant 0 : i32
    return %c0_i32, %c0_i32_0, %c0_i32_1 : i32, i32, i32
  }
  func.func @transform_2(%arg0: i32) -> (i32, i32) {
    %c0_i32 = arith.constant 0 : i32
    %c0_i32_0 = arith.constant 0 : i32
    %c0_i32_1 = arith.constant 0 : i32
    return %c0_i32, %c0_i32_0 : i32, i32
  }
  func.func @transform_3(%arg0: i32) -> (i32, i32, i32) {
    %c0_i32 = arith.constant 0 : i32
    %c0_i32_0 = arith.constant 0 : i32
    %c0_i32_1 = arith.constant 0 : i32
    return %arg0, %c0_i32, %c0_i32_0 : i32, i32, i32
  }
}

module attributes {stable_mosaic.version = 11 : i64} {
  func.func @kernel(%arg0: i32, %arg1: memref<16x1x4x256xbf16, #tpu.memory_space<vmem>>, %arg2: memref<3x256x256xbf16, #tpu.memory_space<vmem>>, %arg3: memref<1x256xf32, #tpu.memory_space<vmem>>, %arg4: memref<16x2x256xf32, #tpu.memory_space<vmem>>) attributes {dimension_semantics = [#tpu.dimension_semantics<parallel>], iteration_bounds = array<i64: 2>, scalar_prefetch = 0 : i64, scratch_operands = 0 : i64, tpu.core_type = #tpu.core_type<tc>, window_params = [{transform_indices = @transform_0, window_bounds = array<i64: 16, 1, 4, 256>}, {pipeline_mode = #tpu.pipeline_mode<synchronous>, transform_indices = @transform_1, window_bounds = array<i64: 3, 256, 256>}, {pipeline_mode = #tpu.pipeline_mode<synchronous>, transform_indices = @transform_2, window_bounds = array<i64: 1, 256>}, {transform_indices = @transform_3, window_bounds = array<i64: 16, 2, 256>}]} {
    %cst = arith.constant 0.000000e+00 : f32
    %0 = vector.broadcast %cst : f32 to vector<32x256xf32>
    %c0 = arith.constant 0 : index
    %c0_0 = arith.constant 0 : index
    %c0_1 = arith.constant 0 : index
    %c0_2 = arith.constant 0 : index
    %1 = vector.load %arg1[%c0, %c0_0, %c0_1, %c0_2] : memref<16x1x4x256xbf16, #tpu.memory_space<vmem>>, vector<16x1x2x256xbf16>
    %2 = vector.shape_cast %1 : vector<16x1x2x256xbf16> to vector<16x2x256xbf16>
    %3 = vector.shape_cast %2 : vector<16x2x256xbf16> to vector<32x256xbf16>
    %c0_3 = arith.constant 0 : index
    %c0_4 = arith.constant 0 : index
    %c0_5 = arith.constant 0 : index
    %4 = vector.load %arg2[%c0_3, %c0_4, %c0_5] : memref<3x256x256xbf16, #tpu.memory_space<vmem>>, vector<1x256x256xbf16>
    %5 = vector.shape_cast %4 : vector<1x256x256xbf16> to vector<256x256xbf16>
    %cst_6 = arith.constant dense<0.000000e+00> : vector<32x256xf32>
    %6 = tpu.matmul %3, %5, %cst_6 {dimension_numbers = #tpu.dot_dimension_numbers<[1], [0], [0], [1], [0, 0, 1, 1], [], []>} : vector<32x256xbf16>, vector<256x256xbf16>, vector<32x256xf32> -> vector<32x256xf32>
    %7 = arith.addf %0, %6 : vector<32x256xf32>
    %c0_7 = arith.constant 0 : index
    %c0_8 = arith.constant 0 : index
    %c1 = arith.constant 1 : index
    %c0_9 = arith.constant 0 : index
    %8 = vector.load %arg1[%c0_7, %c0_8, %c1, %c0_9] : memref<16x1x4x256xbf16, #tpu.memory_space<vmem>>, vector<16x1x2x256xbf16>
    %9 = vector.shape_cast %8 : vector<16x1x2x256xbf16> to vector<16x2x256xbf16>
    %10 = vector.shape_cast %9 : vector<16x2x256xbf16> to vector<32x256xbf16>
    %c1_10 = arith.constant 1 : index
    %c0_11 = arith.constant 0 : index
    %c0_12 = arith.constant 0 : index
    %11 = vector.load %arg2[%c1_10, %c0_11, %c0_12] : memref<3x256x256xbf16, #tpu.memory_space<vmem>>, vector<1x256x256xbf16>
    %12 = vector.shape_cast %11 : vector<1x256x256xbf16> to vector<256x256xbf16>
    %cst_13 = arith.constant dense<0.000000e+00> : vector<32x256xf32>
    %13 = tpu.matmul %10, %12, %cst_13 {dimension_numbers = #tpu.dot_dimension_numbers<[1], [0], [0], [1], [0, 0, 1, 1], [], []>} : vector<32x256xbf16>, vector<256x256xbf16>, vector<32x256xf32> -> vector<32x256xf32>
    %14 = arith.addf %7, %13 : vector<32x256xf32>
    %c0_14 = arith.constant 0 : index
    %c0_15 = arith.constant 0 : index
    %c2 = arith.constant 2 : index
    %c0_16 = arith.constant 0 : index
    %15 = vector.load %arg1[%c0_14, %c0_15, %c2, %c0_16] : memref<16x1x4x256xbf16, #tpu.memory_space<vmem>>, vector<16x1x2x256xbf16>
    %16 = vector.shape_cast %15 : vector<16x1x2x256xbf16> to vector<16x2x256xbf16>
    %17 = vector.shape_cast %16 : vector<16x2x256xbf16> to vector<32x256xbf16>
    %c2_17 = arith.constant 2 : index
    %c0_18 = arith.constant 0 : index
    %c0_19 = arith.constant 0 : index
    %18 = vector.load %arg2[%c2_17, %c0_18, %c0_19] : memref<3x256x256xbf16, #tpu.memory_space<vmem>>, vector<1x256x256xbf16>
    %19 = vector.shape_cast %18 : vector<1x256x256xbf16> to vector<256x256xbf16>
    %cst_20 = arith.constant dense<0.000000e+00> : vector<32x256xf32>
    %20 = tpu.matmul %17, %19, %cst_20 {dimension_numbers = #tpu.dot_dimension_numbers<[1], [0], [0], [1], [0, 0, 1, 1], [], []>} : vector<32x256xbf16>, vector<256x256xbf16>, vector<32x256xf32> -> vector<32x256xf32>
    %21 = arith.addf %14, %20 : vector<32x256xf32>
    %22 = vector.shape_cast %21 : vector<32x256xf32> to vector<16x2x256xf32>
    %c0_21 = arith.constant 0 : index
    %c0_22 = arith.constant 0 : index
    %23 = vector.load %arg3[%c0_21, %c0_22] : memref<1x256xf32, #tpu.memory_space<vmem>>, vector<1x256xf32>
    %24 = vector.shape_cast %23 : vector<1x256xf32> to vector<1x1x256xf32>
    %25 = vector.broadcast %24 : vector<1x1x256xf32> to vector<16x2x256xf32>
    %26 = arith.addf %22, %25 : vector<16x2x256xf32>
    %cst_23 = arith.constant 0.000000e+00 : f32
    %27 = vector.broadcast %cst_23 : f32 to vector<16x2x256xf32>
    %28 = arith.cmpf oge, %26, %27 : vector<16x2x256xf32>
    %cst_24 = arith.constant 2.000000e-01 : f32
    %29 = vector.broadcast %cst_24 : f32 to vector<16x2x256xf32>
    %30 = arith.mulf %29, %26 : vector<16x2x256xf32>
    %31 = arith.select %28, %26, %30 : vector<16x2x256xi1>, vector<16x2x256xf32>
    %c0_25 = arith.constant 0 : index
    %c0_26 = arith.constant 0 : index
    %c0_27 = arith.constant 0 : index
    %32 = vector.load %arg4[%c0_25, %c0_26, %c0_27] : memref<16x2x256xf32, #tpu.memory_space<vmem>>, vector<16x2x256xf32>
    tpu.vector_store %arg4[%c0_25, %c0_26, %c0_27], %31 {strides = array<i32>} : memref<16x2x256xf32, #tpu.memory_space<vmem>>, vector<16x2x256xf32>,
    return
  }
  func.func @transform_0(%arg0: i32) -> (i32, i32, i32, i32) {
    %c0_i32 = arith.constant 0 : i32
    %c0_i32_0 = arith.constant 0 : i32
    %c0_i32_1 = arith.constant 0 : i32
    %c0_i32_2 = arith.constant 0 : i32
    return %arg0, %c0_i32, %c0_i32_0, %c0_i32_1 : i32, i32, i32, i32
  }
  func.func @transform_1(%arg0: i32) -> (i32, i32, i32) {
    %c0_i32 = arith.constant 0 : i32
    %c0_i32_0 = arith.constant 0 : i32
    %c0_i32_1 = arith.constant 0 : i32
    %c0_i32_2 = arith.constant 0 : i32
    return %c0_i32, %c0_i32_0, %c0_i32_1 : i32, i32, i32
  }
  func.func @transform_2(%arg0: i32) -> (i32, i32) {
    %c0_i32 = arith.constant 0 : i32
    %c0_i32_0 = arith.constant 0 : i32
    %c0_i32_1 = arith.constant 0 : i32
    return %c0_i32, %c0_i32_0 : i32, i32
  }
  func.func @transform_3(%arg0: i32) -> (i32, i32, i32) {
    %c0_i32 = arith.constant 0 : i32
    %c0_i32_0 = arith.constant 0 : i32
    %c0_i32_1 = arith.constant 0 : i32
    return %arg0, %c0_i32, %c0_i32_0 : i32, i32, i32
  }
}

</mosaic_0001>

<bundles_post_ra>
// kernel: ultrasound_encoder_forward.7
= control target key start
LH: loop header
LB: loop body
LE: loop exit
PB: predicated region body
PF: predicated region fallthrough
CT: control target
= control target key end

     0   :  { %s2040_s12 = smov 0   ;;  %s2834_s0 = inlined_call_operand.vmem [shape: bf16[32,1,18,1], index: 0, kind: input, shape index: {}]   ;;  %s2835_s1 = inlined_call_operand.vmem [shape: bf16[3,1,32], index: 1, kind: input, shape index: {}]   ;;  %s2836_s2 = inlined_call_operand.vmem [shape: f32[1,32], index: 2, kind: input, shape index: {}]   ;;  %s2837_s3 = inlined_call_operand.vmem [shape: bf16[32,16,32], index: 3, kind: output, shape index: {}]  }
   0x1 LB: > { %s1663_s13 = sadd.s32 4294967295, %s2017_s12   ;;  %p1667_p0 = scmp.ge.s32.totalorder %s2017_s12, 1  ;;  %s2017_s12 = sphi %s2040_s12, %s13_s12  }
   0x2   : > { %p139_p1 = scmp.lt.s32.totalorder %s2017_s12, 3 }
   0x4   : > { %p140_p2 = pnand %p1667_p0, %p139_p1 }
   0x6   : > { %143 = sbr.rel (%p140_p2) target bundleno = 322 (0x142), region = 32 }
   0xb   : > { %s1668_s14 = sshll.u32 %s1663_s13, 4  ;;  %v2019_v0 = vmov 0   ;;  %vm906_vm0 = vcmask 1046528   ;;  %vm1263_vm1 = vcmask 1045504   ;;  %vm1572_vm2 = vcmask 257024  }
   0xc   : > { %1788 = vset.pattern.permute.xlu2 %v2019_v0  ;;  %1777 = vset.pattern.permute.xlu1 %v2019_v0  ;;  %p166_p3 = scmp.lt.s32.totalorder %s1668_s14, 31 }
   0xd   : > { %1766 = vset.pattern.permute.xlu0 %v2019_v0 }
   0xe   : > { %s2892_s14 = smov (!%p166_p3, %s1668_s14), 31 }
   0xf   : > { %s1756_s15 = smul.u32 12, %s2892_s14  ;;  %s1677_s27 = sshll.u32 %s2892_s14, 3 }
  0x10   : > { %s2372_s30 = scalar_lea.vmem %s2837_s3, %s1677_s27 }
  0x11   : > { %s2054_s18 = scalar_lea.vmem %s2834_s0, %s1756_s15 }
  0x12   : > { %v1743_v1 = vld [vmem:[%s2054_s18 + $0x30] sm:$0xff]   ;;  %v1742_v2 = vld [vmem:[%s2054_s18 + $0x18] sm:$0xff]   ;;  %v1679_v3 = vld [vmem:[%s2054_s18] sm:$0xff]  }
  0x13   : > { %v1688_v4 = vunpack.c.l.bf16 %v1743_v1  ;;  %v1689_v5 = vunpack.c.h.bf16 %v1743_v1  ;;  %v1684_v6 = vunpack.c.l.bf16 %v1742_v2  ;;  %v1685_v7 = vunpack.c.h.bf16 %v1742_v2  ;;  %v189_v10 = vld [vmem:[%s2054_s18 + $0x3c] sm:$0xff]   ;;  %v185_v11 = vld [vmem:[%s2054_s18 + $0x24] sm:$0xff]   ;;  %v181_v14 = vld [vmem:[%s2054_s18 + $0xc] sm:$0xff]  }
  0x14   : > { %v1680_v8 = vunpack.c.l.bf16 %v1679_v3  ;;  %v1681_v9 = vunpack.c.h.bf16 %v1679_v3  ;;  %v221_v16 = vunpack.c.l.bf16 %v189_v10  ;;  %v222_v17 = vunpack.c.h.bf16 %v189_v10  ;;  %v1745_v25 = vld [vmem:[%s2054_s18 + $0x60] sm:$0xff]   ;;  %v193_v26 = vld [vmem:[%s2054_s18 + $0x54] sm:$0xff]   ;;  %v1744_v27 = vld [vmem:[%s2054_s18 + $0x48] sm:$0xff]  }
  0x15   : > { %v2061_v12 = vpack.i.bf16 %v1689_v5, %v1688_v4  ;;  %v2063_v13 = vpack.i.bf16 %v1685_v7, %v1684_v6  ;;  %v217_v18 = vunpack.c.l.bf16 %v185_v11  ;;  %v218_v19 = vunpack.c.h.bf16 %v185_v11  ;;  %v201_v37 = vld [vmem:[%s2054_s18 + $0x84] sm:$0xff]   ;;  %v1746_v38 = vld [vmem:[%s2054_s18 + $0x78] sm:$0xff]   ;;  %v197_v39 = vld [vmem:[%s2054_s18 + $0x6c] sm:$0xff]  }
  0x16   : > { %v2066_v15 = vpack.i.bf16 %v1681_v9, %v1680_v8  ;;  %v213_v20 = vunpack.c.l.bf16 %v181_v14  ;;  %v214_v21 = vunpack.c.h.bf16 %v181_v14  ;;  %v1794_v22 = vpack.i.bf16 %v222_v17, %v221_v16  ;;  %v1748_v49 = vld [vmem:[%s2054_s18 + $0xa8] sm:$0xff]   ;;  %v205_v50 = vld [vmem:[%s2054_s18 + $0x9c] sm:$0xff]   ;;  %v1747_v51 = vld [vmem:[%s2054_s18 + $0x90] sm:$0xff]  }
  0x17   : > { %1790 = vperm.xlu2 %1788, %v2061_v12   ;;  %1779 = vperm.xlu1 %1777, %v2063_v13   ;;  %v1783_v23 = vpack.i.bf16 %v218_v19, %v217_v18  ;;  %v1696_v28 = vunpack.c.l.bf16 %v1745_v25  ;;  %v1697_v29 = vunpack.c.h.bf16 %v1745_v25  ;;  %v225_v30 = vunpack.c.l.bf16 %v193_v26  ;;  %v472_v61 = vld [vmem:[%s2054_s18 + $0x8] sm:$0x1]  ;;  %v473_v62 = vld [vmem:[%s2054_s18 + $0xc] sm:$0xff]   ;;  %v209_v63 = vld [vmem:[%s2054_s18 + $0xb4] sm:$0xff]  }
  0x18   : > { %1768 = vperm.xlu0 %1766, %v2066_v15   ;;  %v1772_v24 = vpack.i.bf16 %v214_v21, %v213_v20  ;;  %v226_v31 = vunpack.c.h.bf16 %v193_v26  ;;  %v1692_v32 = vunpack.c.l.bf16 %v1744_v27  ;;  %v1693_v33 = vunpack.c.h.bf16 %v1744_v27  ;;  %v478_v6 = vld [vmem:[%s2054_s18 + $0x20] sm:$0x1]  ;;  %v479_v7 = vld [vmem:[%s2054_s18 + $0x24] sm:$0xff]   ;;  %v475_v8 = vld [vmem:[%s2054_s18 + $0x14] sm:$0x1] }
  0x19   : > { %v2074_v34 = vpack.i.bf16 %v1697_v29, %v1696_v28  ;;  %v233_v40 = vunpack.c.l.bf16 %v201_v37  ;;  %v234_v41 = vunpack.c.h.bf16 %v201_v37  ;;  %v1700_v42 = vunpack.c.l.bf16 %v1746_v38  ;;  %v484_v18 = vld [vmem:[%s2054_s18 + $0x38] sm:$0x1]  ;;  %v485_v19 = vld [vmem:[%s2054_s18 + $0x3c] sm:$0xff]   ;;  %v481_v20 = vld [vmem:[%s2054_s18 + $0x2c] sm:$0x1] }
  0x1a   : > { %v1804_v35 = vpack.i.bf16 %v226_v31, %v225_v30  ;;  %v2076_v36 = vpack.i.bf16 %v1693_v33, %v1692_v32  ;;  %v1701_v43 = vunpack.c.h.bf16 %v1746_v38  ;;  %v229_v44 = vunpack.c.l.bf16 %v197_v39  ;;  %v490_v26 = vld [vmem:[%s2054_s18 + $0x50] sm:$0x1]  ;;  %v491_v27 = vld [vmem:[%s2054_s18 + $0x54] sm:$0xff]   ;;  %v487_v28 = vld [vmem:[%s2054_s18 + $0x44] sm:$0x1] }
  0x1b   : > { %v230_v45 = vunpack.c.h.bf16 %v197_v39  ;;  %v1824_v46 = vpack.i.bf16 %v234_v41, %v233_v40  ;;  %v1708_v52 = vunpack.c.l.bf16 %v1748_v49  ;;  %v1709_v53 = vunpack.c.h.bf16 %v1748_v49  ;;  %v497_v37 = vld [vmem:[%s2054_s18 + $0x6c] sm:$0xff]   ;;  %v493_v38 = vld [vmem:[%s2054_s18 + $0x5c] sm:$0x1] }
  0x1c   : > { %v2083_v47 = vpack.i.bf16 %v1701_v43, %v1700_v42  ;;  %v237_v54 = vunpack.c.l.bf16 %v205_v50  ;;  %v238_v55 = vunpack.c.h.bf16 %v205_v50  ;;  %v1704_v56 = vunpack.c.l.bf16 %v1747_v51 }
  0x1d   : > { %v1814_v48 = vpack.i.bf16 %v230_v45, %v229_v44  ;;  %v1705_v57 = vunpack.c.h.bf16 %v1747_v51  ;;  %v2089_v58 = vpack.i.bf16 %v1709_v53, %v1708_v52  ;;  %v520_v0 = vunpack.c.l.bf16 %v472_v61  ;;  %v502_v44 = vld [vmem:[%s2054_s18 + $0x80] sm:$0x1]  ;;  %v503_v45 = vld [vmem:[%s2054_s18 + $0x84] sm:$0xff]   ;;  %v508_v53 = vld [vmem:[%s2054_s18 + $0x98] sm:$0x1] }
  0x1e   : > { %v1834_v59 = vpack.i.bf16 %v238_v55, %v237_v54  ;;  %v521_v1 = vunpack.c.l.bf16 %v473_v62  ;;  %v241_v2 = vunpack.c.l.bf16 %v209_v63  ;;  %v242_v3 = vunpack.c.h.bf16 %v209_v63  ;;  %v509_v54 = vld [vmem:[%s2054_s18 + $0x9c] sm:$0xff]   ;;  %v505_v55 = vld [vmem:[%s2054_s18 + $0x8c] sm:$0x1]  ;;  %v514_v63 = vld [vmem:[%s2054_s18 + $0xb0] sm:$0x1] }
  0x1f   : > { %1795 = vperm.xlu2 %1788, %v1794_v22   ;;  %1784 = vperm.xlu1 %1777, %v1783_v23   ;;  %v2091_v60 = vpack.i.bf16 %v1705_v57, %v1704_v56  ;;  %v526_v9 = vunpack.c.l.bf16 %v478_v6  ;;  %v527_v10 = vunpack.c.l.bf16 %v479_v7  ;;  %v522_v11 = vunpack.c.h.bf16 %v473_v62 }
  0x20   : > { %1773 = vperm.xlu0 %1766, %v1772_v24   ;;  %v1854_v4 = vpack.i.bf16 %v521_v1, %v520_v0  ;;  %v1844_v5 = vpack.i.bf16 %v242_v3, %v241_v2  ;;  %v523_v14 = vunpack.c.l.bf16 %v475_v8  ;;  %v532_v21 = vunpack.c.l.bf16 %v484_v18  ;;  %v515_v0 = vld [vmem:[%s2054_s18 + $0xb4] sm:$0xff]   ;;  %v511_v1 = vld [vmem:[%s2054_s18 + $0xa4] sm:$0x1] }
  0x21   : > { %v1869_v16 = vpack.i.bf16 %v527_v10, %v526_v9  ;;  %v533_v22 = vunpack.c.l.bf16 %v485_v19  ;;  %v529_v23 = vunpack.c.l.bf16 %v481_v20  ;;  %v538_v29 = vunpack.c.l.bf16 %v490_v26  ;;  %v1054_v9 = vld [vmem:[%s2054_s18 + $0x24] sm:$0xe]  ;;  %v1051_v10 = vld [vmem:[%s2054_s18] sm:$0xe]  ;;  %v1057_v26 = vld [vmem:[%s2054_s18 + $0x48] sm:$0xe] }
  0x22   : > { %v1859_v17 = vpack.i.bf16 %v523_v14, %v522_v11  ;;  %v539_v30 = vunpack.c.l.bf16 %v491_v27  ;;  %v535_v31 = vunpack.c.l.bf16 %v487_v28  ;;  %v545_v40 = vunpack.c.l.bf16 %v497_v37  ;;  %v1052_v11 = vld [vmem:[%s2054_s18 + $0xc] sm:$0xe]  ;;  %v517_v14 = vld [vmem:[%s2054_s18 + $0xbc] sm:$0x1]  ;;  %v1056_v28 = vld [vmem:[%s2054_s18 + $0x3c] sm:$0xe] }
  0x23   : > { %v1884_v24 = vpack.i.bf16 %v533_v22, %v532_v21  ;;  %v541_v41 = vunpack.c.l.bf16 %v493_v38  ;;  %v551_v49 = vunpack.c.l.bf16 %v503_v45  ;;  %v556_v56 = vunpack.c.l.bf16 %v508_v53 }
  0x24   : > { %v1899_v32 = vpack.i.bf16 %v539_v30, %v538_v29  ;;  %v557_v57 = vunpack.c.l.bf16 %v509_v54  ;;  %v562_v2 = vunpack.c.l.bf16 %v514_v63  ;;  %v558_v3 = vunpack.c.h.bf16 %v509_v54 }
  0x25   : > { %v1068_v18 = vunpack.c.l.bf16 %v1052_v11  ;;  %v565_v20 = vunpack.c.l.bf16 %v517_v14 }
  0x26   : > { %v1944_v61 = vpack.i.bf16 %v557_v57, %v556_v56 }
  0x27   : > { %1810 = vperm.xlu2 %1788, %v2074_v34   ;;  %1805 = vperm.xlu1 %1777, %v1804_v35   ;;  %v496_v35 = vld [vmem:[%s2054_s18 + $0x68] sm:$0x1] }
  0x28   : > { %1800 = vperm.xlu0 %1766, %v2076_v36   ;;  %v544_v39 = vunpack.c.l.bf16 %v496_v35 }
  0x2a   : > { %v1914_v42 = vpack.i.bf16 %v545_v40, %v544_v39  ;;  %v1065_v39 = vld [vmem:[%s2054_s18 + $0xa8] sm:$0xe] }
  0x2f   : > { %1825 = vperm.xlu2 %1788, %v1824_v46   ;;  %1820 = vperm.xlu1 %1777, %v2083_v47   ;;  %v499_v46 = vld [vmem:[%s2054_s18 + $0x74] sm:$0x1] }
  0x30   : > { %1815 = vperm.xlu0 %1766, %v1814_v48   ;;  %v550_v48 = vunpack.c.l.bf16 %v502_v44  ;;  %v547_v50 = vunpack.c.l.bf16 %v499_v46  ;;  %v1062_v44 = vld [vmem:[%s2054_s18 + $0x84] sm:$0xe] }
  0x32   : > { %v1929_v51 = vpack.i.bf16 %v551_v49, %v550_v48 }
  0x37   : > { %1840 = vperm.xlu2 %1788, %v2089_v58   ;;  %1835 = vperm.xlu1 %1777, %v1834_v59   ;;  %v553_v59 = vunpack.c.l.bf16 %v505_v55 }
  0x38   : > { %1830 = vperm.xlu0 %1766, %v2091_v60  }
  0x3f   : > { %1855 = vperm.xlu2 %1788, %v1854_v4   ;;  %1850 = vperm.xlu1 %1777, %v2066_v15   ;;  %v528_v15 = vunpack.c.h.bf16 %v479_v7  ;;  %v559_v4 = vunpack.c.l.bf16 %v511_v1  ;;  %v1053_v7 = vld [vmem:[%s2054_s18 + $0x18] sm:$0xe]  ;;  %v1673_v1 = vld [vmem:[%s2835_s1 + $0x1] sm:$0x1] }
  0x40   : > { %1845 = vperm.xlu0 %1766, %v1844_v5  }
  0x41   : > { %v1874_v25 = vpack.i.bf16 %v529_v23, %v528_v15  ;;  %v1949_v8 = vpack.i.bf16 %v559_v4, %v558_v3  ;;  %v1059_v23 = vld [vmem:[%s2054_s18 + $0x60] sm:$0xe] }
  0x42   : > { %v1075_v29 = vunpack.c.l.bf16 %v1059_v23 }
  0x47   : > { %1870 = vperm.xlu2 %1788, %v1869_v16   ;;  %1865 = vperm.xlu1 %1777, %v2063_v13   ;;  %v534_v13 = vunpack.c.h.bf16 %v485_v19  ;;  %v1070_v16 = vunpack.c.l.bf16 %v1054_v9  ;;  %v564_v19 = vunpack.c.h.bf16 %v515_v0 }
  0x48   : > { %1860 = vperm.xlu0 %1766, %v1859_v17   ;;  %v1067_v17 = vunpack.c.l.bf16 %v1051_v10 }
  0x49   : > { %v1889_v33 = vpack.i.bf16 %v535_v31, %v534_v13  ;;  %v1073_v13 = vunpack.c.l.bf16 %v1057_v26 }
  0x4a   : > { %v1969_v15 = vpack.i.bf16 %v1068_v18, %v1067_v17 }
  0x4f   : > { %1885 = vperm.xlu2 %1788, %v1884_v24   ;;  %1880 = vperm.xlu1 %1777, %v2061_v12   ;;  %v540_v12 = vunpack.c.h.bf16 %v491_v27  ;;  %v1964_v24 = vpack.i.bf16 %v565_v20, %v564_v19  ;;  %v1058_v27 = vld [vmem:[%s2054_s18 + $0x54] sm:$0xe] }
  0x50   : > { %1875 = vperm.xlu0 %1766, %v1874_v25   ;;  %v1060_v25 = vld [vmem:[%s2054_s18 + $0x6c] sm:$0xe]  ;;  %v1074_v31 = vunpack.c.l.bf16 %v1058_v27 }
  0x51   : > { %v1904_v43 = vpack.i.bf16 %v541_v41, %v540_v12  ;;  %v1076_v30 = vunpack.c.l.bf16 %v1060_v25  ;;  %v1066_v12 = vld [vmem:[%s2054_s18 + $0xb4] sm:$0xe]  ;;  %v1063_v41 = vld [vmem:[%s2054_s18 + $0x90] sm:$0xe] }
  0x52   : > { %v1984_v38 = vpack.i.bf16 %v1074_v31, %v1073_v13  ;;  %v1082_v46 = vunpack.c.l.bf16 %v1066_v12  ;;  %v1079_v48 = vunpack.c.l.bf16 %v1063_v41 }
  0x57   : > { %1900 = vperm.xlu2 %1788, %v1899_v32   ;;  %1895 = vperm.xlu1 %1777, %v2076_v36   ;;  %v546_v36 = vunpack.c.h.bf16 %v497_v37  ;;  %v1989_v37 = vpack.i.bf16 %v1076_v30, %v1075_v29 }
  0x58   : > { %1890 = vperm.xlu0 %1766, %v1889_v33   ;;  %v1072_v33 = vunpack.c.l.bf16 %v1056_v28 }
  0x59   : > { %v1919_v52 = vpack.i.bf16 %v547_v50, %v546_v36  ;;  %v1078_v50 = vunpack.c.l.bf16 %v1062_v44 }
  0x5f   : > { %1915 = vperm.xlu2 %1788, %v1914_v42   ;;  %1910 = vperm.xlu1 %1777, %v2074_v34   ;;  %v552_v34 = vunpack.c.h.bf16 %v503_v45  ;;  %v1064_v42 = vld [vmem:[%s2054_s18 + $0x9c] sm:$0xe]  ;;  %v1081_v45 = vunpack.c.l.bf16 %v1065_v39 }
  0x60   : > { %1905 = vperm.xlu0 %1766, %v1904_v43   ;;  %v1061_v43 = vld [vmem:[%s2054_s18 + $0x78] sm:$0xe]  ;;  %v1080_v49 = vunpack.c.l.bf16 %v1064_v42 }
  0x61   : > { %v1934_v62 = vpack.i.bf16 %v553_v59, %v552_v34  ;;  %v1077_v36 = vunpack.c.l.bf16 %v1061_v43  ;;  %v2004_v54 = vpack.i.bf16 %v1082_v46, %v1081_v45 }
  0x62   : > { %v1999_v55 = vpack.i.bf16 %v1080_v49, %v1079_v48 }
  0x63   : > { %v1994_v56 = vpack.i.bf16 %v1078_v50, %v1077_v36 }
  0x67   : > { %1930 = vperm.xlu2 %1788, %v1929_v51   ;;  %1925 = vperm.xlu1 %1777, %v2083_v47   ;;  %v563_v47 = vunpack.c.l.bf16 %v515_v0 }
  0x68   : > { %1920 = vperm.xlu0 %1766, %v1919_v52  }
  0x69   : > { %v1959_v6 = vpack.i.bf16 %v563_v47, %v562_v2  ;;  %v1674_v2 = vld [vmem:[%s2835_s1 + $0x2] sm:$0x1] }
  0x6f   : > { %1945 = vperm.xlu2 %1788, %v1944_v61   ;;  %1940 = vperm.xlu1 %1777, %v2091_v60   ;;  %v1069_v60 = vunpack.c.l.bf16 %v1053_v7  ;;  %v243_v61 = vld [vmem:[%s2835_s1] sm:$0x1]  ;;  %v568_v7 = vunpack.c.l.bf16 %v1673_v1 }
  0x70   : > { %1935 = vperm.xlu0 %1766, %v1934_v62   ;;  %v244_v62 = vunpack.c.l.bf16 %v243_v61 }
  0x71   : > { %v2126_v5 = vpop.permute.xlu2 %1790  ;;  %v1974_v22 = vpack.i.bf16 %v1070_v16, %v1069_v60  ;;  %v2177_v20 = vperm.slane %v568_v7, 0 }
  0x72   : > { %v2163_v3 = vperm.slane %v244_v62, 0  ;;  %v1793_v4 = vunpack.i.h.bf16 %v2126_v5 }
  0x74   : > { %v2172_v60 = vmul.f32 %v1793_v4, %v2163_v3 }
  0x77   : > { %1960 = vperm.xlu2 %1788, %v1959_v6   ;;  %1955 = vperm.xlu1 %1777, %v2089_v58   ;;  %v1055_v58 = vld [vmem:[%s2054_s18 + $0x30] sm:$0xe]  ;;  %v1792_v6 = vunpack.i.l.bf16 %v2126_v5 }
  0x78   : > { %1950 = vperm.xlu0 %1766, %v1949_v8   ;;  %v1071_v32 = vunpack.c.l.bf16 %v1055_v58  ;;  %v1085_v8 = vunpack.c.l.bf16 %v1674_v2 }
  0x79   : > { %v2134_v21 = vpop.permute.xlu2 %1795  ;;  %v2175_v16 = vmul.f32 %v1792_v6, %v2163_v3 }
  0x7a   : > { %v1979_v40 = vpack.i.bf16 %v1072_v33, %v1071_v32  ;;  %v1798_v9 = vunpack.i.h.bf16 %v2134_v21  ;;  %v1797_v10 = vunpack.i.l.bf16 %v2134_v21 }
  0x7c   : > { %v2182_v23 = vmul.f32 %v1798_v9, %v2163_v3 }
  0x7f   : > { %1975 = vperm.xlu2 %1788, %v1974_v22   ;;  %1970 = vperm.xlu1 %1777, %v1969_v15   ;;  %v2179_v22 = vperm.slane %v1085_v8, 0 }
  0x80   : > { %1965 = vperm.xlu0 %1766, %v1964_v24   ;;  %v2185_v24 = vmul.f32 %v1797_v10, %v2163_v3 }
  0x81   : > { %v2142_v35 = vpop.permute.xlu2 %1810 }
  0x82   : > { %v1813_v11 = vunpack.i.h.bf16 %v2142_v35  ;;  %v1812_v14 = vunpack.i.l.bf16 %v2142_v35 }
  0x84   : > { %v2188_v58 = vmul.f32 %v1813_v11, %v2163_v3  ;;  %v2191_v28 = vmul.f32 %v1812_v14, %v2163_v3 }
  0x87   : > { %1990 = vperm.xlu2 %1788, %v1989_v37   ;;  %1985 = vperm.xlu1 %1777, %v1984_v38  }
  0x88   : > { %1980 = vperm.xlu0 %1766, %v1979_v40  }
  0x89   : > { %v1826_v51 = vpop.permute.xlu2 %1825  ;;  %v1780_v52 = vpop.permute.xlu1 %1779 }
  0x8a   : > { %v1769_v53 = vpop.permute.xlu0 %1768  ;;  %v1828_v17 = vunpack.i.h.bf16 %v1826_v51  ;;  %v1827_v18 = vunpack.i.l.bf16 %v1826_v51  ;;  %v1782_v19 = vunpack.i.h.bf16 %v1780_v52  ;;  %v1781_v5 = vunpack.i.l.bf16 %v1780_v52 }
  0x8b   : > { %v1771_v25 = vunpack.i.h.bf16 %v1769_v53  ;;  %v1770_v26 = vunpack.i.l.bf16 %v1769_v53 }
  0x8c   : > { %v2194_v13 = vmul.f32 %v1828_v17, %v2163_v3  ;;  %v2197_v31 = vmul.f32 %v1827_v18, %v2163_v3  ;;  %v2200_v35 = vmul.f32 %v1782_v19, %v2163_v3  ;;  %v2203_v37 = vmul.f32 %v1781_v5, %v2163_v3 }
  0x8d   : > { %v2206_v40 = vmul.f32 %v1771_v25, %v2163_v3  ;;  %v2209_v12 = vmul.f32 %v1770_v26, %v2163_v3 }
  0x8f   : > { %2005 = vperm.xlu2 %1788, %v2004_v54   ;;  %2000 = vperm.xlu1 %1777, %v1999_v55  }
  0x90   : > { %1995 = vperm.xlu0 %1766, %v1994_v56  }
  0x91   : > { %v1841_v57 = vpop.permute.xlu2 %1840  ;;  %v1785_v34 = vpop.permute.xlu1 %1784 }
  0x92   : > { %v1774_v59 = vpop.permute.xlu0 %1773  ;;  %v1843_v29 = vunpack.i.h.bf16 %v1841_v57  ;;  %v1842_v30 = vunpack.i.l.bf16 %v1841_v57  ;;  %v1787_v32 = vunpack.i.h.bf16 %v1785_v34  ;;  %v1786_v33 = vunpack.i.l.bf16 %v1785_v34 }
  0x93   : > { %v1776_v38 = vunpack.i.h.bf16 %v1774_v59  ;;  %v1775_v39 = vunpack.i.l.bf16 %v1774_v59 }
  0x94   : > { %v2212_v43 = vmul.f32 %v1843_v29, %v2163_v3  ;;  %v2215_v44 = vmul.f32 %v1842_v30, %v2163_v3  ;;  %v2220_v48 = vmul.f32 %v1787_v32, %v2163_v3  ;;  %v2223_v49 = vmul.f32 %v1786_v33, %v2163_v3 }
  0x95   : > { %v2226_v51 = vmul.f32 %v1776_v38, %v2163_v3  ;;  %v2229_v52 = vmul.f32 %v1775_v39, %v2163_v3 }
  0x99   : > { %v1856_v63 = vpop.permute.xlu2 %1855  ;;  %v2153_v0 = vpop.permute.xlu1 %1805 }
  0x9a   : > { %v2161_v47 = vpop.permute.xlu0 %1800  ;;  %v1858_v41 = vunpack.i.h.bf16 %v1856_v63  ;;  %v1857_v42 = vunpack.i.l.bf16 %v1856_v63  ;;  %v1808_v45 = vunpack.i.h.bf16 %v2153_v0  ;;  %v1807_v46 = vunpack.i.l.bf16 %v2153_v0 }
  0x9b   : > { %v1803_v53 = vunpack.i.h.bf16 %v2161_v47  ;;  %v1802_v54 = vunpack.i.l.bf16 %v2161_v47 }
  0x9c   : > { %v2234_v57 = vmul.f32 %v1858_v41, %v2177_v20  ;;  %v2237_v34 = vmul.f32 %v1857_v42, %v2177_v20  ;;  %v2240_v59 = vmul.f32 %v1857_v42, %v2179_v22  ;;  %v2243_v63 = vmul.f32 %v1808_v45, %v2163_v3 }
  0x9d   : > { %v2246_v0 = vmul.f32 %v1807_v46, %v2163_v3  ;;  %v2258_v8 = vmul.f32 %v1803_v53, %v2163_v3  ;;  %v2261_v9 = vmul.f32 %v1802_v54, %v2163_v3 }
  0x9e   : > { %v910_v17 = vrot.slane %v2237_v34, 1  ;;  %v1267_v18 = vrot.slane %v2240_v59, 2 }
  0xa1   : > { %v1871_v15 = vpop.permute.xlu2 %1870  ;;  %v1821_v21 = vpop.permute.xlu1 %1820 }
  0xa2   : > { %v1816_v27 = vpop.permute.xlu0 %1815  ;;  %v1873_v36 = vunpack.i.h.bf16 %v1871_v15  ;;  %v1872_v50 = vunpack.i.l.bf16 %v1871_v15  ;;  %v1823_v61 = vunpack.i.h.bf16 %v1821_v21  ;;  %v1822_v1 = vunpack.i.l.bf16 %v1821_v21 }
  0xa3   : > { %v1818_v2 = vunpack.i.h.bf16 %v1816_v27  ;;  %v1817_v7 = vunpack.i.l.bf16 %v1816_v27 }
  0xa4   : > { %v2249_v47 = vmul.f32 %v1873_v36, %v2177_v20  ;;  %v2252_v4 = vmul.f32 %v1872_v50, %v2177_v20  ;;  %v2255_v6 = vmul.f32 %v1872_v50, %v2179_v22  ;;  %v2267_v19 = vmul.f32 %v1823_v61, %v2163_v3 }
  0xa5   : > { %v2270_v5 = vmul.f32 %v1822_v1, %v2163_v3  ;;  %v2273_v15 = vmul.f32 %v1818_v2, %v2163_v3  ;;  %v2279_v30 = vmul.f32 %v1817_v7, %v2163_v3 }
  0xa9   : > { %v1886_v55 = vpop.permute.xlu2 %1885  ;;  %v1836_v56 = vpop.permute.xlu1 %1835 }
  0xaa   : > { %v1831_v62 = vpop.permute.xlu0 %1830  ;;  %v1888_v10 = vunpack.i.h.bf16 %v1886_v55  ;;  %v1887_v11 = vunpack.i.l.bf16 %v1886_v55  ;;  %v1838_v21 = vunpack.i.h.bf16 %v1836_v56  ;;  %v1837_v25 = vunpack.i.l.bf16 %v1836_v56 }
  0xab   : > { %v1833_v38 = vunpack.i.h.bf16 %v1831_v62  ;;  %v1832_v39 = vunpack.i.l.bf16 %v1831_v62 }
  0xac   : > { %v2282_v32 = vmul.f32 %v1888_v10, %v2177_v20  ;;  %v2285_v33 = vmul.f32 %v1887_v11, %v2177_v20  ;;  %v2288_v54 = vmul.f32 %v1887_v11, %v2179_v22  ;;  %v2291_v55 = vmul.f32 %v1838_v21, %v2163_v3 }
  0xad   : > { %v2294_v56 = vmul.f32 %v1837_v25, %v2163_v3  ;;  %v2304_v2 = vmul.f32 %v1833_v38, %v2163_v3 }
  0xae   : > { %2847 = vst [vmem:[#allocation2_spill] sm:$0xff] %v2291_v55 }
  0xaf   : > { %2848 = vst [vmem:[#allocation3_spill] sm:$0xff] %v2294_v56 }
  0xb1   : > { %v1901_v41 = vpop.permute.xlu2 %1900  ;;  %v1851_v42 = vpop.permute.xlu1 %1850 }
  0xb2   : > { %v1903_v45 = vunpack.i.h.bf16 %v1901_v41  ;;  %v1902_v46 = vunpack.i.l.bf16 %v1901_v41  ;;  %v1853_v36 = vunpack.i.h.bf16 %v1851_v42  ;;  %v1852_v50 = vunpack.i.l.bf16 %v1851_v42  ;;  %v1846_v53 = vpop.permute.xlu0 %1845 }
  0xb3   : > { %v1848_v34 = vunpack.i.h.bf16 %v1846_v53  ;;  %v1847_v1 = vunpack.i.l.bf16 %v1846_v53  ;;  %v2316_v41 = vmul.f32 %v1832_v39, %v2163_v3 }
  0xb4   : > { %v2297_v59 = vmul.f32 %v1903_v45, %v2177_v20  ;;  %v2300_v61 = vmul.f32 %v1902_v46, %v2177_v20  ;;  %v811_v62 = vmul.f32 %v1853_v36, %v2177_v20  ;;  %v2307_v7 = vmul.f32 %v1902_v46, %v2179_v22 }
  0xb5   : > { %v2310_v10 = vmul.f32 %v1853_v36, %v2179_v22  ;;  %v810_v11 = vmul.f32 %v1852_v50, %v2177_v20  ;;  %v2321_v46 = vmul.f32 %v1848_v34, %v2163_v3  ;;  %v2327_v26 = vmul.f32 %v1847_v1, %v2163_v3 }
  0xb6   : > { %v908_v42 = vrot.slane %v811_v62, 1  ;;  %v2333_v62 = vld [vmem:[%s2836_s2] ss:$0 sm:$0xff] }
  0xb7   : > { %2849 = vst [vmem:[#allocation4_spill] sm:$0xff] %v2310_v10  ;;  %v2838_v38 = vrot.slane %v2310_v10, 2  ;;  %v907_v53 = vrot.slane %v810_v11, 1 }
  0xb8   : > { %2850 = vst [vmem:[#allocation5_spill] sm:$0xff] %v2321_v46  ;;  %v911_v21 = vsel %vm906_vm0, %v908_v42, %v910_v17 }
  0xb9   : > { %2851 = vst [vmem:[#allocation6_spill] sm:$0xff] %v2327_v26  ;;  %v1268_v34 = vsel %vm1263_vm1, %v2838_v38, %v1267_v18  ;;  %v909_v11 = vsel %vm906_vm0, %v907_v53, %v908_v42  ;;  %v1020_v36 = vadd.f32 %v911_v21, %v2206_v40  ;;  %v1916_v17 = vpop.permute.xlu2 %1915  ;;  %v1866_v50 = vpop.permute.xlu1 %1865 }
  0xba   : > { %v2341_v3 = vadd.f32 %v909_v11, %v2209_v12  ;;  %v1918_v1 = vunpack.i.h.bf16 %v1916_v17  ;;  %v1917_v39 = vunpack.i.l.bf16 %v1916_v17  ;;  %v1868_v45 = vunpack.i.h.bf16 %v1866_v50  ;;  %v1861_v25 = vpop.permute.xlu0 %1860 }
  0xbb   : > { %v1377_v14 = vadd.f32 %v1268_v34, %v1020_v36  ;;  %v1867_v29 = vunpack.i.l.bf16 %v1866_v50  ;;  %v1863_v27 = vunpack.i.h.bf16 %v1861_v25  ;;  %v1862_v46 = vunpack.i.l.bf16 %v1861_v25 }
  0xbc   : > { %2852 = vst [vmem:[#allocation7_spill] sm:$0xff] %v2341_v3  ;;  %v2344_v18 = vmul.f32 %v1918_v1, %v2177_v20  ;;  %v2347_v42 = vmul.f32 %v1917_v39, %v2177_v20  ;;  %v2350_v40 = vmul.f32 %v1917_v39, %v2179_v22  ;;  %v817_v12 = vmul.f32 %v1868_v45, %v2177_v20 }
  0xbd   : > { %v1413_v21 = vadd.f32 %v2333_v62, %v1377_v14  ;;  %v2355_v53 = vmul.f32 %v1868_v45, %v2179_v22  ;;  %v816_v36 = vmul.f32 %v1867_v29, %v2177_v20  ;;  %v815_v25 = vmul.f32 %v1863_v27, %v2177_v20 }
  0xbe   : > { %v918_v39 = vrot.slane %v817_v12, 1  ;;  %v2853_v45 = vrot.slane %v2252_v4, 1  ;;  %v1172_v26 = vmul.f32 %v1863_v27, %v2179_v22  ;;  %v814_v3 = vmul.f32 %v1862_v46, %v2177_v20 }
  0xbf   : > { %vm1445_vm3 = vcmp.ge.f32.partialorder %v1413_v21, 0.0  ;;  %v1477_v17 = vmul.f32 0.2, %v1413_v21  ;;  %v2842_v1 = vrot.slane %v2355_v53, 2  ;;  %v917_v14 = vrot.slane %v816_v36, 1 }
  0xc0   : > { %v921_v38 = vsel %vm906_vm0, %v918_v39, %v2853_v45  ;;  %v915_v29 = vrot.slane %v815_v25, 1  ;;  %v2854_v50 = vrot.slane %v2255_v6, 2  ;;  %v1272_v10 = vrot.slane %v1172_v26, 2 }
  0xc1   : > { %v1509_v12 = vsel %vm1445_vm3, %v1413_v21, %v1477_v17  ;;  %v919_v36 = vsel %vm906_vm0, %v917_v14, %v918_v39  ;;  %v1024_v25 = vadd.f32 %v921_v38, %v2200_v35  ;;  %v1931_v27 = vpop.permute.xlu2 %1930  ;;  %v1881_v45 = vpop.permute.xlu1 %1880  ;;  %v913_v55 = vrot.slane %v814_v3, 1 }
  0xc2   : > { %v1278_v4 = vsel %vm1263_vm1, %v2842_v1, %v2854_v50  ;;  %v1541_v11 = vpack.c.bf16 %v1509_v12, %v1509_v12  ;;  %v2382_v34 = vadd.f32 %v919_v36, %v2203_v37  ;;  %v2385_v21 = vmul.f32 %v1862_v46, %v2179_v22 }
  0xc3   : > { %v1381_v56 = vadd.f32 %v1278_v4, %v1024_v25  ;;  %v1933_v6 = vunpack.i.h.bf16 %v1931_v27  ;;  %v1932_v17 = vunpack.i.l.bf16 %v1931_v27  ;;  %v2855_v50 = vrot.slane %v2234_v57, 1 }
  0xc4   : > { %1574 = vst.msk [vmem:[%s2372_s30 + $0x4] sm:$0xf] %vm1572_vm2, %v1541_v11  ;;  %v916_v38 = vsel %vm906_vm0, %v913_v55, %v915_v29  ;;  %v1883_v39 = vunpack.i.h.bf16 %v1881_v45  ;;  %v1882_v14 = vunpack.i.l.bf16 %v1881_v45  ;;  %v2840_v3 = vrot.slane %v2385_v21, 2  ;;  %v1876_v29 = vpop.permute.xlu0 %1875 }
  0xc5   : > { %v914_v35 = vsel %vm906_vm0, %v2855_v50, %v913_v55  ;;  %v1417_v37 = vadd.f32 %v2333_v62, %v1381_v56  ;;  %v1022_v46 = vadd.f32 %v916_v38, %v2226_v51  ;;  %v2400_v12 = vmul.f32 %v1933_v6, %v2177_v20 }
  0xc6   : > { %v2395_v26 = vadd.f32 %v914_v35, %v2229_v52  ;;  %v2403_v57 = vmul.f32 %v1932_v17, %v2177_v20  ;;  %v2406_v11 = vmul.f32 %v1932_v17, %v2179_v22  ;;  %v823_v55 = vmul.f32 %v1883_v39, %v2177_v20 }
  0xc7   : > { %vm1449_vm4 = vcmp.ge.f32.partialorder %v1417_v37, 0.0  ;;  %v1481_v56 = vmul.f32 0.2, %v1417_v37  ;;  %v1273_v52 = vsel %vm1263_vm1, %v2840_v3, %v1272_v10  ;;  %v2413_v51 = vmul.f32 %v1883_v39, %v2179_v22 }
  0xc8   : > { %v1379_v4 = vadd.f32 %v1273_v52, %v1022_v46  ;;  %v928_v6 = vrot.slane %v823_v55, 1  ;;  %v822_v50 = vmul.f32 %v1882_v14, %v2177_v20  ;;  %v1878_v39 = vunpack.i.h.bf16 %v1876_v29 }
  0xc9   : > { %v1513_v45 = vsel %vm1449_vm4, %v1417_v37, %v1481_v56  ;;  %v2841_v17 = vrot.slane %v2413_v51, 2  ;;  %v1946_v35 = vpop.permute.xlu2 %1945  ;;  %v1877_v3 = vunpack.i.l.bf16 %v1876_v29  ;;  %v2856_v46 = vrot.slane %v2285_v33, 1 }
  0xca   : > { %v1545_v10 = vpack.c.bf16 %v1513_v45, %v1513_v45  ;;  %v1415_v38 = vadd.f32 %v2333_v62, %v1379_v4  ;;  %v2857_v36 = vrot.slane %v2288_v54, 2  ;;  %v927_v55 = vrot.slane %v822_v50, 1 }
  0xcb   : > { %v931_v52 = vsel %vm906_vm0, %v928_v6, %v2856_v46  ;;  %v1948_v56 = vunpack.i.h.bf16 %v1946_v35  ;;  %v821_v29 = vmul.f32 %v1878_v39, %v2177_v20  ;;  %v1178_v45 = vmul.f32 %v1878_v39, %v2179_v22 }
  0xcc   : > { %v1288_v37 = vsel %vm1263_vm1, %v2841_v17, %v2857_v36  ;;  %1578 = vst.msk [vmem:[%s2372_s30 + $0x14] sm:$0xf] %vm1572_vm2, %v1545_v10  ;;  %vm1447_vm5 = vcmp.ge.f32.partialorder %v1415_v38, 0.0  ;;  %v1479_v14 = vmul.f32 0.2, %v1415_v38  ;;  %v1028_v4 = vadd.f32 %v931_v52, %v2172_v60  ;;  %v1896_v36 = vpop.permute.xlu1 %1895 }
  0xcd   : > { %v929_v33 = vsel %vm906_vm0, %v927_v55, %v928_v6  ;;  %v820_v54 = vmul.f32 %v1877_v3, %v2177_v20  ;;  %v2437_v46 = vmul.f32 %v1877_v3, %v2179_v22  ;;  %v925_v27 = vrot.slane %v821_v29, 1 }
  0xce   : > { %v1511_v50 = vsel %vm1447_vm5, %v1415_v38, %v1479_v14  ;;  %v1385_v17 = vadd.f32 %v1288_v37, %v1028_v4  ;;  %v2440_v10 = vadd.f32 %v929_v33, %v2175_v16  ;;  %v1282_v52 = vrot.slane %v1178_v45, 2 }
  0xcf   : > { %v1543_v60 = vpack.c.bf16 %v1511_v50, %v1511_v50  ;;  %v923_v25 = vrot.slane %v820_v54, 1  ;;  %v2846_v6 = vrot.slane %v2437_v46, 2  ;;  %v2445_v55 = vmul.f32 %v1948_v56, %v2177_v20 }
  0xd0   : > { %2858 = vst [vmem:[#allocation8_spill] sm:$0xff] %v2440_v10  ;;  %v1421_v39 = vadd.f32 %v2333_v62, %v1385_v17  ;;  %v1947_v1 = vunpack.i.l.bf16 %v1946_v35  ;;  %v1898_v3 = vunpack.i.h.bf16 %v1896_v36  ;;  %v2859_v38 = vrot.slane %v2249_v47, 1 }
  0xd1   : > { %1576 = vst.msk [vmem:[%s2372_s30 + $0xc] sm:$0xf] %vm1572_vm2, %v1543_v60  ;;  %v926_v37 = vsel %vm906_vm0, %v923_v25, %v925_v27  ;;  %v1283_v14 = vsel %vm1263_vm1, %v2846_v6, %v1282_v52  ;;  %v1897_v4 = vunpack.i.l.bf16 %v1896_v36  ;;  %v1891_v27 = vpop.permute.xlu0 %1890  ;;  %v2865_v10 = vrot.slane %v2297_v59, 1 }
  0xd2   : > { %v924_v16 = vsel %vm906_vm0, %v2859_v38, %v923_v25  ;;  %vm1453_vm6 = vcmp.ge.f32.partialorder %v1421_v39, 0.0  ;;  %v1485_v17 = vmul.f32 0.2, %v1421_v39  ;;  %v1026_v35 = vadd.f32 %v926_v37, %v2220_v48  ;;  %v1961_v48 = vpop.permute.xlu2 %1960 }
  0xd3   : > { %v2457_v56 = vadd.f32 %v924_v16, %v2223_v49  ;;  %v2462_v47 = vmul.f32 %v1947_v1, %v2177_v20  ;;  %v2465_v33 = vmul.f32 %v1947_v1, %v2179_v22  ;;  %v829_v25 = vmul.f32 %v1898_v3, %v2177_v20 }
  0xd4   : > { %v1517_v45 = vsel %vm1453_vm6, %v1421_v39, %v1485_v17  ;;  %v1383_v54 = vadd.f32 %v1283_v14, %v1026_v35  ;;  %v2469_v36 = vmul.f32 %v1898_v3, %v2179_v22  ;;  %v828_v49 = vmul.f32 %v1897_v4, %v2177_v20 }
  0xd5   : > { %v1549_v50 = vpack.c.bf16 %v1517_v45, %v1517_v45  ;;  %v938_v38 = vrot.slane %v829_v25, 1  ;;  %v1893_v29 = vunpack.i.h.bf16 %v1891_v27  ;;  %v2860_v39 = vrot.slane %v2300_v61, 1 }
  0xd6   : > { %v1419_v1 = vadd.f32 %v2333_v62, %v1383_v54  ;;  %v2843_v16 = vrot.slane %v2469_v36, 2  ;;  %v937_v37 = vrot.slane %v828_v49, 1  ;;  %v1892_v14 = vunpack.i.l.bf16 %v1891_v27 }
  0xd7   : > { %1582 = vst.msk [vmem:[%s2372_s30 + $0x24] sm:$0xf] %vm1572_vm2, %v1549_v50  ;;  %v941_v3 = vsel %vm906_vm0, %v938_v38, %v2860_v39  ;;  %v1963_v4 = vunpack.i.h.bf16 %v1961_v48  ;;  %v1962_v17 = vunpack.i.l.bf16 %v1961_v48  ;;  %v2861_v45 = vrot.slane %v2307_v7, 2 }
  0xd8   : > { %vm1451_vm7 = vcmp.ge.f32.partialorder %v1419_v1, 0.0  ;;  %v1483_v35 = vmul.f32 0.2, %v1419_v1  ;;  %v939_v54 = vsel %vm906_vm0, %v937_v37, %v938_v38  ;;  %v1032_v61 = vadd.f32 %v941_v3, %v2258_v8  ;;  %v1911_v38 = vpop.permute.xlu1 %1910 }
  0xd9   : > { %v1298_v25 = vsel %vm1263_vm1, %v2843_v16, %v2861_v45  ;;  %v2488_v49 = vadd.f32 %v939_v54, %v2261_v9  ;;  %v827_v27 = vmul.f32 %v1893_v29, %v2177_v20  ;;  %v1184_v48 = vmul.f32 %v1893_v29, %v2179_v22 }
  0xda   : > { %v1515_v50 = vsel %vm1451_vm7, %v1419_v1, %v1483_v35  ;;  %v826_v39 = vmul.f32 %v1892_v14, %v2177_v20  ;;  %v2495_v7 = vmul.f32 %v1892_v14, %v2179_v22  ;;  %v2498_v45 = vmul.f32 %v1963_v4, %v2177_v20 }
  0xdb   : > { %v1547_v37 = vpack.c.bf16 %v1515_v50, %v1515_v50  ;;  %v1389_v9 = vadd.f32 %v1298_v25, %v1032_v61  ;;  %v935_v54 = vrot.slane %v827_v27, 1  ;;  %v1292_v16 = vrot.slane %v1184_v48, 2  ;;  %v1906_v25 = vpop.permute.xlu0 %1905 }
  0xdc   : > { %v933_v8 = vrot.slane %v826_v39, 1  ;;  %v2844_v3 = vrot.slane %v2495_v7, 2  ;;  %v2503_v29 = vmul.f32 %v1962_v17, %v2177_v20  ;;  %v2509_v14 = vmul.f32 %v1962_v17, %v2179_v22 }
  0xdd   : > { %1580 = vst.msk [vmem:[%s2372_s30 + $0x1c] sm:$0xf] %vm1572_vm2, %v1547_v37  ;;  %v1425_v1 = vadd.f32 %v2333_v62, %v1389_v9  ;;  %v1913_v4 = vunpack.i.h.bf16 %v1911_v38  ;;  %v1912_v35 = vunpack.i.l.bf16 %v1911_v38  ;;  %v2862_v61 = vrot.slane %v2282_v32, 1 }
  0xde   : > { %v936_v48 = vsel %vm906_vm0, %v933_v8, %v935_v54  ;;  %v1293_v50 = vsel %vm1263_vm1, %v2844_v3, %v1292_v16  ;;  %v1908_v3 = vunpack.i.h.bf16 %v1906_v25  ;;  %v1907_v52 = vunpack.i.l.bf16 %v1906_v25 }
  0xdf   : > { %v934_v27 = vsel %vm906_vm0, %v2862_v61, %v933_v8  ;;  %vm1457_vm8 = vcmp.ge.f32.partialorder %v1425_v1, 0.0  ;;  %v1489_v37 = vmul.f32 0.2, %v1425_v1  ;;  %v1030_v38 = vadd.f32 %v936_v48, %v2182_v23 }
  0xe0   : > { %v2520_v17 = vadd.f32 %v934_v27, %v2185_v24  ;;  %v835_v32 = vmul.f32 %v1913_v4, %v2177_v20  ;;  %v2526_v54 = vmul.f32 %v1913_v4, %v2179_v22  ;;  %v834_v8 = vmul.f32 %v1912_v35, %v2177_v20 }
  0xe1   : > { %v1521_v16 = vsel %vm1457_vm8, %v1425_v1, %v1489_v37  ;;  %v1387_v61 = vadd.f32 %v1293_v50, %v1030_v38  ;;  %v833_v48 = vmul.f32 %v1908_v3, %v2177_v20  ;;  %v1190_v9 = vmul.f32 %v1908_v3, %v2179_v22  ;;  %v1976_v3 = vpop.permute.xlu2 %1975 }
  0xe2   : > { %v1553_v39 = vpack.c.bf16 %v1521_v16, %v1521_v16  ;;  %v948_v60 = vrot.slane %v835_v32, 1  ;;  %v2845_v24 = vrot.slane %v2526_v54, 2  ;;  %v947_v27 = vrot.slane %v834_v8, 1 }
  0xe3   : > { %v1423_v23 = vadd.f32 %v2333_v62, %v1387_v61  ;;  %v832_v4 = vmul.f32 %v1907_v52, %v2177_v20  ;;  %v2863_v1 = vrot.slane %v2347_v42, 1  ;;  %v2864_v25 = vrot.slane %v2350_v40, 2 }
  0xe4   : > { %1586 = vst.msk [vmem:[%s2372_s30 + $0x34] sm:$0xf] %vm1572_vm2, %v1553_v39  ;;  %v949_v37 = vsel %vm906_vm0, %v947_v27, %v948_v60  ;;  %v2546_v38 = vmul.f32 %v1907_v52, %v2179_v22  ;;  %v945_v8 = vrot.slane %v833_v48, 1  ;;  %v1302_v16 = vrot.slane %v1190_v9, 2  ;;  %v1926_v52 = vpop.permute.xlu1 %1925 }
  0xe5   : > { %v951_v35 = vsel %vm906_vm0, %v948_v60, %v2863_v1  ;;  %v1308_v50 = vsel %vm1263_vm1, %v2845_v24, %v2864_v25  ;;  %vm1455_vm9 = vcmp.ge.f32.partialorder %v1423_v23, 0.0  ;;  %v1487_v32 = vmul.f32 0.2, %v1423_v23  ;;  %v2553_v24 = vpop.permute.xlu0 %1920 }
  0xe6   : > { %v1036_v39 = vadd.f32 %v951_v35, %v2188_v58  ;;  %v2550_v42 = vadd.f32 %v949_v37, %v2191_v28  ;;  %v943_v40 = vrot.slane %v832_v4, 1  ;;  %v1300_v61 = vrot.slane %v2546_v38, 2 }
  0xe7   : > { %v1519_v1 = vsel %vm1455_vm9, %v1423_v23, %v1487_v32  ;;  %v1978_v60 = vunpack.i.h.bf16 %v1976_v3  ;;  %v1977_v27 = vunpack.i.l.bf16 %v1976_v3  ;;  %v1923_v37 = vunpack.i.h.bf16 %v2553_v24 }
  0xe8   : > { %v1393_v25 = vadd.f32 %v1308_v50, %v1036_v39  ;;  %v1551_v6 = vpack.c.bf16 %v1519_v1, %v1519_v1  ;;  %v944_v58 = vsel %vm906_vm0, %v2865_v10, %v943_v40  ;;  %v946_v28 = vsel %vm906_vm0, %v943_v40, %v945_v8 }
  0xe9   : > { %v1303_v9 = vsel %vm1263_vm1, %v1300_v61, %v1302_v16  ;;  %v2564_v23 = vadd.f32 %v944_v58, %v2246_v0  ;;  %v1034_v4 = vadd.f32 %v946_v28, %v2243_v63  ;;  %v1176_v35 = vmul.f32 %v1978_v60, %v2179_v22 }
  0xea   : > { %v1429_v48 = vadd.f32 %v2333_v62, %v1393_v25  ;;  %1584 = vst.msk [vmem:[%s2372_s30 + $0x2c] sm:$0xf] %vm1572_vm2, %v1551_v6  ;;  %v1173_v59 = vmul.f32 %v1977_v27, %v2179_v22  ;;  %v1928_v10 = vunpack.i.h.bf16 %v1926_v52  ;;  %v1927_v50 = vunpack.i.l.bf16 %v1926_v52 }
  0xeb   : > { %v1391_v32 = vadd.f32 %v1303_v9, %v1034_v4  ;;  %v1279_v39 = vrot.slane %v1176_v35, 2  ;;  %v2866_v1 = vrot.slane %v2437_v46, 2  ;;  %v839_v60 = vmul.f32 %v1923_v37, %v2177_v20 }
  0xec   : > { %vm1461_vm10 = vcmp.ge.f32.partialorder %v1429_v48, 0.0  ;;  %v1493_v3 = vmul.f32 0.2, %v1429_v48  ;;  %v1274_v8 = vrot.slane %v1173_v59, 2  ;;  %v841_v0 = vmul.f32 %v1928_v10, %v2177_v20 }
  0xed   : > { %v2574_v63 = vmul.f32 %v1928_v10, %v2179_v22  ;;  %v840_v16 = vmul.f32 %v1927_v50, %v2177_v20  ;;  %v1427_v40 = vadd.f32 %v2333_v62, %v1391_v32  ;;  %v1281_v25 = vsel %vm1263_vm1, %v1279_v39, %v2866_v1 }
  0xee   : > { %v1525_v6 = vsel %vm1461_vm10, %v1429_v48, %v1493_v3  ;;  %v2867_v52 = vrot.slane %v2355_v53, 2  ;;  %v1382_v28 = vadd.f32 %v1281_v25, %v2457_v56  ;;  %v958_v9 = vrot.slane %v841_v0, 1 }
  0xef   : > { %v1557_v27 = vpack.c.bf16 %v1525_v6, %v1525_v6  ;;  %vm1459_vm11 = vcmp.ge.f32.partialorder %v1427_v40, 0.0  ;;  %v1491_v4 = vmul.f32 0.2, %v1427_v40  ;;  %v1315_v35 = vrot.slane %v2574_v63, 2 }
  0xf0   : > { %v1276_v58 = vsel %vm1263_vm1, %v1274_v8, %v2867_v52  ;;  %v1418_v46 = vadd.f32 %v2333_v62, %v1382_v28  ;;  %v2868_v59 = vrot.slane %v2403_v57, 1  ;;  %v957_v53 = vrot.slane %v840_v16, 1  ;;  %v1991_v8 = vpop.permute.xlu2 %1990 }
  0xf1   : > { %v1380_v48 = vadd.f32 %v1276_v58, %v2382_v34  ;;  %1590 = vst.msk [vmem:[%s2372_s30 + $0x44] sm:$0xf] %vm1572_vm2, %v1557_v27  ;;  %v955_v50 = vrot.slane %v839_v60, 1  ;;  %v1523_v3 = vsel %vm1459_vm11, %v1427_v40, %v1491_v4  ;;  %v2869_v32 = vrot.slane %v2406_v11, 2 }
  0xf2   : > { %v961_v10 = vsel %vm906_vm0, %v958_v9, %v2868_v59  ;;  %v1555_v0 = vpack.c.bf16 %v1523_v3, %v1523_v3  ;;  %vm1450_vm12 = vcmp.ge.f32.partialorder %v1418_v46, 0.0  ;;  %v1482_v57 = vmul.f32 0.2, %v1418_v46 }
  0xf3   : > { %v1416_v56 = vadd.f32 %v2333_v62, %v1380_v48  ;;  %v1318_v34 = vsel %vm1263_vm1, %v1315_v35, %v2869_v32  ;;  %v1040_v39 = vadd.f32 %v961_v10, %v2267_v19  ;;  %v959_v6 = vsel %vm906_vm0, %v957_v53, %v958_v9  ;;  %v1941_v9 = vpop.permute.xlu1 %1940  ;;  %v2612_v10 = vpop.permute.xlu0 %1935 }
  0xf4   : > { %v2603_v40 = vadd.f32 %v959_v6, %v2270_v5  ;;  %1588 = vst.msk [vmem:[%s2372_s30 + $0x3c] sm:$0xf] %vm1572_vm2, %v1555_v0  ;;  %v1514_v11 = vsel %vm1450_vm12, %v1418_v46, %v1482_v57  ;;  %v1196_v25 = vmul.f32 %v1923_v37, %v2179_v22  ;;  %v1922_v19 = vunpack.i.l.bf16 %v2553_v24 }
  0xf5   : > { %vm1448_vm13 = vcmp.ge.f32.partialorder %v1416_v56, 0.0  ;;  %v1480_v16 = vmul.f32 0.2, %v1416_v56  ;;  %v1397_v1 = vadd.f32 %v1318_v34, %v1040_v39  ;;  %v1993_v60 = vunpack.i.h.bf16 %v1991_v8 }
  0xf6   : > { %v1546_v52 = vpack.c.bf16 %v1514_v11, %v1514_v11  ;;  %v1992_v28 = vunpack.i.l.bf16 %v1991_v8  ;;  %v1312_v5 = vrot.slane %v1196_v25, 2  ;;  %v838_v48 = vmul.f32 %v1922_v19, %v2177_v20 }
  0xf7   : > { %v1512_v27 = vsel %vm1448_vm13, %v1416_v56, %v1480_v16  ;;  %v1433_v58 = vadd.f32 %v2333_v62, %v1397_v1  ;;  %v1195_v59 = vmul.f32 %v1922_v19, %v2179_v22  ;;  %v1194_v37 = vmul.f32 %v1993_v60, %v2179_v22 }
  0xf8   : > { %v1544_v4 = vpack.c.bf16 %v1512_v27, %v1512_v27  ;;  %1579 = vst.msk [vmem:[%s2372_s30 + $0x18] sm:$0xf] %vm1572_vm2, %v1546_v52  ;;  %v1191_v46 = vmul.f32 %v1992_v28, %v2179_v22  ;;  %v953_v53 = vrot.slane %v838_v48, 1  ;;  %v1943_v56 = vunpack.i.h.bf16 %v1941_v9 }
  0xf9   : > { %vm1465_vm14 = vcmp.ge.f32.partialorder %v1433_v58, 0.0  ;;  %v1497_v24 = vmul.f32 0.2, %v1433_v58  ;;  %v1310_v3 = vrot.slane %v1195_v59, 2  ;;  %v1942_v32 = vunpack.i.l.bf16 %v1941_v9 }
  0xfa   : > { %1577 = vst.msk [vmem:[%s2372_s30 + $0x10] sm:$0xf] %vm1572_vm2, %v1544_v4  ;;  %v1309_v39 = vrot.slane %v1194_v37, 2  ;;  %v1304_v8 = vrot.slane %v1191_v46, 2  ;;  %v1938_v0 = vunpack.i.h.bf16 %v2612_v10  ;;  %v2870_v6 = vrot.slane %v2344_v18, 1 }
  0xfb   : > { %v1529_v34 = vsel %vm1465_vm14, %v1433_v58, %v1497_v24  ;;  %v956_v1 = vsel %vm906_vm0, %v953_v53, %v955_v50  ;;  %v1313_v11 = vsel %vm1263_vm1, %v1310_v3, %v1312_v5  ;;  %v2871_v60 = vrot.slane %v2526_v54, 2 }
  0xfc   : > { %v1561_v57 = vpack.c.bf16 %v1529_v34, %v1529_v34  ;;  %v954_v16 = vsel %vm906_vm0, %v2870_v6, %v953_v53  ;;  %v1038_v19 = vadd.f32 %v956_v1, %v2273_v15  ;;  %v1311_v52 = vsel %vm1263_vm1, %v1309_v39, %v1310_v3  ;;  %v1956_v1 = vpop.permute.xlu1 %1955 }
  0xfd   : > { %v1037_v25 = vadd.f32 %v954_v16, %v2279_v30  ;;  %v1306_v27 = vsel %vm1263_vm1, %v1304_v8, %v2871_v60  ;;  %v847_v58 = vmul.f32 %v1943_v56, %v2177_v20  ;;  %v2637_v50 = vmul.f32 %v1943_v56, %v2179_v22  ;;  %v2006_v16 = vpop.permute.xlu2 %2005  ;;  %v1951_v60 = vpop.permute.xlu0 %1950 }
  0xfe   : > { %1594 = vst.msk [vmem:[%s2372_s30 + $0x54] sm:$0xf] %vm1572_vm2, %v1561_v57  ;;  %v1392_v18 = vadd.f32 %v1306_v27, %v2550_v42  ;;  %v846_v28 = vmul.f32 %v1942_v32, %v2177_v20  ;;  %v1395_v30 = vadd.f32 %v1313_v11, %v1038_v19  ;;  %v845_v15 = vmul.f32 %v1938_v0, %v2177_v20 }
  0xff   : > { %v1394_v9 = vadd.f32 %v1311_v52, %v1037_v25  ;;  %v1202_v54 = vmul.f32 %v1938_v0, %v2179_v22  ;;  %v968_v5 = vrot.slane %v847_v58, 1  ;;  %v1325_v48 = vrot.slane %v2637_v50, 2 }
 0x100   : > { %v1428_v4 = vadd.f32 %v2333_v62, %v1392_v18  ;;  %v967_v59 = vrot.slane %v846_v28, 1  ;;  %v1431_v42 = vadd.f32 %v2333_v62, %v1395_v30  ;;  %v965_v37 = vrot.slane %v845_v15, 1 }
 0x101   : > { %v1430_v24 = vadd.f32 %v2333_v62, %v1394_v9  ;;  %v1322_v46 = vrot.slane %v1202_v54, 2  ;;  %v2872_v3 = vrot.slane %v2462_v47, 1  ;;  %v2873_v32 = vrot.slane %v2465_v33, 2 }
 0x102   : > { %vm1460_vm15 = vcmp.ge.f32.partialorder %v1428_v4, 0.0  ;;  %v1492_v53 = vmul.f32 0.2, %v1428_v4  ;;  %vm1463_vm3 = vcmp.ge.f32.partialorder %v1431_v42, 0.0  ;;  %v1495_v39 = vmul.f32 0.2, %v1431_v42 }
 0x103   : > { %v971_v56 = vsel %vm906_vm0, %v968_v5, %v2872_v3  ;;  %v1328_v34 = vsel %vm1263_vm1, %v1325_v48, %v2873_v32  ;;  %vm1462_vm4 = vcmp.ge.f32.partialorder %v1430_v24, 0.0  ;;  %v1494_v8 = vmul.f32 0.2, %v1430_v24 }
 0x104   : > { %v1524_v0 = vsel %vm1460_vm15, %v1428_v4, %v1492_v53  ;;  %v969_v57 = vsel %vm906_vm0, %v967_v59, %v968_v5  ;;  %v1044_v6 = vadd.f32 %v971_v56, %v2304_v2  ;;  %v1937_v47 = vunpack.i.l.bf16 %v2612_v10 }
 0x105   : > { %v1527_v33 = vsel %vm1463_vm3, %v1431_v42, %v1495_v39  ;;  %v1526_v11 = vsel %vm1462_vm4, %v1430_v24, %v1494_v8  ;;  %v1556_v25 = vpack.c.bf16 %v1524_v0, %v1524_v0  ;;  %v2658_v19 = vadd.f32 %v969_v57, %v2316_v41 }
 0x106   : > { %v1559_v27 = vpack.c.bf16 %v1527_v33, %v1527_v33  ;;  %v1558_v52 = vpack.c.bf16 %v1526_v11, %v1526_v11  ;;  %v1401_v18 = vadd.f32 %v1328_v34, %v1044_v6  ;;  %v844_v58 = vmul.f32 %v1937_v47, %v2177_v20 }
 0x107   : > { %1589 = vst.msk [vmem:[%s2372_s30 + $0x40] sm:$0xf] %vm1572_vm2, %v1556_v25  ;;  %v2664_v2 = vmul.f32 %v1937_v47, %v2179_v22  ;;  %v2008_v10 = vunpack.i.h.bf16 %v2006_v16  ;;  %v2007_v28 = vunpack.i.l.bf16 %v2006_v16  ;;  %v1958_v30 = vunpack.i.h.bf16 %v1956_v1 }
 0x108   : > { %1592 = vst.msk [vmem:[%s2372_s30 + $0x4c] sm:$0xf] %vm1572_vm2, %v1559_v27  ;;  %v1437_v41 = vadd.f32 %v2333_v62, %v1401_v18  ;;  %v963_v9 = vrot.slane %v844_v58, 1  ;;  %v1957_v15 = vunpack.i.l.bf16 %v1956_v1  ;;  %v1953_v54 = vunpack.i.h.bf16 %v1951_v60  ;;  %v1971_v58 = vpop.permute.xlu1 %1970 }
 0x109   : > { %1591 = vst.msk [vmem:[%s2372_s30 + $0x48] sm:$0xf] %vm1572_vm2, %v1558_v52  ;;  %v1320_v4 = vrot.slane %v2664_v2, 2  ;;  %v2673_v5 = vmul.f32 %v2008_v10, %v2179_v22  ;;  %v1209_v59 = vmul.f32 %v2007_v28, %v2179_v22  ;;  %v853_v42 = vmul.f32 %v1958_v30, %v2177_v20 }
 0x10a   : > { %vm1469_vm5 = vcmp.ge.f32.partialorder %v1437_v41, 0.0  ;;  %v1501_v24 = vmul.f32 0.2, %v1437_v41  ;;  %v2874_v53 = vrot.slane %v2400_v12, 1  ;;  %v966_v56 = vsel %vm906_vm0, %v963_v9, %v965_v37 }
 0x10b   : > { %v1042_v34 = vadd.f32 %v966_v56, %v2194_v13  ;;  %v1323_v39 = vsel %vm1263_vm1, %v1320_v4, %v1322_v46  ;;  %v1339_v8 = vrot.slane %v2673_v5, 2  ;;  %v1334_v57 = vrot.slane %v1209_v59, 2 }
 0x10c   : > { %v964_v3 = vsel %vm906_vm0, %v2874_v53, %v963_v9  ;;  %v1533_v0 = vsel %vm1469_vm5, %v1437_v41, %v1501_v24  ;;  %v978_v6 = vrot.slane %v853_v42, 1  ;;  %v1210_v12 = vmul.f32 %v1958_v30, %v2179_v22  ;;  %v1966_v9 = vpop.permute.xlu0 %1965 }
 0x10d   : > { %v2682_v32 = vadd.f32 %v964_v3, %v2197_v31  ;;  %v1565_v47 = vpack.c.bf16 %v1533_v0, %v1533_v0  ;;  %v1399_v16 = vadd.f32 %v1323_v39, %v1042_v34  ;;  %v852_v37 = vmul.f32 %v1957_v15, %v2177_v20 }
 0x10e   : > { %v851_v31 = vmul.f32 %v1953_v54, %v2177_v20  ;;  %v2875_v1 = vrot.slane %v2503_v29, 1  ;;  %v1335_v33 = vrot.slane %v1210_v12, 2  ;;  %v1208_v46 = vmul.f32 %v1953_v54, %v2179_v22  ;;  %v2878_v12 = vld [vmem:[#allocation3_spill] sm:$0xff] }
 0x10f   : > { %v1952_v11 = vunpack.i.l.bf16 %v1951_v60  ;;  %1598 = vst.msk [vmem:[%s2372_s30 + $0x64] sm:$0xf] %vm1572_vm2, %v1565_v47  ;;  %v1435_v25 = vadd.f32 %v2333_v62, %v1399_v16  ;;  %v977_v52 = vrot.slane %v852_v37, 1  ;;  %v2876_v28 = vrot.slane %v2509_v14, 2  ;;  %v2879_v16 = vld [vmem:[#allocation2_spill] sm:$0xff] }
 0x110   : > { %v981_v13 = vsel %vm906_vm0, %v978_v6, %v2875_v1  ;;  %v975_v18 = vrot.slane %v851_v31, 1  ;;  %v1336_v10 = vsel %vm1263_vm1, %v1334_v57, %v1335_v33  ;;  %v1332_v30 = vrot.slane %v1208_v46, 2 }
 0x111   : > { %v1048_v27 = vadd.f32 %v981_v13, %v2212_v43  ;;  %v1338_v29 = vsel %vm1263_vm1, %v1335_v33, %v2876_v28  ;;  %v850_v41 = vmul.f32 %v1952_v11, %v2177_v20  ;;  %vm1467_vm6 = vcmp.ge.f32.partialorder %v1435_v25, 0.0 }
 0x112   : > { %v1499_v60 = vmul.f32 0.2, %v1435_v25  ;;  %v979_v54 = vsel %vm906_vm0, %v977_v52, %v978_v6  ;;  %v2708_v42 = vmul.f32 %v1952_v11, %v2179_v22  ;;  %v1973_v24 = vunpack.i.h.bf16 %v1971_v58 }
 0x113   : > { %v1405_v15 = vadd.f32 %v1338_v29, %v1048_v27  ;;  %v1047_v43 = vadd.f32 %v979_v54, %v2215_v44  ;;  %v973_v59 = vrot.slane %v850_v41, 1  ;;  %v1972_v3 = vunpack.i.l.bf16 %v1971_v58  ;;  %v1986_v54 = vpop.permute.xlu1 %1985 }
 0x114   : > { %v1531_v14 = vsel %vm1467_vm6, %v1435_v25, %v1499_v60  ;;  %v1968_v56 = vunpack.i.h.bf16 %v1966_v9  ;;  %v2877_v0 = vrot.slane %v2445_v55, 1  ;;  %v1330_v1 = vrot.slane %v2708_v42, 2 }
 0x115   : > { %v1441_v53 = vadd.f32 %v2333_v62, %v1405_v15  ;;  %v1563_v34 = vpack.c.bf16 %v1531_v14, %v1531_v14  ;;  %v1404_v39 = vadd.f32 %v1336_v10, %v1047_v43  ;;  %v976_v6 = vsel %vm906_vm0, %v973_v59, %v975_v18 }
 0x116   : > { %v974_v57 = vsel %vm906_vm0, %v2877_v0, %v973_v59  ;;  %v1046_v37 = vadd.f32 %v976_v6, %v2879_v16  ;;  %v1170_v55 = vmul.f32 %v1973_v24, %v2179_v22  ;;  %v1167_v13 = vmul.f32 %v1972_v3, %v2179_v22  ;;  %v2880_v24 = vld [vmem:[#allocation4_spill] sm:$0xff] }
 0x117   : > { %vm1473_vm7 = vcmp.ge.f32.partialorder %v1441_v53, 0.0  ;;  %v1505_v44 = vmul.f32 0.2, %v1441_v53  ;;  %v2716_v47 = vadd.f32 %v974_v57, %v2878_v12  ;;  %1596 = vst.msk [vmem:[%s2372_s30 + $0x5c] sm:$0xf] %vm1572_vm2, %v1563_v34  ;;  %v1440_v31 = vadd.f32 %v2333_v62, %v1404_v39 }
 0x118   : > { %v857_v46 = vmul.f32 %v1968_v56, %v2177_v20  ;;  %v1214_v11 = vmul.f32 %v1968_v56, %v2179_v22  ;;  %v1967_v25 = vunpack.i.l.bf16 %v1966_v9  ;;  %v1333_v18 = vsel %vm1263_vm1, %v1330_v1, %v1332_v30  ;;  %v2883_v56 = vld [vmem:[#allocation7_spill] sm:$0xff] }
 0x119   : > { %v1537_v33 = vsel %vm1473_vm7, %v1441_v53, %v1505_v44  ;;  %vm1472_vm8 = vcmp.ge.f32.partialorder %v1440_v31, 0.0  ;;  %v1504_v52 = vmul.f32 0.2, %v1440_v31  ;;  %v1403_v58 = vadd.f32 %v1333_v18, %v1046_v37 }
 0x11a   : > { %v1569_v27 = vpack.c.bf16 %v1537_v33, %v1537_v33  ;;  %v1269_v10 = vrot.slane %v1170_v55, 2  ;;  %v1264_v28 = vrot.slane %v1167_v13, 2  ;;  %v985_v29 = vrot.slane %v857_v46, 1  ;;  %v2885_v55 = vld [vmem:[#allocation6_spill] sm:$0xff]  ;;  %v2886_v33 = vld [vmem:[#allocation5_spill] sm:$0xff] }
 0x11b   : > { %v1536_v41 = vsel %vm1472_vm8, %v1440_v31, %v1504_v52  ;;  %v1342_v60 = vrot.slane %v1214_v11, 2  ;;  %v856_v15 = vmul.f32 %v1967_v25, %v2177_v20  ;;  %v1213_v9 = vmul.f32 %v1967_v25, %v2179_v22  ;;  %v1981_v25 = vpop.permute.xlu0 %1980 }
 0x11c   : > { %1602 = vst.msk [vmem:[%s2372_s30 + $0x74] sm:$0xf] %vm1572_vm2, %v1569_v27  ;;  %v1568_v43 = vpack.c.bf16 %v1536_v41, %v1536_v41  ;;  %v1439_v59 = vadd.f32 %v2333_v62, %v1403_v58  ;;  %v2881_v14 = vrot.slane %v2880_v24, 2  ;;  %v2882_v53 = vrot.slane %v2385_v21, 2 }
 0x11d   : > { %v983_v0 = vrot.slane %v856_v15, 1  ;;  %v1340_v20 = vrot.slane %v1213_v9, 2  ;;  %v1988_v6 = vunpack.i.h.bf16 %v1986_v54  ;;  %v1987_v44 = vunpack.i.l.bf16 %v1986_v54 }
 0x11e   : > { %v1266_v30 = vsel %vm1263_vm1, %v1264_v28, %v2881_v14  ;;  %v1271_v3 = vsel %vm1263_vm1, %v1269_v10, %v2882_v53  ;;  %1601 = vst.msk [vmem:[%s2372_s30 + $0x70] sm:$0xf] %vm1572_vm2, %v1568_v43  ;;  %vm1471_vm9 = vcmp.ge.f32.partialorder %v1439_v59, 0.0  ;;  %v1503_v57 = vmul.f32 0.2, %v1439_v59 }
 0x11f   : > { %v1376_v34 = vadd.f32 %v1266_v30, %v2883_v56  ;;  %v1378_v39 = vadd.f32 %v1271_v3, %v2395_v26  ;;  %v2884_v21 = vrot.slane %v2498_v45, 1  ;;  %v986_v31 = vsel %vm906_vm0, %v983_v0, %v985_v29  ;;  %v2001_v3 = vpop.permute.xlu1 %2000 }
 0x120   : > { %v1535_v26 = vsel %vm1471_vm9, %v1439_v59, %v1503_v57  ;;  %v1050_v46 = vadd.f32 %v986_v31, %v2886_v33  ;;  %v1341_v11 = vsel %vm1263_vm1, %v1339_v8, %v1340_v20  ;;  %v1343_v18 = vsel %vm1263_vm1, %v1340_v20, %v1342_v60 }
 0x121   : > { %v1412_v12 = vadd.f32 %v2333_v62, %v1376_v34  ;;  %v1414_v16 = vadd.f32 %v2333_v62, %v1378_v39  ;;  %v984_v37 = vsel %vm906_vm0, %v2884_v21, %v983_v0  ;;  %v1567_v27 = vpack.c.bf16 %v1535_v26, %v1535_v26 }
 0x122   : > { %v1049_v13 = vadd.f32 %v984_v37, %v2885_v55  ;;  %v1188_v10 = vmul.f32 %v1988_v6, %v2179_v22  ;;  %v1407_v29 = vadd.f32 %v1343_v18, %v1050_v46  ;;  %v1185_v5 = vmul.f32 %v1987_v44, %v2179_v22 }
 0x123   : > { %vm1444_vm10 = vcmp.ge.f32.partialorder %v1412_v12, 0.0  ;;  %vm1446_vm11 = vcmp.ge.f32.partialorder %v1414_v16, 0.0  ;;  %v1476_v52 = vmul.f32 0.2, %v1412_v12  ;;  %v1478_v45 = vmul.f32 0.2, %v1414_v16 }
 0x124   : > { %v1406_v58 = vadd.f32 %v1341_v11, %v1049_v13  ;;  %1600 = vst.msk [vmem:[%s2372_s30 + $0x6c] sm:$0xf] %vm1572_vm2, %v1567_v27  ;;  %v1983_v8 = vunpack.i.h.bf16 %v1981_v25  ;;  %v1299_v54 = vrot.slane %v1188_v10, 2  ;;  %v1443_v60 = vadd.f32 %v2333_v62, %v1407_v29  ;;  %v1996_v13 = vpop.permute.xlu0 %1995  ;;  %v2890_v27 = vld [vmem:[#allocation8_spill] sm:$0xff] }
 0x125   : > { %v1508_v28 = vsel %vm1444_vm10, %v1412_v12, %v1476_v52  ;;  %v1510_v41 = vsel %vm1446_vm11, %v1414_v16, %v1478_v45  ;;  %v1294_v59 = vrot.slane %v1185_v5, 2  ;;  %v1982_v53 = vunpack.i.l.bf16 %v1981_v25 }
 0x126   : > { %v1540_v15 = vpack.c.bf16 %v1508_v28, %v1508_v28  ;;  %v1442_v9 = vadd.f32 %v2333_v62, %v1406_v58  ;;  %v1542_v43 = vpack.c.bf16 %v1510_v41, %v1510_v41  ;;  %v1182_v24 = vmul.f32 %v1983_v8, %v2179_v22 }
 0x127   : > { %v1301_v30 = vsel %vm1263_vm1, %v1299_v54, %v1300_v61  ;;  %vm1475_vm12 = vcmp.ge.f32.partialorder %v1443_v60, 0.0  ;;  %v1507_v56 = vmul.f32 0.2, %v1443_v60  ;;  %v2887_v34 = vrot.slane %v2469_v36, 2 }
 0x128   : > { %1573 = vst.msk [vmem:[%s2372_s30] sm:$0xf] %vm1572_vm2, %v1540_v15  ;;  %vm1474_vm0 = vcmp.ge.f32.partialorder %v1442_v9, 0.0  ;;  %v1506_v14 = vmul.f32 0.2, %v1442_v9  ;;  %v1390_v0 = vadd.f32 %v1301_v30, %v2564_v23  ;;  %v1289_v6 = vrot.slane %v1182_v24, 2 }
 0x129   : > { %1575 = vst.msk [vmem:[%s2372_s30 + $0x8] sm:$0xf] %vm1572_vm2, %v1542_v43  ;;  %v1296_v39 = vsel %vm1263_vm1, %v1294_v59, %v2887_v34  ;;  %v1179_v38 = vmul.f32 %v1982_v53, %v2179_v22  ;;  %v1539_v61 = vsel %vm1475_vm12, %v1443_v60, %v1507_v56  ;;  %v2003_v16 = vunpack.i.h.bf16 %v2001_v3 }
 0x12a   : > { %v1538_v20 = vsel %vm1474_vm0, %v1442_v9, %v1506_v14  ;;  %v1388_v57 = vadd.f32 %v1296_v39, %v2488_v49  ;;  %v1426_v12 = vadd.f32 %v2333_v62, %v1390_v0  ;;  %v1571_v21 = vpack.c.bf16 %v1539_v61, %v1539_v61 }
 0x12b   : > { %v1570_v44 = vpack.c.bf16 %v1538_v20, %v1538_v20  ;;  %v1284_v36 = vrot.slane %v1179_v38, 2  ;;  %v2888_v31 = vrot.slane %v2495_v7, 2  ;;  %v1206_v55 = vmul.f32 %v2003_v16, %v2179_v22 }
 0x12c   : > { %v1424_v37 = vadd.f32 %v2333_v62, %v1388_v57  ;;  %vm1458_vm13 = vcmp.ge.f32.partialorder %v1426_v12, 0.0  ;;  %v1490_v49 = vmul.f32 0.2, %v1426_v12  ;;  %1604 = vst.msk [vmem:[%s2372_s30 + $0x7c] sm:$0xf] %vm1572_vm2, %v1571_v21  ;;  %v2889_v46 = vrot.slane %v2413_v51, 2 }
 0x12d   : > { %v1291_v23 = vsel %vm1263_vm1, %v1289_v6, %v2888_v31  ;;  %1603 = vst.msk [vmem:[%s2372_s30 + $0x78] sm:$0xf] %vm1572_vm2, %v1570_v44  ;;  %v2002_v11 = vunpack.i.l.bf16 %v2001_v3  ;;  %v1998_v28 = vunpack.i.h.bf16 %v1996_v13  ;;  %v2010_v51 = vld [vmem:[%s2836_s2] ss:$0 sm:$0xff]  ;;  %v1997_v9 = vunpack.i.l.bf16 %v1996_v13 }
 0x12e   : > { %v1386_v26 = vadd.f32 %v1291_v23, %v2520_v17  ;;  %vm1456_vm14 = vcmp.ge.f32.partialorder %v1424_v37, 0.0  ;;  %v1488_v33 = vmul.f32 0.2, %v1424_v37  ;;  %v1286_v7 = vsel %vm1263_vm1, %v1284_v36, %v2889_v46 }
 0x12f   : > { %v1522_v25 = vsel %vm1458_vm13, %v1426_v12, %v1490_v49  ;;  %v1384_v52 = vadd.f32 %v1286_v7, %v2890_v27  ;;  %v1329_v17 = vrot.slane %v1206_v55, 2  ;;  %v1203_v10 = vmul.f32 %v2002_v11, %v2179_v22 }
 0x130   : > { %v1422_v45 = vadd.f32 %v2333_v62, %v1386_v26  ;;  %v1520_v18 = vsel %vm1456_vm14, %v1424_v37, %v1488_v33  ;;  %v1554_v58 = vpack.c.bf16 %v1522_v25, %v1522_v25  ;;  %v1200_v15 = vmul.f32 %v1998_v28, %v2179_v22 }
 0x131   : > { %v1552_v29 = vpack.c.bf16 %v1520_v18, %v1520_v18  ;;  %v1420_v5 = vadd.f32 %v2010_v51, %v1384_v52  ;;  %v1324_v41 = vrot.slane %v1203_v10, 2  ;;  %v1331_v62 = vsel %vm1263_vm1, %v1329_v17, %v1330_v1 }
 0x132   : > { %vm1454_vm15 = vcmp.ge.f32.partialorder %v1422_v45, 0.0  ;;  %v1486_v8 = vmul.f32 0.2, %v1422_v45  ;;  %1587 = vst.msk [vmem:[%s2372_s30 + $0x38] sm:$0xf] %vm1572_vm2, %v1554_v58  ;;  %v1402_v60 = vadd.f32 %v1331_v62, %v2716_v47  ;;  %v1319_v42 = vrot.slane %v1200_v15, 2 }
 0x133   : > { %1585 = vst.msk [vmem:[%s2372_s30 + $0x30] sm:$0xf] %vm1572_vm2, %v1552_v29  ;;  %vm1452_vm3 = vcmp.ge.f32.partialorder %v1420_v5, 0.0  ;;  %v1484_v54 = vmul.f32 0.2, %v1420_v5  ;;  %v1326_v24 = vsel %vm1263_vm1, %v1324_v41, %v1325_v48  ;;  %v1197_v1 = vmul.f32 %v1997_v9, %v2179_v22 }
 0x134   : > { %v1518_v43 = vsel %vm1454_vm15, %v1422_v45, %v1486_v8  ;;  %v1400_v30 = vadd.f32 %v1326_v24, %v2658_v19  ;;  %v1438_v53 = vadd.f32 %v2010_v51, %v1402_v60  ;;  %v1321_v47 = vsel %vm1263_vm1, %v1319_v42, %v1320_v4 }
 0x135   : > { %v1550_v59 = vpack.c.bf16 %v1518_v43, %v1518_v43  ;;  %v1516_v14 = vsel %vm1452_vm3, %v1420_v5, %v1484_v54  ;;  %v1314_v56 = vrot.slane %v1197_v1, 2  ;;  %v1398_v48 = vadd.f32 %v1321_v47, %v2682_v32 }
 0x136   : > { %v1548_v3 = vpack.c.bf16 %v1516_v14, %v1516_v14  ;;  %v1436_v34 = vadd.f32 %v2010_v51, %v1400_v30  ;;  %vm1470_vm4 = vcmp.ge.f32.partialorder %v1438_v53, 0.0  ;;  %v1502_v50 = vmul.f32 0.2, %v1438_v53 }
 0x137   : > { %1583 = vst.msk [vmem:[%s2372_s30 + $0x28] sm:$0xf] %vm1572_vm2, %v1550_v59  ;;  %v1316_v22 = vsel %vm1263_vm1, %v1314_v56, %v1315_v35  ;;  %v1434_v0 = vadd.f32 %v2010_v51, %v1398_v48 }
 0x138   : > { %1581 = vst.msk [vmem:[%s2372_s30 + $0x20] sm:$0xf] %vm1572_vm2, %v1548_v3  ;;  %vm1468_vm5 = vcmp.ge.f32.partialorder %v1436_v34, 0.0  ;;  %v1500_v19 = vmul.f32 0.2, %v1436_v34  ;;  %v1534_v39 = vsel %vm1470_vm4, %v1438_v53, %v1502_v50  ;;  %v1396_v2 = vadd.f32 %v1316_v22, %v2603_v40 }
 0x139   : > { %v1566_v4 = vpack.c.bf16 %v1534_v39, %v1534_v39  ;;  %vm1466_vm6 = vcmp.ge.f32.partialorder %v1434_v0, 0.0  ;;  %v1498_v32 = vmul.f32 0.2, %v1434_v0 }
 0x13a   : > { %v1532_v20 = vsel %vm1468_vm5, %v1436_v34, %v1500_v19  ;;  %v1432_v57 = vadd.f32 %v2010_v51, %v1396_v2 }
 0x13b   : > { %v1564_v6 = vpack.c.bf16 %v1532_v20, %v1532_v20  ;;  %1599 = vst.msk [vmem:[%s2372_s30 + $0x68] sm:$0xf] %vm1572_vm2, %v1566_v4  ;;  %v1530_v35 = vsel %vm1466_vm6, %v1434_v0, %v1498_v32 }
 0x13c   : > { %vm1464_vm7 = vcmp.ge.f32.partialorder %v1432_v57, 0.0  ;;  %v1496_v63 = vmul.f32 0.2, %v1432_v57  ;;  %v1562_v61 = vpack.c.bf16 %v1530_v35, %v1530_v35 }
 0x13d   : > { %1597 = vst.msk [vmem:[%s2372_s30 + $0x60] sm:$0xf] %vm1572_vm2, %v1564_v6 }
 0x13e   : > { %v1528_v38 = vsel %vm1464_vm7, %v1432_v57, %v1496_v63  ;;  %1595 = vst.msk [vmem:[%s2372_s30 + $0x58] sm:$0xf] %vm1572_vm2, %v1562_v61 }
 0x13f   : > { %v1560_v44 = vpack.c.bf16 %v1528_v38, %v1528_v38 }
 0x141   : > { %1593 = vst.msk [vmem:[%s2372_s30 + $0x50] sm:$0xf] %vm1572_vm2, %v1560_v44 }
 0x142 PF: > { %s13_s12 = sadd.s32 1, %s2017_s12  }
 0x143   : > { %p10_p4 = scmp.ge.s32.totalorder %s13_s12, 4  }
 0x145   :  { %12 = sbr.rel (!%p10_p4) target bundleno = 1 (0x1), region = 64 }

// kernel: ultrasound_encoder_forward.8
= control target key start
LH: loop header
LB: loop body
LE: loop exit
PB: predicated region body
PF: predicated region fallthrough
CT: control target
= control target key end

     0   :  { %s1231_s12 = smov 0   ;;  %s1520_s0 = inlined_call_operand.vmem [shape: bf16[32,2,9,32], index: 0, kind: input, shape index: {}]   ;;  %s1521_s1 = inlined_call_operand.vmem [shape: bf16[3,32,64], index: 1, kind: input, shape index: {}]   ;;  %s1522_s2 = inlined_call_operand.vmem [shape: f32[1,64], index: 2, kind: input, shape index: {}]   ;;  %s1523_s3 = inlined_call_operand.vmem [shape: bf16[32,8,64], index: 3, kind: output, shape index: {}]  }
   0x1 LB: > { %s1017_s13 = sadd.s32 4294967295, %s1209_s12   ;;  %p1021_p0 = scmp.ge.s32.totalorder %s1209_s12, 1  ;;  %s1209_s12 = sphi %s1231_s12, %s13_s12  }
   0x2   : > { %p139_p1 = scmp.lt.s32.totalorder %s1209_s12, 3 }
   0x4   : > { %p140_p2 = pnand %p1021_p0, %p139_p1 }
   0x5   : > { %s1022_s16 = sshll.u32 (!%p140_p2), %s1017_s13, 4 }
   0x6   : > { %143 = sbr.rel (%p140_p2) target bundleno = 261 (0x105), region = 32  ;;  %p165_p3 = scmp.lt.s32.totalorder (!%p140_p2), %s1022_s16, 31 }
   0xb   : > { %v1185_v0 = vld [vmem:[%s1521_s1 + $0x18] sm:$0xff]  ;;  %v1175_v1 = vld [vmem:[%s1521_s1 + $0x8] sm:$0xff]  ;;  %v1184_v3 = vld [vmem:[%s1521_s1 + $0x10] sm:$0xff]  ;;  %s1527_s16 = smov (!%p165_p3, %s1022_s16), 31  ;;  %vm272_vm0 = vcmask 261120   ;;  %vm944_vm5 = vcmask 519168  }
   0xc   : > { %v1187_v2 = vld [vmem:[%s1521_s1 + $0x28] sm:$0xff]  ;;  %1188 = vmatpush.bf16.msra.mxu3 %v1185_v0  ;;  %303 = vmatpush.bf16.msra.mxu0 %v1185_v0  ;;  %v1174_v4 = vld [vmem:[%s1521_s1] sm:$0xff]  ;;  %s1165_s27 = sshll.u32 %s1527_s16, 4  ;;  %vm503_vm1 = vsmask.f32 3328  ;;  %s1026_s6 = sshll.u32 %s1527_s16, 2 }
   0xd   : > { %428 = vmatpush.bf16.msra.mxu1 %v1175_v1  ;;  %801 = vmatpush.bf16.msra.mxu2 %v1187_v2  ;;  %v1186_v5 = vld [vmem:[%s1521_s1 + $0x20] sm:$0xff]  ;;  %s1263_s30 = scalar_lea.vmem %s1520_s0, %s1165_s27  ;;  %vm504_vm2 = vsmask.f32 7440  ;;  %s1459_s9 = scalar_lea.vmem %s1523_s3, %s1026_s6 }
   0xe   : > { %v1073_v6 = vld [vmem:[%s1263_s30 + $0xc8] sm:$0xf]  ;;  %v1182_v7 = vld [vmem:[%s1263_s30 + $0xd4] sm:$0xf0]  ;;  %v1097_v11 = vld [vmem:[%s1263_s30] sm:$0xf] }
   0xf   : > { %v1049_v8 = vld [vmem:[%s1263_s30 + $0x8] sm:$0xf]  ;;  %v1074_v9 = vor.u32 %v1182_v7, %v1073_v6  ;;  %v1176_v10 = vld [vmem:[%s1263_s30 + $0x14] sm:$0xf0]  ;;  %v1166_v12 = vld [vmem:[%s1263_s30 + $0xc] sm:$0xf0] }
  0x10   : > { %1189 = vmatpush.bf16.msra.mxu3 %v1184_v3  ;;  %304 = vmatpush.bf16.msra.mxu0 %v1184_v3  ;;  %v1050_v13 = vor.u32 %v1176_v10, %v1049_v8  ;;  %v1098_v14 = vor.u32 %v1166_v12, %v1097_v11  ;;  %v471_v15 = vld [vmem:[%s1263_s30] sm:$0xf]  ;;  %v472_v16 = vld [vmem:[%s1263_s30 + $0x4] sm:$0x1]  ;;  %v473_v17 = vld [vmem:[%s1263_s30 + $0x10] sm:$0xf] }
  0x11   : > { %429 = vmatpush.bf16.msra.mxu1 %v1174_v4  ;;  %802 = vmatpush.bf16.msra.mxu2 %v1186_v5  ;;  %v474_v18 = vld [vmem:[%s1263_s30 + $0x14] sm:$0x1]  ;;  %v507_v19 = vshrl.u32 %v471_v15, 16  ;;  %v510_v20 = vshll.u32 %v471_v15, 16  ;;  %v516_v21 = vshll.u32 %v472_v16, 16  ;;  %v521_v22 = vshrl.u32 %v473_v17, 16  ;;  %vm1279_vm3 = vmor %vm503_vm1, %vm504_vm2 }
  0x12   : > { %v524_v23 = vshll.u32 %v473_v17, 16  ;;  %v530_v24 = vshll.u32 %v474_v18, 16  ;;  %v475_v31 = vld [vmem:[%s1263_s30 + $0x20] sm:$0xf]  ;;  %v477_v35 = vld [vmem:[%s1263_s30 + $0x30] sm:$0xf] }
  0x13   : > { %1093 = vmatmul.msk.bf16.vlgmr.msra.gmra.mxu3 %vm272_vm0, %v1074_v9  ;;  %1087 = vmatmul.msk.bf16.vlgmr.msra.gmra.mxu0 %vm272_vm0, %v1050_v13  ;;  %v509_v25 = vrot.slane %v507_v19, 4  ;;  %v512_v26 = vrot.slane %v510_v20, 5  ;;  %v523_v27 = vrot.slane %v521_v22, 4  ;;  %v518_v30 = vrot.slane %v516_v21, 5  ;;  %v476_v39 = vld [vmem:[%s1263_s30 + $0x24] sm:$0x1] }
  0x14   : > { %1190 = vmatpush.bf16.msrb.mxu3 %v1175_v1  ;;  %1135 = vmatmul.msk.bf16.vlgmr.msra.gmra.mxu1 %vm272_vm0, %v1098_v14  ;;  %v526_v28 = vrot.slane %v524_v23, 5  ;;  %v532_v34 = vrot.slane %v530_v24, 5  ;;  %v535_v36 = vshrl.u32 %v475_v31, 16  ;;  %v538_v37 = vshll.u32 %v475_v31, 16  ;;  %v478_v43 = vld [vmem:[%s1263_s30 + $0x34] sm:$0x1] }
  0x15   : > { %v513_v29 = vor.u32 %v512_v26, %v509_v25  ;;  %v549_v40 = vshrl.u32 %v477_v35, 16  ;;  %v552_v41 = vshll.u32 %v477_v35, 16  ;;  %v1077_v47 = vld [vmem:[%s1263_s30 + $0xe8] sm:$0xf]  ;;  %v1183_v52 = vld [vmem:[%s1263_s30 + $0xf4] sm:$0xf0] }
  0x16   : > { %v527_v33 = vor.u32 %v526_v28, %v523_v27  ;;  %v537_v44 = vrot.slane %v535_v36, 4  ;;  %v540_v45 = vrot.slane %v538_v37, 5  ;;  %v1053_v53 = vld [vmem:[%s1263_s30 + $0x28] sm:$0xf]  ;;  %v1177_v54 = vld [vmem:[%s1263_s30 + $0x34] sm:$0xf0]  ;;  %v1078_v0 = vor.u32 %v1183_v52, %v1077_v47 }
  0x17   : > { %v514_v38 = vrot.slane %v513_v29, 4  ;;  %v551_v48 = vrot.slane %v549_v40, 4  ;;  %v554_v49 = vrot.slane %v552_v41, 5  ;;  %v1101_v56 = vld [vmem:[%s1263_s30 + $0x20] sm:$0xf]  ;;  %v544_v59 = vshll.u32 %v476_v39, 16 }
  0x18   : > { %1191 = vmatpush.bf16.msrb.mxu3 %v1174_v4  ;;  %v528_v42 = vrot.slane %v527_v33, 4  ;;  %v1167_v57 = vld [vmem:[%s1263_s30 + $0x2c] sm:$0xf0]  ;;  %v541_v58 = vor.u32 %v540_v45, %v537_v44  ;;  %v558_v60 = vshll.u32 %v478_v43, 16  ;;  %v479_v62 = vld [vmem:[%s1263_s30 + $0x40] sm:$0xf] }
  0x19   : > { %v519_v46 = vsel %vm1279_vm3, %v514_v38, %v518_v30  ;;  %v555_v61 = vor.u32 %v554_v49, %v551_v48  ;;  %v481_v1 = vld [vmem:[%s1263_s30 + $0x50] sm:$0xf]  ;;  %v1102_v3 = vor.u32 %v1167_v57, %v1101_v56  ;;  %v563_v7 = vshrl.u32 %v479_v62, 16  ;;  %v480_v12 = vld [vmem:[%s1263_s30 + $0x44] sm:$0x1] }
  0x1a   : > { %v533_v50 = vsel %vm1279_vm3, %v528_v42, %v532_v34  ;;  %v735_v51 = vunpack.c.l.b16 %v519_v46  ;;  %v542_v4 = vrot.slane %v541_v58, 4  ;;  %v560_v6 = vrot.slane %v558_v60, 5  ;;  %v482_v19 = vld [vmem:[%s1263_s30 + $0x54] sm:$0x1]  ;;  %v483_v21 = vld [vmem:[%s1263_s30 + $0x60] sm:$0xf] }
  0x1b   : > { %v736_v55 = vunpack.c.l.b16 %v533_v50  ;;  %v556_v8 = vrot.slane %v555_v61, 4  ;;  %v566_v9 = vshll.u32 %v479_v62, 16  ;;  %v577_v10 = vshrl.u32 %v481_v1, 16  ;;  %v1121_v24 = vld [vmem:[%s1263_s30 + $0xc0] sm:$0xf] }
  0x1c   : > { %1192 = vmatpush.bf16.msra.mxu3 %v1187_v2  ;;  %v1054_v2 = vor.u32 %v1177_v54, %v1053_v53  ;;  %v580_v11 = vshll.u32 %v481_v1, 16  ;;  %v565_v14 = vrot.slane %v563_v7, 4  ;;  %v572_v20 = vshll.u32 %v480_v12, 16  ;;  %v1172_v25 = vld [vmem:[%s1263_s30 + $0xcc] sm:$0xf0] }
  0x1d   : > { %v751_v63 = vpack.c.b16 %v736_v55, %v735_v51  ;;  %v561_v15 = vsel %vm1279_vm3, %v556_v8, %v560_v6  ;;  %v568_v16 = vrot.slane %v566_v9, 5  ;;  %v579_v17 = vrot.slane %v577_v10, 4  ;;  %v1057_v29 = vld [vmem:[%s1263_s30 + $0x48] sm:$0xf]  ;;  %v1178_v30 = vld [vmem:[%s1263_s30 + $0x54] sm:$0xf0] }
  0x1e   : > { %v582_v18 = vrot.slane %v580_v11, 5  ;;  %v738_v23 = vunpack.c.l.b16 %v561_v15  ;;  %v586_v28 = vshll.u32 %v482_v19, 16  ;;  %v1105_v31 = vld [vmem:[%s1263_s30 + $0x40] sm:$0xf]  ;;  %v1168_v33 = vld [vmem:[%s1263_s30 + $0x4c] sm:$0xf0]  ;;  %v1122_v42 = vor.u32 %v1172_v25, %v1121_v24 }
  0x1f   : > { %1155 = vmatmul.msk.bf16.vlgmr.msra.gmra.mxu2 %vm272_vm0, %v751_v63  ;;  %v569_v26 = vor.u32 %v568_v16, %v565_v14  ;;  %v574_v34 = vrot.slane %v572_v20, 5  ;;  %v484_v35 = vld [vmem:[%s1263_s30 + $0x64] sm:$0x1]  ;;  %v591_v36 = vshrl.u32 %v483_v21, 16  ;;  %v594_v37 = vshll.u32 %v483_v21, 16 }
  0x20   : > { %1193 = vmatpush.bf16.msra.mxu3 %v1186_v5  ;;  %v546_v5 = vrot.slane %v544_v59, 5  ;;  %v583_v27 = vor.u32 %v582_v18, %v579_v17  ;;  %v1317_v38 = vld [vmem:[%s1263_s30 + $0xe0] sm:$0xf]  ;;  %v1320_v39 = vld [vmem:[%s1263_s30 + $0xec] sm:$0xf0]  ;;  %v588_v48 = vrot.slane %v586_v28, 5  ;;  %v1058_v56 = vor.u32 %v1178_v30, %v1057_v29 }
  0x21   : > { %v485_v40 = vld [vmem:[%s1263_s30 + $0x70] sm:$0xf]  ;;  %v1324_v43 = vld [vmem:[%s1263_s30 + $0x68] sm:$0xf]  ;;  %v1327_v44 = vld [vmem:[%s1263_s30 + $0x74] sm:$0xf0]  ;;  %v1106_v57 = vor.u32 %v1168_v33, %v1105_v31  ;;  %v1126_v60 = vor.u32 %v1320_v39, %v1317_v38 }
  0x22   : > { %v547_v13 = vsel %vm1279_vm3, %v542_v4, %v546_v5  ;;  %v486_v45 = vld [vmem:[%s1263_s30 + $0x74] sm:$0x1]  ;;  %v570_v46 = vrot.slane %v569_v26, 4  ;;  %v584_v47 = vrot.slane %v583_v27, 4  ;;  %v1331_v49 = vld [vmem:[%s1263_s30 + $0x60] sm:$0xf]  ;;  %v1062_v61 = vor.u32 %v1327_v44, %v1324_v43 }
  0x23   : > { %1094 = vmatmul.msk.bf16.gmra.mxu3 %vm272_vm0, %v1078_v0  ;;  %1088 = vmatmul.msk.bf16.gmra.mxu0 %vm272_vm0, %v1054_v2  ;;  %v737_v22 = vunpack.c.l.b16 %v547_v13  ;;  %v600_v50 = vshll.u32 %v484_v35, 16  ;;  %v1334_v51 = vld [vmem:[%s1263_s30 + $0x6c] sm:$0xf0]  ;;  %v593_v52 = vrot.slane %v591_v36, 4  ;;  %v596_v53 = vrot.slane %v594_v37, 5 }
  0x24   : > { %1136 = vmatmul.msk.bf16.gmra.mxu1 %vm272_vm0, %v1102_v3  ;;  %v605_v54 = vshrl.u32 %v485_v40, 16  ;;  %v608_v55 = vshll.u32 %v485_v40, 16  ;;  %v614_v58 = vshll.u32 %v486_v45, 16  ;;  %v495_v59 = vld [vmem:[%s1263_s30 + $0xc0] sm:$0xf]  ;;  %v575_v63 = vsel %vm1279_vm3, %v570_v46, %v574_v34 }
  0x25   : > { %v752_v41 = vpack.c.b16 %v738_v23, %v737_v22  ;;  %v497_v62 = vld [vmem:[%s1263_s30 + $0xd0] sm:$0xf]  ;;  %v589_v0 = vsel %vm1279_vm3, %v584_v47, %v588_v48  ;;  %v1110_v1 = vor.u32 %v1334_v51, %v1331_v49  ;;  %v1349_v2 = vrot.slane %v600_v50, 5  ;;  %v487_v7 = vld [vmem:[%s1263_s30 + $0x80] sm:$0xf] }
  0x26   : > { %v597_v3 = vor.u32 %v596_v53, %v593_v52  ;;  %v1352_v4 = vrot.slane %v605_v54, 4  ;;  %v1354_v5 = vrot.slane %v608_v55, 5  ;;  %v675_v6 = vshrl.u32 %v495_v59, 16  ;;  %v488_v12 = vld [vmem:[%s1263_s30 + $0x84] sm:$0x1] }
  0x27   : > { %v1359_v8 = vrot.slane %v614_v58, 5  ;;  %v678_v9 = vshll.u32 %v495_v59, 16  ;;  %v689_v10 = vshrl.u32 %v497_v62, 16  ;;  %v692_v11 = vshll.u32 %v497_v62, 16  ;;  %v489_v15 = vld [vmem:[%s1263_s30 + $0x90] sm:$0xf] }
  0x28   : > { %v739_v13 = vunpack.c.l.b16 %v575_v63  ;;  %v740_v14 = vunpack.c.l.b16 %v589_v0  ;;  %v490_v16 = vld [vmem:[%s1263_s30 + $0x94] sm:$0x1]  ;;  %v619_v17 = vshrl.u32 %v487_v7, 16  ;;  %v622_v18 = vshll.u32 %v487_v7, 16  ;;  %v499_v31 = vld [vmem:[%s1263_s30 + $0xe0] sm:$0xf] }
  0x29   : > { %v628_v19 = vshll.u32 %v488_v12, 16  ;;  %v633_v20 = vshrl.u32 %v489_v15, 16  ;;  %v636_v21 = vshll.u32 %v489_v15, 16  ;;  %v642_v22 = vshll.u32 %v490_v16, 16  ;;  %v501_v35 = vld [vmem:[%s1263_s30 + $0xf0] sm:$0xf] }
  0x2a   : > { %v1364_v23 = vrot.slane %v597_v3, 4  ;;  %v677_v24 = vrot.slane %v675_v6, 4  ;;  %v621_v25 = vrot.slane %v619_v17, 4  ;;  %v624_v26 = vrot.slane %v622_v18, 5  ;;  %v496_v46 = vld [vmem:[%s1263_s30 + $0xc4] sm:$0x1] }
  0x2b   : > { %v680_v27 = vrot.slane %v678_v9, 5  ;;  %v691_v28 = vrot.slane %v689_v10, 4  ;;  %v635_v29 = vrot.slane %v633_v20, 4  ;;  %v638_v30 = vrot.slane %v636_v21, 5  ;;  %v498_v59 = vld [vmem:[%s1263_s30 + $0xd4] sm:$0x1] }
  0x2c   : > { %v625_v33 = vor.u32 %v624_v26, %v621_v25  ;;  %v630_v34 = vrot.slane %v628_v19, 5  ;;  %v703_v36 = vshrl.u32 %v499_v31, 16  ;;  %v706_v37 = vshll.u32 %v499_v31, 16  ;;  %v491_v25 = vld [vmem:[%s1263_s30 + $0xa0] sm:$0xf] }
  0x2d   : > { %v639_v40 = vor.u32 %v638_v30, %v635_v29  ;;  %v720_v45 = vshll.u32 %v501_v35, 16  ;;  %v694_v47 = vrot.slane %v692_v11, 5  ;;  %v753_v53 = vpack.c.b16 %v740_v14, %v739_v13  ;;  %v493_v44 = vld [vmem:[%s1263_s30 + $0xb0] sm:$0xf] }
  0x2e   : > { %v626_v48 = vrot.slane %v625_v33, 4  ;;  %v705_v50 = vrot.slane %v703_v36, 4  ;;  %v708_v52 = vrot.slane %v706_v37, 5  ;;  %v611_v54 = vor.u32 %v1354_v5, %v1352_v4 }
  0x2f   : > { %1156 = vmatmul.msk.bf16.gmra.mxu2 %vm272_vm0, %v752_v41  ;;  %v644_v41 = vrot.slane %v642_v22, 5  ;;  %v640_v55 = vrot.slane %v639_v40, 4  ;;  %v722_v3 = vrot.slane %v720_v45, 5  ;;  %v684_v6 = vshll.u32 %v496_v46, 16 }
  0x30   : > { %v631_v62 = vsel %vm1279_vm3, %v626_v48, %v630_v34  ;;  %v709_v63 = vor.u32 %v708_v52, %v705_v50  ;;  %v681_v13 = vor.u32 %v680_v27, %v677_v24  ;;  %v695_v14 = vor.u32 %v694_v47, %v691_v28  ;;  %v1065_v52 = vld [vmem:[%s1263_s30 + $0x88] sm:$0xf] }
  0x31   : > { %v645_v7 = vsel %vm1279_vm3, %v640_v55, %v644_v41  ;;  %v1378_v9 = vunpack.c.l.b16 %v631_v62  ;;  %v698_v15 = vshll.u32 %v498_v59, 16  ;;  %v612_v17 = vrot.slane %v611_v54, 4  ;;  %v1180_v55 = vld [vmem:[%s1263_s30 + $0x94] sm:$0xf0] }
  0x32   : > { %v1380_v11 = vunpack.c.l.b16 %v645_v7  ;;  %v710_v4 = vrot.slane %v709_v63, 4  ;;  %v686_v22 = vrot.slane %v684_v6, 5  ;;  %v682_v26 = vrot.slane %v681_v13, 4 }
  0x33   : > { %1141 = vmatmul.msk.bf16.vlgmr.msrb.gmra.mxu3 %vm272_vm0, %v1122_v42  ;;  %1089 = vmatmul.msk.bf16.gmra.mxu0 %vm272_vm0, %v1058_v56  ;;  %v717_v42 = vshrl.u32 %v501_v35, 16  ;;  %v500_v56 = vld [vmem:[%s1263_s30 + $0xe4] sm:$0x1]  ;;  %v696_v27 = vrot.slane %v695_v14, 4  ;;  %v700_v38 = vrot.slane %v698_v15, 5  ;;  %v603_v28 = vsel %vm1279_vm3, %v1364_v23, %v1349_v2 }
  0x34   : > { %1137 = vmatmul.msk.bf16.gmra.mxu1 %vm272_vm0, %v1106_v57  ;;  %v502_v57 = vld [vmem:[%s1263_s30 + $0xf4] sm:$0x1]  ;;  %v712_v0 = vshll.u32 %v500_v56, 16  ;;  %v755_v18 = vpack.c.b16 %v1380_v11, %v1378_v9  ;;  %v617_v43 = vsel %vm1279_vm3, %v612_v17, %v1359_v8  ;;  %v647_v29 = vshrl.u32 %v491_v25, 16  ;;  %v1113_v56 = vld [vmem:[%s1263_s30 + $0x80] sm:$0xf] }
  0x35   : > { %v719_v58 = vrot.slane %v717_v42, 4  ;;  %v726_v10 = vshll.u32 %v502_v57, 16  ;;  %v650_v49 = vshll.u32 %v491_v25, 16  ;;  %v661_v30 = vshrl.u32 %v493_v44, 16  ;;  %v1170_v57 = vld [vmem:[%s1263_s30 + $0x8c] sm:$0xf0] }
  0x36   : > { %v714_v5 = vrot.slane %v712_v0, 5  ;;  %v664_v31 = vshll.u32 %v493_v44, 16  ;;  %v649_v33 = vrot.slane %v647_v29, 4  ;;  %v687_v2 = vsel %vm1279_vm3, %v682_v26, %v686_v22 }
  0x37   : > { %v723_v12 = vor.u32 %v722_v3, %v719_v58  ;;  %v728_v16 = vrot.slane %v726_v10, 5  ;;  %v652_v34 = vrot.slane %v650_v49, 5  ;;  %v701_v8 = vsel %vm1279_vm3, %v696_v27, %v700_v38  ;;  %v1069_v10 = vld [vmem:[%s1263_s30 + $0xa8] sm:$0xf] }
  0x38   : > { %v715_v19 = vsel %vm1279_vm3, %v710_v4, %v714_v5  ;;  %v663_v23 = vrot.slane %v661_v30, 4  ;;  %v666_v36 = vrot.slane %v664_v31, 5  ;;  %v741_v37 = vunpack.c.l.b16 %v603_v28  ;;  %v1181_v4 = vld [vmem:[%s1263_s30 + $0xb4] sm:$0xf0]  ;;  %v1117_v5 = vld [vmem:[%s1263_s30 + $0xa0] sm:$0xf] }
  0x39   : > { %v724_v20 = vrot.slane %v723_v12, 4  ;;  %v1387_v21 = vunpack.c.l.b16 %v715_v19  ;;  %v742_v40 = vunpack.c.l.b16 %v617_v43  ;;  %v653_v41 = vor.u32 %v652_v34, %v649_v33  ;;  %v1171_v12 = vld [vmem:[%s1263_s30 + $0xac] sm:$0xf0] }
  0x3a   : > { %v667_v45 = vor.u32 %v666_v36, %v663_v23  ;;  %v747_v47 = vunpack.c.l.b16 %v687_v2  ;;  %v748_v48 = vunpack.c.l.b16 %v701_v8  ;;  %v1066_v3 = vor.u32 %v1180_v55, %v1065_v52 }
  0x3b   : > { %v729_v24 = vsel %vm1279_vm3, %v724_v20, %v728_v16  ;;  %v654_v50 = vrot.slane %v653_v41, 4  ;;  %v754_v54 = vpack.c.b16 %v742_v40, %v741_v37  ;;  %v1114_v6 = vor.u32 %v1170_v57, %v1113_v56 }
  0x3c   : > { %v750_v39 = vunpack.c.l.b16 %v729_v24  ;;  %v757_v63 = vpack.c.b16 %v748_v48, %v747_v47  ;;  %v1070_v32 = vor.u32 %v1181_v4, %v1069_v10  ;;  %v1118_v13 = vor.u32 %v1171_v12, %v1117_v5 }
  0x3e   : > { %v758_v51 = vpack.c.b16 %v750_v39, %v1387_v21  ;;  %v1450_v21 = vld [vmem:[%s1522_s2] ss:$0 sm:$0xff] }
  0x3f   : > { %1157 = vmatmul.msk.bf16.gmra.mxu2 %vm272_vm0, %v753_v53  ;;  %v668_v53 = vrot.slane %v667_v45, 4 }
  0x43   : > { %1142 = vmatmul.msk.bf16.gmra.mxu3 %vm272_vm0, %v1126_v60  ;;  %1090 = vmatmul.msk.bf16.gmra.mxu0 %vm272_vm0, %v1062_v61  ;;  %v492_v60 = vld [vmem:[%s1263_s30 + $0xa4] sm:$0x1]  ;;  %v494_v61 = vld [vmem:[%s1263_s30 + $0xb4] sm:$0x1] }
  0x44   : > { %1138 = vmatmul.msk.bf16.gmra.mxu1 %vm272_vm0, %v1110_v1  ;;  %v656_v1 = vshll.u32 %v492_v60, 16  ;;  %v670_v35 = vshll.u32 %v494_v61, 16 }
  0x46   : > { %v658_v42 = vrot.slane %v656_v1, 5  ;;  %v672_v46 = vrot.slane %v670_v35, 5 }
  0x48   : > { %v659_v58 = vsel %vm1279_vm3, %v654_v50, %v658_v42  ;;  %v673_v59 = vsel %vm1279_vm3, %v668_v53, %v672_v46 }
  0x49   : > { %v745_v62 = vunpack.c.l.b16 %v659_v58  ;;  %v746_v0 = vunpack.c.l.b16 %v673_v59 }
  0x4b   : > { %v756_v7 = vpack.c.b16 %v746_v0, %v745_v62 }
  0x4f   : > { %1158 = vmatmul.msk.bf16.gmra.mxu2 %vm272_vm0, %v754_v54 }
  0x53   : > { %1161 = vmatmul.msk.bf16.vlgmr.msra.gmra.mxu3 %vm272_vm0, %v757_v63  ;;  %1091 = vmatmul.msk.bf16.gmra.mxu0 %vm272_vm0, %v1066_v3 }
  0x54   : > { %1139 = vmatmul.msk.bf16.gmra.mxu1 %vm272_vm0, %v1114_v6 }
  0x5f   : > { %1159 = vmatmul.msk.bf16.gmra.mxu2 %vm272_vm0, %v755_v18 }
  0x63   : > { %1162 = vmatmul.msk.bf16.gmra.mxu3 %vm272_vm0, %v758_v51  ;;  %1092 = vmatmul.msk.bf16.gmra.mxu0 %vm272_vm0, %v1070_v32 }
  0x64   : > { %1140 = vmatmul.msk.bf16.gmra.mxu1 %vm272_vm0, %v1118_v13 }
  0x6f   : > { %1160 = vmatmul.msk.bf16.gmra.mxu2 %vm272_vm0, %v756_v7 }
  0x90   : > { %v306_v14 = vpop.f32.mrf.mxu0 }
  0x91   : > { %v431_v15 = vpop.f32.mrf.mxu1 }
  0x92   : > { %v432_v9 = vadd.f32 %v431_v15, %v306_v14 }
  0x96   : > { %v1443_v16 = vpop.f32.mrf.mxu3 }
  0x98   : > { %v308_v17 = vpop.f32.mrf.mxu0 }
  0x99   : > { %v433_v19 = vpop.f32.mrf.mxu1 }
  0x9a   : > { %v434_v60 = vadd.f32 %v433_v19, %v308_v17 }
  0x9e   : > { %v1445_v20 = vpop.f32.mrf.mxu3 }
  0xa0   : > { %v311_v11 = vpop.f32.mrf.mxu0 }
  0xa1   : > { %v436_v18 = vpop.f32.mrf.mxu1 }
  0xa2   : > { %v804_v22 = vpop.f32.mrf.mxu2  ;;  %v437_v51 = vadd.f32 %v436_v18, %v311_v11 }
  0xa3   : > { %v844_v24 = vadd.f32 %v804_v22, %v432_v9 }
  0xa5   : > { %v864_v26 = vadd.f32 %v1450_v21, %v844_v24 }
  0xa6   : > { %v1452_v25 = vpop.f32.mrf.mxu3 }
  0xa7   : > { %vm880_vm4 = vcmp.ge.f32.partialorder %v864_v26, 0.0  ;;  %v896_v27 = vmul.f32 0.2, %v864_v26 }
  0xa8   : > { %v313_v38 = vpop.f32.mrf.mxu0 }
  0xa9   : > { %v438_v39 = vpop.f32.mrf.mxu1  ;;  %v912_v28 = vsel %vm880_vm4, %v864_v26, %v896_v27 }
  0xaa   : > { %v928_v43 = vpack.c.bf16 %v912_v28, %v912_v28  ;;  %v806_v44 = vpop.f32.mrf.mxu2  ;;  %v439_v37 = vadd.f32 %v438_v39, %v313_v38 }
  0xab   : > { %v845_v61 = vadd.f32 %v806_v44, %v434_v60 }
  0xac   : > { %945 = vst.msk [vmem:[%s1459_s9] sm:$0xf] %vm944_vm5, %v928_v43 }
  0xad   : > { %v865_v49 = vadd.f32 %v1450_v21, %v845_v61 }
  0xae   : > { %v1463_v29 = vpop.f32.mrf.mxu3 }
  0xaf   : > { %vm881_vm6 = vcmp.ge.f32.partialorder %v865_v49, 0.0  ;;  %v897_v1 = vmul.f32 0.2, %v865_v49 }
  0xb0   : > { %v316_v30 = vpop.f32.mrf.mxu0 }
  0xb1   : > { %v441_v31 = vpop.f32.mrf.mxu1  ;;  %v913_v33 = vsel %vm881_vm6, %v865_v49, %v897_v1 }
  0xb2   : > { %v929_v34 = vpack.c.bf16 %v913_v33, %v913_v33  ;;  %v809_v35 = vpop.f32.mrf.mxu2  ;;  %v442_v52 = vadd.f32 %v441_v31, %v316_v30 }
  0xb3   : > { %v846_v2 = vadd.f32 %v809_v35, %v437_v51 }
  0xb4   : > { %946 = vst.msk [vmem:[%s1459_s9 + $0x4] sm:$0xf] %vm944_vm5, %v929_v34 }
  0xb5   : > { %v866_v23 = vadd.f32 %v1450_v21, %v846_v2 }
  0xb6   : > { %v461_v8 = vpop.f32.mrf.mxu3 }
  0xb7   : > { %vm882_vm7 = vcmp.ge.f32.partialorder %v866_v23, 0.0  ;;  %v898_v36 = vmul.f32 0.2, %v866_v23  ;;  %v462_v11 = vadd.f32 %v461_v8, %v1443_v16 }
  0xb8   : > { %v318_v41 = vpop.f32.mrf.mxu0 }
  0xb9   : > { %v914_v40 = vsel %vm882_vm7, %v866_v23, %v898_v36  ;;  %v443_v46 = vpop.f32.mrf.mxu1 }
  0xba   : > { %v930_v42 = vpack.c.bf16 %v914_v40, %v914_v40  ;;  %v811_v45 = vpop.f32.mrf.mxu2  ;;  %v444_v3 = vadd.f32 %v443_v46, %v318_v41 }
  0xbb   : > { %v847_v47 = vadd.f32 %v811_v45, %v439_v37 }
  0xbc   : > { %947 = vst.msk [vmem:[%s1459_s9 + $0x8] sm:$0xf] %vm944_vm5, %v930_v42 }
  0xbd   : > { %v867_v50 = vadd.f32 %v1450_v21, %v847_v47 }
  0xbe   : > { %v463_v48 = vpop.f32.mrf.mxu3 }
  0xbf   : > { %vm883_vm8 = vcmp.ge.f32.partialorder %v867_v50, 0.0  ;;  %v899_v53 = vmul.f32 0.2, %v867_v50  ;;  %v464_v49 = vadd.f32 %v463_v48, %v1445_v20 }
  0xc0   : > { %v321_v58 = vpop.f32.mrf.mxu0 }
  0xc1   : > { %v915_v54 = vsel %vm883_vm8, %v867_v50, %v899_v53  ;;  %v446_v62 = vpop.f32.mrf.mxu1 }
  0xc2   : > { %v931_v55 = vpack.c.bf16 %v915_v54, %v915_v54  ;;  %v814_v56 = vpop.f32.mrf.mxu2  ;;  %v447_v14 = vadd.f32 %v446_v62, %v321_v58 }
  0xc3   : > { %v848_v57 = vadd.f32 %v814_v56, %v442_v52 }
  0xc4   : > { %948 = vst.msk [vmem:[%s1459_s9 + $0xc] sm:$0xf] %vm944_vm5, %v931_v55 }
  0xc5   : > { %v868_v63 = vadd.f32 %v1450_v21, %v848_v57 }
  0xc6   : > { %v466_v59 = vpop.f32.mrf.mxu3 }
  0xc7   : > { %vm884_vm9 = vcmp.ge.f32.partialorder %v868_v63, 0.0  ;;  %v900_v0 = vmul.f32 0.2, %v868_v63  ;;  %v467_v42 = vadd.f32 %v466_v59, %v1452_v25 }
  0xc8   : > { %v323_v32 = vpop.f32.mrf.mxu0 }
  0xc9   : > { %v916_v6 = vsel %vm884_vm9, %v868_v63, %v900_v0  ;;  %v448_v13 = vpop.f32.mrf.mxu1 }
  0xca   : > { %v932_v7 = vpack.c.bf16 %v916_v6, %v916_v6  ;;  %v816_v10 = vpop.f32.mrf.mxu2  ;;  %v449_v28 = vadd.f32 %v448_v13, %v323_v32 }
  0xcb   : > { %v849_v4 = vadd.f32 %v816_v10, %v444_v3 }
  0xcc   : > { %949 = vst.msk [vmem:[%s1459_s9 + $0x10] sm:$0xf] %vm944_vm5, %v932_v7 }
  0xcd   : > { %v869_v12 = vadd.f32 %v1450_v21, %v849_v4 }
  0xce   : > { %v1477_v5 = vpop.f32.mrf.mxu3 }
  0xcf   : > { %vm885_vm10 = vcmp.ge.f32.partialorder %v869_v12, 0.0  ;;  %v901_v15 = vmul.f32 0.2, %v869_v12  ;;  %v469_v59 = vadd.f32 %v1477_v5, %v1463_v29 }
  0xd0   : > { %v326_v39 = vpop.f32.mrf.mxu0 }
  0xd1   : > { %v917_v17 = vsel %vm885_vm10, %v869_v12, %v901_v15  ;;  %v451_v60 = vpop.f32.mrf.mxu1 }
  0xd2   : > { %v933_v19 = vpack.c.bf16 %v917_v17, %v917_v17  ;;  %v819_v9 = vpop.f32.mrf.mxu2  ;;  %v452_v35 = vadd.f32 %v451_v60, %v326_v39 }
  0xd3   : > { %v850_v18 = vadd.f32 %v819_v9, %v447_v14 }
  0xd4   : > { %950 = vst.msk [vmem:[%s1459_s9 + $0x14] sm:$0xf] %vm944_vm5, %v933_v19 }
  0xd5   : > { %v870_v24 = vadd.f32 %v1450_v21, %v850_v18 }
  0xd6   : > { %v834_v22 = vpop.f32.mrf.mxu3 }
  0xd7   : > { %v856_v26 = vadd.f32 %v834_v22, %v462_v11  ;;  %vm886_vm11 = vcmp.ge.f32.partialorder %v870_v24, 0.0  ;;  %v902_v27 = vmul.f32 0.2, %v870_v24 }
  0xd8   : > { %v328_v36 = vpop.f32.mrf.mxu0 }
  0xd9   : > { %v876_v38 = vadd.f32 %v1450_v21, %v856_v26  ;;  %v918_v43 = vsel %vm886_vm11, %v870_v24, %v902_v27  ;;  %v453_v40 = vpop.f32.mrf.mxu1 }
  0xda   : > { %v934_v16 = vpack.c.bf16 %v918_v43, %v918_v43  ;;  %v821_v61 = vpop.f32.mrf.mxu2  ;;  %v454_v55 = vadd.f32 %v453_v40, %v328_v36 }
  0xdb   : > { %vm892_vm12 = vcmp.ge.f32.partialorder %v876_v38, 0.0  ;;  %v908_v44 = vmul.f32 0.2, %v876_v38  ;;  %v851_v1 = vadd.f32 %v821_v61, %v449_v28 }
  0xdc   : > { %951 = vst.msk [vmem:[%s1459_s9 + $0x18] sm:$0xf] %vm944_vm5, %v934_v16 }
  0xdd   : > { %v924_v51 = vsel %vm892_vm12, %v876_v38, %v908_v44  ;;  %v871_v33 = vadd.f32 %v1450_v21, %v851_v1 }
  0xde   : > { %v940_v30 = vpack.c.bf16 %v924_v51, %v924_v51  ;;  %v836_v31 = vpop.f32.mrf.mxu3 }
  0xdf   : > { %v857_v34 = vadd.f32 %v836_v31, %v464_v49  ;;  %vm887_vm13 = vcmp.ge.f32.partialorder %v871_v33, 0.0  ;;  %v903_v2 = vmul.f32 0.2, %v871_v33 }
  0xe0   : > { %957 = vst.msk [vmem:[%s1459_s9 + $0x30] sm:$0xf] %vm944_vm5, %v940_v30  ;;  %v331_v63 = vpop.f32.mrf.mxu0 }
  0xe1   : > { %v877_v8 = vadd.f32 %v1450_v21, %v857_v34  ;;  %v919_v23 = vsel %vm887_vm13, %v871_v33, %v903_v2  ;;  %v456_v6 = vpop.f32.mrf.mxu1 }
  0xe2   : > { %v935_v37 = vpack.c.bf16 %v919_v23, %v919_v23  ;;  %v824_v41 = vpop.f32.mrf.mxu2  ;;  %v457_v12 = vadd.f32 %v456_v6, %v331_v63 }
  0xe3   : > { %vm893_vm14 = vcmp.ge.f32.partialorder %v877_v8, 0.0  ;;  %v909_v20 = vmul.f32 0.2, %v877_v8  ;;  %v852_v46 = vadd.f32 %v824_v41, %v452_v35 }
  0xe4   : > { %952 = vst.msk [vmem:[%s1459_s9 + $0x1c] sm:$0xf] %vm944_vm5, %v935_v37 }
  0xe5   : > { %v925_v45 = vsel %vm893_vm14, %v877_v8, %v909_v20  ;;  %v872_v50 = vadd.f32 %v1450_v21, %v852_v46 }
  0xe6   : > { %v941_v47 = vpack.c.bf16 %v925_v45, %v925_v45  ;;  %v839_v48 = vpop.f32.mrf.mxu3 }
  0xe7   : > { %v858_v52 = vadd.f32 %v839_v48, %v467_v42  ;;  %vm888_vm15 = vcmp.ge.f32.partialorder %v872_v50, 0.0  ;;  %v904_v53 = vmul.f32 0.2, %v872_v50 }
  0xe8   : > { %958 = vst.msk [vmem:[%s1459_s9 + $0x34] sm:$0xf] %vm944_vm5, %v941_v47  ;;  %v333_v18 = vpop.f32.mrf.mxu0 }
  0xe9   : > { %v878_v54 = vadd.f32 %v1450_v21, %v858_v52  ;;  %v920_v56 = vsel %vm888_vm15, %v872_v50, %v904_v53  ;;  %v458_v22 = vpop.f32.mrf.mxu1 }
  0xea   : > { %v936_v57 = vpack.c.bf16 %v920_v56, %v920_v56  ;;  %v826_v58 = vpop.f32.mrf.mxu2  ;;  %v459_v26 = vadd.f32 %v458_v22, %v333_v18 }
  0xeb   : > { %vm894_vm0 = vcmp.ge.f32.partialorder %v878_v54, 0.0  ;;  %v910_v25 = vmul.f32 0.2, %v878_v54  ;;  %v853_v0 = vadd.f32 %v826_v58, %v454_v55 }
  0xec   : > { %953 = vst.msk [vmem:[%s1459_s9 + $0x20] sm:$0xf] %vm944_vm5, %v936_v57 }
  0xed   : > { %v926_v62 = vsel %vm894_vm0, %v878_v54, %v910_v25  ;;  %v873_v10 = vadd.f32 %v1450_v21, %v853_v0 }
  0xee   : > { %v942_v3 = vpack.c.bf16 %v926_v62, %v926_v62  ;;  %v841_v7 = vpop.f32.mrf.mxu3 }
  0xef   : > { %v859_v4 = vadd.f32 %v841_v7, %v469_v59  ;;  %vm889_vm1 = vcmp.ge.f32.partialorder %v873_v10, 0.0  ;;  %v905_v32 = vmul.f32 0.2, %v873_v10 }
  0xf0   : > { %959 = vst.msk [vmem:[%s1459_s9 + $0x38] sm:$0xf] %vm944_vm5, %v942_v3 }
  0xf1   : > { %v879_v29 = vadd.f32 %v1450_v21, %v859_v4  ;;  %v921_v5 = vsel %vm889_vm1, %v873_v10, %v905_v32 }
  0xf2   : > { %v937_v14 = vpack.c.bf16 %v921_v5, %v921_v5  ;;  %v829_v15 = vpop.f32.mrf.mxu2 }
  0xf3   : > { %vm895_vm2 = vcmp.ge.f32.partialorder %v879_v29, 0.0  ;;  %v911_v13 = vmul.f32 0.2, %v879_v29  ;;  %v854_v19 = vadd.f32 %v829_v15, %v457_v12 }
  0xf4   : > { %954 = vst.msk [vmem:[%s1459_s9 + $0x24] sm:$0xf] %vm944_vm5, %v937_v14 }
  0xf5   : > { %v927_v17 = vsel %vm895_vm2, %v879_v29, %v911_v13  ;;  %v874_v11 = vadd.f32 %v1450_v21, %v854_v19 }
  0xf6   : > { %v943_v9 = vpack.c.bf16 %v927_v17, %v927_v17 }
  0xf7   : > { %vm890_vm3 = vcmp.ge.f32.partialorder %v874_v11, 0.0  ;;  %v906_v24 = vmul.f32 0.2, %v874_v11 }
  0xf8   : > { %960 = vst.msk [vmem:[%s1459_s9 + $0x3c] sm:$0xf] %vm944_vm5, %v943_v9 }
  0xf9   : > { %v922_v27 = vsel %vm890_vm3, %v874_v11, %v906_v24 }
  0xfa   : > { %v938_v38 = vpack.c.bf16 %v922_v27, %v922_v27  ;;  %v831_v39 = vpop.f32.mrf.mxu2 }
  0xfb   : > { %v855_v60 = vadd.f32 %v831_v39, %v459_v26 }
  0xfc   : > { %955 = vst.msk [vmem:[%s1459_s9 + $0x28] sm:$0xf] %vm944_vm5, %v938_v38 }
  0xfd   : > { %v875_v28 = vadd.f32 %v1450_v21, %v855_v60 }
  0xff   : > { %vm891_vm4 = vcmp.ge.f32.partialorder %v875_v28, 0.0  ;;  %v907_v43 = vmul.f32 0.2, %v875_v28 }
 0x101   : > { %v923_v44 = vsel %vm891_vm4, %v875_v28, %v907_v43 }
 0x102   : > { %v939_v16 = vpack.c.bf16 %v923_v44, %v923_v44 }
 0x104   : > { %956 = vst.msk [vmem:[%s1459_s9 + $0x2c] sm:$0xf] %vm944_vm5, %v939_v16 }
 0x105 PF: > { %s13_s12 = sadd.s32 1, %s1209_s12  }
 0x106   : > { %p10_p4 = scmp.ge.s32.totalorder %s13_s12, 4  }
 0x108   :  { %12 = sbr.rel (!%p10_p4) target bundleno = 1 (0x1), region = 65 }

// kernel: ultrasound_encoder_forward.9
= control target key start
LH: loop header
LB: loop body
LE: loop exit
PB: predicated region body
PF: predicated region fallthrough
CT: control target
= control target key end

     0   :  { %s1349_s12 = smov 0   ;;  %s1718_s0 = inlined_call_operand.vmem [shape: bf16[32,1,10,64], index: 0, kind: input, shape index: {}]   ;;  %s1719_s1 = inlined_call_operand.vmem [shape: bf16[3,64,64], index: 1, kind: input, shape index: {}]   ;;  %s1720_s2 = inlined_call_operand.vmem [shape: f32[1,64], index: 2, kind: input, shape index: {}]   ;;  %s1721_s3 = inlined_call_operand.vmem [shape: bf16[32,8,64], index: 3, kind: output, shape index: {}]  }
   0x1 LB: > { %s1131_s13 = sadd.s32 4294967295, %s1327_s12   ;;  %p1135_p0 = scmp.ge.s32.totalorder %s1327_s12, 1  ;;  %s1327_s12 = sphi %s1349_s12, %s13_s12  }
   0x2   : > { %p139_p1 = scmp.lt.s32.totalorder %s1327_s12, 3 }
   0x4   : > { %p140_p2 = pnand %p1135_p0, %p139_p1 }
   0x5   : > { %s1136_s20 = sshll.u32 (!%p140_p2), %s1131_s13, 4 }
   0x6   : > { %143 = sbr.rel (%p140_p2) target bundleno = 269 (0x10d), region = 32  ;;  %p165_p3 = scmp.lt.s32.totalorder (!%p140_p2), %s1136_s20, 31 }
   0xb   : > { %v1360_v0 = vld [vmem:[%s1719_s1 + $0x18] sm:$0xff]  ;;  %v1375_v3 = vld [vmem:[%s1719_s1 + $0x10] sm:$0xff]  ;;  %s1727_s20 = smov (!%p165_p3, %s1136_s20), 31  ;;  %vm761_vm0 = vcmask 1042432   ;;  %vm762_vm1 = vcmask 1046532   ;;  %v1390_v6 = vld [vmem:[%s1719_s1 + $0x8] sm:$0xff] }
   0xc   : > { %v1365_v1 = vld [vmem:[%s1719_s1 + $0x58] sm:$0xff]  ;;  %668 = vmatpush.bf16.msra.mxu1 %v1360_v0  ;;  %v1380_v4 = vld [vmem:[%s1719_s1 + $0x50] sm:$0xff]  ;;  %s1279_s29 = sshll.u32 %s1727_s20, 3  ;;  %v1398_v7 = vld [vmem:[%s1719_s1 + $0x48] sm:$0xff]  ;;  %vm502_vm2 = vcmask 523264   ;;  %s1140_s19 = sshll.u32 %s1727_s20, 2 }
   0xd   : > { %v1295_v2 = vld [vmem:[%s1719_s1 + $0x38] sm:$0xff]  ;;  %913 = vmatpush.bf16.msra.mxu2 %v1365_v1  ;;  %v1294_v5 = vld [vmem:[%s1719_s1 + $0x30] sm:$0xff]  ;;  %v1293_v8 = vld [vmem:[%s1719_s1 + $0x28] sm:$0xff]  ;;  %s1406_s9 = scalar_lea.vmem %s1718_s0, %s1279_s29  ;;  %vm218_vm4 = vsmask.f32 3328  ;;  %s1651_s23 = scalar_lea.vmem %s1721_s3, %s1140_s19  ;;  %vm1058_vm8 = vcmask 519168  }
   0xe   : > { %531 = vmatpush.bf16.msra.mxu0 %v1295_v2  ;;  %1300 = vmatpush.bf16.msra.mxu3 %v1295_v2  ;;  %vm1408_vm3 = vmor %vm761_vm0, %vm762_vm1  ;;  %vm219_vm5 = vsmask.f32 7440  ;;  %v1175_v10 = vld [vmem:[%s1406_s9] sm:$0xf]  ;;  %v1280_v11 = vld [vmem:[%s1406_s9 + $0x4] sm:$0xf0] }
   0xf   : > { %v202_v12 = vld [vmem:[%s1406_s9 + $0x4] sm:$0x1]  ;;  %v1176_v15 = vor.u32 %v1280_v11, %v1175_v10  ;;  %v203_v16 = vld [vmem:[%s1406_s9 + $0xc] sm:$0x1]  ;;  %v713_v17 = vld [vmem:[%s1406_s9] sm:$0xe] }
  0x10   : > { %669 = vmatpush.bf16.msra.mxu1 %v1375_v3  ;;  %v1418_v13 = vld [vmem:[%s1719_s1] sm:$0xff]  ;;  %v714_v18 = vld [vmem:[%s1406_s9 + $0x8] sm:$0xe]  ;;  %v1229_v19 = vrot.slane %v713_v17, 9  ;;  %v766_v20 = vrot.slane %v202_v12, 5  ;;  %v770_v22 = vrot.slane %v203_v16, 5  ;;  %vm1451_vm6 = vmor %vm218_vm4, %vm219_vm5 }
  0x11   : > { %914 = vmatpush.bf16.msra.mxu2 %v1380_v4  ;;  %v1423_v14 = vld [vmem:[%s1719_s1 + $0x40] sm:$0xff]  ;;  %v1230_v21 = vrot.slane %v714_v18, 9  ;;  %v179_v24 = vld [vmem:[%s1406_s9 + $0x8] sm:$0xf]  ;;  %v231_v27 = vshll.u32 %v202_v12, 16  ;;  %v245_v28 = vshll.u32 %v203_v16, 16 }
  0x12   : > { %532 = vmatpush.bf16.msra.mxu0 %v1294_v5  ;;  %1301 = vmatpush.bf16.msra.mxu3 %v1294_v5  ;;  %v178_v23 = vld [vmem:[%s1406_s9] sm:$0xf]  ;;  %v767_v30 = vsel %vm1408_vm3, %v1229_v19, %v766_v20  ;;  %v236_v32 = vshrl.u32 %v179_v24, 16  ;;  %v239_v33 = vshll.u32 %v179_v24, 16  ;;  %v191_v39 = vld [vmem:[%s1406_s9 + $0x68] sm:$0xf] }
  0x13   : > { %v222_v25 = vshrl.u32 %v178_v23, 16  ;;  %v225_v26 = vshll.u32 %v178_v23, 16  ;;  %v1292_v29 = vld [vmem:[%s1719_s1 + $0x20] sm:$0xff]  ;;  %v771_v31 = vsel %vm1408_vm3, %v1230_v21, %v770_v22  ;;  %v837_v35 = vunpack.c.l.b16 %v767_v30  ;;  %v1445_v45 = vld [vmem:[%s1406_s9 + $0x6c] sm:$0x1] }
  0x14   : > { %670 = vmatpush.bf16.msra.mxu1 %v1390_v6  ;;  %v190_v34 = vld [vmem:[%s1406_s9 + $0x60] sm:$0xf]  ;;  %v838_v36 = vunpack.c.l.b16 %v771_v31  ;;  %v1442_v40 = vld [vmem:[%s1406_s9 + $0x64] sm:$0x1]  ;;  %v233_v41 = vrot.slane %v231_v27, 5  ;;  %v238_v42 = vrot.slane %v236_v32, 4 }
  0x15   : > { %915 = vmatpush.bf16.msra.mxu2 %v1398_v7  ;;  %v224_v37 = vrot.slane %v222_v25, 4  ;;  %v227_v38 = vrot.slane %v225_v26, 5  ;;  %v241_v43 = vrot.slane %v239_v33, 5  ;;  %v247_v44 = vrot.slane %v245_v28, 5  ;;  %v1457_v55 = vld [vmem:[%s1406_s9 + $0x10] sm:$0xf] }
  0x16   : > { %533 = vmatpush.bf16.msra.mxu0 %v1293_v8  ;;  %1302 = vmatpush.bf16.msra.mxu3 %v1293_v8  ;;  %v853_v46 = vpack.c.b16 %v838_v36, %v837_v35  ;;  %v390_v48 = vshrl.u32 %v190_v34, 16  ;;  %v393_v49 = vshll.u32 %v190_v34, 16  ;;  %v399_v52 = vshll.u32 %v1442_v40, 16  ;;  %v1460_v56 = vld [vmem:[%s1406_s9 + $0x14] sm:$0xf0] }
  0x17   : > { %v228_v47 = vor.u32 %v227_v38, %v224_v37  ;;  %v242_v51 = vor.u32 %v241_v43, %v238_v42  ;;  %v404_v53 = vshrl.u32 %v191_v39, 16  ;;  %v407_v54 = vshll.u32 %v191_v39, 16  ;;  %v204_v61 = vld [vmem:[%s1406_s9 + $0x14] sm:$0x1]  ;;  %v715_v5 = vld [vmem:[%s1406_s9 + $0x10] sm:$0xe] }
  0x18   : > { %671 = vmatpush.bf16.msra.mxu1 %v1418_v13  ;;  %v392_v58 = vrot.slane %v390_v48, 4  ;;  %v395_v59 = vrot.slane %v393_v49, 5  ;;  %v413_v60 = vshll.u32 %v1445_v45, 16  ;;  %v401_v11 = vrot.slane %v399_v52, 5  ;;  %v205_v12 = vld [vmem:[%s1406_s9 + $0x1c] sm:$0x1] }
  0x19   : > { %916 = vmatpush.bf16.msra.mxu2 %v1423_v14  ;;  %v229_v57 = vrot.slane %v228_v47, 4  ;;  %v243_v62 = vrot.slane %v242_v51, 4  ;;  %v406_v63 = vrot.slane %v404_v53, 4  ;;  %v409_v2 = vrot.slane %v407_v54, 5  ;;  %v716_v16 = vld [vmem:[%s1406_s9 + $0x18] sm:$0xe] }
  0x1a   : > { %534 = vmatpush.bf16.msra.mxu0 %v1292_v29  ;;  %1303 = vmatpush.bf16.msra.mxu3 %v1292_v29  ;;  %v396_v10 = vor.u32 %v395_v59, %v392_v58  ;;  %v180_v19 = vld [vmem:[%s1406_s9 + $0x10] sm:$0xf]  ;;  %v1180_v22 = vor.u32 %v1460_v56, %v1457_v55  ;;  %v1231_v23 = vrot.slane %v715_v5, 9  ;;  %v774_v25 = vrot.slane %v204_v61, 5  ;;  %v181_v30 = vld [vmem:[%s1406_s9 + $0x18] sm:$0xf] }
  0x1b   : > { %1221 = vmatmul.msk.bf16.vlgmr.msra.gmra.mxu1 %vm502_vm2, %v1176_v15  ;;  %v234_v8 = vsel %vm1451_vm6, %v229_v57, %v233_v41  ;;  %v410_v18 = vor.u32 %v409_v2, %v406_v63  ;;  %v415_v15 = vrot.slane %v413_v60, 5  ;;  %v1232_v26 = vrot.slane %v716_v16, 9  ;;  %v192_v36 = vld [vmem:[%s1406_s9 + $0x70] sm:$0xf]  ;;  %v1491_v47 = vld [vmem:[%s1406_s9 + $0x74] sm:$0x1] }
  0x1c   : > { %1269 = vmatmul.msk.bf16.vlgmr.msra.gmra.mxu2 %vm502_vm2, %v853_v46  ;;  %v454_v17 = vunpack.c.l.b16 %v234_v8  ;;  %v397_v21 = vrot.slane %v396_v10, 4  ;;  %v778_v27 = vrot.slane %v205_v12, 5  ;;  %v250_v31 = vshrl.u32 %v180_v19, 16  ;;  %v193_v52 = vld [vmem:[%s1406_s9 + $0x78] sm:$0xf] }
  0x1d   : > { %v411_v24 = vrot.slane %v410_v18, 4  ;;  %v253_v32 = vshll.u32 %v180_v19, 16  ;;  %v775_v34 = vsel %vm1408_vm3, %v1231_v23, %v774_v25  ;;  %v259_v43 = vshll.u32 %v204_v61, 16  ;;  %v1495_v60 = vld [vmem:[%s1406_s9 + $0x7c] sm:$0x1] }
  0x1e   : > { %1304 = vmatpush.bf16.msrb.mxu3 %v1360_v0  ;;  %v248_v0 = vsel %vm1451_vm6, %v243_v62, %v247_v44  ;;  %v402_v29 = vsel %vm1451_vm6, %v397_v21, %v401_v11  ;;  %v779_v35 = vsel %vm1408_vm3, %v1232_v26, %v778_v27  ;;  %v839_v38 = vunpack.c.l.b16 %v775_v34  ;;  %v206_v2 = vld [vmem:[%s1406_s9 + $0x24] sm:$0x1]  ;;  %v717_v16 = vld [vmem:[%s1406_s9 + $0x20] sm:$0xe]  ;;  %v183_v56 = vld [vmem:[%s1406_s9 + $0x28] sm:$0xf] }
  0x1f   : > { %v455_v20 = vunpack.c.l.b16 %v248_v0  ;;  %v466_v33 = vunpack.c.l.b16 %v402_v29  ;;  %v840_v39 = vunpack.c.l.b16 %v779_v35  ;;  %v252_v41 = vrot.slane %v250_v31, 4  ;;  %v1195_v9 = vld [vmem:[%s1406_s9 + $0x50] sm:$0xf] }
  0x20   : > { %v255_v42 = vrot.slane %v253_v32, 5  ;;  %v264_v44 = vshrl.u32 %v181_v30, 16  ;;  %v267_v46 = vshll.u32 %v181_v30, 16  ;;  %v273_v51 = vshll.u32 %v205_v12, 16  ;;  %v1502_v12 = vld [vmem:[%s1406_s9 + $0x2c] sm:$0x1] }
  0x21   : > { %v470_v28 = vpack.c.b16 %v455_v20, %v454_v17  ;;  %v854_v49 = vpack.c.b16 %v840_v39, %v839_v38  ;;  %v418_v53 = vshrl.u32 %v192_v36, 16  ;;  %v261_v57 = vrot.slane %v259_v43, 5 }
  0x22   : > { %1305 = vmatpush.bf16.msrb.mxu3 %v1375_v3  ;;  %v416_v3 = vsel %vm1451_vm6, %v411_v24, %v415_v15  ;;  %v256_v54 = vor.u32 %v255_v42, %v252_v41  ;;  %v266_v58 = vrot.slane %v264_v44, 4  ;;  %v269_v59 = vrot.slane %v267_v46, 5  ;;  %v718_v15 = vld [vmem:[%s1406_s9 + $0x28] sm:$0xe]  ;;  %v182_v24 = vld [vmem:[%s1406_s9 + $0x20] sm:$0xf] }
  0x23   : > { %1165 = vmatmul.msk.bf16.vlgmr.msra.gmra.mxu0 %vm502_vm2, %v470_v28  ;;  %v467_v37 = vunpack.c.l.b16 %v416_v3  ;;  %v420_v61 = vrot.slane %v418_v53, 4  ;;  %v421_v62 = vshll.u32 %v192_v36, 16  ;;  %v427_v63 = vshll.u32 %v1491_v47, 16  ;;  %v1183_v44 = vld [vmem:[%s1406_s9 + $0x20] sm:$0xf] }
  0x24   : > { %v257_v5 = vrot.slane %v256_v54, 4  ;;  %v270_v8 = vor.u32 %v269_v59, %v266_v58  ;;  %v432_v10 = vshrl.u32 %v193_v52, 16  ;;  %v435_v11 = vshll.u32 %v193_v52, 16  ;;  %v184_v54 = vld [vmem:[%s1406_s9 + $0x30] sm:$0xf] }
  0x25   : > { %v476_v48 = vpack.c.b16 %v467_v37, %v466_v33  ;;  %v423_v0 = vrot.slane %v421_v62, 5  ;;  %v429_v17 = vrot.slane %v427_v63, 5  ;;  %v441_v18 = vshll.u32 %v1495_v60, 16 }
  0x26   : > { %1306 = vmatpush.bf16.msrb.mxu3 %v1390_v6  ;;  %v275_v6 = vrot.slane %v273_v51, 5  ;;  %v262_v19 = vsel %vm1451_vm6, %v257_v5, %v261_v57  ;;  %v271_v20 = vrot.slane %v270_v8, 4  ;;  %v434_v21 = vrot.slane %v432_v10, 4  ;;  %v1282_v51 = vld [vmem:[%s1406_s9 + $0x24] sm:$0xf0] }
  0x27   : > { %1171 = vmatmul.msk.bf16.vlgmr.msra.gmra.mxu3 %vm502_vm2, %v476_v48  ;;  %v437_v23 = vrot.slane %v435_v11, 5  ;;  %v456_v25 = vunpack.c.l.b16 %v262_v19  ;;  %v424_v26 = vor.u32 %v423_v0, %v420_v61  ;;  %v1233_v27 = vrot.slane %v717_v16, 9  ;;  %v719_v61 = vld [vmem:[%s1406_s9 + $0x30] sm:$0xe]  ;;  %v720_v5 = vld [vmem:[%s1406_s9 + $0x38] sm:$0xe] }
  0x28   : > { %v782_v29 = vrot.slane %v206_v2, 5  ;;  %v1234_v30 = vrot.slane %v718_v15, 9  ;;  %v786_v3 = vrot.slane %v1502_v12, 5  ;;  %v278_v33 = vshrl.u32 %v182_v24, 16  ;;  %v1540_v11 = vld [vmem:[%s1406_s9 + $0x60] sm:$0xf] }
  0x29   : > { %v438_v28 = vor.u32 %v437_v23, %v434_v21  ;;  %v425_v32 = vrot.slane %v424_v26, 4  ;;  %v287_v38 = vshll.u32 %v206_v2, 16  ;;  %v295_v52 = vshll.u32 %v183_v56, 16  ;;  %v209_v2 = vld [vmem:[%s1406_s9 + $0x3c] sm:$0x1] }
  0x2a   : > { %1307 = vmatpush.bf16.msrb.mxu3 %v1418_v13  ;;  %v443_v13 = vrot.slane %v441_v18, 5  ;;  %v783_v55 = vsel %vm1408_vm3, %v1233_v27, %v782_v29  ;;  %v787_v37 = vsel %vm1408_vm3, %v1234_v30, %v786_v3  ;;  %v280_v42 = vrot.slane %v278_v33, 4  ;;  %v185_v18 = vld [vmem:[%s1406_s9 + $0x38] sm:$0xf]  ;;  %v1546_v19 = vld [vmem:[%s1406_s9 + $0x64] sm:$0xf0] }
  0x2b   : > { %1222 = vmatmul.msk.bf16.gmra.mxu1 %vm502_vm2, %v1180_v22  ;;  %v439_v34 = vrot.slane %v438_v28, 4  ;;  %v281_v22 = vshll.u32 %v182_v24, 16  ;;  %v430_v36 = vsel %vm1451_vm6, %v425_v32, %v429_v17  ;;  %v841_v41 = vunpack.c.l.b16 %v783_v55 }
  0x2c   : > { %1270 = vmatmul.msk.bf16.gmra.mxu2 %vm502_vm2, %v854_v49  ;;  %v842_v46 = vunpack.c.l.b16 %v787_v37  ;;  %v292_v49 = vshrl.u32 %v183_v56, 16  ;;  %v301_v53 = vshll.u32 %v1502_v12, 16  ;;  %v289_v62 = vrot.slane %v287_v38, 5  ;;  %v211_v38 = vld [vmem:[%s1406_s9 + $0x4c] sm:$0x1] }
  0x2d   : > { %v444_v39 = vsel %vm1451_vm6, %v439_v34, %v443_v13  ;;  %v283_v48 = vrot.slane %v281_v22, 5  ;;  %v297_v63 = vrot.slane %v295_v52, 5  ;;  %v306_v12 = vshrl.u32 %v184_v54, 16  ;;  %v210_v22 = vld [vmem:[%s1406_s9 + $0x44] sm:$0x1] }
  0x2e   : > { %1308 = vmatpush.bf16.msra.mxu3 %v1365_v1  ;;  %v276_v1 = vsel %vm1451_vm6, %v271_v20, %v275_v6  ;;  %v469_v43 = vunpack.c.l.b16 %v444_v39  ;;  %v294_v59 = vrot.slane %v292_v49, 4  ;;  %v208_v6 = vld [vmem:[%s1406_s9 + $0x34] sm:$0x1]  ;;  %v855_v8 = vpack.c.b16 %v842_v46, %v841_v41  ;;  %v721_v39 = vld [vmem:[%s1406_s9 + $0x40] sm:$0xe] }
  0x2f   : > { %v457_v31 = vunpack.c.l.b16 %v276_v1  ;;  %v284_v58 = vor.u32 %v283_v48, %v280_v42  ;;  %v303_v0 = vrot.slane %v301_v53, 5  ;;  %v1235_v17 = vrot.slane %v719_v61, 9 }
  0x30   : > { %v298_v16 = vor.u32 %v297_v63, %v294_v59  ;;  %v309_v15 = vshll.u32 %v184_v54, 16  ;;  %v790_v20 = vrot.slane %v208_v6, 5  ;;  %v1236_v21 = vrot.slane %v720_v5, 9  ;;  %v726_v5 = vld [vmem:[%s1406_s9 + $0x68] sm:$0xe] }
  0x31   : > { %v471_v35 = vpack.c.b16 %v457_v31, %v456_v25  ;;  %v285_v10 = vrot.slane %v284_v58, 4  ;;  %v794_v23 = vrot.slane %v209_v2, 5  ;;  %v308_v24 = vrot.slane %v306_v12, 4 }
  0x32   : > { %1309 = vmatpush.bf16.msra.mxu3 %v1380_v4  ;;  %v468_v4 = vunpack.c.l.b16 %v430_v36  ;;  %v299_v26 = vrot.slane %v298_v16, 4  ;;  %v315_v13 = vshll.u32 %v208_v6, 16  ;;  %v814_v27 = vrot.slane %v1442_v40, 5 }
  0x33   : > { %1166 = vmatmul.msk.bf16.gmra.mxu0 %vm502_vm2, %v471_v35  ;;  %v290_v25 = vsel %vm1451_vm6, %v285_v10, %v289_v62  ;;  %v320_v1 = vshrl.u32 %v185_v18, 16  ;;  %v323_v28 = vshll.u32 %v185_v18, 16  ;;  %v329_v29 = vshll.u32 %v209_v2, 16  ;;  %v186_v35 = vld [vmem:[%s1406_s9 + $0x40] sm:$0xf] }
  0x34   : > { %v477_v57 = vpack.c.b16 %v469_v43, %v468_v4  ;;  %v818_v30 = vrot.slane %v1445_v45, 5  ;;  %v304_v31 = vsel %vm1451_vm6, %v299_v26, %v303_v0  ;;  %v1200_v32 = vor.u32 %v1546_v19, %v1540_v11  ;;  %v722_v43 = vld [vmem:[%s1406_s9 + $0x48] sm:$0xe]  ;;  %v725_v2 = vld [vmem:[%s1406_s9 + $0x60] sm:$0xe] }
  0x35   : > { %v458_v33 = vunpack.c.l.b16 %v290_v25  ;;  %v459_v34 = vunpack.c.l.b16 %v304_v31  ;;  %v322_v55 = vrot.slane %v320_v1, 4  ;;  %v325_v56 = vrot.slane %v323_v28, 5  ;;  %v1187_v26 = vld [vmem:[%s1406_s9 + $0x30] sm:$0xf] }
  0x36   : > { %1310 = vmatpush.bf16.msra.mxu3 %v1398_v7  ;;  %v1184_v7 = vor.u32 %v1282_v51, %v1183_v44  ;;  %v791_v45 = vsel %vm1408_vm3, %v1235_v17, %v790_v20  ;;  %v795_v36 = vsel %vm1408_vm3, %v1236_v21, %v794_v23  ;;  %v317_v37 = vrot.slane %v315_v13, 5  ;;  %v187_v51 = vld [vmem:[%s1406_s9 + $0x48] sm:$0xf] }
  0x37   : > { %1172 = vmatmul.msk.bf16.gmra.mxu3 %vm502_vm2, %v477_v57  ;;  %v798_v4 = vrot.slane %v210_v22, 5  ;;  %v326_v41 = vor.u32 %v325_v56, %v322_v55  ;;  %v331_v42 = vrot.slane %v329_v29, 5  ;;  %v1237_v44 = vrot.slane %v721_v39, 9 }
  0x38   : > { %v802_v46 = vrot.slane %v211_v38, 5  ;;  %v1238_v49 = vrot.slane %v722_v43, 9  ;;  %v334_v52 = vshrl.u32 %v186_v35, 16  ;;  %v337_v53 = vshll.u32 %v186_v35, 16  ;;  %v188_v35 = vld [vmem:[%s1406_s9 + $0x50] sm:$0xf] }
  0x39   : > { %v472_v54 = vpack.c.b16 %v459_v34, %v458_v33  ;;  %v327_v57 = vrot.slane %v326_v41, 4  ;;  %v799_v58 = vsel %vm1408_vm3, %v1237_v44, %v798_v4  ;;  %v343_v59 = vshll.u32 %v210_v22, 16  ;;  %v212_v41 = vld [vmem:[%s1406_s9 + $0x54] sm:$0x1]  ;;  %v723_v43 = vld [vmem:[%s1406_s9 + $0x50] sm:$0xe] }
  0x3a   : > { %1311 = vmatpush.bf16.msra.mxu3 %v1423_v14  ;;  %v311_v14 = vrot.slane %v309_v15, 5  ;;  %v803_v6 = vsel %vm1408_vm3, %v1238_v49, %v802_v46  ;;  %v845_v61 = vunpack.c.l.b16 %v799_v58  ;;  %v336_v62 = vrot.slane %v334_v52, 4  ;;  %v724_v44 = vld [vmem:[%s1406_s9 + $0x58] sm:$0xe] }
  0x3b   : > { %1223 = vmatmul.msk.bf16.gmra.mxu1 %vm502_vm2, %v1184_v7  ;;  %v339_v63 = vrot.slane %v337_v53, 5  ;;  %v843_v7 = vunpack.c.l.b16 %v791_v45  ;;  %v846_v10 = vunpack.c.l.b16 %v803_v6  ;;  %v348_v11 = vshrl.u32 %v187_v51, 16  ;;  %v189_v45 = vld [vmem:[%s1406_s9 + $0x58] sm:$0xf] }
  0x3c   : > { %v312_v3 = vor.u32 %v311_v14, %v308_v24  ;;  %1271 = vmatmul.msk.bf16.gmra.mxu2 %vm502_vm2, %v855_v8  ;;  %v844_v8 = vunpack.c.l.b16 %v795_v36  ;;  %v345_v16 = vrot.slane %v343_v59, 5  ;;  %v351_v0 = vshll.u32 %v187_v51, 16  ;;  %v1283_v14 = vld [vmem:[%s1406_s9 + $0x34] sm:$0xf0] }
  0x3d   : > { %v340_v12 = vor.u32 %v339_v63, %v336_v62  ;;  %v357_v17 = vshll.u32 %v211_v38, 16  ;;  %v1575_v18 = vpack.c.b16 %v846_v10, %v845_v61  ;;  %v350_v15 = vrot.slane %v348_v11, 4  ;;  %v1203_v10 = vld [vmem:[%s1406_s9 + $0x70] sm:$0xf]  ;;  %v1287_v11 = vld [vmem:[%s1406_s9 + $0x74] sm:$0xf0] }
  0x3e   : > { %v313_v48 = vrot.slane %v312_v3, 4  ;;  %v1241_v19 = vrot.slane %v725_v2, 9  ;;  %v1242_v20 = vrot.slane %v726_v5, 9  ;;  %v332_v23 = vsel %vm1451_vm6, %v327_v57, %v331_v42  ;;  %v213_v42 = vld [vmem:[%s1406_s9 + $0x5c] sm:$0x1] }
  0x3f   : > { %v341_v24 = vrot.slane %v340_v12, 4  ;;  %v353_v25 = vrot.slane %v351_v0, 5  ;;  %v359_v13 = vrot.slane %v357_v17, 5  ;;  %v461_v55 = vunpack.c.l.b16 %v332_v23 }
  0x40   : > { %v318_v21 = vsel %vm1451_vm6, %v313_v48, %v317_v37  ;;  %v815_v1 = vsel %vm1408_vm3, %v1241_v19, %v814_v27  ;;  %v819_v28 = vsel %vm1408_vm3, %v1242_v20, %v818_v30  ;;  %v1188_v40 = vor.u32 %v1283_v14, %v1187_v26 }
  0x41   : > { %v346_v29 = vsel %vm1451_vm6, %v341_v24, %v345_v16  ;;  %v354_v31 = vor.u32 %v353_v25, %v350_v15  ;;  %v849_v3 = vunpack.c.l.b16 %v815_v1  ;;  %v850_v33 = vunpack.c.l.b16 %v819_v28  ;;  %v1191_v28 = vld [vmem:[%s1406_s9 + $0x40] sm:$0xf] }
  0x42   : > { %v460_v34 = vunpack.c.l.b16 %v318_v21  ;;  %v856_v56 = vpack.c.b16 %v844_v8, %v843_v7  ;;  %v1594_v30 = vunpack.c.l.b16 %v346_v29  ;;  %v362_v37 = vshrl.u32 %v188_v35, 16  ;;  %v727_v7 = vld [vmem:[%s1406_s9 + $0x70] sm:$0xe]  ;;  %v728_v8 = vld [vmem:[%s1406_s9 + $0x78] sm:$0xe] }
  0x43   : > { %1167 = vmatmul.msk.bf16.gmra.mxu0 %vm502_vm2, %v472_v54  ;;  %v355_v22 = vrot.slane %v354_v31, 4  ;;  %v1592_v27 = vpack.c.b16 %v850_v33, %v849_v3  ;;  %v376_v38 = vshrl.u32 %v189_v45, 16  ;;  %v1239_v46 = vrot.slane %v723_v43, 9  ;;  %v1284_v29 = vld [vmem:[%s1406_s9 + $0x44] sm:$0xf0] }
  0x44   : > { %v473_v39 = vpack.c.b16 %v461_v55, %v460_v34  ;;  %v806_v48 = vrot.slane %v212_v41, 5  ;;  %v810_v49 = vrot.slane %v213_v42, 5  ;;  %v364_v51 = vrot.slane %v362_v37, 4 }
  0x45   : > { %v360_v36 = vsel %vm1451_vm6, %v355_v22, %v359_v13  ;;  %v1240_v53 = vrot.slane %v724_v44, 9  ;;  %v371_v57 = vshll.u32 %v212_v41, 16  ;;  %v378_v59 = vrot.slane %v376_v38, 4 }
  0x46   : > { %v463_v4 = vunpack.c.l.b16 %v360_v36  ;;  %v807_v58 = vsel %vm1408_vm3, %v1239_v46, %v806_v48  ;;  %v379_v6 = vshll.u32 %v189_v45, 16  ;;  %v385_v61 = vshll.u32 %v213_v42, 16  ;;  %v1644_v45 = vld [vmem:[%s1720_s2] ss:$0 sm:$0xff] }
  0x47   : > { %1227 = vmatmul.msk.bf16.vlgmr.msrb.gmra.mxu3 %vm502_vm2, %v1200_v32  ;;  %v365_v32 = vshll.u32 %v188_v35, 16  ;;  %v811_v62 = vsel %vm1408_vm3, %v1240_v53, %v810_v49  ;;  %v847_v63 = vunpack.c.l.b16 %v807_v58  ;;  %v373_v5 = vrot.slane %v371_v57, 5 }
  0x48   : > { %v474_v52 = vpack.c.b16 %v463_v4, %v1594_v30  ;;  %v848_v12 = vunpack.c.l.b16 %v811_v62  ;;  %v381_v16 = vrot.slane %v379_v6, 5  ;;  %v1243_v0 = vrot.slane %v727_v7, 9 }
  0x49   : > { %v367_v54 = vrot.slane %v365_v32, 5  ;;  %v822_v15 = vrot.slane %v1491_v47, 5  ;;  %v1244_v19 = vrot.slane %v728_v8, 9  ;;  %v826_v20 = vrot.slane %v1495_v60, 5 }
  0x4a   : > { %v858_v21 = vpack.c.b16 %v848_v12, %v847_v63  ;;  %v382_v23 = vor.u32 %v381_v16, %v378_v59  ;;  %v387_v24 = vrot.slane %v385_v61, 5  ;;  %v1204_v25 = vor.u32 %v1287_v11, %v1203_v10 }
  0x4b   : > { %1224 = vmatmul.msk.bf16.gmra.mxu1 %vm502_vm2, %v1188_v40  ;;  %v368_v2 = vor.u32 %v367_v54, %v364_v51  ;;  %v823_v14 = vsel %vm1408_vm3, %v1243_v0, %v822_v15  ;;  %v827_v13 = vsel %vm1408_vm3, %v1244_v19, %v826_v20  ;;  %v1192_v55 = vor.u32 %v1284_v29, %v1191_v28 }
  0x4c   : > { %1272 = vmatmul.msk.bf16.gmra.mxu2 %vm502_vm2, %v856_v56  ;;  %v383_v47 = vrot.slane %v382_v23, 4  ;;  %v851_v1 = vunpack.c.l.b16 %v823_v14  ;;  %v852_v60 = vunpack.c.l.b16 %v827_v13  ;;  %v1285_v56 = vld [vmem:[%s1406_s9 + $0x54] sm:$0xf0] }
  0x4d   : > { %v369_v17 = vrot.slane %v368_v2, 4  ;;  %v1196_v50 = vor.u32 %v1285_v56, %v1195_v9 }
  0x4e   : > { %v388_v3 = vsel %vm1451_vm6, %v383_v47, %v387_v24  ;;  %v860_v33 = vpack.c.b16 %v852_v60, %v851_v1 }
  0x4f   : > { %v374_v26 = vsel %vm1451_vm6, %v369_v17, %v373_v5  ;;  %v465_v34 = vunpack.c.l.b16 %v388_v3 }
  0x50   : > { %v464_v31 = vunpack.c.l.b16 %v374_v26 }
  0x52   : > { %v475_v40 = vpack.c.b16 %v465_v34, %v464_v31 }
  0x53   : > { %1168 = vmatmul.msk.bf16.gmra.mxu0 %vm502_vm2, %v473_v39 }
  0x57   : > { %1228 = vmatmul.msk.bf16.gmra.mxu3 %vm502_vm2, %v1204_v25 }
  0x5b   : > { %1225 = vmatmul.msk.bf16.gmra.mxu1 %vm502_vm2, %v1192_v55 }
  0x5c   : > { %1273 = vmatmul.msk.bf16.gmra.mxu2 %vm502_vm2, %v1575_v18 }
  0x63   : > { %1169 = vmatmul.msk.bf16.gmra.mxu0 %vm502_vm2, %v474_v52 }
  0x67   : > { %1275 = vmatmul.msk.bf16.vlgmr.msra.gmra.mxu3 %vm502_vm2, %v1592_v27 }
  0x6b   : > { %1226 = vmatmul.msk.bf16.gmra.mxu1 %vm502_vm2, %v1196_v50 }
  0x6c   : > { %1274 = vmatmul.msk.bf16.gmra.mxu2 %vm502_vm2, %v858_v21 }
  0x73   : > { %1170 = vmatmul.msk.bf16.gmra.mxu0 %vm502_vm2, %v475_v40 }
  0x77   : > { %1276 = vmatmul.msk.bf16.gmra.mxu3 %vm502_vm2, %v860_v33 }
  0x98   : > { %v673_v22 = vpop.f32.mrf.mxu1 }
  0x9f   : > { %v918_v30 = vpop.f32.mrf.mxu2 }
  0xa0   : > { %v536_v18 = vpop.f32.mrf.mxu0  ;;  %v675_v36 = vpop.f32.mrf.mxu1 }
  0xa1   : > { %v674_v35 = vadd.f32 %v673_v22, %v536_v18 }
  0xa3   : > { %v958_v27 = vadd.f32 %v918_v30, %v674_v35 }
  0xa5   : > { %v978_v37 = vadd.f32 %v1644_v45, %v958_v27 }
  0xa7   : > { %vm994_vm7 = vcmp.ge.f32.partialorder %v978_v37, 0.0  ;;  %v1010_v32 = vmul.f32 0.2, %v978_v37  ;;  %v920_v38 = vpop.f32.mrf.mxu2 }
  0xa8   : > { %v538_v39 = vpop.f32.mrf.mxu0  ;;  %v678_v42 = vpop.f32.mrf.mxu1 }
  0xa9   : > { %v1026_v4 = vsel %vm994_vm7, %v978_v37, %v1010_v32  ;;  %v676_v41 = vadd.f32 %v675_v36, %v538_v39 }
  0xaa   : > { %v1042_v43 = vpack.c.bf16 %v1026_v4, %v1026_v4  ;;  %v1653_v44 = vpop.f32.mrf.mxu3 }
  0xab   : > { %v959_v46 = vadd.f32 %v920_v38, %v676_v41 }
  0xac   : > { %1059 = vst.msk [vmem:[%s1651_s23] sm:$0xf] %vm1058_vm8, %v1042_v43 }
  0xad   : > { %v979_v48 = vadd.f32 %v1644_v45, %v959_v46 }
  0xaf   : > { %vm995_vm9 = vcmp.ge.f32.partialorder %v979_v48, 0.0  ;;  %v1011_v49 = vmul.f32 0.2, %v979_v48  ;;  %v923_v51 = vpop.f32.mrf.mxu2 }
  0xb0   : > { %v541_v52 = vpop.f32.mrf.mxu0  ;;  %v680_v57 = vpop.f32.mrf.mxu1 }
  0xb1   : > { %v1027_v53 = vsel %vm995_vm9, %v979_v48, %v1011_v49  ;;  %v679_v54 = vadd.f32 %v678_v42, %v541_v52 }
  0xb2   : > { %v1043_v58 = vpack.c.bf16 %v1027_v53, %v1027_v53  ;;  %v1658_v59 = vpop.f32.mrf.mxu3 }
  0xb3   : > { %v960_v6 = vadd.f32 %v923_v51, %v679_v54 }
  0xb4   : > { %1060 = vst.msk [vmem:[%s1651_s23 + $0x4] sm:$0xf] %vm1058_vm8, %v1043_v58 }
  0xb5   : > { %v980_v61 = vadd.f32 %v1644_v45, %v960_v6 }
  0xb7   : > { %vm996_vm10 = vcmp.ge.f32.partialorder %v980_v61, 0.0  ;;  %v1012_v62 = vmul.f32 0.2, %v980_v61  ;;  %v925_v63 = vpop.f32.mrf.mxu2 }
  0xb8   : > { %v543_v2 = vpop.f32.mrf.mxu0  ;;  %v683_v8 = vpop.f32.mrf.mxu1 }
  0xb9   : > { %v1028_v5 = vsel %vm996_vm10, %v980_v61, %v1012_v62  ;;  %v681_v7 = vadd.f32 %v680_v57, %v543_v2 }
  0xba   : > { %v1044_v10 = vpack.c.bf16 %v1028_v5, %v1028_v5  ;;  %v1663_v11 = vpop.f32.mrf.mxu3 }
  0xbb   : > { %v961_v12 = vadd.f32 %v925_v63, %v681_v7 }
  0xbc   : > { %1061 = vst.msk [vmem:[%s1651_s23 + $0x8] sm:$0xf] %vm1058_vm8, %v1044_v10 }
  0xbd   : > { %v981_v16 = vadd.f32 %v1644_v45, %v961_v12 }
  0xbf   : > { %vm997_vm11 = vcmp.ge.f32.partialorder %v981_v16, 0.0  ;;  %v1013_v0 = vmul.f32 0.2, %v981_v16  ;;  %v928_v17 = vpop.f32.mrf.mxu2 }
  0xc0   : > { %v546_v15 = vpop.f32.mrf.mxu0  ;;  %v685_v21 = vpop.f32.mrf.mxu1 }
  0xc1   : > { %v1029_v19 = vsel %vm997_vm11, %v981_v16, %v1013_v0  ;;  %v684_v20 = vadd.f32 %v683_v8, %v546_v15 }
  0xc2   : > { %v1045_v23 = vpack.c.bf16 %v1029_v19, %v1029_v19  ;;  %v1668_v24 = vpop.f32.mrf.mxu3 }
  0xc3   : > { %v962_v25 = vadd.f32 %v928_v17, %v684_v20 }
  0xc4   : > { %1062 = vst.msk [vmem:[%s1651_s23 + $0xc] sm:$0xf] %vm1058_vm8, %v1045_v23 }
  0xc5   : > { %v982_v26 = vadd.f32 %v1644_v45, %v962_v25 }
  0xc7   : > { %vm998_vm12 = vcmp.ge.f32.partialorder %v982_v26, 0.0  ;;  %v1014_v14 = vmul.f32 0.2, %v982_v26  ;;  %v930_v13 = vpop.f32.mrf.mxu2 }
  0xc8   : > { %v548_v47 = vpop.f32.mrf.mxu0  ;;  %v688_v28 = vpop.f32.mrf.mxu1 }
  0xc9   : > { %v1030_v1 = vsel %vm998_vm12, %v982_v26, %v1014_v14  ;;  %v686_v60 = vadd.f32 %v685_v21, %v548_v47 }
  0xca   : > { %v1046_v29 = vpack.c.bf16 %v1030_v1, %v1030_v1  ;;  %v703_v31 = vpop.f32.mrf.mxu3 }
  0xcb   : > { %v963_v3 = vadd.f32 %v930_v13, %v686_v60  ;;  %v704_v2 = vadd.f32 %v703_v31, %v1653_v44 }
  0xcc   : > { %1063 = vst.msk [vmem:[%s1651_s23 + $0x10] sm:$0xf] %vm1058_vm8, %v1046_v29 }
  0xcd   : > { %v983_v33 = vadd.f32 %v1644_v45, %v963_v3 }
  0xcf   : > { %vm999_vm13 = vcmp.ge.f32.partialorder %v983_v33, 0.0  ;;  %v1015_v34 = vmul.f32 0.2, %v983_v33  ;;  %v933_v55 = vpop.f32.mrf.mxu2 }
  0xd0   : > { %v551_v40 = vpop.f32.mrf.mxu0  ;;  %v690_v50 = vpop.f32.mrf.mxu1 }
  0xd1   : > { %v1031_v9 = vsel %vm999_vm13, %v983_v33, %v1015_v34  ;;  %v689_v56 = vadd.f32 %v688_v28, %v551_v40 }
  0xd2   : > { %v1047_v22 = vpack.c.bf16 %v1031_v9, %v1031_v9  ;;  %v705_v30 = vpop.f32.mrf.mxu3 }
  0xd3   : > { %v964_v18 = vadd.f32 %v933_v55, %v689_v56  ;;  %v706_v23 = vadd.f32 %v705_v30, %v1658_v59 }
  0xd4   : > { %1064 = vst.msk [vmem:[%s1651_s23 + $0x14] sm:$0xf] %vm1058_vm8, %v1047_v22 }
  0xd5   : > { %v984_v35 = vadd.f32 %v1644_v45, %v964_v18 }
  0xd7   : > { %vm1000_vm14 = vcmp.ge.f32.partialorder %v984_v35, 0.0  ;;  %v1016_v36 = vmul.f32 0.2, %v984_v35  ;;  %v935_v27 = vpop.f32.mrf.mxu2 }
  0xd8   : > { %v553_v37 = vpop.f32.mrf.mxu0  ;;  %v693_v39 = vpop.f32.mrf.mxu1 }
  0xd9   : > { %v1032_v32 = vsel %vm1000_vm14, %v984_v35, %v1016_v36  ;;  %v691_v38 = vadd.f32 %v690_v50, %v553_v37 }
  0xda   : > { %v1048_v4 = vpack.c.bf16 %v1032_v32, %v1032_v32  ;;  %v708_v41 = vpop.f32.mrf.mxu3 }
  0xdb   : > { %v965_v42 = vadd.f32 %v935_v27, %v691_v38  ;;  %v709_v40 = vadd.f32 %v708_v41, %v1663_v11 }
  0xdc   : > { %1065 = vst.msk [vmem:[%s1651_s23 + $0x18] sm:$0xf] %vm1058_vm8, %v1048_v4 }
  0xdd   : > { %v985_v43 = vadd.f32 %v1644_v45, %v965_v42 }
  0xdf   : > { %vm1001_vm15 = vcmp.ge.f32.partialorder %v985_v43, 0.0  ;;  %v1017_v46 = vmul.f32 0.2, %v985_v43  ;;  %v938_v48 = vpop.f32.mrf.mxu2 }
  0xe0   : > { %v556_v49 = vpop.f32.mrf.mxu0  ;;  %v695_v58 = vpop.f32.mrf.mxu1 }
  0xe1   : > { %v1033_v51 = vsel %vm1001_vm15, %v985_v43, %v1017_v46  ;;  %v694_v52 = vadd.f32 %v693_v39, %v556_v49 }
  0xe2   : > { %v1049_v53 = vpack.c.bf16 %v1033_v51, %v1033_v51  ;;  %v1682_v54 = vpop.f32.mrf.mxu3 }
  0xe3   : > { %v966_v57 = vadd.f32 %v938_v48, %v694_v52  ;;  %v711_v38 = vadd.f32 %v1682_v54, %v1668_v24 }
  0xe4   : > { %1066 = vst.msk [vmem:[%s1651_s23 + $0x1c] sm:$0xf] %vm1058_vm8, %v1049_v53 }
  0xe5   : > { %v986_v6 = vadd.f32 %v1644_v45, %v966_v57 }
  0xe7   : > { %vm1002_vm0 = vcmp.ge.f32.partialorder %v986_v6, 0.0  ;;  %v1018_v61 = vmul.f32 0.2, %v986_v6  ;;  %v940_v62 = vpop.f32.mrf.mxu2 }
  0xe8   : > { %v558_v63 = vpop.f32.mrf.mxu0  ;;  %v698_v15 = vpop.f32.mrf.mxu1 }
  0xe9   : > { %v1034_v5 = vsel %vm1002_vm0, %v986_v6, %v1018_v61  ;;  %v696_v7 = vadd.f32 %v695_v58, %v558_v63 }
  0xea   : > { %v1050_v8 = vpack.c.bf16 %v1034_v5, %v1034_v5  ;;  %v948_v10 = vpop.f32.mrf.mxu3 }
  0xeb   : > { %v970_v12 = vadd.f32 %v948_v10, %v704_v2  ;;  %v967_v16 = vadd.f32 %v940_v62, %v696_v7 }
  0xec   : > { %1067 = vst.msk [vmem:[%s1651_s23 + $0x20] sm:$0xf] %vm1058_vm8, %v1050_v8 }
  0xed   : > { %v990_v0 = vadd.f32 %v1644_v45, %v970_v12  ;;  %v987_v17 = vadd.f32 %v1644_v45, %v967_v16 }
  0xef   : > { %vm1006_vm1 = vcmp.ge.f32.partialorder %v990_v0, 0.0  ;;  %v1022_v19 = vmul.f32 0.2, %v990_v0  ;;  %vm1003_vm2 = vcmp.ge.f32.partialorder %v987_v17, 0.0  ;;  %v1019_v20 = vmul.f32 0.2, %v987_v17  ;;  %v943_v44 = vpop.f32.mrf.mxu2 }
  0xf0   : > { %v561_v21 = vpop.f32.mrf.mxu0  ;;  %v700_v33 = vpop.f32.mrf.mxu1 }
  0xf1   : > { %v1038_v25 = vsel %vm1006_vm1, %v990_v0, %v1022_v19  ;;  %v1035_v26 = vsel %vm1003_vm2, %v987_v17, %v1019_v20  ;;  %v699_v14 = vadd.f32 %v698_v15, %v561_v21 }
  0xf2   : > { %v1054_v13 = vpack.c.bf16 %v1038_v25, %v1038_v25  ;;  %v1051_v47 = vpack.c.bf16 %v1035_v26, %v1035_v26  ;;  %v950_v1 = vpop.f32.mrf.mxu3 }
  0xf3   : > { %v971_v60 = vadd.f32 %v950_v1, %v706_v23  ;;  %v968_v28 = vadd.f32 %v943_v44, %v699_v14 }
  0xf4   : > { %1071 = vst.msk [vmem:[%s1651_s23 + $0x30] sm:$0xf] %vm1058_vm8, %v1054_v13 }
  0xf5   : > { %1068 = vst.msk [vmem:[%s1651_s23 + $0x24] sm:$0xf] %vm1058_vm8, %v1051_v47  ;;  %v991_v29 = vadd.f32 %v1644_v45, %v971_v60  ;;  %v988_v31 = vadd.f32 %v1644_v45, %v968_v28 }
  0xf7   : > { %vm1007_vm3 = vcmp.ge.f32.partialorder %v991_v29, 0.0  ;;  %v1023_v3 = vmul.f32 0.2, %v991_v29  ;;  %vm1004_vm4 = vcmp.ge.f32.partialorder %v988_v31, 0.0  ;;  %v1020_v59 = vmul.f32 0.2, %v988_v31  ;;  %v945_v55 = vpop.f32.mrf.mxu2 }
  0xf8   : > { %v563_v34 = vpop.f32.mrf.mxu0 }
  0xf9   : > { %v1039_v9 = vsel %vm1007_vm3, %v991_v29, %v1023_v3  ;;  %v1036_v56 = vsel %vm1004_vm4, %v988_v31, %v1020_v59  ;;  %v701_v50 = vadd.f32 %v700_v33, %v563_v34 }
  0xfa   : > { %v1055_v22 = vpack.c.bf16 %v1039_v9, %v1039_v9  ;;  %v1052_v30 = vpack.c.bf16 %v1036_v56, %v1036_v56  ;;  %v953_v18 = vpop.f32.mrf.mxu3 }
  0xfb   : > { %v972_v35 = vadd.f32 %v953_v18, %v709_v40  ;;  %v969_v36 = vadd.f32 %v945_v55, %v701_v50 }
  0xfc   : > { %1072 = vst.msk [vmem:[%s1651_s23 + $0x34] sm:$0xf] %vm1058_vm8, %v1055_v22 }
  0xfd   : > { %1069 = vst.msk [vmem:[%s1651_s23 + $0x28] sm:$0xf] %vm1058_vm8, %v1052_v30  ;;  %v992_v27 = vadd.f32 %v1644_v45, %v972_v35  ;;  %v989_v37 = vadd.f32 %v1644_v45, %v969_v36 }
  0xff   : > { %vm1008_vm5 = vcmp.ge.f32.partialorder %v992_v27, 0.0  ;;  %v1024_v11 = vmul.f32 0.2, %v992_v27  ;;  %vm1005_vm6 = vcmp.ge.f32.partialorder %v989_v37, 0.0  ;;  %v1021_v32 = vmul.f32 0.2, %v989_v37 }
 0x101   : > { %v1040_v39 = vsel %vm1008_vm5, %v992_v27, %v1024_v11  ;;  %v1037_v4 = vsel %vm1005_vm6, %v989_v37, %v1021_v32 }
 0x102   : > { %v1056_v41 = vpack.c.bf16 %v1040_v39, %v1040_v39  ;;  %v1053_v42 = vpack.c.bf16 %v1037_v4, %v1037_v4  ;;  %v955_v43 = vpop.f32.mrf.mxu3 }
 0x103   : > { %v973_v46 = vadd.f32 %v955_v43, %v711_v38 }
 0x104   : > { %1073 = vst.msk [vmem:[%s1651_s23 + $0x38] sm:$0xf] %vm1058_vm8, %v1056_v41 }
 0x105   : > { %1070 = vst.msk [vmem:[%s1651_s23 + $0x2c] sm:$0xf] %vm1058_vm8, %v1053_v42  ;;  %v993_v48 = vadd.f32 %v1644_v45, %v973_v46 }
 0x107   : > { %vm1009_vm7 = vcmp.ge.f32.partialorder %v993_v48, 0.0  ;;  %v1025_v49 = vmul.f32 0.2, %v993_v48 }
 0x109   : > { %v1041_v51 = vsel %vm1009_vm7, %v993_v48, %v1025_v49 }
 0x10a   : > { %v1057_v52 = vpack.c.bf16 %v1041_v51, %v1041_v51 }
 0x10c   : > { %1074 = vst.msk [vmem:[%s1651_s23 + $0x3c] sm:$0xf] %vm1058_vm8, %v1057_v52 }
 0x10d PF: > { %s13_s12 = sadd.s32 1, %s1327_s12  }
 0x10e   : > { %p10_p4 = scmp.ge.s32.totalorder %s13_s12, 4  }
 0x110   :  { %12 = sbr.rel (!%p10_p4) target bundleno = 1 (0x1), region = 64 }

// kernel: ultrasound_encoder_forward.10
= control target key start
LH: loop header
LB: loop body
LE: loop exit
PB: predicated region body
PF: predicated region fallthrough
CT: control target
= control target key end

     0   :  { %s1265_s12 = smov 0   ;;  %s1630_s0 = inlined_call_operand.vmem [shape: bf16[32,2,5,64], index: 0, kind: input, shape index: {}]   ;;  %s1631_s1 = inlined_call_operand.vmem [shape: bf16[3,64,128], index: 1, kind: input, shape index: {}]   ;;  %s1632_s2 = inlined_call_operand.vmem [shape: f32[1,128], index: 2, kind: input, shape index: {}]   ;;  %s1633_s3 = inlined_call_operand.vmem [shape: bf16[32,4,128], index: 3, kind: output, shape index: {}]  }
   0x1 LB: > { %s1099_s13 = sadd.s32 4294967295, %s1243_s12   ;;  %p1103_p0 = scmp.ge.s32.totalorder %s1243_s12, 1  ;;  %s1243_s12 = sphi %s1265_s12, %s13_s12  }
   0x2   : > { %p139_p1 = scmp.lt.s32.totalorder %s1243_s12, 3 }
   0x4   : > { %p140_p2 = pnand %p1103_p0, %p139_p1 }
   0x5   : > { %s1104_s16 = sshll.u32 (!%p140_p2), %s1099_s13, 4 }
   0x6   : > { %143 = sbr.rel (%p140_p2) target bundleno = 269 (0x10d), region = 32  ;;  %p165_p3 = scmp.lt.s32.totalorder (!%p140_p2), %s1104_s16, 31 }
   0xb   : > { %v1211_v0 = vld [vmem:[%s1631_s1 + $0x38] sm:$0xff]  ;;  %v1210_v2 = vld [vmem:[%s1631_s1 + $0x30] sm:$0xff]  ;;  %s1641_s16 = smov (!%p165_p3, %s1104_s16), 31  ;;  %v1209_v5 = vld [vmem:[%s1631_s1 + $0x28] sm:$0xff]  ;;  %vm295_vm0 = vcmask 523264   ;;  %vm485_vm1 = vcmask 1041408  }
   0xc   : > { %v1207_v1 = vld [vmem:[%s1631_s1 + $0x18] sm:$0xff]  ;;  %308 = vmatpush.bf16.msra.mxu0 %v1211_v0  ;;  %1216 = vmatpush.bf16.msra.mxu3 %v1211_v0  ;;  %s1203_s23 = sshll.u32 %s1641_s16, 3  ;;  %v1206_v4 = vld [vmem:[%s1631_s1 + $0x10] sm:$0xff]  ;;  %v1205_v10 = vld [vmem:[%s1631_s1 + $0x8] sm:$0xff]  ;;  %vm489_vm2 = vcmask 1043458   ;;  %s1108_s20 = sshll.u32 %s1641_s16, 1 }
   0xd   : > { %v1285_v3 = vld [vmem:[%s1631_s1 + $0x58] sm:$0xff]  ;;  %1220 = vmatpush.bf16.msra.mxu1 %v1207_v1  ;;  %s1300_s30 = scalar_lea.vmem %s1630_s0, %s1203_s23  ;;  %v1208_v11 = vld [vmem:[%s1631_s1 + $0x20] sm:$0xff]  ;;  %v1315_v12 = vld [vmem:[%s1631_s1 + $0x50] sm:$0xff]  ;;  %vm583_vm3 = vsmask.f32 1280  ;;  %s1595_s23 = scalar_lea.vmem %s1633_s3, %s1108_s20 }
   0xe   : > { %1224 = vmatpush.bf16.msra.mxu2 %v1285_v3  ;;  %v1109_v6 = vld [vmem:[%s1300_s30 + $0x4] sm:$0x3]  ;;  %v1110_v7 = vld [vmem:[%s1300_s30 + $0xc] sm:$0x3]  ;;  %v1111_v8 = vld [vmem:[%s1300_s30 + $0x14] sm:$0x3] }
   0xf   : > { %v1112_v9 = vld [vmem:[%s1300_s30 + $0x1c] sm:$0x3]  ;;  %229 = vst [vmem:[#allocation1] ss:$4 sm:$0xff] %v1109_v6  ;;  %v1113_v13 = vld [vmem:[%s1300_s30 + $0x24] sm:$0x3] }
  0x10   : > { %309 = vmatpush.bf16.msra.mxu0 %v1210_v2  ;;  %1217 = vmatpush.bf16.msra.mxu3 %v1210_v2  ;;  %232 = vst [vmem:[#allocation1 + $0x1] ss:$4 sm:$0xff] %v1110_v7  ;;  %v1114_v14 = vld [vmem:[%s1300_s30 + $0x2c] sm:$0x3]  ;;  %v1115_v15 = vld [vmem:[%s1300_s30 + $0x34] sm:$0x3] }
  0x11   : > { %1221 = vmatpush.bf16.msra.mxu1 %v1206_v4  ;;  %235 = vst [vmem:[#allocation1 + $0x2] ss:$4 sm:$0xff] %v1111_v8  ;;  %v1204_v16 = vld [vmem:[%s1631_s1] sm:$0xff]  ;;  %v1116_v17 = vld [vmem:[%s1300_s30 + $0x3c] sm:$0x3]  ;;  %v1328_v18 = vld [vmem:[%s1631_s1 + $0x48] sm:$0xff] }
  0x12   : > { %238 = vst [vmem:[#allocation1 + $0x3] ss:$4 sm:$0xff] %v1112_v9  ;;  %1225 = vmatpush.bf16.msra.mxu2 %v1315_v12  ;;  %v1117_v19 = vld [vmem:[%s1300_s30 + $0x44] sm:$0x3]  ;;  %v1118_v20 = vld [vmem:[%s1300_s30 + $0x4c] sm:$0x3] }
  0x13   : > { %241 = vst [vmem:[#allocation1 + $0x20] ss:$4 sm:$0xff] %v1113_v13  ;;  %v1119_v22 = vld [vmem:[%s1300_s30 + $0x54] sm:$0x3]  ;;  %v1120_v23 = vld [vmem:[%s1300_s30 + $0x5c] sm:$0x3] }
  0x14   : > { %310 = vmatpush.bf16.msra.mxu0 %v1209_v5  ;;  %1218 = vmatpush.bf16.msra.mxu3 %v1209_v5  ;;  %244 = vst [vmem:[#allocation1 + $0x21] ss:$4 sm:$0xff] %v1114_v14  ;;  %v1339_v24 = vld [vmem:[%s1631_s1 + $0x40] sm:$0xff]  ;;  %v442_v27 = vld [vmem:[%s1300_s30 + $0x28] sm:$0x7] }
  0x15   : > { %1222 = vmatpush.bf16.msra.mxu1 %v1205_v10  ;;  %247 = vst [vmem:[#allocation1 + $0x22] ss:$4 sm:$0xff] %v1115_v15  ;;  %v1121_v25 = vld [vmem:[%s1300_s30 + $0x64] sm:$0x3]  ;;  %v441_v26 = vld [vmem:[%s1300_s30 + $0x20] sm:$0x7] }
  0x16   : > { %250 = vst [vmem:[#allocation1 + $0x23] ss:$4 sm:$0xff] %v1116_v17  ;;  %1226 = vmatpush.bf16.msra.mxu2 %v1328_v18  ;;  %v1122_v28 = vld [vmem:[%s1300_s30 + $0x6c] sm:$0x3]  ;;  %v1123_v29 = vld [vmem:[%s1300_s30 + $0x74] sm:$0x3] }
  0x17   : > { %v1124_v30 = vld [vmem:[%s1300_s30 + $0x7c] sm:$0x3]  ;;  %v443_v31 = vld [vmem:[%s1300_s30 + $0x30] sm:$0x7]  ;;  %v444_v32 = vld [vmem:[%s1300_s30 + $0x38] sm:$0x7] }
  0x18   : > { %311 = vmatpush.bf16.msra.mxu0 %v1208_v11  ;;  %1219 = vmatpush.bf16.msra.mxu3 %v1208_v11  ;;  %v473_v33 = vrot.slane %v441_v26, 2  ;;  %v474_v35 = vrot.slane %v442_v27, 2  ;;  %v449_v36 = vld [vmem:[%s1300_s30 + $0x60] sm:$0x7]  ;;  %v450_v37 = vld [vmem:[%s1300_s30 + $0x68] sm:$0x7] }
  0x19   : > { %1223 = vmatpush.bf16.msra.mxu1 %v1204_v16  ;;  %v251_v21 = vld.sshfl [vmem:[#allocation1] sm:$0xff pattern:$0x73625140]  ;;  %v451_v38 = vld [vmem:[%s1300_s30 + $0x70] sm:$0x7]  ;;  %v475_v39 = vrot.slane %v443_v31, 2 }
  0x1a   : > { %254 = vst [vmem:[#allocation1] ss:$4 sm:$0xff] %v1117_v19  ;;  %1227 = vmatpush.bf16.msra.mxu2 %v1339_v24  ;;  %v476_v40 = vrot.slane %v444_v32, 2  ;;  %v178_v41 = vld [vmem:[%s1300_s30] sm:$0x3]  ;;  %v513_v43 = vsel %vm485_vm1, %v441_v26, %v473_v33  ;;  %v481_v45 = vrot.slane %v449_v36, 2  ;;  %v514_v47 = vsel %vm489_vm2, %v441_v26, %v473_v33 }
  0x1b   : > { %1149 = vmatmul.msk.bf16.vlgmr.msra.gmra.mxu0 %vm295_vm0, %v251_v21  ;;  %256 = vst [vmem:[#allocation1 + $0x1] ss:$4 sm:$0xff] %v1118_v20  ;;  %v179_v42 = vld [vmem:[%s1300_s30 + $0x8] sm:$0x3]  ;;  %v1358_v44 = vld [vmem:[%s1300_s30 + $0x78] sm:$0x7]  ;;  %v520_v48 = vsel %vm489_vm2, %v442_v27, %v474_v35  ;;  %v519_v52 = vsel %vm485_vm1, %v442_v27, %v474_v35  ;;  %v526_v53 = vsel %vm489_vm2, %v443_v31, %v475_v39 }
  0x1c   : > { %412 = vmatpush.bf16.msrb.mxu0 %v1207_v1  ;;  %258 = vst [vmem:[#allocation1 + $0x2] ss:$4 sm:$0xff] %v1119_v22  ;;  %v482_v46 = vrot.slane %v450_v37, 2  ;;  %v180_v49 = vld [vmem:[%s1300_s30 + $0x10] sm:$0x3]  ;;  %v483_v51 = vrot.slane %v451_v38, 2  ;;  %v1369_v54 = vsel %vm489_vm2, %v444_v32, %v476_v40  ;;  %v525_v56 = vsel %vm485_vm1, %v443_v31, %v475_v39 }
  0x1d   : > { %260 = vst [vmem:[#allocation1 + $0x3] ss:$4 sm:$0xff] %v1120_v23  ;;  %v252_v34 = vld.sshfl [vmem:[#allocation1 + $0x20] sm:$0xff pattern:$0x73625140]  ;;  %v1374_v57 = vsel %vm485_vm1, %v444_v32, %v476_v40  ;;  %v1377_v58 = vsel %vm489_vm2, %v449_v36, %v481_v45  ;;  %v484_v61 = vrot.slane %v1358_v44, 2 }
  0x1e   : > { %1150 = vmatmul.msk.bf16.vlgmr.msra.gmra.mxu3 %vm295_vm0, %v252_v34  ;;  %262 = vst [vmem:[#allocation1 + $0x20] ss:$4 sm:$0xff] %v1121_v25  ;;  %v181_v55 = vld [vmem:[%s1300_s30 + $0x18] sm:$0x3]  ;;  %v1380_v59 = vsel %vm489_vm2, %v450_v37, %v482_v46  ;;  %v182_v60 = vld [vmem:[%s1300_s30 + $0x20] sm:$0x3]  ;;  %v1385_v0 = vsel %vm489_vm2, %v451_v38, %v483_v51  ;;  %v1396_v8 = vsel %vm485_vm1, %v450_v37, %v482_v46 }
  0x1f   : > { %264 = vst [vmem:[#allocation1 + $0x21] ss:$4 sm:$0xff] %v1122_v28  ;;  %v516_v62 = vrot.slane %v514_v47, 2  ;;  %v522_v63 = vrot.slane %v520_v48, 2  ;;  %v183_v1 = vld [vmem:[%s1300_s30 + $0x28] sm:$0x3]  ;;  %v1408_v19 = vsel %vm489_vm2, %v1358_v44, %v484_v61 }
  0x20   : > { %413 = vmatpush.bf16.msrb.mxu0 %v1206_v4  ;;  %266 = vst [vmem:[#allocation1 + $0x22] ss:$4 sm:$0xff] %v1123_v29  ;;  %v528_v2 = vrot.slane %v526_v53, 2  ;;  %v1390_v4 = vsel %vm485_vm1, %v449_v36, %v481_v45  ;;  %v642_v5 = vshrl.u32 %v513_v43, 16  ;;  %v184_v6 = vld [vmem:[%s1300_s30 + $0x30] sm:$0x3] }
  0x21   : > { %268 = vst [vmem:[#allocation1 + $0x23] ss:$4 sm:$0xff] %v1124_v30  ;;  %v564_v7 = vrot.slane %v1377_v58, 2  ;;  %v570_v9 = vrot.slane %v1380_v59, 2  ;;  %v576_v11 = vrot.slane %v1385_v0, 2  ;;  %v645_v13 = vshll.u32 %v513_v43, 16 }
  0x22   : > { %vm584_vm4 = vsmask.f32 3336  ;;  %vm586_vm5 = vsmask.f32 5392  ;;  %v644_v15 = vrot.slane %v642_v5, 6  ;;  %v658_v17 = vshll.u32 %v519_v52, 16 }
  0x23   : > { %v647_v20 = vrot.slane %v645_v13, 7  ;;  %v668_v21 = vshrl.u32 %v525_v56, 16  ;;  %v671_v22 = vshll.u32 %v525_v56, 16  ;;  %v186_v23 = vld [vmem:[%s1300_s30 + $0x40] sm:$0x3]  ;;  %v1412_v25 = vshll.u32 %v516_v62, 16  ;;  %vm1440_vm7 = vmor %vm583_vm3, %vm584_vm4 }
  0x24   : > { %414 = vmatpush.bf16.msrb.mxu0 %v1205_v10  ;;  %v1363_v50 = vld.sshfl [vmem:[#allocation1] sm:$0xff pattern:$0x73625140]  ;;  %v185_v10 = vld [vmem:[%s1300_s30 + $0x38] sm:$0x3]  ;;  %v660_v27 = vrot.slane %v658_v17, 7  ;;  %vm1455_vm8 = vmor %vm1440_vm7, %vm586_vm5 }
  0x25   : > { %334 = vst [vmem:[#allocation1] ss:$4 sm:$0xff] %v178_v41  ;;  %v1414_v28 = vshll.u32 %v522_v63, 16  ;;  %v187_v29 = vld [vmem:[%s1300_s30 + $0x48] sm:$0x3]  ;;  %v670_v30 = vrot.slane %v668_v21, 6  ;;  %v648_v35 = vor.u32 %v647_v20, %v644_v15 }
  0x26   : > { %337 = vst [vmem:[#allocation1 + $0x1] ss:$4 sm:$0xff] %v179_v42  ;;  %v673_v31 = vrot.slane %v671_v22, 7  ;;  %v1417_v32 = vshll.u32 %v528_v2, 16  ;;  %v681_v33 = vshrl.u32 %v1374_v57, 16  ;;  %v684_v36 = vshll.u32 %v1374_v57, 16 }
  0x27   : > { %340 = vst [vmem:[#allocation1 + $0x2] ss:$4 sm:$0xff] %v180_v49  ;;  %v188_v34 = vld [vmem:[%s1300_s30 + $0x50] sm:$0x3]  ;;  %vm588_vm6 = vsmask.f32 7448 }
  0x28   : > { %415 = vmatpush.bf16.msrb.mxu0 %v1204_v16  ;;  %343 = vst [vmem:[#allocation1 + $0x3] ss:$4 sm:$0xff] %v181_v55  ;;  %v1401_v14 = vld.sshfl [vmem:[#allocation1 + $0x20] sm:$0xff pattern:$0x73625140]  ;;  %v655_v16 = vshrl.u32 %v519_v52, 16  ;;  %vm1470_vm9 = vmor %vm1455_vm8, %vm588_vm6 }
  0x29   : > { %346 = vst [vmem:[#allocation1 + $0x20] ss:$4 sm:$0xff] %v182_v60  ;;  %v189_v37 = vld [vmem:[%s1300_s30 + $0x58] sm:$0x3]  ;;  %v683_v40 = vrot.slane %v681_v33, 6  ;;  %v746_v42 = vshrl.u32 %v1390_v4, 16 }
  0x2a   : > { %349 = vst [vmem:[#allocation1 + $0x21] ss:$4 sm:$0xff] %v183_v1  ;;  %v657_v26 = vrot.slane %v655_v16, 6  ;;  %v582_v43 = vrot.slane %v1408_v19, 2  ;;  %v686_v45 = vrot.slane %v684_v36, 7  ;;  %v749_v46 = vshll.u32 %v1390_v4, 16 }
  0x2b   : > { %352 = vst [vmem:[#allocation1 + $0x22] ss:$4 sm:$0xff] %v184_v6  ;;  %v190_v47 = vld [vmem:[%s1300_s30 + $0x60] sm:$0x3]  ;;  %v666_v49 = vrot.slane %v1414_v28, 7  ;;  %v679_v52 = vrot.slane %v1417_v32, 7 }
  0x2c   : > { %886 = vmatpush.bf16.msra.mxu0 %v1285_v3  ;;  %v534_v3 = vrot.slane %v1369_v54, 2  ;;  %355 = vst [vmem:[#allocation1 + $0x23] ss:$4 sm:$0xff] %v185_v10  ;;  %v661_v39 = vor.u32 %v660_v27, %v657_v26  ;;  %v748_v53 = vrot.slane %v746_v42, 6  ;;  %v191_v54 = vld [vmem:[%s1300_s30 + $0x68] sm:$0x3]  ;;  %v687_v55 = vor.u32 %v686_v45, %v683_v40 }
  0x2d   : > { %v755_v56 = vshll.u32 %v564_v7, 16  ;;  %v192_v57 = vld [vmem:[%s1300_s30 + $0x70] sm:$0x3]  ;;  %v649_v58 = vrot.slane %v648_v35, 2  ;;  %v762_v62 = vshll.u32 %v1396_v8, 16  ;;  %v768_v4 = vshll.u32 %v570_v9, 16 }
  0x2e   : > { %v1427_v41 = vshll.u32 %v534_v3, 16  ;;  %1151 = vmatmul.msk.bf16.gmra.mxu3 %vm295_vm0, %v1363_v50  ;;  %v751_v50 = vrot.slane %v749_v46, 7  ;;  %v662_v60 = vrot.slane %v661_v39, 2  ;;  %v193_v63 = vld [vmem:[%s1300_s30 + $0x78] sm:$0x3]  ;;  %v688_v13 = vrot.slane %v687_v55, 2 }
  0x2f   : > { %v757_v15 = vrot.slane %v755_v56, 7  ;;  %v781_v17 = vshll.u32 %v576_v11, 16  ;;  %v437_v19 = vld [vmem:[%s1300_s30] sm:$0x7]  ;;  %v438_v22 = vld [vmem:[%s1300_s30 + $0x8] sm:$0x7] }
  0x30   : > { %887 = vmatpush.bf16.msra.mxu0 %v1315_v12  ;;  %v1404_v12 = vsel %vm485_vm1, %v451_v38, %v483_v51  ;;  %v356_v38 = vld.sshfl [vmem:[#allocation1] sm:$0xff pattern:$0x73625140]  ;;  %v674_v51 = vor.u32 %v673_v31, %v670_v30  ;;  %v752_v2 = vor.u32 %v751_v50, %v748_v53  ;;  %v770_v11 = vrot.slane %v768_v4, 7  ;;  %v439_v32 = vld [vmem:[%s1300_s30 + $0x10] sm:$0x7] }
  0x31   : > { %1169 = vmatmul.msk.bf16.vlgmr.msrb.gmra.mxu0 %vm295_vm0, %v356_v38  ;;  %359 = vst [vmem:[#allocation1] ss:$4 sm:$0xff] %v186_v23  ;;  %v772_v5 = vshrl.u32 %v1404_v12, 16  ;;  %v775_v10 = vshll.u32 %v1404_v12, 16  ;;  %v783_v23 = vrot.slane %v781_v17, 7  ;;  %v667_v31 = vsel %vm1470_vm9, %v662_v60, %v666_v49 }
  0x32   : > { %361 = vst [vmem:[#allocation1 + $0x1] ss:$4 sm:$0xff] %v187_v29  ;;  %v675_v7 = vrot.slane %v674_v51, 2  ;;  %v753_v0 = vrot.slane %v752_v2, 2  ;;  %v440_v33 = vld [vmem:[%s1300_s30 + $0x18] sm:$0x7] }
  0x33   : > { %363 = vst [vmem:[#allocation1 + $0x2] ss:$4 sm:$0xff] %v188_v34  ;;  %v357_v6 = vld.sshfl [vmem:[#allocation1 + $0x20] sm:$0xff pattern:$0x73625140]  ;;  %v774_v16 = vrot.slane %v772_v5, 6 }
  0x34   : > { %888 = vmatpush.bf16.msra.mxu0 %v1328_v18  ;;  %v1423_v18 = vsel %vm485_vm1, %v1358_v44, %v484_v61  ;;  %v653_v44 = vrot.slane %v1412_v25, 7  ;;  %v692_v61 = vrot.slane %v1427_v41, 7  ;;  %365 = vst [vmem:[#allocation1 + $0x3] ss:$4 sm:$0xff] %v189_v37  ;;  %1170 = vmatmul.msk.bf16.vlgmr.msra.gmra.mxu1 %vm295_vm0, %v357_v6  ;;  %v777_v12 = vrot.slane %v775_v10, 7 }
  0x35   : > { %367 = vst [vmem:[#allocation1 + $0x20] ss:$4 sm:$0xff] %v190_v47  ;;  %v785_v20 = vshrl.u32 %v1423_v18, 16  ;;  %v788_v21 = vshll.u32 %v1423_v18, 16  ;;  %v794_v25 = vshll.u32 %v582_v43, 16  ;;  %v680_v34 = vsel %vm1470_vm9, %v675_v7, %v679_v52 }
  0x36   : > { %369 = vst [vmem:[#allocation1 + $0x21] ss:$4 sm:$0xff] %v191_v54  ;;  %v778_v27 = vor.u32 %v777_v12, %v774_v16  ;;  %v654_v30 = vsel %vm1470_vm9, %v649_v58, %v653_v44  ;;  %v445_v36 = vld [vmem:[%s1300_s30 + $0x40] sm:$0x7]  ;;  %v446_v37 = vld [vmem:[%s1300_s30 + $0x48] sm:$0x7]  ;;  %v693_v39 = vsel %vm1470_vm9, %v688_v13, %v692_v61  ;;  %v1491_v40 = vsel %vm1470_vm9, %v753_v0, %v757_v15 }
  0x37   : > { %371 = vst [vmem:[#allocation1 + $0x22] ss:$4 sm:$0xff] %v192_v57  ;;  %v787_v28 = vrot.slane %v785_v20, 6  ;;  %v790_v29 = vrot.slane %v788_v21, 7  ;;  %v469_v38 = vrot.slane %v437_v19, 2  ;;  %v796_v41 = vrot.slane %v794_v25, 7 }
  0x38   : > { %889 = vmatpush.bf16.msra.mxu0 %v1339_v24  ;;  %v759_v24 = vshrl.u32 %v1396_v8, 16  ;;  %v764_v8 = vrot.slane %v762_v62, 7  ;;  %373 = vst [vmem:[#allocation1 + $0x23] ss:$4 sm:$0xff] %v193_v63  ;;  %v779_v18 = vrot.slane %v778_v27, 2  ;;  %v470_v44 = vrot.slane %v438_v22, 2 }
  0x39   : > { %v791_v35 = vor.u32 %v790_v29, %v787_v28  ;;  %v447_v42 = vld [vmem:[%s1300_s30 + $0x50] sm:$0x7]  ;;  %v1495_v43 = vld [vmem:[%s1300_s30 + $0x58] sm:$0x7]  ;;  %v471_v48 = vrot.slane %v439_v32, 2  ;;  %v472_v49 = vrot.slane %v440_v33, 2  ;;  %v488_v55 = vsel %vm485_vm1, %v437_v19, %v469_v38 }
  0x3a   : > { %v761_v3 = vrot.slane %v759_v24, 6  ;;  %v1503_v46 = vsel %vm1470_vm9, %v779_v18, %v783_v23  ;;  %v477_v51 = vrot.slane %v445_v36, 2  ;;  %v478_v52 = vrot.slane %v446_v37, 2 }
  0x3b   : > { %v792_v47 = vrot.slane %v791_v35, 2  ;;  %v479_v53 = vrot.slane %v447_v42, 2  ;;  %v480_v54 = vrot.slane %v1495_v43, 2  ;;  %v490_v50 = vsel %vm489_vm2, %v437_v19, %v469_v38  ;;  %v374_v19 = vld.sshfl [vmem:[#allocation1] sm:$0xff pattern:$0x73625140] }
  0x3c   : > { %v765_v9 = vor.u32 %v764_v8, %v761_v3  ;;  %v496_v56 = vsel %vm489_vm2, %v438_v22, %v470_v44  ;;  %v492_v58 = vrot.slane %v490_v50, 2  ;;  %v495_v60 = vsel %vm485_vm1, %v438_v22, %v470_v44 }
  0x3d   : > { %v1513_v57 = vsel %vm1470_vm9, %v792_v47, %v796_v41  ;;  %v502_v61 = vsel %vm489_vm2, %v439_v32, %v471_v48  ;;  %v498_v62 = vrot.slane %v496_v56, 2  ;;  %v501_v63 = vsel %vm485_vm1, %v439_v32, %v471_v48 }
  0x3e   : > { %v766_v26 = vrot.slane %v765_v9, 2  ;;  %1152 = vmatmul.msk.bf16.gmra.mxu3 %vm295_vm0, %v1401_v14  ;;  %v504_v1 = vrot.slane %v502_v61, 2  ;;  %v508_v2 = vsel %vm489_vm2, %v440_v33, %v472_v49  ;;  %v507_v3 = vsel %vm485_vm1, %v440_v33, %v472_v49 }
  0x3f   : > { %v1509_v24 = vld.sshfl [vmem:[#allocation1 + $0x20] sm:$0xff pattern:$0x73625140]  ;;  %v537_v4 = vsel %vm485_vm1, %v445_v36, %v477_v51  ;;  %v1524_v5 = vsel %vm489_vm2, %v445_v36, %v477_v51  ;;  %v1527_v6 = vsel %vm489_vm2, %v446_v37, %v478_v52  ;;  %v510_v14 = vrot.slane %v508_v2, 2 }
  0x40   : > { %v1499_v45 = vsel %vm1470_vm9, %v766_v26, %v770_v11  ;;  %820 = vst [vmem:[#allocation1 + $0x20] ss:$4 sm:$0xff] %v654_v30  ;;  %v540_v7 = vrot.slane %v1524_v5, 2  ;;  %v543_v8 = vsel %vm485_vm1, %v446_v37, %v478_v52  ;;  %v1532_v10 = vsel %vm489_vm2, %v447_v42, %v479_v53 }
  0x41   : > { %823 = vst [vmem:[#allocation1 + $0x21] ss:$4 sm:$0xff] %v667_v31  ;;  %v546_v13 = vrot.slane %v1527_v6, 2  ;;  %v1536_v15 = vsel %vm485_vm1, %v447_v42, %v479_v53  ;;  %v552_v16 = vrot.slane %v1532_v10, 2  ;;  %v590_v17 = vshrl.u32 %v488_v55, 16 }
  0x42   : > { %826 = vst [vmem:[#allocation1 + $0x22] ss:$4 sm:$0xff] %v680_v34  ;;  %v1543_v9 = vsel %vm485_vm1, %v1495_v43, %v480_v54  ;;  %v593_v12 = vshll.u32 %v488_v55, 16  ;;  %v599_v20 = vshll.u32 %v492_v58, 16  ;;  %v603_v21 = vshrl.u32 %v495_v60, 16 }
  0x43   : > { %829 = vst [vmem:[#allocation1 + $0x23] ss:$4 sm:$0xff] %v693_v39  ;;  %v592_v22 = vrot.slane %v590_v17, 6  ;;  %v606_v0 = vshll.u32 %v495_v60, 16  ;;  %v612_v11 = vshll.u32 %v498_v62, 16  ;;  %v616_v23 = vshrl.u32 %v501_v63, 16 }
  0x44   : > { %1171 = vmatmul.msk.bf16.gmra.mxu1 %vm295_vm0, %v374_v19  ;;  %v595_v25 = vrot.slane %v593_v12, 7  ;;  %v601_v26 = vrot.slane %v599_v20, 7  ;;  %v605_v27 = vrot.slane %v603_v21, 6  ;;  %v619_v28 = vshll.u32 %v501_v63, 16 }
  0x45   : > { %v608_v29 = vrot.slane %v606_v0, 7  ;;  %v614_v30 = vrot.slane %v612_v11, 7  ;;  %v618_v31 = vrot.slane %v616_v23, 6  ;;  %v625_v32 = vshll.u32 %v504_v1, 16 }
  0x46   : > { %v596_v33 = vor.u32 %v595_v25, %v592_v22  ;;  %v621_v34 = vrot.slane %v619_v28, 7  ;;  %v629_v18 = vshrl.u32 %v507_v3, 16  ;;  %v632_v35 = vshll.u32 %v507_v3, 16 }
  0x47   : > { %v609_v36 = vor.u32 %v608_v29, %v605_v27  ;;  %v627_v37 = vrot.slane %v625_v32, 7  ;;  %v638_v38 = vshll.u32 %v510_v14, 16  ;;  %v694_v39 = vshrl.u32 %v537_v4, 16 }
  0x48   : > { %v597_v42 = vrot.slane %v596_v33, 2  ;;  %v622_v44 = vor.u32 %v621_v34, %v618_v31  ;;  %v631_v47 = vrot.slane %v629_v18, 6  ;;  %v634_v48 = vrot.slane %v632_v35, 7 }
  0x49   : > { %v556_v49 = vsel %vm489_vm2, %v1495_v43, %v480_v54  ;;  %v610_v51 = vrot.slane %v609_v36, 2  ;;  %v696_v52 = vrot.slane %v694_v39, 6  ;;  %v697_v53 = vshll.u32 %v537_v4, 16 }
  0x4a   : > { %v831_v41 = vld.sshfl [vmem:[#allocation1 + $0x20] sm:$0xff pattern:$0x73625140]  ;;  %v602_v55 = vsel %vm1470_vm9, %v597_v42, %v601_v26  ;;  %v623_v50 = vrot.slane %v622_v44, 2  ;;  %v635_v56 = vor.u32 %v634_v48, %v631_v47  ;;  %v640_v58 = vrot.slane %v638_v38, 7 }
  0x4b   : > { %841 = vst [vmem:[#allocation1 + $0x20] ss:$4 sm:$0xff] %v1491_v40  ;;  %1198 = vmatmul.msk.bf16.vlgmr.msra.gmra.mxu2 %vm295_vm0, %v831_v41  ;;  %v615_v40 = vsel %vm1470_vm9, %v610_v51, %v614_v30  ;;  %v699_v60 = vrot.slane %v697_v53, 7  ;;  %v707_v61 = vshrl.u32 %v543_v8, 16  ;;  %v710_v62 = vshll.u32 %v543_v8, 16 }
  0x4c   : > { %843 = vst [vmem:[#allocation1 + $0x21] ss:$4 sm:$0xff] %v1499_v45  ;;  %v558_v43 = vrot.slane %v556_v49, 2  ;;  %v628_v45 = vsel %vm1470_vm9, %v623_v50, %v627_v37  ;;  %v636_v54 = vrot.slane %v635_v56, 2  ;;  %v703_v63 = vshll.u32 %v540_v7, 16 }
  0x4d   : > { %845 = vst [vmem:[#allocation1 + $0x22] ss:$4 sm:$0xff] %v1503_v46  ;;  %v700_v1 = vor.u32 %v699_v60, %v696_v52  ;;  %v709_v2 = vrot.slane %v707_v61, 6  ;;  %v712_v3 = vrot.slane %v710_v62, 7  ;;  %v720_v4 = vshrl.u32 %v1536_v15, 16 }
  0x4e   : > { %847 = vst [vmem:[#allocation1 + $0x23] ss:$4 sm:$0xff] %v1513_v57  ;;  %v641_v46 = vsel %vm1470_vm9, %v636_v54, %v640_v58  ;;  %v716_v5 = vshll.u32 %v546_v13, 16  ;;  %v723_v57 = vshll.u32 %v1536_v15, 16  ;;  %v729_v7 = vshll.u32 %v552_v16, 16 }
  0x4f   : > { %808 = vst [vmem:[#allocation1] ss:$4 sm:$0xff] %v602_v55  ;;  %v713_v14 = vor.u32 %v712_v3, %v709_v2  ;;  %v722_v8 = vrot.slane %v720_v4, 6  ;;  %v733_v17 = vshrl.u32 %v1543_v9, 16  ;;  %v736_v12 = vshll.u32 %v1543_v9, 16 }
  0x50   : > { %811 = vst [vmem:[#allocation1 + $0x1] ss:$4 sm:$0xff] %v615_v40  ;;  %v725_v19 = vrot.slane %v723_v57, 7  ;;  %v742_v20 = vshll.u32 %v558_v43, 16  ;;  %v701_v21 = vrot.slane %v700_v1, 2  ;;  %v705_v22 = vrot.slane %v703_v63, 7 }
  0x51   : > { %814 = vst [vmem:[#allocation1 + $0x2] ss:$4 sm:$0xff] %v628_v45  ;;  %v735_v6 = vrot.slane %v733_v17, 6  ;;  %v714_v13 = vrot.slane %v713_v14, 2  ;;  %v718_v0 = vrot.slane %v716_v5, 7  ;;  %v738_v11 = vrot.slane %v736_v12, 7 }
  0x52   : > { %817 = vst [vmem:[#allocation1 + $0x3] ss:$4 sm:$0xff] %v641_v46  ;;  %v726_v15 = vor.u32 %v725_v19, %v722_v8  ;;  %v731_v23 = vrot.slane %v729_v7, 7  ;;  %v744_v25 = vrot.slane %v742_v20, 7  ;;  %v706_v26 = vsel %vm1470_vm9, %v701_v21, %v705_v22  ;;  %v1587_v37 = vld [vmem:[%s1632_s2] ss:$0 sm:$0xff] }
  0x53   : > { %v739_v16 = vor.u32 %v738_v11, %v735_v6  ;;  %v719_v9 = vsel %vm1470_vm9, %v714_v13, %v718_v0 }
  0x54   : > { %1172 = vmatmul.msk.bf16.gmra.mxu1 %vm295_vm0, %v1509_v24  ;;  %v727_v10 = vrot.slane %v726_v15, 2 }
  0x55   : > { %v740_v27 = vrot.slane %v739_v16, 2  ;;  %v849_v31 = vld.sshfl [vmem:[#allocation1 + $0x20] sm:$0xff pattern:$0x73625140] }
  0x56   : > { %v732_v28 = vsel %vm1470_vm9, %v727_v10, %v731_v23 }
  0x57   : > { %v745_v30 = vsel %vm1470_vm9, %v740_v27, %v744_v25 }
  0x59   : > { %v830_v29 = vld.sshfl [vmem:[#allocation1] sm:$0xff pattern:$0x73625140] }
  0x5a   : > { %833 = vst [vmem:[#allocation1] ss:$4 sm:$0xff] %v706_v26  ;;  %1197 = vmatmul.msk.bf16.vlgmr.msra.gmra.mxu0 %vm295_vm0, %v830_v29 }
  0x5b   : > { %835 = vst [vmem:[#allocation1 + $0x1] ss:$4 sm:$0xff] %v719_v9 }
  0x5c   : > { %837 = vst [vmem:[#allocation1 + $0x2] ss:$4 sm:$0xff] %v732_v28 }
  0x5d   : > { %839 = vst [vmem:[#allocation1 + $0x3] ss:$4 sm:$0xff] %v745_v30 }
  0x64   : > { %v848_v24 = vld.sshfl [vmem:[#allocation1] sm:$0xff pattern:$0x73625140] }
  0x65   : > { %1199 = vmatmul.msk.bf16.gmra.mxu2 %vm295_vm0, %v848_v24 }
  0x75   : > { %1200 = vmatmul.msk.bf16.gmra.mxu2 %vm295_vm0, %v849_v31 }
  0x98   : > { %v313_v32 = vpop.f32.mrf.mxu0 }
  0xa0   : > { %v315_v33 = vpop.f32.mrf.mxu0 }
  0xa1   : > { %v318_v18 = vpop.f32.mrf.mxu3 }
  0xa9   : > { %v320_v44 = vpop.f32.mrf.mxu3 }
  0xae   : > { %v417_v34 = vpop.f32.mrf.mxu0 }
  0xaf   : > { %v418_v51 = vadd.f32 %v417_v34, %v313_v32 }
  0xb1   : > { %v422_v35 = vpop.f32.mrf.mxu1  ;;  %v323_v5 = vpop.f32.mrf.mxu3 }
  0xb2   : > { %v423_v59 = vadd.f32 %v422_v35, %v318_v18 }
  0xb6   : > { %v419_v36 = vpop.f32.mrf.mxu0 }
  0xb7   : > { %v420_v3 = vadd.f32 %v419_v36, %v315_v33 }
  0xb9   : > { %v424_v47 = vpop.f32.mrf.mxu1  ;;  %v325_v27 = vpop.f32.mrf.mxu3 }
  0xba   : > { %v425_v52 = vadd.f32 %v424_v47, %v320_v44 }
  0xc1   : > { %v427_v17 = vpop.f32.mrf.mxu1  ;;  %v328_v47 = vpop.f32.mrf.mxu3 }
  0xc2   : > { %v428_v16 = vadd.f32 %v427_v17, %v323_v5 }
  0xc9   : > { %v429_v29 = vpop.f32.mrf.mxu1 }
  0xca   : > { %v430_v35 = vadd.f32 %v429_v29, %v325_v27 }
  0xce   : > { %v896_v38 = vpop.f32.mrf.mxu2 }
  0xcf   : > { %v913_v39 = vadd.f32 %v896_v38, %v423_v59 }
  0xd1   : > { %v929_v41 = vrot.slane %v913_v39, 4  ;;  %v951_v42 = vadd.f32 %v1587_v37, %v913_v39 }
  0xd3   : > { %v952_v48 = vadd.f32 %v1587_v37, %v929_v41  ;;  %vm967_vm10 = vcmp.ge.f32.partialorder %v951_v42, 0.0  ;;  %v983_v49 = vmul.f32 0.2, %v951_v42 }
  0xd5   : > { %vm968_vm11 = vcmp.ge.f32.partialorder %v952_v48, 0.0  ;;  %v984_v53 = vmul.f32 0.2, %v952_v48  ;;  %v999_v55 = vsel %vm967_vm10, %v951_v42, %v983_v49 }
  0xd6   : > { %v1015_v50 = vpack.c.bf16 %v999_v55, %v999_v55  ;;  %v898_v56 = vpop.f32.mrf.mxu2 }
  0xd7   : > { %v891_v58 = vpop.f32.mrf.mxu0  ;;  %v1000_v40 = vsel %vm968_vm11, %v952_v48, %v984_v53  ;;  %v914_v60 = vadd.f32 %v898_v56, %v425_v52  ;;  %v432_v48 = vpop.f32.mrf.mxu1 }
  0xd8   : > { %v911_v61 = vadd.f32 %v891_v58, %v418_v51  ;;  %v1016_v62 = vpack.c.bf16 %v1000_v40, %v1000_v40  ;;  %1031 = vst [vmem:[%s1595_s23 + $0x8] sm:$0x3] %v1015_v50  ;;  %v433_v52 = vadd.f32 %v432_v48, %v328_v47 }
  0xd9   : > { %v930_v43 = vrot.slane %v914_v60, 4  ;;  %v953_v45 = vadd.f32 %v1587_v37, %v914_v60 }
  0xda   : > { %v927_v54 = vrot.slane %v911_v61, 4  ;;  %v947_v63 = vadd.f32 %v1587_v37, %v911_v61  ;;  %1032 = vst [vmem:[%s1595_s23 + $0xa] sm:$0x3] %v1016_v62 }
  0xdb   : > { %v954_v1 = vadd.f32 %v1587_v37, %v930_v43  ;;  %vm969_vm12 = vcmp.ge.f32.partialorder %v953_v45, 0.0  ;;  %v985_v2 = vmul.f32 0.2, %v953_v45 }
  0xdc   : > { %v948_v4 = vadd.f32 %v1587_v37, %v927_v54  ;;  %vm963_vm13 = vcmp.ge.f32.partialorder %v947_v63, 0.0  ;;  %v979_v46 = vmul.f32 0.2, %v947_v63  ;;  %v330_v54 = vpop.f32.mrf.mxu3 }
  0xdd   : > { %vm970_vm14 = vcmp.ge.f32.partialorder %v954_v1, 0.0  ;;  %v986_v57 = vmul.f32 0.2, %v954_v1  ;;  %v1001_v14 = vsel %vm969_vm12, %v953_v45, %v985_v2 }
  0xde   : > { %vm964_vm15 = vcmp.ge.f32.partialorder %v948_v4, 0.0  ;;  %v980_v8 = vmul.f32 0.2, %v948_v4  ;;  %v995_v7 = vsel %vm963_vm13, %v947_v63, %v979_v46  ;;  %v1017_v19 = vpack.c.bf16 %v1001_v14, %v1001_v14 }
  0xdf   : > { %v1011_v12 = vpack.c.bf16 %v995_v7, %v995_v7  ;;  %v893_v20 = vpop.f32.mrf.mxu0  ;;  %v1002_v21 = vsel %vm970_vm14, %v954_v1, %v986_v57  ;;  %v434_v63 = vpop.f32.mrf.mxu1 }
  0xe0   : > { %v996_v22 = vsel %vm964_vm15, %v948_v4, %v980_v8  ;;  %v912_v6 = vadd.f32 %v893_v20, %v420_v3  ;;  %v1018_v13 = vpack.c.bf16 %v1002_v21, %v1002_v21  ;;  %1033 = vst [vmem:[%s1595_s23 + $0xc] sm:$0x3] %v1017_v19  ;;  %v435_v3 = vadd.f32 %v434_v63, %v330_v54 }
  0xe1   : > { %v1012_v0 = vpack.c.bf16 %v996_v22, %v996_v22  ;;  %1027 = vst [vmem:[%s1595_s23] sm:$0x3] %v1011_v12 }
  0xe2   : > { %v928_v15 = vrot.slane %v912_v6, 4  ;;  %v949_v11 = vadd.f32 %v1587_v37, %v912_v6  ;;  %1034 = vst [vmem:[%s1595_s23 + $0xe] sm:$0x3] %v1018_v13 }
  0xe3   : > { %1028 = vst [vmem:[%s1595_s23 + $0x2] sm:$0x3] %v1012_v0 }
  0xe4   : > { %v950_v23 = vadd.f32 %v1587_v37, %v928_v15  ;;  %vm965_vm0 = vcmp.ge.f32.partialorder %v949_v11, 0.0  ;;  %v981_v10 = vmul.f32 0.2, %v949_v11 }
  0xe6   : > { %vm966_vm1 = vcmp.ge.f32.partialorder %v950_v23, 0.0  ;;  %v982_v25 = vmul.f32 0.2, %v950_v23  ;;  %v997_v26 = vsel %vm965_vm0, %v949_v11, %v981_v10 }
  0xe7   : > { %v1013_v9 = vpack.c.bf16 %v997_v26, %v997_v26 }
  0xe8   : > { %v998_v28 = vsel %vm966_vm1, %v950_v23, %v982_v25  ;;  %v901_v30 = vpop.f32.mrf.mxu2 }
  0xe9   : > { %v1014_v24 = vpack.c.bf16 %v998_v28, %v998_v28  ;;  %1029 = vst [vmem:[%s1595_s23 + $0x4] sm:$0x3] %v1013_v9  ;;  %v915_v31 = vadd.f32 %v901_v30, %v428_v16 }
  0xeb   : > { %1030 = vst [vmem:[%s1595_s23 + $0x6] sm:$0x3] %v1014_v24  ;;  %v931_v32 = vrot.slane %v915_v31, 4  ;;  %v955_v33 = vadd.f32 %v1587_v37, %v915_v31 }
  0xed   : > { %v956_v34 = vadd.f32 %v1587_v37, %v931_v32  ;;  %vm971_vm2 = vcmp.ge.f32.partialorder %v955_v33, 0.0  ;;  %v987_v18 = vmul.f32 0.2, %v955_v33 }
  0xef   : > { %vm972_vm3 = vcmp.ge.f32.partialorder %v956_v34, 0.0  ;;  %v988_v59 = vmul.f32 0.2, %v956_v34  ;;  %v1003_v36 = vsel %vm971_vm2, %v955_v33, %v987_v18 }
  0xf0   : > { %v1019_v38 = vpack.c.bf16 %v1003_v36, %v1003_v36  ;;  %v903_v39 = vpop.f32.mrf.mxu2 }
  0xf1   : > { %v1004_v41 = vsel %vm972_vm3, %v956_v34, %v988_v59  ;;  %v916_v42 = vadd.f32 %v903_v39, %v430_v35 }
  0xf2   : > { %v1020_v44 = vpack.c.bf16 %v1004_v41, %v1004_v41  ;;  %1035 = vst [vmem:[%s1595_s23 + $0x10] sm:$0x3] %v1019_v38 }
  0xf3   : > { %v932_v49 = vrot.slane %v916_v42, 4  ;;  %v957_v51 = vadd.f32 %v1587_v37, %v916_v42 }
  0xf4   : > { %1036 = vst [vmem:[%s1595_s23 + $0x12] sm:$0x3] %v1020_v44 }
  0xf5   : > { %v958_v53 = vadd.f32 %v1587_v37, %v932_v49  ;;  %vm973_vm4 = vcmp.ge.f32.partialorder %v957_v51, 0.0  ;;  %v989_v55 = vmul.f32 0.2, %v957_v51 }
  0xf7   : > { %vm974_vm5 = vcmp.ge.f32.partialorder %v958_v53, 0.0  ;;  %v990_v50 = vmul.f32 0.2, %v958_v53  ;;  %v1005_v56 = vsel %vm973_vm4, %v957_v51, %v989_v55 }
  0xf8   : > { %v1021_v58 = vpack.c.bf16 %v1005_v56, %v1005_v56  ;;  %v906_v40 = vpop.f32.mrf.mxu2 }
  0xf9   : > { %v1006_v60 = vsel %vm974_vm5, %v958_v53, %v990_v50  ;;  %v917_v61 = vadd.f32 %v906_v40, %v433_v52 }
  0xfa   : > { %v1022_v62 = vpack.c.bf16 %v1006_v60, %v1006_v60  ;;  %1037 = vst [vmem:[%s1595_s23 + $0x14] sm:$0x3] %v1021_v58 }
  0xfb   : > { %v933_v43 = vrot.slane %v917_v61, 4  ;;  %v959_v45 = vadd.f32 %v1587_v37, %v917_v61 }
  0xfc   : > { %1038 = vst [vmem:[%s1595_s23 + $0x16] sm:$0x3] %v1022_v62 }
  0xfd   : > { %v960_v1 = vadd.f32 %v1587_v37, %v933_v43  ;;  %vm975_vm6 = vcmp.ge.f32.partialorder %v959_v45, 0.0  ;;  %v991_v2 = vmul.f32 0.2, %v959_v45 }
  0xff   : > { %vm976_vm7 = vcmp.ge.f32.partialorder %v960_v1, 0.0  ;;  %v992_v4 = vmul.f32 0.2, %v960_v1  ;;  %v1007_v46 = vsel %vm975_vm6, %v959_v45, %v991_v2 }
 0x100   : > { %v1023_v5 = vpack.c.bf16 %v1007_v46, %v1007_v46  ;;  %v908_v57 = vpop.f32.mrf.mxu2 }
 0x101   : > { %v1008_v14 = vsel %vm976_vm7, %v960_v1, %v992_v4  ;;  %v918_v8 = vadd.f32 %v908_v57, %v435_v3 }
 0x102   : > { %v1024_v7 = vpack.c.bf16 %v1008_v14, %v1008_v14  ;;  %1039 = vst [vmem:[%s1595_s23 + $0x18] sm:$0x3] %v1023_v5 }
 0x103   : > { %v934_v17 = vrot.slane %v918_v8, 4  ;;  %v961_v19 = vadd.f32 %v1587_v37, %v918_v8 }
 0x104   : > { %1040 = vst [vmem:[%s1595_s23 + $0x1a] sm:$0x3] %v1024_v7 }
 0x105   : > { %v962_v12 = vadd.f32 %v1587_v37, %v934_v17  ;;  %vm977_vm8 = vcmp.ge.f32.partialorder %v961_v19, 0.0  ;;  %v993_v20 = vmul.f32 0.2, %v961_v19 }
 0x107   : > { %vm978_vm9 = vcmp.ge.f32.partialorder %v962_v12, 0.0  ;;  %v994_v21 = vmul.f32 0.2, %v962_v12  ;;  %v1009_v22 = vsel %vm977_vm8, %v961_v19, %v993_v20 }
 0x108   : > { %v1025_v6 = vpack.c.bf16 %v1009_v22, %v1009_v22 }
 0x109   : > { %v1010_v13 = vsel %vm978_vm9, %v962_v12, %v994_v21 }
 0x10a   : > { %v1026_v0 = vpack.c.bf16 %v1010_v13, %v1010_v13  ;;  %1041 = vst [vmem:[%s1595_s23 + $0x1c] sm:$0x3] %v1025_v6 }
 0x10c   : > { %1042 = vst [vmem:[%s1595_s23 + $0x1e] sm:$0x3] %v1026_v0 }
 0x10d PF: > { %s13_s12 = sadd.s32 1, %s1243_s12  }
 0x10e   : > { %p10_p4 = scmp.ge.s32.totalorder %s13_s12, 4  }
 0x110   :  { %12 = sbr.rel (!%p10_p4) target bundleno = 1 (0x1), region = 86 }

// kernel: ultrasound_encoder_forward.11
= control target key start
LH: loop header
LB: loop body
LE: loop exit
PB: predicated region body
PF: predicated region fallthrough
CT: control target
= control target key end

     0   :  { %s1632_s12 = smov 0   ;;  %s2021_s0 = inlined_call_operand.vmem [shape: bf16[32,1,6,128], index: 0, kind: input, shape index: {}]   ;;  %s2022_s1 = inlined_call_operand.vmem [shape: bf16[3,128,128], index: 1, kind: input, shape index: {}]   ;;  %s2023_s2 = inlined_call_operand.vmem [shape: f32[1,128], index: 2, kind: input, shape index: {}]   ;;  %s2024_s3 = inlined_call_operand.vmem [shape: bf16[32,4,128], index: 3, kind: output, shape index: {}]  }
   0x1 LB: > { %s1392_s13 = sadd.s32 4294967295, %s1610_s12   ;;  %p1396_p0 = scmp.ge.s32.totalorder %s1610_s12, 1  ;;  %s1610_s12 = sphi %s1632_s12, %s13_s12  }
   0x2   : > { %p138_p1 = scmp.lt.s32.totalorder %s1610_s12, 3 }
   0x4   : > { %p139_p2 = pnand %p1396_p0, %p138_p1 }
   0x5   : > { %s1397_s18 = sshll.u32 (!%p139_p2), %s1392_s13, 4 }
   0x6   : > { %142 = sbr.rel (%p139_p2) target bundleno = 309 (0x135), region = 32  ;;  %p163_p3 = scmp.lt.s32.totalorder (!%p139_p2), %s1397_s18, 31 }
   0xb   : > { %v1578_v0 = vld [vmem:[%s2022_s1 + $0x78] sm:$0xff]  ;;  %v1577_v3 = vld [vmem:[%s2022_s1 + $0x70] sm:$0xff]  ;;  %s2036_s18 = smov (!%p163_p3, %s1397_s18), 31  ;;  %v1576_v6 = vld [vmem:[%s2022_s1 + $0x68] sm:$0xff]  ;;  %vm254_vm0 = vcmask 1041408   ;;  %vm258_vm1 = vcmask 1043458  }
   0xc   : > { %v1570_v1 = vld [vmem:[%s2022_s1 + $0x38] sm:$0xff]  ;;  %679 = vmatpush.bf16.msra.mxu0 %v1578_v0  ;;  %v1569_v4 = vld [vmem:[%s2022_s1 + $0x30] sm:$0xff]  ;;  %1587 = vmatpush.bf16.msra.mxu3 %v1578_v0  ;;  %s1398_s27 = sshll.u32 %s2036_s18, 2  ;;  %v1568_v7 = vld [vmem:[%s2022_s1 + $0x28] sm:$0xff]  ;;  %vm352_vm2 = vsmask.f32 1280 }
   0xd   : > { %v1586_v2 = vld [vmem:[%s2022_s1 + $0xb8] sm:$0xff]  ;;  %803 = vmatpush.bf16.msra.mxu1 %v1570_v1  ;;  %v1585_v5 = vld [vmem:[%s2022_s1 + $0xb0] sm:$0xff]  ;;  %s1670_s7 = scalar_lea.vmem %s2021_s0, %s1398_s27  ;;  %v1584_v8 = vld [vmem:[%s2022_s1 + $0xa8] sm:$0xff]  ;;  %vm353_vm3 = vsmask.f32 3336  ;;  %vm992_vm9 = vcmask 1040384  }
   0xe   : > { %1175 = vmatpush.bf16.msra.mxu2 %v1586_v2  ;;  %v206_v9 = vld [vmem:[%s1670_s7] sm:$0x7]  ;;  %v207_v10 = vld [vmem:[%s1670_s7 + $0x4] sm:$0x7]  ;;  %v208_v11 = vld [vmem:[%s1670_s7 + $0x8] sm:$0x7] }
   0xf   : > { %v209_v12 = vld [vmem:[%s1670_s7 + $0xc] sm:$0x7]  ;;  %v238_v13 = vrot.slane %v206_v9, 2  ;;  %v239_v14 = vrot.slane %v207_v10, 2  ;;  %v240_v15 = vrot.slane %v208_v11, 2  ;;  %v1575_v17 = vld [vmem:[%s2022_s1 + $0x60] sm:$0xff]  ;;  %vm1701_vm6 = vmor %vm352_vm2, %vm353_vm3 }
  0x10   : > { %680 = vmatpush.bf16.msra.mxu0 %v1577_v3  ;;  %1588 = vmatpush.bf16.msra.mxu3 %v1577_v3  ;;  %v241_v16 = vrot.slane %v209_v12, 2  ;;  %v1567_v18 = vld [vmem:[%s2022_s1 + $0x20] sm:$0xff]  ;;  %vm355_vm4 = vsmask.f32 5392  ;;  %vm357_vm5 = vsmask.f32 7448 }
  0x11   : > { %804 = vmatpush.bf16.msra.mxu1 %v1569_v4  ;;  %v1583_v19 = vld [vmem:[%s2022_s1 + $0xa0] sm:$0xff]  ;;  %v257_v20 = vsel %vm254_vm0, %v206_v9, %v238_v13  ;;  %v259_v21 = vsel %vm258_vm1, %v206_v9, %v238_v13  ;;  %v264_v22 = vsel %vm254_vm0, %v207_v10, %v239_v14  ;;  %v265_v24 = vsel %vm258_vm1, %v207_v10, %v239_v14  ;;  %v1574_v27 = vld [vmem:[%s2022_s1 + $0x58] sm:$0xff]  ;;  %v1573_v44 = vld [vmem:[%s2022_s1 + $0x50] sm:$0xff]  ;;  %s1400_s19 = sshll.u32 %s2036_s18, 1 }
  0x12   : > { %1176 = vmatpush.bf16.msra.mxu2 %v1585_v5  ;;  %v261_v23 = vrot.slane %v259_v21, 2  ;;  %v270_v25 = vsel %vm254_vm0, %v208_v11, %v240_v15  ;;  %v271_v26 = vsel %vm258_vm1, %v208_v11, %v240_v15  ;;  %v267_v28 = vrot.slane %v265_v24, 2  ;;  %v1566_v33 = vld [vmem:[%s2022_s1 + $0x18] sm:$0xff]  ;;  %v214_v43 = vld [vmem:[%s1670_s7 + $0x20] sm:$0x7]  ;;  %vm1718_vm7 = vmor %vm1701_vm6, %vm355_vm4  ;;  %s1986_s22 = scalar_lea.vmem %s2024_s3, %s1400_s19 }
  0x13   : > { %v273_v29 = vrot.slane %v271_v26, 2  ;;  %v276_v30 = vsel %vm254_vm0, %v209_v12, %v241_v16  ;;  %v277_v31 = vsel %vm258_vm1, %v209_v12, %v241_v16  ;;  %v1582_v34 = vld [vmem:[%s2022_s1 + $0x98] sm:$0xff]  ;;  %v359_v36 = vshrl.u32 %v257_v20, 16  ;;  %v215_v50 = vld [vmem:[%s1670_s7 + $0x24] sm:$0x7]  ;;  %v1565_v55 = vld [vmem:[%s2022_s1 + $0x10] sm:$0xff] }
  0x14   : > { %681 = vmatpush.bf16.msra.mxu0 %v1576_v6  ;;  %1589 = vmatpush.bf16.msra.mxu3 %v1576_v6  ;;  %v279_v35 = vrot.slane %v277_v31, 2  ;;  %v362_v37 = vshll.u32 %v257_v20, 16  ;;  %v368_v38 = vshll.u32 %v261_v23, 16  ;;  %v372_v39 = vshrl.u32 %v264_v22, 16  ;;  %v216_v60 = vld [vmem:[%s1670_s7 + $0x28] sm:$0x7]  ;;  %vm1733_vm8 = vmor %vm1718_vm7, %vm357_vm5 }
  0x15   : > { %805 = vmatpush.bf16.msra.mxu1 %v1568_v7  ;;  %v375_v40 = vshll.u32 %v264_v22, 16  ;;  %v381_v41 = vshll.u32 %v267_v28, 16  ;;  %v385_v42 = vshrl.u32 %v270_v25, 16  ;;  %v361_v46 = vrot.slane %v359_v36, 6  ;;  %v1581_v61 = vld [vmem:[%s2022_s1 + $0x90] sm:$0xff]  ;;  %v1572_v12 = vld [vmem:[%s2022_s1 + $0x48] sm:$0xff] }
  0x16   : > { %1177 = vmatpush.bf16.msra.mxu2 %v1584_v8  ;;  %v364_v47 = vrot.slane %v362_v37, 7  ;;  %v370_v48 = vrot.slane %v368_v38, 7  ;;  %v388_v49 = vshll.u32 %v270_v25, 16  ;;  %v374_v51 = vrot.slane %v372_v39, 6  ;;  %v217_v2 = vld [vmem:[%s1670_s7 + $0x2c] sm:$0x7] }
  0x17   : > { %v377_v52 = vrot.slane %v375_v40, 7  ;;  %v383_v53 = vrot.slane %v381_v41, 7  ;;  %v387_v54 = vrot.slane %v385_v42, 6  ;;  %v394_v58 = vshll.u32 %v273_v29, 16  ;;  %v1564_v13 = vld [vmem:[%s2022_s1 + $0x8] sm:$0xff]  ;;  %v1563_v31 = vld [vmem:[%s2022_s1] sm:$0xff] }
  0x18   : > { %682 = vmatpush.bf16.msra.mxu0 %v1575_v17  ;;  %1590 = vmatpush.bf16.msra.mxu3 %v1575_v17  ;;  %v365_v56 = vor.u32 %v364_v47, %v361_v46  ;;  %v390_v57 = vrot.slane %v388_v49, 7  ;;  %v398_v59 = vshrl.u32 %v276_v30, 16  ;;  %v401_v0 = vshll.u32 %v276_v30, 16  ;;  %v1571_v30 = vld [vmem:[%s2022_s1 + $0x40] sm:$0xff]  ;;  %v178_v62 = vld [vmem:[%s1670_s7 + $0x10] sm:$0x3] }
  0x19   : > { %806 = vmatpush.bf16.msra.mxu1 %v1567_v18  ;;  %v378_v63 = vor.u32 %v377_v52, %v374_v51  ;;  %v407_v1 = vshll.u32 %v279_v35, 16  ;;  %v246_v3 = vrot.slane %v214_v43, 2  ;;  %v396_v6 = vrot.slane %v394_v58, 7  ;;  %v1580_v18 = vld [vmem:[%s2022_s1 + $0x88] sm:$0xff] }
  0x1a   : > { %1178 = vmatpush.bf16.msra.mxu2 %v1583_v19  ;;  %v366_v4 = vrot.slane %v365_v56, 2  ;;  %v391_v5 = vor.u32 %v390_v57, %v387_v54  ;;  %v400_v7 = vrot.slane %v398_v59, 6  ;;  %v403_v9 = vrot.slane %v401_v0, 7 }
  0x1b   : > { %v379_v8 = vrot.slane %v378_v63, 2  ;;  %v409_v10 = vrot.slane %v407_v1, 7  ;;  %v247_v11 = vrot.slane %v215_v50, 2  ;;  %v248_v16 = vrot.slane %v216_v60, 2 }
  0x1c   : > { %683 = vmatpush.bf16.msra.mxu0 %v1574_v27  ;;  %1591 = vmatpush.bf16.msra.mxu3 %v1574_v27  ;;  %v371_v14 = vsel %vm1733_vm8, %v366_v4, %v370_v48  ;;  %v392_v15 = vrot.slane %v391_v5, 2  ;;  %v249_v17 = vrot.slane %v217_v2, 2  ;;  %v404_v20 = vor.u32 %v403_v9, %v400_v7  ;;  %v1579_v48 = vld [vmem:[%s2022_s1 + $0x80] sm:$0xff] }
  0x1d   : > { %807 = vmatpush.bf16.msra.mxu1 %v1566_v33  ;;  %v384_v19 = vsel %vm1733_vm8, %v379_v8, %v383_v53  ;;  %585 = vst [vmem:[#allocation1] ss:$4 sm:$0xff] %v371_v14  ;;  %v306_v21 = vsel %vm254_vm0, %v214_v43, %v246_v3  ;;  %v307_v23 = vsel %vm258_vm1, %v214_v43, %v246_v3  ;;  %v832_v4 = vld [vmem:[%s1670_s7] sm:$0x6]  ;;  %v833_v8 = vld [vmem:[%s1670_s7 + $0x4] sm:$0x6] }
  0x1e   : > { %1179 = vmatpush.bf16.msra.mxu2 %v1582_v34  ;;  %v397_v22 = vsel %vm1733_vm8, %v392_v15, %v396_v6  ;;  %588 = vst [vmem:[#allocation1 + $0x1] ss:$4 sm:$0xff] %v384_v19  ;;  %v312_v24 = vsel %vm254_vm0, %v215_v50, %v247_v11  ;;  %v313_v25 = vsel %vm258_vm1, %v215_v50, %v247_v11  ;;  %v405_v26 = vrot.slane %v404_v20, 2  ;;  %v835_v15 = vld [vmem:[%s1670_s7 + $0xc] sm:$0x6] }
  0x1f   : > { %591 = vst [vmem:[#allocation1 + $0x2] ss:$4 sm:$0xff] %v397_v22  ;;  %v309_v27 = vrot.slane %v307_v23, 2  ;;  %v315_v28 = vrot.slane %v313_v25, 2  ;;  %v318_v29 = vsel %vm254_vm0, %v216_v60, %v248_v16  ;;  %v319_v32 = vsel %vm258_vm1, %v216_v60, %v248_v16  ;;  %v842_v22 = vld [vmem:[%s1670_s7 + $0x28] sm:$0x6] }
  0x20   : > { %684 = vmatpush.bf16.msra.mxu0 %v1573_v44  ;;  %1592 = vmatpush.bf16.msra.mxu3 %v1573_v44  ;;  %v324_v33 = vsel %vm254_vm0, %v217_v2, %v249_v17  ;;  %v325_v34 = vsel %vm258_vm1, %v217_v2, %v249_v17  ;;  %v463_v35 = vshrl.u32 %v306_v21, 16  ;;  %v410_v36 = vsel %vm1733_vm8, %v405_v26, %v409_v10  ;;  %v840_v17 = vld [vmem:[%s1670_s7 + $0x20] sm:$0x6]  ;;  %v843_v23 = vld [vmem:[%s1670_s7 + $0x2c] sm:$0x6] }
  0x21   : > { %808 = vmatpush.bf16.msra.mxu1 %v1565_v55  ;;  %v321_v37 = vrot.slane %v319_v32, 2  ;;  %v327_v38 = vrot.slane %v325_v34, 2  ;;  %v466_v39 = vshll.u32 %v306_v21, 16  ;;  %594 = vst [vmem:[#allocation1 + $0x3] ss:$4 sm:$0xff] %v410_v36  ;;  %v472_v41 = vshll.u32 %v309_v27, 16 }
  0x22   : > { %1180 = vmatpush.bf16.msra.mxu2 %v1581_v61  ;;  %v465_v40 = vrot.slane %v463_v35, 6  ;;  %v476_v42 = vshrl.u32 %v312_v24, 16  ;;  %v479_v43 = vshll.u32 %v312_v24, 16  ;;  %v485_v45 = vshll.u32 %v315_v28, 16  ;;  %v218_v32 = vld [vmem:[%s1670_s7 + $0x30] sm:$0x7] }
  0x23   : > { %v468_v44 = vrot.slane %v466_v39, 7  ;;  %v489_v46 = vshrl.u32 %v318_v29, 16  ;;  %v492_v47 = vshll.u32 %v318_v29, 16  ;;  %v498_v51 = vshll.u32 %v321_v37, 16  ;;  %v175_v37 = vld [vmem:[%s1670_s7 + $0x4] sm:$0x3] }
  0x24   : > { %685 = vmatpush.bf16.msra.mxu0 %v1572_v12  ;;  %1593 = vmatpush.bf16.msra.mxu3 %v1572_v12  ;;  %v478_v49 = vrot.slane %v476_v42, 6  ;;  %v481_v50 = vrot.slane %v479_v43, 7  ;;  %v474_v53 = vrot.slane %v472_v41, 7  ;;  %v487_v57 = vrot.slane %v485_v45, 7  ;;  %v834_v12 = vld [vmem:[%s1670_s7 + $0x8] sm:$0x6] }
  0x25   : > { %809 = vmatpush.bf16.msra.mxu1 %v1564_v13  ;;  %v469_v52 = vor.u32 %v468_v44, %v465_v40  ;;  %v491_v54 = vrot.slane %v489_v46, 6  ;;  %v494_v55 = vrot.slane %v492_v47, 7  ;;  %v502_v58 = vshrl.u32 %v324_v33, 16  ;;  %v210_v41 = vld [vmem:[%s1670_s7 + $0x10] sm:$0x7] }
  0x26   : > { %1181 = vmatpush.bf16.msra.mxu2 %v1580_v18  ;;  %v482_v56 = vor.u32 %v481_v50, %v478_v49  ;;  %v505_v59 = vshll.u32 %v324_v33, 16  ;;  %v500_v63 = vrot.slane %v498_v51, 7  ;;  %v511_v0 = vshll.u32 %v327_v38, 16  ;;  %v841_v18 = vld [vmem:[%s1670_s7 + $0x24] sm:$0x6] }
  0x27   : > { %v470_v60 = vrot.slane %v469_v52, 2  ;;  %v495_v61 = vor.u32 %v494_v55, %v491_v54  ;;  %v504_v2 = vrot.slane %v502_v58, 6  ;;  %v864_v16 = vrot.slane %v832_v4, 2  ;;  %v174_v33 = vld [vmem:[%s1670_s7] sm:$0x3] }
  0x28   : > { %686 = vmatpush.bf16.msra.mxu0 %v1571_v30  ;;  %1594 = vmatpush.bf16.msra.mxu3 %v1571_v30  ;;  %v483_v1 = vrot.slane %v482_v56, 2  ;;  %v507_v3 = vrot.slane %v505_v59, 7  ;;  %v607_v5 = vld.sshfl [vmem:[#allocation1] sm:$0xff pattern:$0x73625140]  ;;  %v513_v11 = vrot.slane %v511_v0, 7 }
  0x29   : > { %810 = vmatpush.bf16.msra.mxu1 %v1563_v31  ;;  %v475_v6 = vsel %vm1733_vm8, %v470_v60, %v474_v53  ;;  %v496_v7 = vrot.slane %v495_v61, 2  ;;  %v865_v19 = vrot.slane %v833_v8, 2  ;;  %v866_v20 = vrot.slane %v834_v12, 2  ;;  %v211_v47 = vld [vmem:[%s1670_s7 + $0x14] sm:$0x7] }
  0x2a   : > { %1182 = vmatpush.bf16.msra.mxu2 %v1579_v48  ;;  %v488_v9 = vsel %vm1733_vm8, %v483_v1, %v487_v57  ;;  %v508_v10 = vor.u32 %v507_v3, %v504_v2  ;;  %610 = vst [vmem:[#allocation1] ss:$4 sm:$0xff] %v475_v6  ;;  %v867_v24 = vrot.slane %v835_v15, 2  ;;  %vm993_vm10 = vcmask 1042434   ;;  %v212_v48 = vld [vmem:[%s1670_s7 + $0x18] sm:$0x7] }
  0x2b   : > { %687 = vmatmul.bf16.vlgmr.msra.gmra.mxu0 %v607_v5  ;;  %v501_v13 = vsel %vm1733_vm8, %v496_v7, %v500_v63  ;;  %612 = vst [vmem:[#allocation1 + $0x1] ss:$4 sm:$0xff] %v488_v9  ;;  %vm995_vm11 = vcmask 1044484   ;;  %v872_v25 = vrot.slane %v840_v17, 2  ;;  %v873_v26 = vrot.slane %v841_v18, 2  ;;  %vm994_vm12 = vmor %vm992_vm9, %vm993_vm10 }
  0x2c   : > { %v509_v14 = vrot.slane %v508_v10, 2  ;;  %614 = vst [vmem:[#allocation1 + $0x2] ss:$4 sm:$0xff] %v501_v13  ;;  %v882_v27 = vsel %vm254_vm0, %v832_v4, %v864_v16  ;;  %v884_v28 = vsel %vm258_vm1, %v832_v4, %v864_v16  ;;  %v889_v29 = vsel %vm254_vm0, %v833_v8, %v865_v19  ;;  %vm1793_vm13 = vmor %vm994_vm12, %vm995_vm11  ;;  %v213_v53 = vld [vmem:[%s1670_s7 + $0x1c] sm:$0x7] }
  0x2d   : > { %v891_v30 = vsel %vm258_vm1, %v833_v8, %v865_v19  ;;  %v896_v31 = vsel %vm254_vm0, %v834_v12, %v866_v20  ;;  %v874_v34 = vrot.slane %v842_v22, 2  ;;  %v875_v35 = vrot.slane %v843_v23, 2  ;;  %v176_v54 = vld [vmem:[%s1670_s7 + $0x8] sm:$0x3]  ;;  %v177_v60 = vld [vmem:[%s1670_s7 + $0xc] sm:$0x3] }
  0x2e   : > { %v514_v21 = vsel %vm1733_vm8, %v509_v14, %v513_v11  ;;  %v898_v36 = vsel %vm258_vm1, %v834_v12, %v866_v20  ;;  %vm997_vm14 = vcmask 1046534   ;;  %v1801_v38 = vsel %vm254_vm0, %v835_v15, %v867_v24 }
  0x2f   : > { %616 = vst [vmem:[#allocation1 + $0x3] ss:$4 sm:$0xff] %v514_v21  ;;  %v1481_v39 = vrot.slane %v882_v27, 9  ;;  %v1482_v40 = vrot.slane %v884_v28, 9  ;;  %v1805_v42 = vsel %vm258_vm1, %v835_v15, %v867_v24  ;;  %v1808_v43 = vsel %vm254_vm0, %v840_v17, %v872_v25  ;;  %vm1818_vm15 = vmor %vm1793_vm13, %vm997_vm14  ;;  %v183_v27 = vld [vmem:[%s1670_s7 + $0x24] sm:$0x3] }
  0x30   : > { %v1811_v44 = vsel %vm258_vm1, %v840_v17, %v872_v25  ;;  %v1814_v45 = vsel %vm254_vm0, %v841_v18, %v873_v26  ;;  %v1483_v49 = vrot.slane %v889_v29, 9  ;;  %v1484_v50 = vrot.slane %v891_v30, 9 }
  0x31   : > { %v1485_v51 = vrot.slane %v896_v31, 9  ;;  %v1486_v52 = vrot.slane %v898_v36, 9  ;;  %v1829_v56 = vsel %vm258_vm1, %v841_v18, %v873_v26  ;;  %v1832_v57 = vsel %vm254_vm0, %v842_v22, %v874_v34 }
  0x32   : > { %v1835_v58 = vsel %vm258_vm1, %v842_v22, %v874_v34  ;;  %v1838_v59 = vsel %vm254_vm0, %v843_v23, %v875_v35  ;;  %v1842_v61 = vsel %vm258_vm1, %v843_v23, %v875_v35  ;;  %v1846_v63 = vsel %vm1818_vm15, %v1481_v39, %v1482_v40  ;;  %v182_v22 = vld [vmem:[%s1670_s7 + $0x20] sm:$0x3]  ;;  %v219_v39 = vld [vmem:[%s1670_s7 + $0x34] sm:$0x7]  ;;  %v220_v40 = vld [vmem:[%s1670_s7 + $0x38] sm:$0x7] }
  0x33   : > { %v1487_v0 = vrot.slane %v1801_v38, 9  ;;  %v242_v1 = vrot.slane %v210_v41, 2  ;;  %v1488_v2 = vrot.slane %v1805_v42, 9  ;;  %v243_v3 = vrot.slane %v211_v47, 2 }
  0x34   : > { %v244_v4 = vrot.slane %v212_v48, 2  ;;  %v245_v5 = vrot.slane %v213_v53, 2  ;;  %v1852_v6 = vsel %vm1818_vm15, %v1483_v49, %v1484_v50  ;;  %v1856_v7 = vsel %vm1818_vm15, %v1485_v51, %v1486_v52  ;;  %v221_v51 = vld [vmem:[%s1670_s7 + $0x3c] sm:$0x7] }
  0x35   : > { %v282_v8 = vsel %vm254_vm0, %v210_v41, %v242_v1  ;;  %v283_v9 = vsel %vm258_vm1, %v210_v41, %v242_v1  ;;  %v288_v11 = vsel %vm254_vm0, %v211_v47, %v243_v3  ;;  %v289_v12 = vsel %vm258_vm1, %v211_v47, %v243_v3  ;;  %v185_v41 = vld [vmem:[%s1670_s7 + $0x2c] sm:$0x3] }
  0x36   : > { %v1826_v55 = vld.sshfl [vmem:[#allocation1] sm:$0xff pattern:$0x73625140]  ;;  %v285_v10 = vrot.slane %v283_v9, 2  ;;  %v294_v13 = vsel %vm254_vm0, %v212_v48, %v244_v4  ;;  %v291_v14 = vrot.slane %v289_v12, 2  ;;  %v295_v15 = vsel %vm258_vm1, %v212_v48, %v244_v4 }
  0x37   : > { %709 = vst [vmem:[#allocation1] ss:$4 sm:$0xff] %v174_v33  ;;  %v300_v16 = vsel %vm254_vm0, %v213_v53, %v245_v5  ;;  %v301_v17 = vsel %vm258_vm1, %v213_v53, %v245_v5  ;;  %v297_v18 = vrot.slane %v295_v15, 2  ;;  %v411_v20 = vshrl.u32 %v282_v8, 16  ;;  %v184_v33 = vld [vmem:[%s1670_s7 + $0x28] sm:$0x3] }
  0x38   : > { %712 = vst [vmem:[#allocation1 + $0x1] ss:$4 sm:$0xff] %v175_v37  ;;  %v303_v19 = vrot.slane %v301_v17, 2  ;;  %v414_v21 = vshll.u32 %v282_v8, 16  ;;  %v420_v23 = vshll.u32 %v285_v10, 16  ;;  %v424_v24 = vshrl.u32 %v288_v11, 16 }
  0x39   : > { %715 = vst [vmem:[#allocation1 + $0x2] ss:$4 sm:$0xff] %v176_v54  ;;  %v427_v25 = vshll.u32 %v288_v11, 16  ;;  %v433_v26 = vshll.u32 %v291_v14, 16  ;;  %v413_v28 = vrot.slane %v411_v20, 6  ;;  %v437_v30 = vshrl.u32 %v294_v13, 16 }
  0x3a   : > { %718 = vst [vmem:[#allocation1 + $0x3] ss:$4 sm:$0xff] %v177_v60  ;;  %v416_v29 = vrot.slane %v414_v21, 7  ;;  %v440_v31 = vshll.u32 %v294_v13, 16  ;;  %v422_v34 = vrot.slane %v420_v23, 7  ;;  %v426_v35 = vrot.slane %v424_v24, 6 }
  0x3b   : > { %v429_v36 = vrot.slane %v427_v25, 7  ;;  %v435_v37 = vrot.slane %v433_v26, 7  ;;  %v439_v48 = vrot.slane %v437_v30, 6  ;;  %v446_v50 = vshll.u32 %v297_v18, 16 }
  0x3c   : > { %v417_v47 = vor.u32 %v416_v29, %v413_v28  ;;  %v442_v49 = vrot.slane %v440_v31, 7  ;;  %v450_v54 = vshrl.u32 %v300_v16, 16  ;;  %v453_v60 = vshll.u32 %v300_v16, 16 }
  0x3d   : > { %v430_v53 = vor.u32 %v429_v36, %v426_v35  ;;  %v459_v1 = vshll.u32 %v303_v19, 16  ;;  %v448_v5 = vrot.slane %v446_v50, 7  ;;  %v250_v8 = vrot.slane %v218_v32, 2 }
  0x3e   : > { %v418_v3 = vrot.slane %v417_v47, 2  ;;  %v443_v4 = vor.u32 %v442_v49, %v439_v48  ;;  %v452_v10 = vrot.slane %v450_v54, 6  ;;  %v455_v11 = vrot.slane %v453_v60, 7 }
  0x3f   : > { %v431_v9 = vrot.slane %v430_v53, 2  ;;  %v461_v12 = vrot.slane %v459_v1, 7  ;;  %v251_v15 = vrot.slane %v219_v39, 2  ;;  %v252_v17 = vrot.slane %v220_v40, 2 }
  0x40   : > { %v423_v13 = vsel %vm1733_vm8, %v418_v3, %v422_v34  ;;  %v444_v14 = vrot.slane %v443_v4, 2  ;;  %v456_v18 = vor.u32 %v455_v11, %v452_v10  ;;  %v253_v19 = vrot.slane %v221_v51, 2 }
  0x41   : > { %v731_v52 = vld.sshfl [vmem:[#allocation1] sm:$0xff pattern:$0x73625140]  ;;  %v436_v16 = vsel %vm1733_vm8, %v431_v9, %v435_v37  ;;  %v330_v20 = vsel %vm254_vm0, %v218_v32, %v250_v8  ;;  %597 = vst [vmem:[#allocation1 + $0x20] ss:$4 sm:$0xff] %v423_v13  ;;  %v336_v23 = vsel %vm254_vm0, %v219_v39, %v251_v15  ;;  %v337_v24 = vsel %vm258_vm1, %v219_v39, %v251_v15 }
  0x42   : > { %811 = vmatmul.bf16.vlgmr.msra.gmra.mxu1 %v731_v52  ;;  %734 = vst [vmem:[#allocation1] ss:$4 sm:$0xff] %v182_v22  ;;  %v449_v21 = vsel %vm1733_vm8, %v444_v14, %v448_v5  ;;  %v331_v22 = vsel %vm258_vm1, %v218_v32, %v250_v8  ;;  %v457_v25 = vrot.slane %v456_v18, 2  ;;  %v342_v28 = vsel %vm254_vm0, %v220_v40, %v252_v17 }
  0x43   : > { %736 = vst [vmem:[#allocation1 + $0x1] ss:$4 sm:$0xff] %v183_v27  ;;  %v333_v26 = vrot.slane %v331_v22, 2  ;;  %v339_v27 = vrot.slane %v337_v24, 2  ;;  %v343_v29 = vsel %vm258_vm1, %v220_v40, %v252_v17  ;;  %v348_v30 = vsel %vm254_vm0, %v221_v51, %v253_v19 }
  0x44   : > { %738 = vst [vmem:[#allocation1 + $0x2] ss:$4 sm:$0xff] %v184_v33  ;;  %v349_v31 = vsel %vm258_vm1, %v221_v51, %v253_v19  ;;  %v515_v33 = vshrl.u32 %v330_v20, 16  ;;  %v462_v32 = vsel %vm1733_vm8, %v457_v25, %v461_v12  ;;  %v345_v34 = vrot.slane %v343_v29, 2  ;;  %v181_v29 = vld [vmem:[%s1670_s7 + $0x1c] sm:$0x3] }
  0x45   : > { %740 = vst [vmem:[#allocation1 + $0x3] ss:$4 sm:$0xff] %v185_v41  ;;  %v351_v35 = vrot.slane %v349_v31, 2  ;;  %v518_v36 = vshll.u32 %v330_v20, 16  ;;  %v524_v39 = vshll.u32 %v333_v26, 16  ;;  %v528_v41 = vshrl.u32 %v336_v23, 16 }
  0x46   : > { %600 = vst [vmem:[#allocation1 + $0x21] ss:$4 sm:$0xff] %v436_v16  ;;  %v517_v37 = vrot.slane %v515_v33, 6  ;;  %v531_v47 = vshll.u32 %v336_v23, 16  ;;  %v537_v49 = vshll.u32 %v339_v27, 16  ;;  %v541_v50 = vshrl.u32 %v342_v28, 16 }
  0x47   : > { %603 = vst [vmem:[#allocation1 + $0x22] ss:$4 sm:$0xff] %v449_v21  ;;  %v520_v48 = vrot.slane %v518_v36, 7  ;;  %v544_v40 = vshll.u32 %v342_v28, 16  ;;  %v1014_v51 = vsel %vm1818_vm15, %v1487_v0, %v1488_v2  ;;  %v526_v53 = vrot.slane %v524_v39, 7 }
  0x48   : > { %606 = vst [vmem:[#allocation1 + $0x23] ss:$4 sm:$0xff] %v462_v32  ;;  %v530_v54 = vrot.slane %v528_v41, 6  ;;  %v533_v60 = vrot.slane %v531_v47, 7  ;;  %v539_v3 = vrot.slane %v537_v49, 7  ;;  %v543_v4 = vrot.slane %v541_v50, 6 }
  0x49   : > { %v521_v1 = vor.u32 %v520_v48, %v517_v37  ;;  %v546_v5 = vrot.slane %v544_v40, 7  ;;  %v550_v9 = vshll.u32 %v345_v34, 16  ;;  %v554_v10 = vshrl.u32 %v348_v30, 16  ;;  %v179_v26 = vld [vmem:[%s1670_s7 + $0x14] sm:$0x3] }
  0x4a   : > { %v534_v8 = vor.u32 %v533_v60, %v530_v54  ;;  %v557_v42 = vshll.u32 %v348_v30, 16  ;;  %v1497_v38 = vrot.slane %v1808_v43, 9  ;;  %v563_v11 = vshll.u32 %v351_v35, 16  ;;  %v180_v27 = vld [vmem:[%s1670_s7 + $0x18] sm:$0x3] }
  0x4b   : > { %v522_v0 = vrot.slane %v521_v1, 2  ;;  %v547_v2 = vor.u32 %v546_v5, %v543_v4  ;;  %v556_v13 = vrot.slane %v554_v10, 6  ;;  %v1498_v15 = vrot.slane %v1811_v44, 9  ;;  %v836_v30 = vld [vmem:[%s1670_s7 + $0x10] sm:$0x6] }
  0x4c   : > { %v1890_v52 = vld.sshfl [vmem:[#allocation1] sm:$0xff pattern:$0x73625140]  ;;  %v535_v12 = vrot.slane %v534_v8, 2  ;;  %v559_v14 = vrot.slane %v557_v42, 7  ;;  %v1500_v43 = vrot.slane %v1829_v56, 9 }
  0x4d   : > { %1081 = vst [vmem:[#allocation1] ss:$4 sm:$0xff] %v1846_v63  ;;  %v552_v63 = vrot.slane %v550_v9, 7  ;;  %v527_v16 = vsel %vm1733_vm8, %v522_v0, %v526_v53  ;;  %v548_v18 = vrot.slane %v547_v2, 2  ;;  %v565_v20 = vrot.slane %v563_v11, 7 }
  0x4e   : > { %1084 = vst [vmem:[#allocation1 + $0x1] ss:$4 sm:$0xff] %v1852_v6  ;;  %v1499_v6 = vrot.slane %v1814_v45, 9  ;;  %v560_v19 = vor.u32 %v559_v14, %v556_v13  ;;  %v1501_v21 = vrot.slane %v1832_v57, 9  ;;  %v1502_v44 = vrot.slane %v1835_v58, 9 }
  0x4f   : > { %1087 = vst [vmem:[#allocation1 + $0x2] ss:$4 sm:$0xff] %v1856_v7  ;;  %v608_v17 = vld.sshfl [vmem:[#allocation1 + $0x20] sm:$0xff pattern:$0x73625140]  ;;  %v540_v7 = vsel %vm1733_vm8, %v535_v12, %v539_v3  ;;  %v553_v45 = vsel %vm1733_vm8, %v548_v18, %v552_v63  ;;  %v1503_v22 = vrot.slane %v1838_v59, 9  ;;  %v1034_v24 = vsel %vm1818_vm15, %v1497_v38, %v1498_v15 }
  0x50   : > { %1090 = vst [vmem:[#allocation1 + $0x3] ss:$4 sm:$0xff] %v1014_v51  ;;  %692 = vmatmul.bf16.vlgmr.msra.gmra.mxu3 %v608_v17  ;;  %v1504_v56 = vrot.slane %v1842_v61, 9  ;;  %v561_v23 = vrot.slane %v560_v19, 2  ;;  %v1038_v57 = vsel %vm1818_vm15, %v1499_v6, %v1500_v43  ;;  %v1042_v59 = vsel %vm1818_vm15, %v1501_v21, %v1502_v44  ;;  %v837_v31 = vld [vmem:[%s1670_s7 + $0x14] sm:$0x6] }
  0x51   : > { %618 = vst [vmem:[#allocation1 + $0x20] ss:$4 sm:$0xff] %v527_v16  ;;  %v838_v33 = vld [vmem:[%s1670_s7 + $0x18] sm:$0x6]  ;;  %v186_v32 = vld [vmem:[%s1670_s7 + $0x30] sm:$0x3] }
  0x52   : > { %620 = vst [vmem:[#allocation1 + $0x21] ss:$4 sm:$0xff] %v540_v7  ;;  %v566_v58 = vsel %vm1733_vm8, %v561_v23, %v565_v20  ;;  %v1046_v61 = vsel %vm1818_vm15, %v1503_v22, %v1504_v56  ;;  %v839_v34 = vld [vmem:[%s1670_s7 + $0x1c] sm:$0x6]  ;;  %v868_v35 = vrot.slane %v836_v30, 2  ;;  %v869_v37 = vrot.slane %v837_v31, 2 }
  0x53   : > { %622 = vst [vmem:[#allocation1 + $0x22] ss:$4 sm:$0xff] %v553_v45  ;;  %v187_v36 = vld [vmem:[%s1670_s7 + $0x34] sm:$0x3]  ;;  %v188_v41 = vld [vmem:[%s1670_s7 + $0x38] sm:$0x3] }
  0x54   : > { %624 = vst [vmem:[#allocation1 + $0x23] ss:$4 sm:$0xff] %v566_v58  ;;  %v870_v47 = vrot.slane %v838_v33, 2  ;;  %v189_v48 = vld [vmem:[%s1670_s7 + $0x3c] sm:$0x3]  ;;  %v871_v49 = vrot.slane %v839_v34, 2  ;;  %v912_v50 = vsel %vm258_vm1, %v836_v30, %v868_v35  ;;  %v917_v40 = vsel %vm254_vm0, %v837_v31, %v869_v37 }
  0x55   : > { %v919_v51 = vsel %vm258_vm1, %v837_v31, %v869_v37  ;;  %v1490_v4 = vrot.slane %v912_v50, 9  ;;  %v844_v5 = vld [vmem:[%s1670_s7 + $0x30] sm:$0x6]  ;;  %v1491_v8 = vrot.slane %v917_v40, 9  ;;  %v845_v10 = vld [vmem:[%s1670_s7 + $0x34] sm:$0x6] }
  0x56   : > { %v924_v53 = vsel %vm254_vm0, %v838_v33, %v870_v47  ;;  %v926_v54 = vsel %vm258_vm1, %v838_v33, %v870_v47  ;;  %v931_v60 = vsel %vm254_vm0, %v839_v34, %v871_v49  ;;  %v933_v1 = vsel %vm258_vm1, %v839_v34, %v871_v49  ;;  %v846_v0 = vld [vmem:[%s1670_s7 + $0x38] sm:$0x6]  ;;  %v847_v12 = vld [vmem:[%s1670_s7 + $0x3c] sm:$0x6] }
  0x57   : > { %v1103_v25 = vld.sshfl [vmem:[#allocation1] sm:$0xff pattern:$0x73625140]  ;;  %v1492_v9 = vrot.slane %v919_v51, 9  ;;  %v1493_v42 = vrot.slane %v924_v53, 9  ;;  %v1494_v38 = vrot.slane %v926_v54, 9 }
  0x58   : > { %1106 = vst [vmem:[#allocation1] ss:$4 sm:$0xff] %v1034_v24  ;;  %1183 = vmatmul.bf16.vlgmr.msra.gmra.mxu2 %v1103_v25  ;;  %v1495_v2 = vrot.slane %v931_v60, 9  ;;  %v1496_v11 = vrot.slane %v933_v1, 9  ;;  %v876_v63 = vrot.slane %v844_v5, 2  ;;  %v877_v14 = vrot.slane %v845_v10, 2 }
  0x59   : > { %1108 = vst [vmem:[#allocation1 + $0x1] ss:$4 sm:$0xff] %v1038_v57  ;;  %v1022_v15 = vsel %vm1818_vm15, %v1491_v8, %v1492_v9  ;;  %v878_v17 = vrot.slane %v846_v0, 2  ;;  %v1026_v16 = vsel %vm1818_vm15, %v1493_v42, %v1494_v38  ;;  %v879_v18 = vrot.slane %v847_v12, 2 }
  0x5a   : > { %1110 = vst [vmem:[#allocation1 + $0x2] ss:$4 sm:$0xff] %v1042_v59  ;;  %v1030_v43 = vsel %vm1818_vm15, %v1495_v2, %v1496_v11  ;;  %v966_v7 = vsel %vm254_vm0, %v844_v5, %v876_v63  ;;  %v968_v19 = vsel %vm258_vm1, %v844_v5, %v876_v63  ;;  %v973_v20 = vsel %vm254_vm0, %v845_v10, %v877_v14 }
  0x5b   : > { %1112 = vst [vmem:[#allocation1 + $0x3] ss:$4 sm:$0xff] %v1046_v61  ;;  %v626_v28 = vld.sshfl [vmem:[#allocation1 + $0x20] sm:$0xff pattern:$0x73625140]  ;;  %v975_v21 = vsel %vm258_vm1, %v845_v10, %v877_v14  ;;  %v980_v44 = vsel %vm254_vm0, %v846_v0, %v878_v17  ;;  %v982_v45 = vsel %vm258_vm1, %v846_v0, %v878_v17  ;;  %v987_v22 = vsel %vm254_vm0, %v847_v12, %v879_v18 }
  0x5c   : > { %721 = vst [vmem:[#allocation1 + $0x20] ss:$4 sm:$0xff] %v178_v62  ;;  %v989_v56 = vsel %vm258_vm1, %v847_v12, %v879_v18  ;;  %v1505_v23 = vrot.slane %v966_v7, 9  ;;  %v1506_v24 = vrot.slane %v968_v19, 9  ;;  %v1507_v57 = vrot.slane %v973_v20, 9 }
  0x5d   : > { %724 = vst [vmem:[#allocation1 + $0x21] ss:$4 sm:$0xff] %v179_v26  ;;  %v1508_v58 = vrot.slane %v975_v21, 9  ;;  %v1509_v59 = vrot.slane %v980_v44, 9  ;;  %v1510_v25 = vrot.slane %v982_v45, 9  ;;  %v1511_v61 = vrot.slane %v987_v22, 9 }
  0x5e   : > { %727 = vst [vmem:[#allocation1 + $0x22] ss:$4 sm:$0xff] %v180_v27  ;;  %v1512_v62 = vrot.slane %v989_v56, 9  ;;  %v1050_v26 = vsel %vm1818_vm15, %v1505_v23, %v1506_v24 }
  0x5f   : > { %730 = vst [vmem:[#allocation1 + $0x23] ss:$4 sm:$0xff] %v181_v29  ;;  %v1054_v27 = vsel %vm1818_vm15, %v1507_v57, %v1508_v58 }
  0x60   : > { %697 = vmatmul.bf16.gmra.mxu3 %v1826_v55  ;;  %v910_v55 = vsel %vm254_vm0, %v836_v30, %v868_v35  ;;  %v1062_v30 = vsel %vm1818_vm15, %v1511_v61, %v1512_v62  ;;  %v1978_v35 = vld [vmem:[%s2023_s2] ss:$0 sm:$0xff] }
  0x61   : > { %v1489_v3 = vrot.slane %v910_v55, 9 }
  0x63   : > { %v1018_v13 = vsel %vm1818_vm15, %v1489_v3, %v1490_v4 }
  0x66   : > { %v732_v39 = vld.sshfl [vmem:[#allocation1 + $0x20] sm:$0xff pattern:$0x73625140] }
  0x67   : > { %816 = vmatmul.bf16.gmra.mxu1 %v732_v39  ;;  %742 = vst [vmem:[#allocation1 + $0x20] ss:$4 sm:$0xff] %v186_v32 }
  0x68   : > { %744 = vst [vmem:[#allocation1 + $0x21] ss:$4 sm:$0xff] %v187_v36 }
  0x69   : > { %746 = vst [vmem:[#allocation1 + $0x22] ss:$4 sm:$0xff] %v188_v41 }
  0x6a   : > { %748 = vst [vmem:[#allocation1 + $0x23] ss:$4 sm:$0xff] %v189_v48 }
  0x70   : > { %702 = vmatmul.bf16.gmra.mxu3 %v626_v28  ;;  %v1058_v28 = vsel %vm1818_vm15, %v1509_v59, %v1510_v25 }
  0x71   : > { %v750_v6 = vld.sshfl [vmem:[#allocation1 + $0x20] sm:$0xff pattern:$0x73625140] }
  0x72   : > { %1093 = vst [vmem:[#allocation1 + $0x20] ss:$4 sm:$0xff] %v1018_v13 }
  0x73   : > { %1096 = vst [vmem:[#allocation1 + $0x21] ss:$4 sm:$0xff] %v1022_v15 }
  0x74   : > { %1099 = vst [vmem:[#allocation1 + $0x22] ss:$4 sm:$0xff] %v1026_v16 }
  0x75   : > { %1102 = vst [vmem:[#allocation1 + $0x23] ss:$4 sm:$0xff] %v1030_v43 }
  0x77   : > { %821 = vmatmul.bf16.gmra.mxu1 %v1890_v52  ;;  %v1121_v52 = vld.sshfl [vmem:[#allocation1] sm:$0xff pattern:$0x73625140] }
  0x7c   : > { %v1104_v29 = vld.sshfl [vmem:[#allocation1 + $0x20] sm:$0xff pattern:$0x73625140] }
  0x7d   : > { %1114 = vst [vmem:[#allocation1 + $0x20] ss:$4 sm:$0xff] %v1050_v26  ;;  %1188 = vmatmul.bf16.gmra.mxu2 %v1104_v29 }
  0x7e   : > { %1116 = vst [vmem:[#allocation1 + $0x21] ss:$4 sm:$0xff] %v1054_v27 }
  0x7f   : > { %1118 = vst [vmem:[#allocation1 + $0x22] ss:$4 sm:$0xff] %v1058_v28 }
  0x80   : > { %1120 = vst [vmem:[#allocation1 + $0x23] ss:$4 sm:$0xff] %v1062_v30 }
  0x87   : > { %826 = vmatmul.bf16.gmra.mxu1 %v750_v6  ;;  %v1122_v31 = vld.sshfl [vmem:[#allocation1 + $0x20] sm:$0xff pattern:$0x73625140] }
  0x8d   : > { %1193 = vmatmul.bf16.gmra.mxu2 %v1121_v52 }
  0x9d   : > { %1198 = vmatmul.bf16.gmra.mxu2 %v1122_v31 }
  0xa8   : > { %v688_v33 = vpop.f32.mrf.mxu0 }
  0xb0   : > { %v690_v41 = vpop.f32.mrf.mxu0 }
  0xbf   : > { %v812_v32 = vpop.f32.mrf.mxu1 }
  0xc0   : > { %v813_v34 = vadd.f32 %v812_v32, %v688_v33 }
  0xc7   : > { %v814_v47 = vpop.f32.mrf.mxu1 }
  0xc8   : > { %v815_v55 = vadd.f32 %v814_v47, %v690_v41 }
  0xd3   : > { %v693_v2 = vpop.f32.mrf.mxu3 }
  0xdb   : > { %v1184_v46 = vpop.f32.mrf.mxu2  ;;  %v695_v12 = vpop.f32.mrf.mxu3 }
  0xdc   : > { %v1204_v36 = vadd.f32 %v1184_v46, %v813_v34 }
  0xde   : > { %v1220_v37 = vrot.slane %v1204_v36, 4  ;;  %v1240_v39 = vadd.f32 %v1978_v35, %v1204_v36 }
  0xe0   : > { %v1241_v48 = vadd.f32 %v1978_v35, %v1220_v37  ;;  %vm1256_vm0 = vcmp.ge.f32.partialorder %v1240_v39, 0.0  ;;  %v1272_v49 = vmul.f32 0.2, %v1240_v39 }
  0xe2   : > { %vm1257_vm1 = vcmp.ge.f32.partialorder %v1241_v48, 0.0  ;;  %v1273_v50 = vmul.f32 0.2, %v1241_v48  ;;  %v1288_v40 = vsel %vm1256_vm0, %v1240_v39, %v1272_v49 }
  0xe3   : > { %v1304_v51 = vpack.c.bf16 %v1288_v40, %v1288_v40  ;;  %v1186_v53 = vpop.f32.mrf.mxu2  ;;  %v698_v43 = vpop.f32.mrf.mxu3 }
  0xe4   : > { %v1289_v54 = vsel %vm1257_vm1, %v1241_v48, %v1273_v50  ;;  %v1205_v60 = vadd.f32 %v1186_v53, %v815_v55  ;;  %v817_v11 = vpop.f32.mrf.mxu1 }
  0xe5   : > { %v1305_v1 = vpack.c.bf16 %v1289_v54, %v1289_v54  ;;  %1320 = vst [vmem:[%s1986_s22] sm:$0x3] %v1304_v51  ;;  %v818_v13 = vadd.f32 %v817_v11, %v693_v2 }
  0xe6   : > { %v1221_v3 = vrot.slane %v1205_v60, 4  ;;  %v1242_v4 = vadd.f32 %v1978_v35, %v1205_v60 }
  0xe7   : > { %1321 = vst [vmem:[%s1986_s22 + $0x2] sm:$0x3] %v1305_v1 }
  0xe8   : > { %v1243_v5 = vadd.f32 %v1978_v35, %v1221_v3  ;;  %vm1258_vm2 = vcmp.ge.f32.partialorder %v1242_v4, 0.0  ;;  %v1274_v8 = vmul.f32 0.2, %v1242_v4 }
  0xea   : > { %vm1259_vm3 = vcmp.ge.f32.partialorder %v1243_v5, 0.0  ;;  %v1275_v9 = vmul.f32 0.2, %v1243_v5  ;;  %v1290_v10 = vsel %vm1258_vm2, %v1242_v4, %v1274_v8 }
  0xeb   : > { %v1306_v42 = vpack.c.bf16 %v1290_v10, %v1290_v10  ;;  %v700_v26 = vpop.f32.mrf.mxu3 }
  0xec   : > { %v1291_v38 = vsel %vm1259_vm3, %v1243_v5, %v1275_v9  ;;  %v819_v63 = vpop.f32.mrf.mxu1 }
  0xed   : > { %v1307_v0 = vpack.c.bf16 %v1291_v38, %v1291_v38  ;;  %1322 = vst [vmem:[%s1986_s22 + $0x4] sm:$0x3] %v1306_v42  ;;  %v820_v19 = vadd.f32 %v819_v63, %v695_v12 }
  0xef   : > { %1323 = vst [vmem:[%s1986_s22 + $0x6] sm:$0x3] %v1307_v0 }
  0xf3   : > { %v703_v50 = vpop.f32.mrf.mxu3 }
  0xf4   : > { %v822_v7 = vpop.f32.mrf.mxu1 }
  0xf5   : > { %v823_v58 = vadd.f32 %v822_v7, %v698_v43 }
  0xfb   : > { %v705_v2 = vpop.f32.mrf.mxu3 }
  0xfc   : > { %v824_v28 = vpop.f32.mrf.mxu1 }
  0xfd   : > { %v825_v36 = vadd.f32 %v824_v28, %v700_v26 }
 0x100   : > { %v1189_v14 = vpop.f32.mrf.mxu2 }
 0x101   : > { %v1206_v15 = vadd.f32 %v1189_v14, %v818_v13 }
 0x103   : > { %v1222_v6 = vrot.slane %v1206_v15, 4  ;;  %v1244_v17 = vadd.f32 %v1978_v35, %v1206_v15 }
 0x104   : > { %v827_v40 = vpop.f32.mrf.mxu1 }
 0x105   : > { %v1245_v16 = vadd.f32 %v1978_v35, %v1222_v6  ;;  %vm1260_vm4 = vcmp.ge.f32.partialorder %v1244_v17, 0.0  ;;  %v1276_v18 = vmul.f32 0.2, %v1244_v17  ;;  %v828_v54 = vadd.f32 %v827_v40, %v703_v50 }
 0x107   : > { %vm1261_vm5 = vcmp.ge.f32.partialorder %v1245_v16, 0.0  ;;  %v1277_v20 = vmul.f32 0.2, %v1245_v16  ;;  %v1292_v21 = vsel %vm1260_vm4, %v1244_v17, %v1276_v18 }
 0x108   : > { %v1308_v44 = vpack.c.bf16 %v1292_v21, %v1292_v21  ;;  %v1191_v45 = vpop.f32.mrf.mxu2 }
 0x109   : > { %v1293_v22 = vsel %vm1261_vm5, %v1245_v16, %v1277_v20  ;;  %v1207_v56 = vadd.f32 %v1191_v45, %v820_v19 }
 0x10a   : > { %v1309_v23 = vpack.c.bf16 %v1293_v22, %v1293_v22  ;;  %1324 = vst [vmem:[%s1986_s22 + $0x8] sm:$0x3] %v1308_v44 }
 0x10b   : > { %v1223_v24 = vrot.slane %v1207_v56, 4  ;;  %v1246_v57 = vadd.f32 %v1978_v35, %v1207_v56 }
 0x10c   : > { %1325 = vst [vmem:[%s1986_s22 + $0xa] sm:$0x3] %v1309_v23  ;;  %v829_v11 = vpop.f32.mrf.mxu1 }
 0x10d   : > { %v1247_v59 = vadd.f32 %v1978_v35, %v1223_v24  ;;  %vm1262_vm6 = vcmp.ge.f32.partialorder %v1246_v57, 0.0  ;;  %v1278_v25 = vmul.f32 0.2, %v1246_v57  ;;  %v830_v13 = vadd.f32 %v829_v11, %v705_v2 }
 0x10f   : > { %vm1263_vm7 = vcmp.ge.f32.partialorder %v1247_v59, 0.0  ;;  %v1279_v61 = vmul.f32 0.2, %v1247_v59  ;;  %v1294_v62 = vsel %vm1262_vm6, %v1246_v57, %v1278_v25 }
 0x110   : > { %v1310_v27 = vpack.c.bf16 %v1294_v62, %v1294_v62  ;;  %v1194_v29 = vpop.f32.mrf.mxu2 }
 0x111   : > { %v1295_v30 = vsel %vm1263_vm7, %v1247_v59, %v1279_v61  ;;  %v1208_v52 = vadd.f32 %v1194_v29, %v823_v58 }
 0x112   : > { %v1311_v31 = vpack.c.bf16 %v1295_v30, %v1295_v30  ;;  %1326 = vst [vmem:[%s1986_s22 + $0xc] sm:$0x3] %v1310_v27 }
 0x113   : > { %v1224_v33 = vrot.slane %v1208_v52, 4  ;;  %v1248_v32 = vadd.f32 %v1978_v35, %v1208_v52 }
 0x114   : > { %1327 = vst [vmem:[%s1986_s22 + $0xe] sm:$0x3] %v1311_v31 }
 0x115   : > { %v1249_v34 = vadd.f32 %v1978_v35, %v1224_v33  ;;  %vm1264_vm8 = vcmp.ge.f32.partialorder %v1248_v32, 0.0  ;;  %v1280_v46 = vmul.f32 0.2, %v1248_v32 }
 0x117   : > { %vm1265_vm9 = vcmp.ge.f32.partialorder %v1249_v34, 0.0  ;;  %v1281_v37 = vmul.f32 0.2, %v1249_v34  ;;  %v1296_v39 = vsel %vm1264_vm8, %v1248_v32, %v1280_v46 }
 0x118   : > { %v1312_v41 = vpack.c.bf16 %v1296_v39, %v1296_v39  ;;  %v1196_v47 = vpop.f32.mrf.mxu2 }
 0x119   : > { %v1297_v48 = vsel %vm1265_vm9, %v1249_v34, %v1281_v37  ;;  %v1209_v49 = vadd.f32 %v1196_v47, %v825_v36 }
 0x11a   : > { %v1313_v55 = vpack.c.bf16 %v1297_v48, %v1297_v48  ;;  %1328 = vst [vmem:[%s1986_s22 + $0x10] sm:$0x3] %v1312_v41 }
 0x11b   : > { %v1225_v51 = vrot.slane %v1209_v49, 4  ;;  %v1250_v53 = vadd.f32 %v1978_v35, %v1209_v49 }
 0x11c   : > { %1329 = vst [vmem:[%s1986_s22 + $0x12] sm:$0x3] %v1313_v55 }
 0x11d   : > { %v1251_v60 = vadd.f32 %v1978_v35, %v1225_v51  ;;  %vm1266_vm10 = vcmp.ge.f32.partialorder %v1250_v53, 0.0  ;;  %v1282_v1 = vmul.f32 0.2, %v1250_v53 }
 0x11f   : > { %vm1267_vm11 = vcmp.ge.f32.partialorder %v1251_v60, 0.0  ;;  %v1283_v3 = vmul.f32 0.2, %v1251_v60  ;;  %v1298_v4 = vsel %vm1266_vm10, %v1250_v53, %v1282_v1 }
 0x120   : > { %v1314_v5 = vpack.c.bf16 %v1298_v4, %v1298_v4  ;;  %v1199_v8 = vpop.f32.mrf.mxu2 }
 0x121   : > { %v1299_v9 = vsel %vm1267_vm11, %v1251_v60, %v1283_v3  ;;  %v1210_v10 = vadd.f32 %v1199_v8, %v828_v54 }
 0x122   : > { %v1315_v42 = vpack.c.bf16 %v1299_v9, %v1299_v9  ;;  %1330 = vst [vmem:[%s1986_s22 + $0x14] sm:$0x3] %v1314_v5 }
 0x123   : > { %v1226_v38 = vrot.slane %v1210_v10, 4  ;;  %v1252_v0 = vadd.f32 %v1978_v35, %v1210_v10 }
 0x124   : > { %1331 = vst [vmem:[%s1986_s22 + $0x16] sm:$0x3] %v1315_v42 }
 0x125   : > { %v1253_v12 = vadd.f32 %v1978_v35, %v1226_v38  ;;  %vm1268_vm12 = vcmp.ge.f32.partialorder %v1252_v0, 0.0  ;;  %v1284_v63 = vmul.f32 0.2, %v1252_v0 }
 0x127   : > { %vm1269_vm13 = vcmp.ge.f32.partialorder %v1253_v12, 0.0  ;;  %v1285_v14 = vmul.f32 0.2, %v1253_v12  ;;  %v1300_v15 = vsel %vm1268_vm12, %v1252_v0, %v1284_v63 }
 0x128   : > { %v1316_v6 = vpack.c.bf16 %v1300_v15, %v1300_v15  ;;  %v1201_v17 = vpop.f32.mrf.mxu2 }
 0x129   : > { %v1301_v16 = vsel %vm1269_vm13, %v1253_v12, %v1285_v14  ;;  %v1211_v18 = vadd.f32 %v1201_v17, %v830_v13 }
 0x12a   : > { %v1317_v43 = vpack.c.bf16 %v1301_v16, %v1301_v16  ;;  %1332 = vst [vmem:[%s1986_s22 + $0x18] sm:$0x3] %v1316_v6 }
 0x12b   : > { %v1227_v7 = vrot.slane %v1211_v18, 4  ;;  %v1254_v19 = vadd.f32 %v1978_v35, %v1211_v18 }
 0x12c   : > { %1333 = vst [vmem:[%s1986_s22 + $0x1a] sm:$0x3] %v1317_v43 }
 0x12d   : > { %v1255_v20 = vadd.f32 %v1978_v35, %v1227_v7  ;;  %vm1270_vm14 = vcmp.ge.f32.partialorder %v1254_v19, 0.0  ;;  %v1286_v21 = vmul.f32 0.2, %v1254_v19 }
 0x12f   : > { %vm1271_vm15 = vcmp.ge.f32.partialorder %v1255_v20, 0.0  ;;  %v1287_v44 = vmul.f32 0.2, %v1255_v20  ;;  %v1302_v45 = vsel %vm1270_vm14, %v1254_v19, %v1286_v21 }
 0x130   : > { %v1318_v22 = vpack.c.bf16 %v1302_v45, %v1302_v45 }
 0x131   : > { %v1303_v56 = vsel %vm1271_vm15, %v1255_v20, %v1287_v44 }
 0x132   : > { %v1319_v23 = vpack.c.bf16 %v1303_v56, %v1303_v56  ;;  %1334 = vst [vmem:[%s1986_s22 + $0x1c] sm:$0x3] %v1318_v22 }
 0x134   : > { %1335 = vst [vmem:[%s1986_s22 + $0x1e] sm:$0x3] %v1319_v23 }
 0x135 PF: > { %s13_s12 = sadd.s32 1, %s1610_s12  }
 0x136   : > { %p10_p4 = scmp.ge.s32.totalorder %s13_s12, 4  }
 0x138   :  { %12 = sbr.rel (!%p10_p4) target bundleno = 1 (0x1), region = 85 }

// kernel: ultrasound_encoder_forward.12
= control target key start
LH: loop header
LB: loop body
LE: loop exit
PB: predicated region body
PF: predicated region fallthrough
CT: control target
= control target key end

     0   :  { %s1952_s12 = smov 0   ;;  %s2783_s0 = inlined_call_operand.vmem [shape: bf16[32,2,3,128], index: 0, kind: input, shape index: {}]   ;;  %s2784_s1 = inlined_call_operand.vmem [shape: bf16[3,128,256], index: 1, kind: input, shape index: {}]   ;;  %s2785_s2 = inlined_call_operand.vmem [shape: f32[1,256], index: 2, kind: input, shape index: {}]   ;;  %s2786_s3 = inlined_call_operand.vmem [shape: bf16[32,2,256], index: 3, kind: output, shape index: {}]  }
   0x1 LB: > { %s1583_s13 = sadd.s32 4294967295, %s1930_s12   ;;  %p1587_p0 = scmp.ge.s32.totalorder %s1930_s12, 1  ;;  %s1930_s12 = sphi %s1952_s12, %s13_s12  }
   0x2   : > { %p139_p1 = scmp.lt.s32.totalorder %s1930_s12, 3 }
   0x4   : > { %p140_p2 = pnand %p1587_p0, %p139_p1 }
   0x5   : > { %s1588_s22 = sshll.u32 (!%p140_p2), %s1583_s13, 4 }
   0x6   : > { %143 = sbr.rel (%p140_p2) target bundleno = 322 (0x142), region = 32  ;;  %p165_p3 = scmp.lt.s32.totalorder (!%p140_p2), %s1588_s22, 31 }
   0xb   : > { %v1683_v0 = vld [vmem:[%s2784_s1 + $0xf0] sm:$0xf]  ;;  %v1883_v1 = vld [vmem:[%s2784_s1 + $0xf4] sm:$0xf0]  ;;  %v1882_v2 = vld [vmem:[%s2784_s1 + $0xf4] sm:$0xf] }
   0xc   : > { %v1684_v3 = vor.u32 %v1883_v1, %v1683_v0  ;;  %v1685_v4 = vld [vmem:[%s2784_s1 + $0xf8] sm:$0xf0]  ;;  %v1747_v5 = vld [vmem:[%s2784_s1 + $0x70] sm:$0xf]  ;;  %v1867_v6 = vld [vmem:[%s2784_s1 + $0x74] sm:$0xf0] }
   0xd   : > { %v1688_v7 = vor.u32 %v1882_v2, %v1685_v4  ;;  %v1748_v8 = vor.u32 %v1867_v6, %v1747_v5  ;;  %v1866_v9 = vld [vmem:[%s2784_s1 + $0x74] sm:$0xf]  ;;  %v1749_v10 = vld [vmem:[%s2784_s1 + $0x78] sm:$0xf0]  ;;  %v1675_v11 = vld [vmem:[%s2784_s1 + $0xe0] sm:$0xf] }
   0xe   : > { %366 = vmatpush.bf16.msra.mxu0 %v1684_v3  ;;  %v1752_v12 = vor.u32 %v1866_v9, %v1749_v10  ;;  %v1881_v13 = vld [vmem:[%s2784_s1 + $0xe4] sm:$0xf0]  ;;  %v1880_v14 = vld [vmem:[%s2784_s1 + $0xe4] sm:$0xf]  ;;  %v1677_v15 = vld [vmem:[%s2784_s1 + $0xe8] sm:$0xf0] }
   0xf   : > { %385 = vmatpush.bf16.msra.mxu1 %v1688_v7  ;;  %527 = vmatpush.bf16.msra.mxu2 %v1748_v8  ;;  %v1676_v16 = vor.u32 %v1881_v13, %v1675_v11  ;;  %v1680_v17 = vor.u32 %v1880_v14, %v1677_v15  ;;  %v1739_v18 = vld [vmem:[%s2784_s1 + $0x60] sm:$0xf]  ;;  %v1865_v19 = vld [vmem:[%s2784_s1 + $0x64] sm:$0xf0]  ;;  %v1864_v20 = vld [vmem:[%s2784_s1 + $0x64] sm:$0xf] }
  0x10   : > { %546 = vmatpush.bf16.msra.mxu3 %v1752_v12  ;;  %v1740_v21 = vor.u32 %v1865_v19, %v1739_v18  ;;  %v1741_v22 = vld [vmem:[%s2784_s1 + $0x68] sm:$0xf0]  ;;  %v1667_v23 = vld [vmem:[%s2784_s1 + $0xd0] sm:$0xf]  ;;  %v1879_v24 = vld [vmem:[%s2784_s1 + $0xd4] sm:$0xf0] }
  0x11   : > { %v1744_v25 = vor.u32 %v1864_v20, %v1741_v22  ;;  %v1878_v26 = vld [vmem:[%s2784_s1 + $0xd4] sm:$0xf]  ;;  %v1669_v27 = vld [vmem:[%s2784_s1 + $0xd8] sm:$0xf0]  ;;  %v1731_v28 = vld [vmem:[%s2784_s1 + $0x50] sm:$0xf]  ;;  %v1668_v29 = vor.u32 %v1879_v24, %v1667_v23 }
  0x12   : > { %367 = vmatpush.bf16.msra.mxu0 %v1676_v16  ;;  %v1863_v30 = vld [vmem:[%s2784_s1 + $0x54] sm:$0xf0]  ;;  %v1862_v31 = vld [vmem:[%s2784_s1 + $0x54] sm:$0xf]  ;;  %v1733_v32 = vld [vmem:[%s2784_s1 + $0x58] sm:$0xf0]  ;;  %v1672_v33 = vor.u32 %v1878_v26, %v1669_v27 }
  0x13   : > { %386 = vmatpush.bf16.msra.mxu1 %v1680_v17  ;;  %528 = vmatpush.bf16.msra.mxu2 %v1740_v21  ;;  %v1732_v34 = vor.u32 %v1863_v30, %v1731_v28  ;;  %v1659_v35 = vld [vmem:[%s2784_s1 + $0xc0] sm:$0xf]  ;;  %v1877_v36 = vld [vmem:[%s2784_s1 + $0xc4] sm:$0xf0]  ;;  %v1876_v37 = vld [vmem:[%s2784_s1 + $0xc4] sm:$0xf]  ;;  %v1736_v38 = vor.u32 %v1862_v31, %v1733_v32 }
  0x14   : > { %547 = vmatpush.bf16.msra.mxu3 %v1744_v25  ;;  %v1661_v39 = vld [vmem:[%s2784_s1 + $0xc8] sm:$0xf0]  ;;  %v1723_v40 = vld [vmem:[%s2784_s1 + $0x40] sm:$0xf]  ;;  %v1861_v41 = vld [vmem:[%s2784_s1 + $0x44] sm:$0xf0]  ;;  %v1660_v44 = vor.u32 %v1877_v36, %v1659_v35 }
  0x15   : > { %v1860_v42 = vld [vmem:[%s2784_s1 + $0x44] sm:$0xf]  ;;  %v1725_v43 = vld [vmem:[%s2784_s1 + $0x48] sm:$0xf0]  ;;  %v1664_v45 = vor.u32 %v1876_v37, %v1661_v39  ;;  %v1724_v46 = vor.u32 %v1861_v41, %v1723_v40  ;;  %v1651_v47 = vld [vmem:[%s2784_s1 + $0xb0] sm:$0xf] }
  0x16   : > { %368 = vmatpush.bf16.msra.mxu0 %v1668_v29  ;;  %v1875_v48 = vld [vmem:[%s2784_s1 + $0xb4] sm:$0xf0]  ;;  %v1874_v49 = vld [vmem:[%s2784_s1 + $0xb4] sm:$0xf]  ;;  %v1728_v50 = vor.u32 %v1860_v42, %v1725_v43  ;;  %v1653_v51 = vld [vmem:[%s2784_s1 + $0xb8] sm:$0xf0] }
  0x17   : > { %387 = vmatpush.bf16.msra.mxu1 %v1672_v33  ;;  %529 = vmatpush.bf16.msra.mxu2 %v1732_v34  ;;  %v1715_v52 = vld [vmem:[%s2784_s1 + $0x30] sm:$0xf]  ;;  %v1859_v53 = vld [vmem:[%s2784_s1 + $0x34] sm:$0xf0]  ;;  %v1858_v54 = vld [vmem:[%s2784_s1 + $0x34] sm:$0xf]  ;;  %v1652_v56 = vor.u32 %v1875_v48, %v1651_v47  ;;  %v1656_v57 = vor.u32 %v1874_v49, %v1653_v51 }
  0x18   : > { %548 = vmatpush.bf16.msra.mxu3 %v1736_v38  ;;  %v1717_v55 = vld [vmem:[%s2784_s1 + $0x38] sm:$0xf0]  ;;  %v1716_v58 = vor.u32 %v1859_v53, %v1715_v52  ;;  %v1643_v59 = vld [vmem:[%s2784_s1 + $0xa0] sm:$0xf]  ;;  %v1873_v60 = vld [vmem:[%s2784_s1 + $0xa4] sm:$0xf0] }
  0x19   : > { %v1872_v61 = vld [vmem:[%s2784_s1 + $0xa4] sm:$0xf]  ;;  %v1720_v62 = vor.u32 %v1858_v54, %v1717_v55  ;;  %v1645_v63 = vld [vmem:[%s2784_s1 + $0xa8] sm:$0xf0]  ;;  %v1707_v0 = vld [vmem:[%s2784_s1 + $0x20] sm:$0xf]  ;;  %v1644_v4 = vor.u32 %v1873_v60, %v1643_v59 }
  0x1a   : > { %369 = vmatpush.bf16.msra.mxu0 %v1660_v44  ;;  %v1857_v1 = vld [vmem:[%s2784_s1 + $0x24] sm:$0xf0]  ;;  %v1856_v2 = vld [vmem:[%s2784_s1 + $0x24] sm:$0xf]  ;;  %v1709_v3 = vld [vmem:[%s2784_s1 + $0x28] sm:$0xf0]  ;;  %v1648_v6 = vor.u32 %v1872_v61, %v1645_v63 }
  0x1b   : > { %388 = vmatpush.bf16.msra.mxu1 %v1664_v45  ;;  %530 = vmatpush.bf16.msra.mxu2 %v1724_v46  ;;  %v1635_v5 = vld [vmem:[%s2784_s1 + $0x90] sm:$0xf]  ;;  %v1708_v7 = vor.u32 %v1857_v1, %v1707_v0  ;;  %v1871_v8 = vld [vmem:[%s2784_s1 + $0x94] sm:$0xf0]  ;;  %v1870_v9 = vld [vmem:[%s2784_s1 + $0x94] sm:$0xf]  ;;  %v1712_v11 = vor.u32 %v1856_v2, %v1709_v3 }
  0x1c   : > { %549 = vmatpush.bf16.msra.mxu3 %v1728_v50  ;;  %v1637_v10 = vld [vmem:[%s2784_s1 + $0x98] sm:$0xf0]  ;;  %v1699_v12 = vld [vmem:[%s2784_s1 + $0x10] sm:$0xf]  ;;  %v1855_v13 = vld [vmem:[%s2784_s1 + $0x14] sm:$0xf0]  ;;  %v1636_v16 = vor.u32 %v1871_v8, %v1635_v5 }
  0x1d   : > { %v1854_v14 = vld [vmem:[%s2784_s1 + $0x14] sm:$0xf]  ;;  %v1701_v15 = vld [vmem:[%s2784_s1 + $0x18] sm:$0xf0]  ;;  %v1627_v17 = vld [vmem:[%s2784_s1 + $0x80] sm:$0xf]  ;;  %v1640_v18 = vor.u32 %v1870_v9, %v1637_v10  ;;  %v1700_v19 = vor.u32 %v1855_v13, %v1699_v12 }
  0x1e   : > { %370 = vmatpush.bf16.msra.mxu0 %v1652_v56  ;;  %v1869_v20 = vld [vmem:[%s2784_s1 + $0x84] sm:$0xf0]  ;;  %v1868_v21 = vld [vmem:[%s2784_s1 + $0x84] sm:$0xf]  ;;  %s2799_s22 = smov (!%p165_p3, %s1588_s22), 31  ;;  %v1704_v22 = vor.u32 %v1854_v14, %v1701_v15  ;;  %vm645_vm0 = vcmask 1040384  }
  0x1f   : > { %389 = vmatpush.bf16.msra.mxu1 %v1656_v57  ;;  %531 = vmatpush.bf16.msra.mxu2 %v1716_v58  ;;  %v1629_v23 = vld [vmem:[%s2784_s1 + $0x88] sm:$0xf0]  ;;  %v1691_v24 = vld [vmem:[%s2784_s1] sm:$0xf]  ;;  %v1853_v25 = vld [vmem:[%s2784_s1 + $0x4] sm:$0xf0]  ;;  %v1628_v28 = vor.u32 %v1869_v20, %v1627_v17 }
  0x20   : > { %550 = vmatpush.bf16.msra.mxu3 %v1720_v62  ;;  %v1852_v26 = vld [vmem:[%s2784_s1 + $0x4] sm:$0xf]  ;;  %v1693_v27 = vld [vmem:[%s2784_s1 + $0x8] sm:$0xf0]  ;;  %s1851_s17 = sshll.u32 %s2799_s22, 2  ;;  %v1632_v29 = vor.u32 %v1868_v21, %v1629_v23  ;;  %v1692_v30 = vor.u32 %v1853_v25, %v1691_v24  ;;  %vm649_vm1 = vcmask 1042434  }
  0x21   : > { %s2160_s20 = scalar_lea.vmem %s2783_s0, %s1851_s17  ;;  %v1696_v33 = vor.u32 %v1852_v26, %v1693_v27  ;;  %v1898_v41 = vld [vmem:[%s2784_s1 + $0x174] sm:$0xf]  ;;  %v1845_v42 = vld [vmem:[%s2784_s1 + $0x178] sm:$0xf0]  ;;  %v1843_v43 = vld [vmem:[%s2784_s1 + $0x170] sm:$0xf] }
  0x22   : > { %371 = vmatpush.bf16.msra.mxu0 %v1644_v4  ;;  %v1593_v31 = vld [vmem:[%s2160_s20 + $0x2] sm:$0x1]  ;;  %v1594_v32 = vld [vmem:[%s2160_s20 + $0x6] sm:$0x1]  ;;  %v1595_v34 = vld [vmem:[%s2160_s20 + $0xa] sm:$0x1]  ;;  %v1848_v46 = vor.u32 %v1898_v41, %v1845_v42 }
  0x23   : > { %390 = vmatpush.bf16.msra.mxu1 %v1648_v6  ;;  %532 = vmatpush.bf16.msra.mxu2 %v1708_v7  ;;  %v1596_v35 = vld [vmem:[%s2160_s20 + $0xe] sm:$0x1]  ;;  %244 = vst [vmem:[#allocation1] ss:$9 sm:$0xff] %v1593_v31  ;;  %v1597_v36 = vld [vmem:[%s2160_s20 + $0x12] sm:$0x1] }
  0x24   : > { %551 = vmatpush.bf16.msra.mxu3 %v1712_v11  ;;  %247 = vst [vmem:[#allocation1 + $0x1] ss:$9 sm:$0xff] %v1594_v32  ;;  %v1598_v37 = vld [vmem:[%s2160_s20 + $0x16] sm:$0x1]  ;;  %v1599_v38 = vld [vmem:[%s2160_s20 + $0x1a] sm:$0x1] }
  0x25   : > { %250 = vst [vmem:[#allocation1 + $0x2] ss:$9 sm:$0xff] %v1595_v34  ;;  %v1600_v39 = vld [vmem:[%s2160_s20 + $0x1e] sm:$0x1]  ;;  %v1601_v40 = vld [vmem:[%s2160_s20 + $0x22] sm:$0x1] }
  0x26   : > { %372 = vmatpush.bf16.msra.mxu0 %v1636_v16  ;;  %253 = vst [vmem:[#allocation1 + $0x3] ss:$9 sm:$0xff] %v1596_v35  ;;  %v1602_v44 = vld [vmem:[%s2160_s20 + $0x26] sm:$0x1]  ;;  %v1603_v45 = vld [vmem:[%s2160_s20 + $0x2a] sm:$0x1] }
  0x27   : > { %391 = vmatpush.bf16.msra.mxu1 %v1640_v18  ;;  %533 = vmatpush.bf16.msra.mxu2 %v1700_v19  ;;  %256 = vst [vmem:[#allocation1 + $0x4] ss:$9 sm:$0xff] %v1597_v36  ;;  %v1899_v47 = vld [vmem:[%s2784_s1 + $0x174] sm:$0xf0]  ;;  %v1896_v49 = vld [vmem:[%s2784_s1 + $0x164] sm:$0xf] }
  0x28   : > { %552 = vmatpush.bf16.msra.mxu3 %v1704_v22  ;;  %259 = vst [vmem:[#allocation1 + $0x5] ss:$9 sm:$0xff] %v1598_v37  ;;  %v1844_v48 = vor.u32 %v1899_v47, %v1843_v43  ;;  %v1837_v50 = vld [vmem:[%s2784_s1 + $0x168] sm:$0xf0]  ;;  %v1835_v51 = vld [vmem:[%s2784_s1 + $0x160] sm:$0xf] }
  0x29   : > { %262 = vst [vmem:[#allocation1 + $0x6] ss:$9 sm:$0xff] %v1599_v38  ;;  %v1604_v53 = vld [vmem:[%s2160_s20 + $0x2e] sm:$0x1]  ;;  %v1840_v54 = vor.u32 %v1896_v49, %v1837_v50  ;;  %v1897_v55 = vld [vmem:[%s2784_s1 + $0x164] sm:$0xf0] }
  0x2a   : > { %373 = vmatpush.bf16.msra.mxu0 %v1628_v28  ;;  %265 = vst [vmem:[#allocation1 + $0x7] ss:$9 sm:$0xff] %v1600_v39  ;;  %v1894_v56 = vld [vmem:[%s2784_s1 + $0x154] sm:$0xf]  ;;  %v1829_v57 = vld [vmem:[%s2784_s1 + $0x158] sm:$0xf0]  ;;  %v1836_v60 = vor.u32 %v1897_v55, %v1835_v51 }
  0x2b   : > { %392 = vmatpush.bf16.msra.mxu1 %v1632_v29  ;;  %534 = vmatpush.bf16.msra.mxu2 %v1692_v30  ;;  %v1605_v58 = vld [vmem:[%s2160_s20 + $0x32] sm:$0x1]  ;;  %v1606_v59 = vld [vmem:[%s2160_s20 + $0x36] sm:$0x1]  ;;  %v1895_v62 = vld [vmem:[%s2784_s1 + $0x154] sm:$0xf0]  ;;  %v1832_v1 = vor.u32 %v1894_v56, %v1829_v57 }
  0x2c   : > { %553 = vmatpush.bf16.msra.mxu3 %v1696_v33  ;;  %v1827_v61 = vld [vmem:[%s2784_s1 + $0x150] sm:$0xf]  ;;  %v1607_v63 = vld [vmem:[%s2160_s20 + $0x3a] sm:$0x1]  ;;  %v1608_v0 = vld [vmem:[%s2160_s20 + $0x3e] sm:$0x1] }
  0x2d   : > { %v1892_v2 = vld [vmem:[%s2784_s1 + $0x144] sm:$0xf]  ;;  %v1821_v3 = vld [vmem:[%s2784_s1 + $0x148] sm:$0xf0]  ;;  %v1828_v4 = vor.u32 %v1895_v62, %v1827_v61  ;;  %v1819_v5 = vld [vmem:[%s2784_s1 + $0x140] sm:$0xf] }
  0x2e   : > { %1126 = vmatpush.bf16.msrb.mxu0 %v1844_v48  ;;  %v1893_v6 = vld [vmem:[%s2784_s1 + $0x144] sm:$0xf0]  ;;  %v1824_v7 = vor.u32 %v1892_v2, %v1821_v3  ;;  %v2227_v8 = vld [vmem:[%s2160_s20] sm:$0x3]  ;;  %v2230_v9 = vld [vmem:[%s2160_s20 + $0x4] sm:$0x3] }
  0x2f   : > { %1145 = vmatpush.bf16.msrb.mxu1 %v1848_v46  ;;  %1900 = vmatpush.bf16.msrb.mxu2 %v1844_v48  ;;  %v2233_v10 = vld [vmem:[%s2160_s20 + $0x8] sm:$0x3]  ;;  %v1820_v11 = vor.u32 %v1893_v6, %v1819_v5  ;;  %v177_v12 = vld [vmem:[%s2160_s20] sm:$0x1]  ;;  %v2237_v13 = vld [vmem:[%s2160_s20 + $0xc] sm:$0x3] }
  0x30   : > { %1908 = vmatpush.bf16.msrb.mxu3 %v1848_v46  ;;  %v597_v14 = vrot.slane %v2227_v8, 1  ;;  %v598_v15 = vrot.slane %v2227_v8, 2  ;;  %v599_v16 = vrot.slane %v2227_v8, 3  ;;  %v600_v17 = vrot.slane %v2230_v9, 1  ;;  %v178_v18 = vld [vmem:[%s2160_s20 + $0x4] sm:$0x1] }
  0x31   : > { %v266_v52 = vld [vmem:[#allocation1] sm:$0xff]  ;;  %v601_v19 = vrot.slane %v2230_v9, 2  ;;  %v602_v20 = vrot.slane %v2230_v9, 3  ;;  %v603_v21 = vrot.slane %v2233_v10, 1  ;;  %v604_v22 = vrot.slane %v2233_v10, 2  ;;  %s1592_s11 = sshll.u32 %s2799_s22, 1 }
  0x32   : > { %374 = vmatmul.bf16.vlgmr.msra.gmra.mxu0 %v266_v52  ;;  %393 = vmatmul.bf16.vlgmr.msra.gmra.mxu1 %v266_v52  ;;  %268 = vst [vmem:[#allocation1] ss:$9 sm:$0xff] %v1601_v40  ;;  %v179_v23 = vld [vmem:[%s2160_s20 + $0x8] sm:$0x1]  ;;  %v1890_v24 = vld [vmem:[%s2784_s1 + $0x134] sm:$0xf]  ;;  %s2718_s15 = scalar_lea.vmem %s2786_s3, %s1592_s11 }
  0x33   : > { %270 = vst [vmem:[#allocation1 + $0x1] ss:$9 sm:$0xff] %v1602_v44  ;;  %1146 = vmatpush.bf16.msrb.mxu1 %v1840_v54  ;;  %1127 = vmatpush.bf16.msrb.mxu0 %v1836_v60  ;;  %v1813_v25 = vld [vmem:[%s2784_s1 + $0x138] sm:$0xf0]  ;;  %v1811_v26 = vld [vmem:[%s2784_s1 + $0x130] sm:$0xf] }
  0x34   : > { %272 = vst [vmem:[#allocation1 + $0x2] ss:$9 sm:$0xff] %v1603_v45  ;;  %1909 = vmatpush.bf16.msrb.mxu3 %v1840_v54  ;;  %1901 = vmatpush.bf16.msrb.mxu2 %v1836_v60  ;;  %v180_v27 = vld [vmem:[%s2160_s20 + $0xc] sm:$0x1]  ;;  %v1816_v28 = vor.u32 %v1890_v24, %v1813_v25  ;;  %v1891_v29 = vld [vmem:[%s2784_s1 + $0x134] sm:$0xf0] }
  0x35   : > { %274 = vst [vmem:[#allocation1 + $0x3] ss:$9 sm:$0xff] %v1604_v53  ;;  %v605_v30 = vrot.slane %v2233_v10, 3  ;;  %v606_v31 = vrot.slane %v2237_v13, 1  ;;  %v607_v32 = vrot.slane %v2237_v13, 2  ;;  %v1812_v35 = vor.u32 %v1891_v29, %v1811_v26 }
  0x36   : > { %276 = vst [vmem:[#allocation1 + $0x4] ss:$9 sm:$0xff] %v1605_v58  ;;  %v181_v33 = vld [vmem:[%s2160_s20 + $0x10] sm:$0x1]  ;;  %v1888_v36 = vld [vmem:[%s2784_s1 + $0x124] sm:$0xf] }
  0x37   : > { %278 = vst [vmem:[#allocation1 + $0x5] ss:$9 sm:$0xff] %v1606_v59  ;;  %1147 = vmatpush.bf16.msrb.mxu1 %v1832_v1  ;;  %1128 = vmatpush.bf16.msrb.mxu0 %v1828_v4  ;;  %v1805_v37 = vld [vmem:[%s2784_s1 + $0x128] sm:$0xf0]  ;;  %v608_v38 = vrot.slane %v2237_v13, 3  ;;  %vm653_vm2 = vcmask 1041408  }
  0x38   : > { %280 = vst [vmem:[#allocation1 + $0x6] ss:$9 sm:$0xff] %v1607_v63  ;;  %1910 = vmatpush.bf16.msrb.mxu3 %v1832_v1  ;;  %1902 = vmatpush.bf16.msrb.mxu2 %v1828_v4  ;;  %v182_v39 = vld [vmem:[%s2160_s20 + $0x14] sm:$0x1]  ;;  %v1808_v40 = vor.u32 %v1888_v36, %v1805_v37  ;;  %v1803_v41 = vld [vmem:[%s2784_s1 + $0x120] sm:$0xf] }
  0x39   : > { %282 = vst [vmem:[#allocation1 + $0x7] ss:$9 sm:$0xff] %v1608_v0  ;;  %v1889_v42 = vld [vmem:[%s2784_s1 + $0x124] sm:$0xf0]  ;;  %v2281_v43 = vld [vmem:[%s2160_s20 + $0x10] sm:$0x3] }
  0x3a   : > { %v183_v44 = vld [vmem:[%s2160_s20 + $0x18] sm:$0x1]  ;;  %v1886_v45 = vld [vmem:[%s2784_s1 + $0x114] sm:$0xf]  ;;  %v1797_v46 = vld [vmem:[%s2784_s1 + $0x118] sm:$0xf0]  ;;  %v1804_v49 = vor.u32 %v1889_v42, %v1803_v41  ;;  %v692_v41 = vsel %vm649_vm1, %v607_v32, %v608_v38 }
  0x3b   : > { %1148 = vmatpush.bf16.msrb.mxu1 %v1824_v7  ;;  %1129 = vmatpush.bf16.msrb.mxu0 %v1820_v11  ;;  %v2291_v47 = vld [vmem:[%s2160_s20 + $0x14] sm:$0x3]  ;;  %v184_v48 = vld [vmem:[%s2160_s20 + $0x1c] sm:$0x1]  ;;  %v1795_v50 = vld [vmem:[%s2784_s1 + $0x110] sm:$0xf]  ;;  %v1800_v56 = vor.u32 %v1886_v45, %v1797_v46 }
  0x3c   : > { %1911 = vmatpush.bf16.msrb.mxu3 %v1824_v7  ;;  %1903 = vmatpush.bf16.msrb.mxu2 %v1820_v11  ;;  %v1887_v51 = vld [vmem:[%s2784_s1 + $0x114] sm:$0xf0]  ;;  %v2304_v53 = vld [vmem:[%s2160_s20 + $0x1c] sm:$0x3]  ;;  %v1884_v54 = vld [vmem:[%s2784_s1 + $0x104] sm:$0xf] }
  0x3d   : > { %v2301_v52 = vld [vmem:[%s2160_s20 + $0x18] sm:$0x3]  ;;  %v1789_v55 = vld [vmem:[%s2784_s1 + $0x108] sm:$0xf0]  ;;  %v1796_v57 = vor.u32 %v1887_v51, %v1795_v50  ;;  %v1787_v58 = vld [vmem:[%s2784_s1 + $0x100] sm:$0xf] }
  0x3e   : > { %v1885_v59 = vld [vmem:[%s2784_s1 + $0x104] sm:$0xf0]  ;;  %v1792_v60 = vor.u32 %v1884_v54, %v1789_v55  ;;  %v609_v62 = vrot.slane %v2281_v43, 1  ;;  %v610_v63 = vrot.slane %v2281_v43, 2  ;;  %v611_v0 = vrot.slane %v2281_v43, 3 }
  0x3f   : > { %1149 = vmatpush.bf16.msrb.mxu1 %v1816_v28  ;;  %1130 = vmatpush.bf16.msrb.mxu0 %v1812_v35  ;;  %v1788_v61 = vor.u32 %v1885_v59, %v1787_v58  ;;  %v612_v1 = vrot.slane %v2291_v47, 1  ;;  %v613_v2 = vrot.slane %v2291_v47, 2  ;;  %v614_v3 = vrot.slane %v2291_v47, 3  ;;  %v187_v36 = vld [vmem:[%s2160_s20 + $0x28] sm:$0x1] }
  0x40   : > { %v283_v34 = vld [vmem:[#allocation1] sm:$0xff]  ;;  %1912 = vmatpush.bf16.msrb.mxu3 %v1816_v28  ;;  %1904 = vmatpush.bf16.msrb.mxu2 %v1812_v35  ;;  %v615_v4 = vrot.slane %v2301_v52, 1  ;;  %v616_v5 = vrot.slane %v2301_v52, 2  ;;  %v617_v6 = vrot.slane %v2301_v52, 3  ;;  %v618_v7 = vrot.slane %v2304_v53, 1 }
  0x41   : > { %405 = vst [vmem:[#allocation1] ss:$9 sm:$0xff] %v177_v12  ;;  %v619_v11 = vrot.slane %v2304_v53, 2  ;;  %v648_v12 = vsel %vm645_vm0, %v2227_v8, %v597_v14  ;;  %vm655_vm3 = vcmask 1041409   ;;  %vm657_vm4 = vcmask 1043459  }
  0x42   : > { %408 = vst [vmem:[#allocation1 + $0x1] ss:$9 sm:$0xff] %v178_v18  ;;  %379 = vmatmul.bf16.gmra.mxu0 %v283_v34  ;;  %398 = vmatmul.bf16.gmra.mxu1 %v283_v34  ;;  %v652_v18 = vsel %vm649_vm1, %v598_v15, %v599_v16  ;;  %v656_v24 = vsel %vm655_vm3, %v2227_v8, %v597_v14  ;;  %vm2787_vm5 = vcmask 1042433   ;;  %vm843_vm6 = vsmask.f32 256 }
  0x43   : > { %411 = vst [vmem:[#allocation1 + $0x2] ss:$9 sm:$0xff] %v179_v23  ;;  %1150 = vmatpush.bf16.msrb.mxu1 %v1808_v40  ;;  %1131 = vmatpush.bf16.msrb.mxu0 %v1804_v49  ;;  %v2339_v23 = vsel %vm653_vm2, %v648_v12, %v652_v18  ;;  %v658_v25 = vsel %vm657_vm4, %v598_v15, %v599_v16  ;;  %v185_v15 = vld [vmem:[%s2160_s20 + $0x20] sm:$0x1]  ;;  %v620_v16 = vrot.slane %v2304_v53, 3 }
  0x44   : > { %414 = vst [vmem:[#allocation1 + $0x3] ss:$9 sm:$0xff] %v180_v27  ;;  %1913 = vmatpush.bf16.msrb.mxu3 %v1808_v40  ;;  %1905 = vmatpush.bf16.msrb.mxu2 %v1804_v49  ;;  %v2351_v26 = vsel %vm2787_vm5, %v656_v24, %v658_v25  ;;  %v665_v27 = vsel %vm645_vm0, %v2230_v9, %v600_v17  ;;  %v191_v50 = vld [vmem:[%s2160_s20 + $0x38] sm:$0x1]  ;;  %vm844_vm7 = vsmask.f32 1284 }
  0x45   : > { %417 = vst [vmem:[#allocation1 + $0x4] ss:$9 sm:$0xff] %v181_v33  ;;  %v668_v14 = vsel %vm649_vm1, %v601_v19, %v602_v20  ;;  %v670_v8 = vsel %vm655_vm3, %v2230_v9, %v600_v17  ;;  %v671_v29 = vsel %vm657_vm4, %v601_v19, %v602_v20  ;;  %v677_v33 = vsel %vm645_vm0, %v2233_v10, %v603_v21  ;;  %v186_v17 = vld [vmem:[%s2160_s20 + $0x24] sm:$0x1]  ;;  %vm845_vm8 = vmor %vm843_vm6, %vm844_vm7 }
  0x46   : > { %420 = vst [vmem:[#allocation1 + $0x5] ss:$9 sm:$0xff] %v182_v39  ;;  %v2369_v28 = vsel %vm653_vm2, %v665_v27, %v668_v14  ;;  %v2382_v34 = vsel %vm2787_vm5, %v670_v8, %v671_v29  ;;  %v680_v35 = vsel %vm649_vm1, %v604_v22, %v605_v30  ;;  %v682_v9 = vsel %vm655_vm3, %v2233_v10, %v603_v21  ;;  %v188_v21 = vld [vmem:[%s2160_s20 + $0x2c] sm:$0x1] }
  0x47   : > { %423 = vst [vmem:[#allocation1 + $0x6] ss:$9 sm:$0xff] %v183_v44  ;;  %1151 = vmatpush.bf16.msrb.mxu1 %v1800_v56  ;;  %1132 = vmatpush.bf16.msrb.mxu0 %v1796_v57  ;;  %v683_v19 = vsel %vm657_vm4, %v604_v22, %v605_v30  ;;  %v662_v37 = vrot.slane %v2351_v26, 1  ;;  %v2401_v39 = vsel %vm653_vm2, %v677_v33, %v680_v35  ;;  %v674_v22 = vrot.slane %v2382_v34, 1  ;;  %v189_v44 = vld [vmem:[%s2160_s20 + $0x30] sm:$0x1] }
  0x48   : > { %426 = vst [vmem:[#allocation1 + $0x7] ss:$9 sm:$0xff] %v184_v48  ;;  %1914 = vmatpush.bf16.msrb.mxu3 %v1800_v56  ;;  %1906 = vmatpush.bf16.msrb.mxu2 %v1796_v57  ;;  %v2404_v40 = vsel %vm2787_vm5, %v682_v9, %v683_v19  ;;  %v689_v10 = vsel %vm645_vm0, %v2237_v13, %v606_v31  ;;  %v190_v48 = vld [vmem:[%s2160_s20 + $0x34] sm:$0x1]  ;;  %v192_v56 = vld [vmem:[%s2160_s20 + $0x3c] sm:$0x1] }
  0x49   : > { %v686_v30 = vrot.slane %v2404_v40, 1  ;;  %v694_v42 = vsel %vm655_vm3, %v2237_v13, %v606_v31  ;;  %v695_v45 = vsel %vm657_vm4, %v607_v32, %v608_v38  ;;  %v701_v46 = vsel %vm645_vm0, %v2281_v43, %v609_v62  ;;  %v2532_v33 = vld [vmem:[%s2160_s20 + $0x24] sm:$0x3]  ;;  %v2537_v35 = vld [vmem:[%s2160_s20 + $0x28] sm:$0x3] }
  0x4a   : > { %v704_v31 = vsel %vm649_vm1, %v610_v63, %v611_v0  ;;  %v2439_v49 = vsel %vm653_vm2, %v689_v10, %v692_v41  ;;  %v696_v13 = vsel %vm2787_vm5, %v694_v42, %v695_v45  ;;  %v706_v32 = vsel %vm655_vm3, %v2281_v43, %v609_v62  ;;  %v2546_v40 = vld [vmem:[%s2160_s20 + $0x2c] sm:$0x3]  ;;  %v2559_v45 = vld [vmem:[%s2160_s20 + $0x30] sm:$0x3] }
  0x4b   : > { %1152 = vmatpush.bf16.msrb.mxu1 %v1792_v60  ;;  %1133 = vmatpush.bf16.msrb.mxu0 %v1788_v61  ;;  %v707_v38 = vsel %vm657_vm4, %v610_v63, %v611_v0  ;;  %v2453_v51 = vsel %vm653_vm2, %v701_v46, %v704_v31  ;;  %v713_v55 = vsel %vm645_vm0, %v2291_v47, %v612_v1  ;;  %v698_v57 = vrot.slane %v696_v13, 1  ;;  %v2562_v46 = vld [vmem:[%s2160_s20 + $0x34] sm:$0x3] }
  0x4c   : > { %1915 = vmatpush.bf16.msrb.mxu3 %v1792_v60  ;;  %1907 = vmatpush.bf16.msrb.mxu2 %v1788_v61  ;;  %v708_v54 = vsel %vm2787_vm5, %v706_v32, %v707_v38  ;;  %v716_v43 = vsel %vm649_vm1, %v613_v2, %v614_v3  ;;  %v718_v59 = vsel %vm655_vm3, %v2291_v47, %v612_v1  ;;  %vm846_vm9 = vsmask.f32 2312  ;;  %v2574_v38 = vld [vmem:[%s2160_s20 + $0x38] sm:$0x3] }
  0x4d   : > { %v710_v58 = vrot.slane %v708_v54, 1  ;;  %v719_v60 = vsel %vm657_vm4, %v613_v2, %v614_v3  ;;  %v725_v62 = vsel %vm645_vm0, %v2301_v52, %v615_v4  ;;  %v728_v63 = vsel %vm649_vm1, %v616_v5, %v617_v6  ;;  %vm847_vm11 = vmor %vm845_vm8, %vm846_vm9 }
  0x4e   : > { %v720_v61 = vsel %vm2787_vm5, %v718_v59, %v719_v60  ;;  %v730_v47 = vsel %vm655_vm3, %v2301_v52, %v615_v4  ;;  %v2490_v0 = vsel %vm653_vm2, %v713_v55, %v716_v43  ;;  %v731_v2 = vsel %vm657_vm4, %v616_v5, %v617_v6 }
  0x4f   : > { %v427_v20 = vld [vmem:[#allocation1] sm:$0xff]  ;;  %v722_v1 = vrot.slane %v720_v61, 1  ;;  %v737_v3 = vsel %vm645_vm0, %v2304_v53, %v618_v7  ;;  %v732_v12 = vsel %vm2787_vm5, %v730_v47, %v731_v2  ;;  %v740_v4 = vsel %vm649_vm1, %v619_v11, %v620_v16 }
  0x50   : > { %535 = vmatmul.bf16.vlgmr.msra.gmra.mxu2 %v427_v20  ;;  %554 = vmatmul.bf16.vlgmr.msra.gmra.mxu3 %v427_v20  ;;  %429 = vst [vmem:[#allocation1] ss:$9 sm:$0xff] %v185_v15  ;;  %v742_v52 = vsel %vm655_vm3, %v2304_v53, %v618_v7  ;;  %v743_v5 = vsel %vm657_vm4, %v619_v11, %v620_v16  ;;  %v734_v18 = vrot.slane %v732_v12, 1  ;;  %vm848_vm10 = vsmask.f32 3340 }
  0x51   : > { %431 = vst [vmem:[#allocation1 + $0x1] ss:$9 sm:$0xff] %v186_v17  ;;  %v729_v6 = vsel %vm653_vm2, %v725_v62, %v728_v63  ;;  %v744_v24 = vsel %vm2787_vm5, %v742_v52, %v743_v5  ;;  %v858_v7 = vshrl.u32 %v2339_v23, 16  ;;  %v741_v27 = vsel %vm653_vm2, %v737_v3, %v740_v4  ;;  %v2522_v53 = vld [vmem:[%s2160_s20 + $0x20] sm:$0x3]  ;;  %vm849_vm15 = vmor %vm847_vm11, %vm848_vm10 }
  0x52   : > { %433 = vst [vmem:[#allocation1 + $0x2] ss:$9 sm:$0xff] %v187_v36  ;;  %v746_v25 = vrot.slane %v744_v24, 1  ;;  %vm850_vm12 = vsmask.f32 4368  ;;  %v863_v11 = vshll.u32 %v662_v37, 16 }
  0x53   : > { %435 = vst [vmem:[#allocation1 + $0x3] ss:$9 sm:$0xff] %v188_v21  ;;  %vm852_vm13 = vsmask.f32 5396  ;;  %vm854_vm14 = vsmask.f32 6424  ;;  %vm851_vm6 = vmor %vm849_vm15, %vm850_vm12 }
  0x54   : > { %437 = vst [vmem:[#allocation1 + $0x4] ss:$9 sm:$0xff] %v189_v44  ;;  %vm856_vm5 = vsmask.f32 7452  ;;  %v866_v14 = vshrl.u32 %v2369_v28, 16  ;;  %v871_v8 = vshll.u32 %v674_v22, 16  ;;  %vm853_vm7 = vmor %vm851_vm6, %vm852_vm13 }
  0x55   : > { %439 = vst [vmem:[#allocation1 + $0x5] ss:$9 sm:$0xff] %v190_v48  ;;  %v874_v23 = vshrl.u32 %v2401_v39, 16  ;;  %v879_v15 = vshll.u32 %v686_v30, 16  ;;  %v882_v16 = vshrl.u32 %v2439_v49, 16  ;;  %v887_v29 = vshll.u32 %v698_v57, 16  ;;  %vm855_vm8 = vmor %vm853_vm7, %vm854_vm14 }
  0x56   : > { %441 = vst [vmem:[#allocation1 + $0x6] ss:$9 sm:$0xff] %v191_v50  ;;  %v890_v17 = vshrl.u32 %v2453_v51, 16  ;;  %v895_v26 = vshll.u32 %v710_v58, 16  ;;  %v898_v34 = vshrl.u32 %v2490_v0, 16  ;;  %v903_v28 = vshll.u32 %v722_v1, 16  ;;  %vm2541_vm9 = vmor %vm855_vm8, %vm856_vm5 }
  0x57   : > { %443 = vst [vmem:[#allocation1 + $0x7] ss:$9 sm:$0xff] %v192_v56  ;;  %v906_v19 = vshrl.u32 %v729_v6, 16  ;;  %v911_v20 = vshll.u32 %v734_v18, 16  ;;  %v914_v36 = vshrl.u32 %v741_v27, 16  ;;  %v919_v37 = vshll.u32 %v746_v25, 16 }
  0x58   : > { %v621_v10 = vrot.slane %v2522_v53, 1  ;;  %v622_v21 = vrot.slane %v2522_v53, 2  ;;  %v623_v22 = vrot.slane %v2522_v53, 3  ;;  %v624_v30 = vrot.slane %v2532_v33, 1  ;;  %v2577_v50 = vld [vmem:[%s2160_s20 + $0x3c] sm:$0x3] }
  0x59   : > { %v865_v41 = vsel %vm2541_vm9, %v858_v7, %v863_v11  ;;  %v873_v42 = vsel %vm2541_vm9, %v866_v14, %v871_v8  ;;  %v881_v44 = vsel %vm2541_vm9, %v874_v23, %v879_v15  ;;  %v625_v31 = vrot.slane %v2532_v33, 2 }
  0x5a   : > { %v889_v48 = vsel %vm2541_vm9, %v882_v16, %v887_v29  ;;  %v897_v49 = vsel %vm2541_vm9, %v890_v17, %v895_v26  ;;  %v905_v13 = vsel %vm2541_vm9, %v898_v34, %v903_v28  ;;  %v913_v32 = vsel %vm2541_vm9, %v906_v19, %v911_v20 }
  0x5b   : > { %v921_v51 = vsel %vm2541_vm9, %v914_v36, %v919_v37  ;;  %v626_v54 = vrot.slane %v2532_v33, 3  ;;  %v627_v55 = vrot.slane %v2537_v35, 1  ;;  %v628_v43 = vrot.slane %v2537_v35, 2 }
  0x5c   : > { %v629_v56 = vrot.slane %v2537_v35, 3  ;;  %v630_v57 = vrot.slane %v2546_v40, 1  ;;  %v631_v58 = vrot.slane %v2546_v40, 2  ;;  %v632_v59 = vrot.slane %v2546_v40, 3 }
  0x5d   : > { %v633_v60 = vrot.slane %v2559_v45, 1  ;;  %v634_v61 = vrot.slane %v2559_v45, 2  ;;  %v635_v62 = vrot.slane %v2559_v45, 3  ;;  %v636_v63 = vrot.slane %v2562_v46, 1 }
  0x5e   : > { %v444_v9 = vld [vmem:[#allocation1] sm:$0xff]  ;;  %v637_v47 = vrot.slane %v2562_v46, 2  ;;  %v638_v0 = vrot.slane %v2562_v46, 3  ;;  %v639_v1 = vrot.slane %v2574_v38, 1  ;;  %v640_v2 = vrot.slane %v2574_v38, 2 }
  0x5f   : > { %1004 = vst [vmem:[#allocation1] ss:$9 sm:$0xff] %v865_v41  ;;  %v641_v3 = vrot.slane %v2574_v38, 3  ;;  %v642_v12 = vrot.slane %v2577_v50, 1  ;;  %v643_v4 = vrot.slane %v2577_v50, 2  ;;  %v644_v52 = vrot.slane %v2577_v50, 3 }
  0x60   : > { %540 = vmatmul.bf16.gmra.mxu2 %v444_v9  ;;  %559 = vmatmul.bf16.gmra.mxu3 %v444_v9  ;;  %1007 = vst [vmem:[#allocation1 + $0x1] ss:$9 sm:$0xff] %v873_v42  ;;  %v749_v5 = vsel %vm645_vm0, %v2522_v53, %v621_v10  ;;  %v752_v6 = vsel %vm649_vm1, %v622_v21, %v623_v22  ;;  %vm2790_vm5 = vcmask 1042433  }
  0x61   : > { %1010 = vst [vmem:[#allocation1 + $0x2] ss:$9 sm:$0xff] %v881_v44  ;;  %v754_v18 = vsel %vm655_vm3, %v2522_v53, %v621_v10  ;;  %v755_v24 = vsel %vm657_vm4, %v622_v21, %v623_v22  ;;  %v2607_v25 = vsel %vm653_vm2, %v749_v5, %v752_v6  ;;  %v761_v27 = vsel %vm645_vm0, %v2532_v33, %v624_v30  ;;  %vm2791_vm10 = vmmov %vm2790_vm5 }
  0x62   : > { %1013 = vst [vmem:[#allocation1 + $0x3] ss:$9 sm:$0xff] %v889_v48  ;;  %v756_v7 = vsel %vm2790_vm5, %v754_v18, %v755_v24  ;;  %v764_v11 = vsel %vm649_vm1, %v625_v31, %v626_v54  ;;  %v766_v23 = vsel %vm655_vm3, %v2532_v33, %v624_v30  ;;  %v767_v53 = vsel %vm657_vm4, %v625_v31, %v626_v54  ;;  %vm2792_vm11 = vmmov %vm2790_vm5 }
  0x63   : > { %1016 = vst [vmem:[#allocation1 + $0x4] ss:$9 sm:$0xff] %v897_v49  ;;  %v758_v14 = vrot.slane %v756_v7, 1  ;;  %v765_v8 = vsel %vm653_vm2, %v761_v27, %v764_v11  ;;  %v768_v15 = vsel %vm2791_vm10, %v766_v23, %v767_v53  ;;  %v773_v16 = vsel %vm645_vm0, %v2537_v35, %v627_v55  ;;  %vm2793_vm12 = vmmov %vm2790_vm5 }
  0x64   : > { %1019 = vst [vmem:[#allocation1 + $0x5] ss:$9 sm:$0xff] %v905_v13  ;;  %v776_v29 = vsel %vm649_vm1, %v628_v43, %v629_v56  ;;  %v778_v17 = vsel %vm655_vm3, %v2537_v35, %v627_v55  ;;  %v770_v26 = vrot.slane %v768_v15, 1  ;;  %v779_v28 = vsel %vm657_vm4, %v628_v43, %v629_v56  ;;  %vm2794_vm13 = vmmov %vm2790_vm5 }
  0x65   : > { %1022 = vst [vmem:[#allocation1 + $0x6] ss:$9 sm:$0xff] %v913_v32  ;;  %v777_v34 = vsel %vm653_vm2, %v773_v16, %v776_v29  ;;  %v785_v33 = vsel %vm645_vm0, %v2546_v40, %v630_v57  ;;  %v780_v9 = vsel %vm2792_vm11, %v778_v17, %v779_v28  ;;  %v788_v19 = vsel %vm649_vm1, %v631_v58, %v632_v59  ;;  %vm2795_vm14 = vmmov %vm2790_vm5 }
  0x66   : > { %1025 = vst [vmem:[#allocation1 + $0x7] ss:$9 sm:$0xff] %v921_v51  ;;  %v790_v20 = vsel %vm655_vm3, %v2546_v40, %v630_v57  ;;  %v791_v36 = vsel %vm657_vm4, %v631_v58, %v632_v59  ;;  %v782_v37 = vrot.slane %v780_v9, 1  ;;  %v789_v35 = vsel %vm653_vm2, %v785_v33, %v788_v19  ;;  %vm2796_vm15 = vmmov %vm2790_vm5 }
  0x67   : > { %v792_v10 = vsel %vm2793_vm12, %v790_v20, %v791_v36  ;;  %v797_v21 = vsel %vm645_vm0, %v2559_v45, %v633_v60  ;;  %v800_v30 = vsel %vm649_vm1, %v634_v61, %v635_v62  ;;  %v802_v41 = vsel %vm655_vm3, %v2559_v45, %v633_v60  ;;  %vm2797_vm6 = vmmov %vm2790_vm5 }
  0x68   : > { %v794_v22 = vrot.slane %v792_v10, 1  ;;  %v803_v42 = vsel %vm657_vm4, %v634_v61, %v635_v62  ;;  %v801_v40 = vsel %vm653_vm2, %v797_v21, %v800_v30  ;;  %v809_v48 = vsel %vm645_vm0, %v2562_v46, %v636_v63 }
  0x69   : > { %v804_v31 = vsel %vm2794_vm13, %v802_v41, %v803_v42  ;;  %v812_v49 = vsel %vm649_vm1, %v637_v47, %v638_v0  ;;  %v814_v51 = vsel %vm655_vm3, %v2562_v46, %v636_v63  ;;  %v815_v45 = vsel %vm657_vm4, %v637_v47, %v638_v0 }
  0x6a   : > { %v806_v13 = vrot.slane %v804_v31, 1  ;;  %v813_v32 = vsel %vm653_vm2, %v809_v48, %v812_v49  ;;  %v816_v54 = vsel %vm2795_vm14, %v814_v51, %v815_v45  ;;  %v821_v55 = vsel %vm645_vm0, %v2574_v38, %v639_v1 }
  0x6b   : > { %v824_v43 = vsel %vm649_vm1, %v640_v2, %v641_v3  ;;  %v826_v56 = vsel %vm655_vm3, %v2574_v38, %v639_v1  ;;  %v818_v57 = vrot.slane %v816_v54, 1  ;;  %v827_v59 = vsel %vm657_vm4, %v640_v2, %v641_v3 }
  0x6c   : > { %v825_v58 = vsel %vm653_vm2, %v821_v55, %v824_v43  ;;  %v833_v46 = vsel %vm645_vm0, %v2577_v50, %v642_v12  ;;  %v828_v60 = vsel %vm2796_vm15, %v826_v56, %v827_v59  ;;  %v836_v61 = vsel %vm649_vm1, %v643_v4, %v644_v52 }
  0x6d   : > { %v1026_v44 = vld [vmem:[#allocation1] sm:$0xff]  ;;  %v838_v62 = vsel %vm655_vm3, %v2577_v50, %v642_v12  ;;  %v839_v63 = vsel %vm657_vm4, %v643_v4, %v644_v52  ;;  %v830_v47 = vrot.slane %v828_v60, 1  ;;  %v837_v38 = vsel %vm653_vm2, %v833_v46, %v836_v61 }
  0x6e   : > { %1134 = vmatmul.bf16.vlgmr.msrb.gmra.mxu0 %v1026_v44  ;;  %1153 = vmatmul.bf16.vlgmr.msrb.gmra.mxu1 %v1026_v44  ;;  %v840_v0 = vsel %vm2797_vm6, %v838_v62, %v839_v63  ;;  %v922_v1 = vshrl.u32 %v2607_v25, 16  ;;  %v927_v3 = vshll.u32 %v758_v14, 16  ;;  %v930_v5 = vshrl.u32 %v765_v8, 16 }
  0x6f   : > { %v842_v2 = vrot.slane %v840_v0, 1  ;;  %v935_v6 = vshll.u32 %v770_v26, 16  ;;  %v938_v18 = vshrl.u32 %v777_v34, 16  ;;  %v943_v24 = vshll.u32 %v782_v37, 16 }
  0x70   : > { %v946_v7 = vshrl.u32 %v789_v35, 16  ;;  %v951_v27 = vshll.u32 %v794_v22, 16  ;;  %v929_v50 = vsel %vm2541_vm9, %v922_v1, %v927_v3  ;;  %v954_v4 = vshrl.u32 %v801_v40, 16  ;;  %v1231_v22 = vld [vmem:[%s2785_s2] sm:$0x3] }
  0x71   : > { %v937_v12 = vsel %vm2541_vm9, %v930_v5, %v935_v6  ;;  %v959_v52 = vshll.u32 %v806_v13, 16  ;;  %v945_v11 = vsel %vm2541_vm9, %v938_v18, %v943_v24  ;;  %v962_v14 = vshrl.u32 %v813_v32, 16  ;;  %1028 = vst [vmem:[#allocation1] ss:$9 sm:$0xff] %v929_v50 }
  0x72   : > { %v953_v25 = vsel %vm2541_vm9, %v946_v7, %v951_v27  ;;  %v967_v8 = vshll.u32 %v818_v57, 16  ;;  %v970_v53 = vshrl.u32 %v825_v58, 16  ;;  %v975_v15 = vshll.u32 %v830_v47, 16  ;;  %1030 = vst [vmem:[#allocation1 + $0x1] ss:$9 sm:$0xff] %v937_v12 }
  0x73   : > { %v961_v23 = vsel %vm2541_vm9, %v954_v4, %v959_v52  ;;  %v978_v16 = vshrl.u32 %v837_v38, 16  ;;  %v983_v17 = vshll.u32 %v842_v2, 16  ;;  %1032 = vst [vmem:[#allocation1 + $0x2] ss:$9 sm:$0xff] %v945_v11  ;;  %v1234_v30 = vperm.slane %v1231_v22, 1 }
  0x74   : > { %v969_v29 = vsel %vm2541_vm9, %v962_v14, %v967_v8  ;;  %v977_v26 = vsel %vm2541_vm9, %v970_v53, %v975_v15  ;;  %1034 = vst [vmem:[#allocation1 + $0x3] ss:$9 sm:$0xff] %v953_v25  ;;  %v1233_v40 = vperm.slane %v1231_v22, 0  ;;  %vm1185_vm1 = vcmask 1043458  }
  0x75   : > { %v985_v34 = vsel %vm2541_vm9, %v978_v16, %v983_v17  ;;  %1036 = vst [vmem:[#allocation1 + $0x4] ss:$9 sm:$0xff] %v961_v23  ;;  %v1235_v31 = vrot.slane %v1234_v30, 6  ;;  %vm1188_vm3 = vcmask 1045508   ;;  %vm1191_vm4 = vcmask 1045504  }
  0x76   : > { %1038 = vst [vmem:[#allocation1 + $0x5] ss:$9 sm:$0xff] %v969_v29 }
  0x77   : > { %1040 = vst [vmem:[#allocation1 + $0x6] ss:$9 sm:$0xff] %v977_v26  ;;  %v2695_v54 = vsel %vm653_vm2, %v1233_v40, %v1235_v31 }
  0x78   : > { %1042 = vst [vmem:[#allocation1 + $0x7] ss:$9 sm:$0xff] %v985_v34 }
  0x7f   : > { %v1043_v28 = vld [vmem:[#allocation1] sm:$0xff] }
  0x80   : > { %1139 = vmatmul.bf16.vlgmr.msrb.gmra.mxu2 %v1043_v28  ;;  %1158 = vmatmul.bf16.vlgmr.msrb.gmra.mxu3 %v1043_v28 }
  0xaf   : > { %v375_v33 = vpop.f32.mrf.mxu0  ;;  %v394_v9 = vpop.f32.mrf.mxu1 }
  0xb7   : > { %v377_v19 = vpop.f32.mrf.mxu0  ;;  %v396_v20 = vpop.f32.mrf.mxu1 }
  0xbf   : > { %v2683_v36 = vpop.f32.mrf.mxu0  ;;  %v2685_v37 = vpop.f32.mrf.mxu1 }
  0xc7   : > { %v2687_v21 = vpop.f32.mrf.mxu0  ;;  %v2689_v39 = vpop.f32.mrf.mxu1 }
  0xd3   : > { %v536_v35 = vpop.f32.mrf.mxu2  ;;  %v555_v10 = vpop.f32.mrf.mxu3 }
  0xd4   : > { %v556_v41 = vadd.f32 %v555_v10, %v394_v9  ;;  %v537_v13 = vadd.f32 %v536_v35, %v375_v33 }
  0xdb   : > { %v538_v42 = vpop.f32.mrf.mxu2  ;;  %v557_v44 = vpop.f32.mrf.mxu3 }
  0xdc   : > { %v558_v46 = vadd.f32 %v557_v44, %v396_v20  ;;  %v539_v5 = vadd.f32 %v538_v42, %v377_v19 }
  0xe3   : > { %v2703_v63 = vpop.f32.mrf.mxu2  ;;  %v560_v47 = vpop.f32.mrf.mxu3 }
  0xe4   : > { %v561_v40 = vadd.f32 %v560_v47, %v2685_v37 }
  0xeb   : > { %v1135_v48 = vpop.f32.mrf.mxu0  ;;  %v1154_v49 = vpop.f32.mrf.mxu1 }
  0xec   : > { %v1165_v32 = vadd.f32 %v1154_v49, %v556_v41  ;;  %v1164_v51 = vadd.f32 %v1135_v48, %v537_v13  ;;  %v2710_v14 = vpop.f32.mrf.mxu2  ;;  %v2712_v8 = vpop.f32.mrf.mxu3 }
  0xee   : > { %v1180_v45 = vrot.slane %v1165_v32, 6 }
  0xf0   : > { %v1184_v55 = vsel %vm653_vm2, %v1164_v51, %v1180_v45  ;;  %v1186_v43 = vsel %vm1185_vm1, %v1164_v51, %v1180_v45  ;;  %v1189_v56 = vsel %vm1188_vm3, %v1164_v51, %v1180_v45  ;;  %v1192_v58 = vsel %vm1191_vm4, %v1180_v45, %v1164_v51 }
  0xf1   : > { %v1187_v57 = vrot.slane %v1186_v43, 2  ;;  %v1238_v59 = vadd.f32 %v2695_v54, %v1184_v55  ;;  %v1190_v60 = vrot.slane %v1189_v56, 4  ;;  %v1193_v38 = vrot.slane %v1192_v58, 6 }
  0xf2   : > { %v542_v43 = vadd.f32 %v2703_v63, %v2683_v36 }
  0xf3   : > { %v1239_v61 = vadd.f32 %v2695_v54, %v1187_v57  ;;  %vm1254_vm7 = vcmp.ge.f32.partialorder %v1238_v59, 0.0  ;;  %v1156_v62 = vpop.f32.mrf.mxu1  ;;  %v1270_v0 = vmul.f32 0.2, %v1238_v59  ;;  %v1137_v3 = vpop.f32.mrf.mxu0  ;;  %v1240_v24 = vadd.f32 %v2695_v54, %v1190_v60 }
  0xf4   : > { %v1167_v1 = vadd.f32 %v1156_v62, %v558_v46  ;;  %v1241_v27 = vadd.f32 %v2695_v54, %v1193_v38  ;;  %v1166_v50 = vadd.f32 %v1137_v3, %v539_v5 }
  0xf5   : > { %vm1255_vm8 = vcmp.ge.f32.partialorder %v1239_v61, 0.0  ;;  %v1271_v2 = vmul.f32 0.2, %v1239_v61  ;;  %v1286_v6 = vsel %vm1254_vm7, %v1238_v59, %v1270_v0  ;;  %v1272_v4 = vmul.f32 0.2, %v1240_v24 }
  0xf6   : > { %v1181_v18 = vrot.slane %v1167_v1, 6  ;;  %1318 = vst [vmem:[#allocation1] ss:$4 sm:$0xff] %v1286_v6  ;;  %vm1256_vm9 = vcmp.ge.f32.partialorder %v1240_v24, 0.0  ;;  %v1273_v52 = vmul.f32 0.2, %v1241_v27 }
  0xf7   : > { %v1287_v7 = vsel %vm1255_vm8, %v1239_v61, %v1271_v2  ;;  %vm1257_vm5 = vcmp.ge.f32.partialorder %v1241_v27, 0.0  ;;  %v1288_v15 = vsel %vm1256_vm9, %v1240_v24, %v1272_v4 }
  0xf8   : > { %1322 = vst [vmem:[#allocation1 + $0x20] ss:$4 sm:$0xff] %v1287_v7  ;;  %v1195_v12 = vsel %vm1185_vm1, %v1166_v50, %v1181_v18  ;;  %v1194_v11 = vsel %vm653_vm2, %v1166_v50, %v1181_v18  ;;  %v1289_v26 = vsel %vm1257_vm5, %v1241_v27, %v1273_v52  ;;  %v1197_v35 = vsel %vm1188_vm3, %v1166_v50, %v1181_v18 }
  0xf9   : > { %v1196_v25 = vrot.slane %v1195_v12, 2  ;;  %v1242_v28 = vadd.f32 %v2695_v54, %v1194_v11  ;;  %v1199_v10 = vsel %vm1191_vm4, %v1181_v18, %v1166_v50  ;;  %v1198_v42 = vrot.slane %v1197_v35, 4 }
  0xfa   : > { %v1200_v44 = vrot.slane %v1199_v10, 6  ;;  %v563_v7 = vadd.f32 %v2712_v8, %v2689_v39 }
  0xfb   : > { %v1243_v9 = vadd.f32 %v2695_v54, %v1196_v25  ;;  %v1274_v30 = vmul.f32 0.2, %v1242_v28  ;;  %vm1258_vm10 = vcmp.ge.f32.partialorder %v1242_v28, 0.0  ;;  %v1244_v46 = vadd.f32 %v2695_v54, %v1198_v42 }
  0xfc   : > { %v1245_v61 = vadd.f32 %v2695_v54, %v1200_v44 }
  0xfd   : > { %v1319_v23 = vld.sshfl [vmem:[#allocation1] sm:$0xff pattern:$0x73625140]  ;;  %v1320_v53 = vld.sshfl [vmem:[#allocation1 + $0x8] sm:$0xff pattern:$0x73625140]  ;;  %v1290_v51 = vsel %vm1258_vm10, %v1242_v28, %v1274_v30 }
  0xfe   : > { %v1399_v17 = vpack.c.bf16 %v1320_v53, %v1319_v23  ;;  %1325 = vst [vmem:[#allocation1] ss:$4 sm:$0xff] %v1288_v15  ;;  %v1275_v41 = vmul.f32 0.2, %v1243_v9  ;;  %vm1259_vm11 = vcmp.ge.f32.partialorder %v1243_v9, 0.0  ;;  %vm1260_vm12 = vcmp.ge.f32.partialorder %v1244_v46, 0.0 }
  0xff   : > { %v1323_v16 = vld.sshfl [vmem:[#allocation1 + $0x20] sm:$0xff pattern:$0x73625140]  ;;  %v1324_v29 = vld.sshfl [vmem:[#allocation1 + $0x28] sm:$0xff pattern:$0x73625140] }
 0x100   : > { %v1400_v34 = vpack.c.bf16 %v1324_v29, %v1323_v16  ;;  %1328 = vst [vmem:[#allocation1 + $0x20] ss:$4 sm:$0xff] %v1289_v26  ;;  %v1431_v33 = vrot.slane %v1399_v17, 3  ;;  %v1291_v57 = vsel %vm1259_vm11, %v1243_v9, %v1275_v41  ;;  %v1276_v36 = vmul.f32 0.2, %v1244_v46 }
 0x101   : > { %v1277_v0 = vmul.f32 0.2, %v1245_v61  ;;  %vm1261_vm13 = vcmp.ge.f32.partialorder %v1245_v61, 0.0 }
 0x102   : > { %v1432_v19 = vrot.slane %v1400_v34, 3  ;;  %v1449_v20 = vsel %vm645_vm0, %v1399_v17, %v1431_v33  ;;  %v1292_v18 = vsel %vm1260_vm12, %v1244_v46, %v1276_v36  ;;  %v544_v33 = vadd.f32 %v2710_v14, %v2687_v21 }
 0x103   : > { %1511 = vst [vmem:[%s2718_s15] sm:$0x3] %v1449_v20  ;;  %v1140_v13 = vpop.f32.mrf.mxu2  ;;  %v1159_v32 = vpop.f32.mrf.mxu3  ;;  %v1293_v4 = vsel %vm1261_vm13, %v1245_v61, %v1277_v0 }
 0x104   : > { %v1452_v22 = vsel %vm645_vm0, %v1400_v34, %v1432_v19  ;;  %v1169_v56 = vadd.f32 %v1159_v32, %v561_v40  ;;  %v1168_v37 = vadd.f32 %v1140_v13, %v542_v43 }
 0x105   : > { %1512 = vst [vmem:[%s2718_s15 + $0x2] sm:$0x3] %v1452_v22  ;;  %v1326_v31 = vld.sshfl [vmem:[#allocation1] sm:$0xff pattern:$0x73625140] }
 0x106   : > { %v1327_v48 = vld.sshfl [vmem:[#allocation1 + $0x8] sm:$0xff pattern:$0x73625140]  ;;  %v1182_v60 = vrot.slane %v1169_v56, 6 }
 0x107   : > { %v1401_v49 = vpack.c.bf16 %v1327_v48, %v1326_v31  ;;  %v1329_v45 = vld.sshfl [vmem:[#allocation1 + $0x20] sm:$0xff pattern:$0x73625140]  ;;  %v1330_v55 = vld.sshfl [vmem:[#allocation1 + $0x28] sm:$0xff pattern:$0x73625140] }
 0x108   : > { %1331 = vst [vmem:[#allocation1] ss:$4 sm:$0xff] %v1290_v51  ;;  %v1402_v58 = vpack.c.bf16 %v1330_v55, %v1329_v45  ;;  %v1202_v38 = vsel %vm1185_vm1, %v1168_v37, %v1182_v60  ;;  %v1201_v63 = vsel %vm653_vm2, %v1168_v37, %v1182_v60  ;;  %v1204_v27 = vsel %vm1188_vm3, %v1168_v37, %v1182_v60 }
 0x109   : > { %v1433_v59 = vrot.slane %v1401_v49, 3  ;;  %1334 = vst [vmem:[#allocation1 + $0x20] ss:$4 sm:$0xff] %v1291_v57  ;;  %v1203_v2 = vrot.slane %v1202_v38, 2  ;;  %v1246_v6 = vadd.f32 %v2695_v54, %v1201_v63  ;;  %v1206_v25 = vsel %vm1191_vm4, %v1182_v60, %v1168_v37 }
 0x10a   : > { %v1434_v62 = vrot.slane %v1402_v58, 3  ;;  %v1205_v16 = vrot.slane %v1204_v27, 4  ;;  %v1207_v17 = vrot.slane %v1206_v25, 6 }
 0x10b   : > { %v1455_v47 = vsel %vm645_vm0, %v1401_v49, %v1433_v59  ;;  %v1161_v24 = vpop.f32.mrf.mxu3  ;;  %v1247_v12 = vadd.f32 %v2695_v54, %v1203_v2  ;;  %v1278_v29 = vmul.f32 0.2, %v1246_v6  ;;  %vm1262_vm14 = vcmp.ge.f32.partialorder %v1246_v6, 0.0  ;;  %v1142_v34 = vpop.f32.mrf.mxu2 }
 0x10c   : > { %1513 = vst [vmem:[%s2718_s15 + $0x4] sm:$0x3] %v1455_v47  ;;  %v1458_v1 = vsel %vm645_vm0, %v1402_v58, %v1434_v62  ;;  %v1171_v15 = vadd.f32 %v1161_v24, %v563_v7  ;;  %v1248_v9 = vadd.f32 %v2695_v54, %v1205_v16  ;;  %v1249_v30 = vadd.f32 %v2695_v54, %v1207_v17 }
 0x10d   : > { %1514 = vst [vmem:[%s2718_s15 + $0x6] sm:$0x3] %v1458_v1  ;;  %v1279_v26 = vmul.f32 0.2, %v1247_v12  ;;  %vm1263_vm15 = vcmp.ge.f32.partialorder %v1247_v12, 0.0  ;;  %v1294_v19 = vsel %vm1262_vm14, %v1246_v6, %v1278_v29  ;;  %v1170_v40 = vadd.f32 %v1142_v34, %v544_v33 }
 0x10e   : > { %v1183_v28 = vrot.slane %v1171_v15, 6  ;;  %v1280_v14 = vmul.f32 0.2, %v1248_v9  ;;  %vm1264_vm6 = vcmp.ge.f32.partialorder %v1248_v9, 0.0  ;;  %v1281_v32 = vmul.f32 0.2, %v1249_v30 }
 0x10f   : > { %v1332_v3 = vld.sshfl [vmem:[#allocation1] sm:$0xff pattern:$0x73625140]  ;;  %v1333_v5 = vld.sshfl [vmem:[#allocation1 + $0x8] sm:$0xff pattern:$0x73625140]  ;;  %v1295_v41 = vsel %vm1263_vm15, %v1247_v12, %v1279_v26 }
 0x110   : > { %1337 = vst [vmem:[#allocation1] ss:$4 sm:$0xff] %v1292_v18  ;;  %v1403_v50 = vpack.c.bf16 %v1333_v5, %v1332_v3  ;;  %v1335_v52 = vld.sshfl [vmem:[#allocation1 + $0x20] sm:$0xff pattern:$0x73625140]  ;;  %v1209_v48 = vsel %vm1185_vm1, %v1170_v40, %v1183_v28  ;;  %vm1265_vm7 = vcmp.ge.f32.partialorder %v1249_v30, 0.0  ;;  %v1208_v51 = vsel %vm653_vm2, %v1170_v40, %v1183_v28 }
 0x111   : > { %v1336_v11 = vld.sshfl [vmem:[#allocation1 + $0x28] sm:$0xff pattern:$0x73625140]  ;;  %v1210_v45 = vrot.slane %v1209_v48, 2  ;;  %v1296_v55 = vsel %vm1264_vm6, %v1248_v9, %v1280_v14  ;;  %v1297_v59 = vsel %vm1265_vm7, %v1249_v30, %v1281_v32  ;;  %v1211_v60 = vsel %vm1188_vm3, %v1170_v40, %v1183_v28 }
 0x112   : > { %1340 = vst [vmem:[#allocation1 + $0x20] ss:$4 sm:$0xff] %v1293_v4  ;;  %v1404_v23 = vpack.c.bf16 %v1336_v11, %v1335_v52  ;;  %v1435_v53 = vrot.slane %v1403_v50, 3  ;;  %v1250_v61 = vadd.f32 %v2695_v54, %v1208_v51  ;;  %v1213_v38 = vsel %vm1191_vm4, %v1183_v28, %v1170_v40 }
 0x113   : > { %v1251_v36 = vadd.f32 %v2695_v54, %v1210_v45  ;;  %v1212_v1 = vrot.slane %v1211_v60, 4  ;;  %v1214_v2 = vrot.slane %v1213_v38, 6 }
 0x114   : > { %v1436_v39 = vrot.slane %v1404_v23, 3  ;;  %v1461_v8 = vsel %vm645_vm0, %v1403_v50, %v1435_v53  ;;  %v1282_v3 = vmul.f32 0.2, %v1250_v61  ;;  %vm1266_vm2 = vcmp.ge.f32.partialorder %v1250_v61, 0.0 }
 0x115   : > { %1515 = vst [vmem:[%s2718_s15 + $0x8] sm:$0x3] %v1461_v8  ;;  %vm1267_vm1 = vcmp.ge.f32.partialorder %v1251_v36, 0.0  ;;  %v1283_v6 = vmul.f32 0.2, %v1251_v36  ;;  %v1252_v11 = vadd.f32 %v2695_v54, %v1212_v1 }
 0x116   : > { %v1464_v22 = vsel %vm645_vm0, %v1404_v23, %v1436_v39  ;;  %v1298_v12 = vsel %vm1266_vm2, %v1250_v61, %v1282_v3  ;;  %v1253_v23 = vadd.f32 %v2695_v54, %v1214_v2 }
 0x117   : > { %v1338_v20 = vld.sshfl [vmem:[#allocation1] sm:$0xff pattern:$0x73625140]  ;;  %v1339_v35 = vld.sshfl [vmem:[#allocation1 + $0x8] sm:$0xff pattern:$0x73625140]  ;;  %v1299_v25 = vsel %vm1267_vm1, %v1251_v36, %v1283_v6 }
 0x118   : > { %1343 = vst [vmem:[#allocation1] ss:$4 sm:$0xff] %v1294_v19  ;;  %v1405_v10 = vpack.c.bf16 %v1339_v35, %v1338_v20  ;;  %v1284_v29 = vmul.f32 0.2, %v1252_v11  ;;  %vm1268_vm3 = vcmp.ge.f32.partialorder %v1252_v11, 0.0  ;;  %vm1269_vm4 = vcmp.ge.f32.partialorder %v1253_v23, 0.0 }
 0x119   : > { %v1341_v42 = vld.sshfl [vmem:[#allocation1 + $0x20] sm:$0xff pattern:$0x73625140]  ;;  %v1342_v44 = vld.sshfl [vmem:[#allocation1 + $0x28] sm:$0xff pattern:$0x73625140] }
 0x11a   : > { %1346 = vst [vmem:[#allocation1 + $0x20] ss:$4 sm:$0xff] %v1295_v41  ;;  %v1406_v31 = vpack.c.bf16 %v1342_v44, %v1341_v42  ;;  %v1437_v21 = vrot.slane %v1405_v10, 3  ;;  %v1285_v39 = vmul.f32 0.2, %v1253_v23  ;;  %v1300_v26 = vsel %vm1268_vm3, %v1252_v11, %v1284_v29 }
 0x11b   : > { %1516 = vst [vmem:[%s2718_s15 + $0xa] sm:$0x3] %v1464_v22 }
 0x11c   : > { %v1438_v49 = vrot.slane %v1406_v31, 3  ;;  %v1467_v13 = vsel %vm645_vm0, %v1405_v10, %v1437_v21  ;;  %v1301_v33 = vsel %vm1269_vm4, %v1253_v23, %v1285_v39 }
 0x11d   : > { %1517 = vst [vmem:[%s2718_s15 + $0xc] sm:$0x3] %v1467_v13 }
 0x11e   : > { %v1470_v58 = vsel %vm645_vm0, %v1406_v31, %v1438_v49 }
 0x11f   : > { %v1344_v43 = vld.sshfl [vmem:[#allocation1] sm:$0xff pattern:$0x73625140]  ;;  %v1345_v56 = vld.sshfl [vmem:[#allocation1 + $0x8] sm:$0xff pattern:$0x73625140] }
 0x120   : > { %1349 = vst [vmem:[#allocation1] ss:$4 sm:$0xff] %v1296_v55  ;;  %v1407_v57 = vpack.c.bf16 %v1345_v56, %v1344_v43 }
 0x121   : > { %v1347_v46 = vld.sshfl [vmem:[#allocation1 + $0x20] sm:$0xff pattern:$0x73625140]  ;;  %v1348_v37 = vld.sshfl [vmem:[#allocation1 + $0x28] sm:$0xff pattern:$0x73625140] }
 0x122   : > { %1352 = vst [vmem:[#allocation1 + $0x20] ss:$4 sm:$0xff] %v1297_v59  ;;  %v1408_v62 = vpack.c.bf16 %v1348_v37, %v1347_v46  ;;  %v1439_v47 = vrot.slane %v1407_v57, 3 }
 0x123   : > { %1518 = vst [vmem:[%s2718_s15 + $0xe] sm:$0x3] %v1470_v58 }
 0x124   : > { %v1440_v63 = vrot.slane %v1408_v62, 3  ;;  %v1473_v0 = vsel %vm645_vm0, %v1407_v57, %v1439_v47 }
 0x125   : > { %1519 = vst [vmem:[%s2718_s15 + $0x10] sm:$0x3] %v1473_v0 }
 0x126   : > { %v1476_v5 = vsel %vm645_vm0, %v1408_v62, %v1440_v63 }
 0x127   : > { %v1350_v18 = vld.sshfl [vmem:[#allocation1] sm:$0xff pattern:$0x73625140]  ;;  %v1351_v24 = vld.sshfl [vmem:[#allocation1 + $0x8] sm:$0xff pattern:$0x73625140] }
 0x128   : > { %v1409_v7 = vpack.c.bf16 %v1351_v24, %v1350_v18  ;;  %1520 = vst [vmem:[%s2718_s15 + $0x12] sm:$0x3] %v1476_v5 }
 0x129   : > { %v1353_v27 = vld.sshfl [vmem:[#allocation1 + $0x20] sm:$0xff pattern:$0x73625140]  ;;  %v1354_v50 = vld.sshfl [vmem:[#allocation1 + $0x28] sm:$0xff pattern:$0x73625140] }
 0x12a   : > { %v1410_v4 = vpack.c.bf16 %v1354_v50, %v1353_v27  ;;  %v1441_v52 = vrot.slane %v1409_v7, 3  ;;  %1355 = vst [vmem:[#allocation1] ss:$4 sm:$0xff] %v1298_v12 }
 0x12b   : > { %1358 = vst [vmem:[#allocation1 + $0x20] ss:$4 sm:$0xff] %v1299_v25 }
 0x12c   : > { %v1442_v53 = vrot.slane %v1410_v4, 3  ;;  %v1479_v15 = vsel %vm645_vm0, %v1409_v7, %v1441_v52 }
 0x12d   : > { %1521 = vst [vmem:[%s2718_s15 + $0x14] sm:$0x3] %v1479_v15 }
 0x12e   : > { %v1482_v16 = vsel %vm645_vm0, %v1410_v4, %v1442_v53 }
 0x12f   : > { %1522 = vst [vmem:[%s2718_s15 + $0x16] sm:$0x3] %v1482_v16 }
 0x131   : > { %v1356_v8 = vld.sshfl [vmem:[#allocation1] sm:$0xff pattern:$0x73625140]  ;;  %v1357_v17 = vld.sshfl [vmem:[#allocation1 + $0x8] sm:$0xff pattern:$0x73625140] }
 0x132   : > { %v1359_v34 = vld.sshfl [vmem:[#allocation1 + $0x20] sm:$0xff pattern:$0x73625140]  ;;  %v1360_v28 = vld.sshfl [vmem:[#allocation1 + $0x28] sm:$0xff pattern:$0x73625140]  ;;  %v1411_v54 = vpack.c.bf16 %v1357_v17, %v1356_v8 }
 0x133   : > { %1361 = vst [vmem:[#allocation1] ss:$4 sm:$0xff] %v1300_v26  ;;  %v1412_v9 = vpack.c.bf16 %v1360_v28, %v1359_v34 }
 0x134   : > { %1364 = vst [vmem:[#allocation1 + $0x20] ss:$4 sm:$0xff] %v1301_v33  ;;  %v1443_v19 = vrot.slane %v1411_v54, 3 }
 0x135   : > { %v1444_v20 = vrot.slane %v1412_v9, 3 }
 0x136   : > { %v1485_v35 = vsel %vm645_vm0, %v1411_v54, %v1443_v19 }
 0x137   : > { %v1488_v10 = vsel %vm645_vm0, %v1412_v9, %v1444_v20  ;;  %1523 = vst [vmem:[%s2718_s15 + $0x18] sm:$0x3] %v1485_v35 }
 0x138   : > { %1524 = vst [vmem:[%s2718_s15 + $0x1a] sm:$0x3] %v1488_v10 }
 0x13a   : > { %v1362_v22 = vld.sshfl [vmem:[#allocation1] sm:$0xff pattern:$0x73625140]  ;;  %v1363_v30 = vld.sshfl [vmem:[#allocation1 + $0x8] sm:$0xff pattern:$0x73625140] }
 0x13b   : > { %v1365_v41 = vld.sshfl [vmem:[#allocation1 + $0x20] sm:$0xff pattern:$0x73625140]  ;;  %v1366_v42 = vld.sshfl [vmem:[#allocation1 + $0x28] sm:$0xff pattern:$0x73625140]  ;;  %v1413_v44 = vpack.c.bf16 %v1363_v30, %v1362_v22 }
 0x13c   : > { %v1414_v40 = vpack.c.bf16 %v1366_v42, %v1365_v41 }
 0x13d   : > { %v1445_v31 = vrot.slane %v1413_v44, 3 }
 0x13e   : > { %v1446_v21 = vrot.slane %v1414_v40, 3 }
 0x13f   : > { %v1491_v14 = vsel %vm645_vm0, %v1413_v44, %v1445_v31 }
 0x140   : > { %v1494_v48 = vsel %vm645_vm0, %v1414_v40, %v1446_v21  ;;  %1525 = vst [vmem:[%s2718_s15 + $0x1c] sm:$0x3] %v1491_v14 }
 0x141   : > { %1526 = vst [vmem:[%s2718_s15 + $0x1e] sm:$0x3] %v1494_v48 }
 0x142 PF: > { %s13_s12 = sadd.s32 1, %s1930_s12  }
 0x143   : > { %p10_p4 = scmp.ge.s32.totalorder %s13_s12, 4  }
 0x145   :  { %12 = sbr.rel (!%p10_p4) target bundleno = 1 (0x1), region = 87 }

// kernel: ultrasound_encoder_forward.13
= control target key start
LH: loop header
LB: loop body
LE: loop exit
PB: predicated region body
PF: predicated region fallthrough
CT: control target
= control target key end

     0   :  { %8 = vsyncpa [#allocation3], 0  ;;  %s4141_s0 = inlined_call_operand.vmem [shape: bf16[32,1,4,256], index: 0, kind: input, shape index: {}]   ;;  %s4142_s1 = inlined_call_operand.vmem [shape: bf16[3,256,256], index: 1, kind: input, shape index: {}]   ;;  %s4143_s2 = inlined_call_operand.vmem [shape: f32[1,256], index: 2, kind: input, shape index: {}]   ;;  %s4144_s3 = inlined_call_operand.hbm [shape: f32[32,2,256], index: 3, kind: output, shape index: {}]  }
   0x1   :  { %10 = vsyncpa [#allocation3 + $0x1], 0  ;;  %s2708_s12 = smov 0   ;;  %s2710_s13 = smov 0  }
   0x2   :  { %s2712_s14 = smov 0   ;;  %s2714_s15 = smov 0  }
   0x3 LB: > { %s2729_s16 = sadd.s32 4294967295, %s2684_s15   ;;  %s2004_s17 = sadd.s32 4294967294, %s2684_s15   ;;  %s2684_s15 = sphi %s2714_s15, %s4154_s15   ;;  %s2680_s14 = sphi %s2712_s14, %s4153_s14   ;;  %s2676_s13 = sphi %s2710_s13, %s4152_s13   ;;  %s2672_s12 = sphi %s2708_s12, %s4151_s12  }
   0x4   : > { %s2733_s18 = sadd.s32 1, %s2684_s15   ;;  %s91_s19 = sadd.s32 1, %s2680_s14 }
   0x5   : > { %s88_s20 = ssub.s32 %s2684_s15, %s2733_s18  ;;  %p101_p0 = scmp.ne.s32.totalorder %s2680_s14, %s2676_s13 }
   0x6   : > { %p89_p1 = scmp.eq.s32.totalorder %s88_s20, 0  ;;  %p102_p2 = scmp.eq.s32.totalorder %s2729_s16, 1 }
   0x7   : > { %p107_p3 = scmp.ne.s32.totalorder %s2676_s13, %s2672_s12  ;;  %p108_p4 = scmp.eq.s32.totalorder %s2004_s17, 1 }
   0x8   : > { %s2744_s21 = scalar_select %p89_p1, %s2680_s14, %s91_s19  }
   0x9   : > { %p2746_p5 = por %p102_p2, %p101_p0  ;;  %p2750_p6 = por %p108_p4, %p107_p3 }
   0xa   : > { %p2007_p7 = scmp.ge.s32.totalorder %s2684_s15, 1  ;;  %p142_p8 = scmp.lt.s32.totalorder %s2684_s15, 3 }
   0xc   : > { %p143_p9 = pnand %p2007_p7, %p142_p8 }
   0xd   : > { %s2009_s26 = sshll.u32 (!%p143_p9), %s2729_s16, 4  ;;  %s164_s6 = sand.u32 (!%p143_p9), 1, %s2676_s13  }
   0xe   : > { %146 = sbr.rel (%p143_p9) target bundleno = 378 (0x17a), region = 32  ;;  %p168_p10 = scmp.lt.s32.totalorder (!%p143_p9), %s2009_s26, 31 }
   0xf   : > { %s4045_s7 = sshll.u32 (!%p143_p9), %s164_s6, 6  ;;  %s2580_s9 = sshll.u32 (!%p143_p9), %s2729_s16, 6 }
  0x10   : > { %s4059_s8 = scalar_lea.vmem (!%p143_p9), [#allocation2], %s4045_s7  ;;  %s1938_s11 = scalar_lea.hbm (!%p143_p9), %s4144_s3, %s2580_s9 }
  0x11   : > { %s1939_s17 = sshll.u32 (!%p143_p9), %s4059_s8, 4  ;;  %s1941_s19 = sshll.u32 (!%p143_p9), %s1938_s11, 4  ;;  %s1940_s17 = int_to_ptr.vmem [resolvable:$true] %s1939_s17  ;;  %s1942_s19 = int_to_ptr.hbm [resolvable:$true] %s1941_s19 }
  0x12   : > { %s1926_s20 = scalar_lea.sflag (!%p143_p9), [#allocation3], %s164_s6  ;;  %s2636_s24 = sshra.s32 (!%p143_p9), %s1942_s19, 4  ;;  %s2637_s24 = int_to_ptr.hbm [resolvable:$true] %s2636_s24 }
  0x13   : > { %v2118_v0 = vld [vmem:[%s4142_s1 + $0x170] sm:$0xf]  ;;  %v2530_v1 = vld [vmem:[%s4142_s1 + $0x174] sm:$0xf0]  ;;  %v2529_v5 = vld [vmem:[%s4142_s1 + $0x174] sm:$0xf]  ;;  %p2643_p0 = scmp.lt.s32.totalorder %s2637_s24, %s4144_s3 }
  0x14   : > { %v2182_v2 = vld [vmem:[%s4142_s1 + $0x1f0] sm:$0xf]  ;;  %v2119_v3 = vor.u32 %v2530_v1, %v2118_v0  ;;  %v2546_v4 = vld [vmem:[%s4142_s1 + $0x1f4] sm:$0xf0]  ;;  %v2120_v6 = vld [vmem:[%s4142_s1 + $0x178] sm:$0xf0] }
  0x15   : > { %v2183_v7 = vor.u32 %v2546_v4, %v2182_v2  ;;  %v2123_v8 = vor.u32 %v2529_v5, %v2120_v6  ;;  %v2545_v9 = vld [vmem:[%s4142_s1 + $0x1f4] sm:$0xf]  ;;  %v2184_v10 = vld [vmem:[%s4142_s1 + $0x1f8] sm:$0xf0]  ;;  %v2110_v11 = vld [vmem:[%s4142_s1 + $0x160] sm:$0xf] }
  0x16   : > { %1060 = vmatpush.bf16.msra.mxu0 %v2119_v3  ;;  %v2187_v12 = vor.u32 %v2545_v9, %v2184_v10  ;;  %v2528_v13 = vld [vmem:[%s4142_s1 + $0x164] sm:$0xf0]  ;;  %v2174_v14 = vld [vmem:[%s4142_s1 + $0x1e0] sm:$0xf]  ;;  %v2527_v18 = vld [vmem:[%s4142_s1 + $0x164] sm:$0xf] }
  0x17   : > { %v2544_v15 = vld [vmem:[%s4142_s1 + $0x1e4] sm:$0xf0]  ;;  %1079 = vmatpush.bf16.msra.mxu1 %v2183_v7  ;;  %1098 = vmatpush.bf16.msra.mxu2 %v2123_v8  ;;  %v2111_v16 = vor.u32 %v2528_v13, %v2110_v11  ;;  %v2112_v19 = vld [vmem:[%s4142_s1 + $0x168] sm:$0xf0]  ;;  %v2543_v20 = vld [vmem:[%s4142_s1 + $0x1e4] sm:$0xf] }
  0x18   : > { %v2175_v17 = vor.u32 %v2544_v15, %v2174_v14  ;;  %1117 = vmatpush.bf16.msra.mxu3 %v2187_v12  ;;  %v2115_v21 = vor.u32 %v2527_v18, %v2112_v19  ;;  %v2176_v22 = vld [vmem:[%s4142_s1 + $0x1e8] sm:$0xf0]  ;;  %v2102_v23 = vld [vmem:[%s4142_s1 + $0x150] sm:$0xf]  ;;  %v2526_v24 = vld [vmem:[%s4142_s1 + $0x154] sm:$0xf0] }
  0x19   : > { %v2179_v25 = vor.u32 %v2543_v20, %v2176_v22  ;;  %v2166_v26 = vld [vmem:[%s4142_s1 + $0x1d0] sm:$0xf]  ;;  %v2542_v27 = vld [vmem:[%s4142_s1 + $0x1d4] sm:$0xf0]  ;;  %v2525_v28 = vld [vmem:[%s4142_s1 + $0x154] sm:$0xf]  ;;  %v2103_v29 = vor.u32 %v2526_v24, %v2102_v23 }
  0x1a   : > { %1061 = vmatpush.bf16.msra.mxu0 %v2111_v16  ;;  %v2104_v30 = vld [vmem:[%s4142_s1 + $0x158] sm:$0xf0]  ;;  %v2541_v31 = vld [vmem:[%s4142_s1 + $0x1d4] sm:$0xf]  ;;  %v2167_v33 = vor.u32 %v2542_v27, %v2166_v26  ;;  %v2094_v35 = vld [vmem:[%s4142_s1 + $0x140] sm:$0xf] }
  0x1b   : > { %v2168_v32 = vld [vmem:[%s4142_s1 + $0x1d8] sm:$0xf0]  ;;  %1080 = vmatpush.bf16.msra.mxu1 %v2175_v17  ;;  %1099 = vmatpush.bf16.msra.mxu2 %v2115_v21  ;;  %v2107_v34 = vor.u32 %v2525_v28, %v2104_v30  ;;  %v2524_v36 = vld [vmem:[%s4142_s1 + $0x144] sm:$0xf0]  ;;  %v2158_v37 = vld [vmem:[%s4142_s1 + $0x1c0] sm:$0xf] }
  0x1c   : > { %1118 = vmatpush.bf16.msra.mxu3 %v2179_v25  ;;  %v2171_v38 = vor.u32 %v2541_v31, %v2168_v32  ;;  %v2540_v39 = vld [vmem:[%s4142_s1 + $0x1c4] sm:$0xf0]  ;;  %v2523_v40 = vld [vmem:[%s4142_s1 + $0x144] sm:$0xf]  ;;  %v2096_v41 = vld [vmem:[%s4142_s1 + $0x148] sm:$0xf0]  ;;  %v2095_v44 = vor.u32 %v2524_v36, %v2094_v35 }
  0x1d   : > { %v2539_v42 = vld [vmem:[%s4142_s1 + $0x1c4] sm:$0xf]  ;;  %v2160_v43 = vld [vmem:[%s4142_s1 + $0x1c8] sm:$0xf0]  ;;  %v2159_v45 = vor.u32 %v2540_v39, %v2158_v37  ;;  %v2099_v46 = vor.u32 %v2523_v40, %v2096_v41  ;;  %v2086_v47 = vld [vmem:[%s4142_s1 + $0x130] sm:$0xf] }
  0x1e   : > { %1062 = vmatpush.bf16.msra.mxu0 %v2103_v29  ;;  %v2522_v48 = vld [vmem:[%s4142_s1 + $0x134] sm:$0xf0]  ;;  %v2150_v49 = vld [vmem:[%s4142_s1 + $0x1b0] sm:$0xf]  ;;  %v2163_v50 = vor.u32 %v2539_v42, %v2160_v43  ;;  %v2521_v52 = vld [vmem:[%s4142_s1 + $0x134] sm:$0xf] }
  0x1f   : > { %1081 = vmatpush.bf16.msra.mxu1 %v2167_v33  ;;  %1100 = vmatpush.bf16.msra.mxu2 %v2107_v34  ;;  %v2538_v51 = vld [vmem:[%s4142_s1 + $0x1b4] sm:$0xf0]  ;;  %v2088_v53 = vld [vmem:[%s4142_s1 + $0x138] sm:$0xf0]  ;;  %v2537_v54 = vld [vmem:[%s4142_s1 + $0x1b4] sm:$0xf]  ;;  %v2087_v56 = vor.u32 %v2522_v48, %v2086_v47 }
  0x20   : > { %1119 = vmatpush.bf16.msra.mxu3 %v2171_v38  ;;  %v2152_v55 = vld [vmem:[%s4142_s1 + $0x1b8] sm:$0xf0]  ;;  %v2151_v57 = vor.u32 %v2538_v51, %v2150_v49  ;;  %v2091_v58 = vor.u32 %v2521_v52, %v2088_v53  ;;  %v2078_v59 = vld [vmem:[%s4142_s1 + $0x120] sm:$0xf]  ;;  %v2520_v60 = vld [vmem:[%s4142_s1 + $0x124] sm:$0xf0] }
  0x21   : > { %v2142_v61 = vld [vmem:[%s4142_s1 + $0x1a0] sm:$0xf]  ;;  %v2155_v62 = vor.u32 %v2537_v54, %v2152_v55  ;;  %v2536_v63 = vld [vmem:[%s4142_s1 + $0x1a4] sm:$0xf0]  ;;  %v2519_v0 = vld [vmem:[%s4142_s1 + $0x124] sm:$0xf]  ;;  %v2079_v4 = vor.u32 %v2520_v60, %v2078_v59 }
  0x22   : > { %1063 = vmatpush.bf16.msra.mxu0 %v2095_v44  ;;  %v2080_v1 = vld [vmem:[%s4142_s1 + $0x128] sm:$0xf0]  ;;  %v2535_v2 = vld [vmem:[%s4142_s1 + $0x1a4] sm:$0xf]  ;;  %v2070_v5 = vld [vmem:[%s4142_s1 + $0x110] sm:$0xf]  ;;  %v2143_v7 = vor.u32 %v2536_v63, %v2142_v61 }
  0x23   : > { %1082 = vmatpush.bf16.msra.mxu1 %v2159_v45  ;;  %1101 = vmatpush.bf16.msra.mxu2 %v2099_v46  ;;  %v2144_v3 = vld [vmem:[%s4142_s1 + $0x1a8] sm:$0xf0]  ;;  %v2518_v6 = vld [vmem:[%s4142_s1 + $0x114] sm:$0xf0]  ;;  %v2083_v8 = vor.u32 %v2519_v0, %v2080_v1  ;;  %v2134_v9 = vld [vmem:[%s4142_s1 + $0x190] sm:$0xf] }
  0x24   : > { %1120 = vmatpush.bf16.msra.mxu3 %v2163_v50  ;;  %v2534_v10 = vld [vmem:[%s4142_s1 + $0x194] sm:$0xf0]  ;;  %v2517_v11 = vld [vmem:[%s4142_s1 + $0x114] sm:$0xf]  ;;  %v2147_v12 = vor.u32 %v2535_v2, %v2144_v3  ;;  %v2072_v13 = vld [vmem:[%s4142_s1 + $0x118] sm:$0xf0]  ;;  %v2071_v17 = vor.u32 %v2518_v6, %v2070_v5 }
  0x25   : > { %v2533_v14 = vld [vmem:[%s4142_s1 + $0x194] sm:$0xf]  ;;  %v2136_v15 = vld [vmem:[%s4142_s1 + $0x198] sm:$0xf0]  ;;  %v2062_v16 = vld [vmem:[%s4142_s1 + $0x100] sm:$0xf]  ;;  %v2135_v21 = vor.u32 %v2534_v10, %v2134_v9  ;;  %v2075_v22 = vor.u32 %v2517_v11, %v2072_v13 }
  0x26   : > { %1064 = vmatpush.bf16.msra.mxu0 %v2087_v56  ;;  %v2516_v18 = vld [vmem:[%s4142_s1 + $0x104] sm:$0xf0]  ;;  %v2126_v19 = vld [vmem:[%s4142_s1 + $0x180] sm:$0xf]  ;;  %v2515_v23 = vld [vmem:[%s4142_s1 + $0x104] sm:$0xf]  ;;  %v2139_v25 = vor.u32 %v2533_v14, %v2136_v15 }
  0x27   : > { %1083 = vmatpush.bf16.msra.mxu1 %v2151_v57  ;;  %1102 = vmatpush.bf16.msra.mxu2 %v2091_v58  ;;  %v2532_v20 = vld [vmem:[%s4142_s1 + $0x184] sm:$0xf0]  ;;  %v2064_v24 = vld [vmem:[%s4142_s1 + $0x108] sm:$0xf0]  ;;  %s4156_s26 = smov (!%p168_p10, %s2009_s26), 31  ;;  %vm255_vm0 = vcmask 1040384   ;;  %v2063_v28 = vor.u32 %v2516_v18, %v2062_v16 }
  0x28   : > { %1121 = vmatpush.bf16.msra.mxu3 %v2155_v62  ;;  %v2531_v26 = vld [vmem:[%s4142_s1 + $0x184] sm:$0xf]  ;;  %v2128_v27 = vld [vmem:[%s4142_s1 + $0x188] sm:$0xf0]  ;;  %s2482_s28 = sshll.u32 %s4156_s26, 2  ;;  %vm259_vm1 = vcmask 1042434   ;;  %v2127_v29 = vor.u32 %v2532_v20, %v2126_v19  ;;  %v2067_v30 = vor.u32 %v2515_v23, %v2064_v24 }
  0x29   : > { %vm263_vm2 = vcmask 1041408   ;;  %vm489_vm3 = vcmask 1041409   ;;  %vm491_vm4 = vcmask 1043459   ;;  %s2952_s4 = scalar_lea.vmem %s4141_s0, %s2482_s28  ;;  %vm493_vm5 = vcmask 1042433   ;;  %s2638_s25 = scalar_lea.hbm %s2637_s24, 64 }
  0x2a   : > { %1065 = vmatpush.bf16.msra.mxu0 %v2079_v4  ;;  %vm677_vm6 = vsmask.f32 256  ;;  %vm678_vm7 = vsmask.f32 1284  ;;  %vm680_vm8 = vsmask.f32 2312  ;;  %v2131_v33 = vor.u32 %v2531_v26, %v2128_v27  ;;  %p2639_p11 = scmp.ne.s32.totalorder %s2637_s24, %s2638_s25 }
  0x2b   : > { %1084 = vmatpush.bf16.msra.mxu1 %v2143_v7  ;;  %1103 = vmatpush.bf16.msra.mxu2 %v2083_v8  ;;  %v402_v31 = vld [vmem:[%s2952_s4] sm:$0xf]  ;;  %v403_v32 = vld [vmem:[%s2952_s4 + $0x4] sm:$0xf]  ;;  %vm682_vm9 = vsmask.f32 3340  ;;  %vm2971_vm11 = vmor %vm677_vm6, %vm678_vm7 }
  0x2c   : > { %1122 = vmatpush.bf16.msra.mxu3 %v2147_v12  ;;  %v404_v34 = vld [vmem:[%s2952_s4 + $0x8] sm:$0xf]  ;;  %v2958_v35 = vld [vmem:[%s2952_s4 + $0xc] sm:$0xf]  ;;  %vm684_vm10 = vsmask.f32 4368  ;;  %vm681_vm13 = vmor %vm2971_vm11, %vm680_vm8  ;;  %p2640_p12 = pnand %p2639_p11, %p2746_p5 }
  0x2d   : > { %v2961_v36 = vld [vmem:[%s2952_s4 + $0x10] sm:$0xf]  ;;  %v2964_v37 = vld [vmem:[%s2952_s4 + $0x14] sm:$0xf]  ;;  %v434_v38 = vrot.slane %v402_v31, 1  ;;  %v435_v39 = vrot.slane %v402_v31, 2  ;;  %vm683_vm15 = vmor %vm681_vm13, %vm682_vm9 }
  0x2e   : > { %1066 = vmatpush.bf16.msra.mxu0 %v2071_v17  ;;  %v2967_v40 = vld [vmem:[%s2952_s4 + $0x18] sm:$0xf]  ;;  %v436_v41 = vrot.slane %v402_v31, 3  ;;  %v437_v42 = vrot.slane %v403_v32, 1  ;;  %v438_v43 = vrot.slane %v403_v32, 2  ;;  %v439_v44 = vrot.slane %v403_v32, 3  ;;  %vm685_vm7 = vmor %vm683_vm15, %vm684_vm10  ;;  %p2641_p13 = pneg %p2640_p12 }
  0x2f   : > { %1085 = vmatpush.bf16.msra.mxu1 %v2135_v21  ;;  %1104 = vmatpush.bf16.msra.mxu2 %v2075_v22  ;;  %v2976_v46 = vld [vmem:[%s2952_s4 + $0x1c] sm:$0xf]  ;;  %v440_v47 = vrot.slane %v404_v34, 1  ;;  %v441_v48 = vrot.slane %v404_v34, 2  ;;  %v442_v49 = vrot.slane %v404_v34, 3  ;;  %v443_v50 = vrot.slane %v2958_v35, 1 }
  0x30   : > { %1123 = vmatpush.bf16.msra.mxu3 %v2139_v25  ;;  %vm686_vm12 = vsmask.f32 5396  ;;  %v444_v51 = vrot.slane %v2958_v35, 2  ;;  %v445_v52 = vrot.slane %v2958_v35, 3  ;;  %v446_v53 = vrot.slane %v2961_v36, 1  ;;  %s2642_s29 = scalar_lea.hbm %s4144_s3, 128 }
  0x31   : > { %v447_v54 = vrot.slane %v2961_v36, 2  ;;  %v448_v55 = vrot.slane %v2961_v36, 3  ;;  %v449_v56 = vrot.slane %v2964_v37, 1  ;;  %v450_v57 = vrot.slane %v2964_v37, 2  ;;  %vm687_vm8 = vmor %vm685_vm7, %vm686_vm12  ;;  %p2644_p1 = scmp.lt.s32.totalorder %s2642_s29, %s2638_s25 }
  0x32   : > { %1067 = vmatpush.bf16.msra.mxu0 %v2063_v28  ;;  %v451_v58 = vrot.slane %v2964_v37, 3  ;;  %v452_v59 = vrot.slane %v2967_v40, 1  ;;  %v453_v60 = vrot.slane %v2967_v40, 2  ;;  %v454_v61 = vrot.slane %v2967_v40, 3 }
  0x33   : > { %1086 = vmatpush.bf16.msra.mxu1 %v2127_v29  ;;  %1105 = vmatpush.bf16.msra.mxu2 %v2067_v30  ;;  %v455_v62 = vrot.slane %v2976_v46, 1  ;;  %vm688_vm14 = vsmask.f32 6424  ;;  %v456_v63 = vrot.slane %v2976_v46, 2  ;;  %v457_v0 = vrot.slane %v2976_v46, 3  ;;  %p2645_p2 = por %p2644_p1, %p2643_p0 }
  0x34   : > { %1124 = vmatpush.bf16.msra.mxu3 %v2131_v33  ;;  %v484_v1 = vsel %vm255_vm0, %v402_v31, %v434_v38  ;;  %v487_v2 = vsel %vm259_vm1, %v435_v39, %v436_v41  ;;  %v490_v4 = vsel %vm489_vm3, %v402_v31, %v434_v38  ;;  %v492_v5 = vsel %vm491_vm4, %v435_v39, %v436_v41  ;;  %vm689_vm9 = vmor %vm687_vm8, %vm688_vm14 }
  0x35   : > { %v2999_v3 = vsel %vm263_vm2, %v484_v1, %v487_v2  ;;  %v499_v6 = vsel %vm255_vm0, %v403_v32, %v437_v42  ;;  %v494_v7 = vsel %vm493_vm5, %v490_v4, %v492_v5  ;;  %v502_v8 = vsel %vm259_vm1, %v438_v43, %v439_v44  ;;  %v2513_v2 = vld [vmem:[%s4142_s1 + $0xf4] sm:$0xf]  ;;  %v2246_v4 = vld [vmem:[%s4142_s1 + $0x70] sm:$0xf]  ;;  %v2498_v5 = vld [vmem:[%s4142_s1 + $0x74] sm:$0xf0]  ;;  %p2646_p3 = pnand %p2645_p2, %p2641_p13 }
  0x36   : > { %v504_v9 = vsel %vm489_vm3, %v403_v32, %v437_v42  ;;  %v505_v10 = vsel %vm491_vm4, %v438_v43, %v439_v44  ;;  %vm690_vm6 = vsmask.f32 7452  ;;  %v496_v11 = vrot.slane %v494_v7, 1 }
  0x37   : > { %v3010_v12 = vsel %vm263_vm2, %v499_v6, %v502_v8  ;;  %v506_v13 = vsel %vm493_vm5, %v504_v9, %v505_v10  ;;  %v511_v14 = vsel %vm255_vm0, %v404_v34, %v440_v47  ;;  %v514_v16 = vsel %vm259_vm1, %v441_v48, %v442_v49  ;;  %vm3074_vm10 = vmor %vm689_vm9, %vm690_vm6  ;;  %v2310_v10 = vld [vmem:[%s4142_s1 + $0xf0] sm:$0xf] }
  0x38   : > { %v508_v15 = vrot.slane %v506_v13, 1  ;;  %v516_v17 = vsel %vm489_vm3, %v404_v34, %v440_v47  ;;  %v517_v18 = vsel %vm491_vm4, %v441_v48, %v442_v49  ;;  %v3019_v19 = vsel %vm263_vm2, %v511_v14, %v514_v16  ;;  %v3118_v13 = vld [vmem:[%s4142_s1 + $0x68] sm:$0xf0] }
  0x39   : > { %v518_v20 = vsel %vm493_vm5, %v516_v17, %v517_v18  ;;  %v523_v21 = vsel %vm255_vm0, %v2958_v35, %v443_v50  ;;  %v526_v22 = vsel %vm259_vm1, %v444_v51, %v445_v52  ;;  %v528_v25 = vsel %vm489_vm3, %v2958_v35, %v443_v50  ;;  %v3128_v18 = vld [vmem:[%s4142_s1 + $0xe4] sm:$0xf] }
  0x3a   : > { %v520_v23 = vrot.slane %v518_v20, 1  ;;  %v3026_v24 = vsel %vm263_vm2, %v523_v21, %v526_v22  ;;  %v529_v26 = vsel %vm491_vm4, %v444_v51, %v445_v52  ;;  %v535_v28 = vsel %vm255_vm0, %v2961_v36, %v446_v53  ;;  %v3138_v20 = vld [vmem:[%s4142_s1 + $0x60] sm:$0xf]  ;;  %v3143_v21 = vld [vmem:[%s4142_s1 + $0x64] sm:$0xf0] }
  0x3b   : > { %v530_v27 = vsel %vm493_vm5, %v528_v25, %v529_v26  ;;  %v538_v29 = vsel %vm259_vm1, %v447_v54, %v448_v55  ;;  %v540_v30 = vsel %vm489_vm3, %v2961_v36, %v446_v53  ;;  %v541_v33 = vsel %vm491_vm4, %v447_v54, %v448_v55  ;;  %v3148_v22 = vld [vmem:[%s4142_s1 + $0xe0] sm:$0xf] }
  0x3c   : > { %v532_v31 = vrot.slane %v530_v27, 1  ;;  %v3039_v32 = vsel %vm263_vm2, %v535_v28, %v538_v29  ;;  %v547_v34 = vsel %vm255_vm0, %v2964_v37, %v449_v56  ;;  %v542_v35 = vsel %vm493_vm5, %v540_v30, %v541_v33  ;;  %v3161_v28 = vld [vmem:[%s4142_s1 + $0x54] sm:$0xf]  ;;  %v3166_v29 = vld [vmem:[%s4142_s1 + $0x58] sm:$0xf0] }
  0x3d   : > { %v550_v38 = vsel %vm259_vm1, %v450_v57, %v451_v58  ;;  %v552_v39 = vsel %vm489_vm3, %v2964_v37, %v449_v56  ;;  %v553_v36 = vsel %vm491_vm4, %v450_v57, %v451_v58  ;;  %v544_v41 = vrot.slane %v542_v35, 1  ;;  %v3171_v30 = vld [vmem:[%s4142_s1 + $0xd4] sm:$0xf]  ;;  %v3186_v33 = vld [vmem:[%s4142_s1 + $0x54] sm:$0xf0] }
  0x3e   : > { %v3050_v42 = vsel %vm263_vm2, %v547_v34, %v550_v38  ;;  %v554_v43 = vsel %vm493_vm5, %v552_v39, %v553_v36  ;;  %v559_v44 = vsel %vm255_vm0, %v2967_v40, %v452_v59  ;;  %v562_v47 = vsel %vm259_vm1, %v453_v60, %v454_v61  ;;  %v3189_v34 = vld [vmem:[%s2952_s4 + $0x20] sm:$0xf]  ;;  %v3589_v56 = vld [vmem:[%s4142_s1 + $0x84] sm:$0xf0] }
  0x3f   : > { %v556_v45 = vrot.slane %v554_v43, 1  ;;  %v564_v48 = vsel %vm489_vm3, %v2967_v40, %v452_v59  ;;  %v565_v37 = vsel %vm491_vm4, %v453_v60, %v454_v61  ;;  %v3061_v49 = vsel %vm263_vm2, %v559_v44, %v562_v47  ;;  %v2497_v61 = vld [vmem:[%s4142_s1 + $0x74] sm:$0xf]  ;;  %v3207_v43 = vld [vmem:[%s4142_s1 + $0x44] sm:$0xf] }
  0x40   : > { %v566_v50 = vsel %vm493_vm5, %v564_v48, %v565_v37  ;;  %v571_v51 = vsel %vm255_vm0, %v2976_v46, %v455_v62  ;;  %v574_v52 = vsel %vm259_vm1, %v456_v63, %v457_v0  ;;  %v576_v55 = vsel %vm489_vm3, %v2976_v46, %v455_v62  ;;  %v2248_v46 = vld [vmem:[%s4142_s1 + $0x78] sm:$0xf0]  ;;  %v3212_v44 = vld [vmem:[%s4142_s1 + $0x48] sm:$0xf0] }
  0x41   : > { %v568_v53 = vrot.slane %v566_v50, 1  ;;  %v3068_v54 = vsel %vm263_vm2, %v571_v51, %v574_v52  ;;  %v577_v40 = vsel %vm491_vm4, %v456_v63, %v457_v0  ;;  %v692_v58 = vshrl.u32 %v2999_v3, 16  ;;  %v2312_v3 = vld [vmem:[%s4142_s1 + $0xf8] sm:$0xf0]  ;;  %v3226_v50 = vld [vmem:[%s4142_s1 + $0xc8] sm:$0xf0] }
  0x42   : > { %v578_v57 = vsel %vm493_vm5, %v576_v55, %v577_v40  ;;  %v697_v59 = vshll.u32 %v496_v11, 16  ;;  %v700_v60 = vshrl.u32 %v3010_v12, 16  ;;  %v705_v63 = vshll.u32 %v508_v15, 16  ;;  %v2514_v11 = vld [vmem:[%s4142_s1 + $0xf4] sm:$0xf0] }
  0x43   : > { %v580_v62 = vrot.slane %v578_v57, 1  ;;  %v708_v0 = vshrl.u32 %v3019_v19, 16  ;;  %v713_v1 = vshll.u32 %v520_v23, 16  ;;  %v716_v7 = vshrl.u32 %v3026_v24, 16  ;;  %v3113_v12 = vld [vmem:[%s4142_s1 + $0x64] sm:$0xf] }
  0x44   : > { %v699_v6 = vsel %vm3074_vm10, %v692_v58, %v697_v59  ;;  %v721_v8 = vshll.u32 %v532_v31, 16  ;;  %v724_v9 = vshrl.u32 %v3039_v32, 16  ;;  %v707_v14 = vsel %vm3074_vm10, %v700_v60, %v705_v63  ;;  %v3133_v19 = vld [vmem:[%s4142_s1 + $0xe8] sm:$0xf0]  ;;  %v3153_v23 = vld [vmem:[%s4142_s1 + $0xe4] sm:$0xf0] }
  0x45   : > { %v715_v15 = vsel %vm3074_vm10, %v708_v0, %v713_v1  ;;  %v729_v16 = vshll.u32 %v544_v41, 16  ;;  %v732_v17 = vshrl.u32 %v3050_v42, 16  ;;  %854 = vst [vmem:[#allocation1] ss:$9 sm:$0xff] %v699_v6  ;;  %v737_v25 = vshll.u32 %v556_v45, 16 }
  0x46   : > { %v723_v24 = vsel %vm3074_vm10, %v716_v7, %v721_v8  ;;  %v740_v26 = vshrl.u32 %v3061_v49, 16  ;;  %v745_v27 = vshll.u32 %v568_v53, 16  ;;  %857 = vst [vmem:[#allocation1 + $0x1] ss:$9 sm:$0xff] %v707_v14  ;;  %v3176_v31 = vld [vmem:[%s4142_s1 + $0xd8] sm:$0xf0]  ;;  %v2251_v36 = vor.u32 %v2497_v61, %v2248_v46 }
  0x47   : > { %v3181_v32 = vld [vmem:[%s4142_s1 + $0x50] sm:$0xf]  ;;  %v731_v35 = vsel %vm3074_vm10, %v724_v9, %v729_v16  ;;  %v748_v38 = vshrl.u32 %v3068_v54, 16  ;;  %v753_v39 = vshll.u32 %v580_v62, 16  ;;  %860 = vst [vmem:[#allocation1 + $0x2] ss:$9 sm:$0xff] %v715_v15  ;;  %v739_v45 = vsel %vm3074_vm10, %v732_v17, %v737_v25 }
  0x48   : > { %v3197_v41 = vld [vmem:[%s4142_s1 + $0xd0] sm:$0xf]  ;;  %v3202_v42 = vld [vmem:[%s4142_s1 + $0xd4] sm:$0xf0]  ;;  %v747_v47 = vsel %vm3074_vm10, %v740_v26, %v745_v27  ;;  %863 = vst [vmem:[#allocation1 + $0x3] ss:$9 sm:$0xff] %v723_v24  ;;  %v2315_v48 = vor.u32 %v2513_v2, %v2312_v3  ;;  %v2247_v37 = vor.u32 %v2498_v5, %v2246_v4  ;;  %1365 = vmatpush.bf16.msrb.mxu2 %v2251_v36 }
  0x49   : > { %v3221_v49 = vld [vmem:[%s4142_s1 + $0xc4] sm:$0xf]  ;;  %v755_v52 = vsel %vm3074_vm10, %v748_v38, %v753_v39  ;;  %866 = vst [vmem:[#allocation1 + $0x4] ss:$9 sm:$0xff] %v731_v35  ;;  %v2311_v53 = vor.u32 %v2514_v11, %v2310_v10  ;;  %v2243_v54 = vor.u32 %v3113_v12, %v3118_v13  ;;  %v3238_v55 = vld [vmem:[%s4142_s1 + $0x40] sm:$0xf]  ;;  %v2307_v57 = vor.u32 %v3128_v18, %v3133_v19 }
  0x4a   : > { %v3229_v51 = vld [vmem:[%s2952_s4 + $0x24] sm:$0xf]  ;;  %v3243_v40 = vld [vmem:[%s4142_s1 + $0x44] sm:$0xf0]  ;;  %869 = vst [vmem:[#allocation1 + $0x5] ss:$9 sm:$0xff] %v739_v45  ;;  %1384 = vmatpush.bf16.msrb.mxu3 %v2315_v48  ;;  %1327 = vmatpush.bf16.msrb.mxu0 %v2247_v37  ;;  %v2239_v58 = vor.u32 %v3143_v21, %v3138_v20  ;;  %v2303_v59 = vor.u32 %v3153_v23, %v3148_v22 }
  0x4b   : > { %v3254_v60 = vld [vmem:[%s4142_s1 + $0xc0] sm:$0xf]  ;;  %v3259_v61 = vld [vmem:[%s4142_s1 + $0xc4] sm:$0xf0]  ;;  %872 = vst [vmem:[#allocation1 + $0x6] ss:$9 sm:$0xff] %v747_v47  ;;  %1346 = vmatpush.bf16.msrb.mxu1 %v2311_v53  ;;  %v2235_v46 = vor.u32 %v3161_v28, %v3166_v29  ;;  %v2299_v62 = vor.u32 %v3171_v30, %v3176_v31  ;;  %v2231_v63 = vor.u32 %v3186_v33, %v3181_v32 }
  0x4c   : > { %v3268_v0 = vld [vmem:[%s2952_s4 + $0x28] sm:$0xf]  ;;  %v458_v1 = vrot.slane %v3189_v34, 1  ;;  %875 = vst [vmem:[#allocation1 + $0x7] ss:$9 sm:$0xff] %v755_v52  ;;  %v2295_v2 = vor.u32 %v3202_v42, %v3197_v41  ;;  %v2227_v3 = vor.u32 %v3207_v43, %v3212_v44  ;;  %v2291_v4 = vor.u32 %v3221_v49, %v3226_v50  ;;  %1366 = vmatpush.bf16.msrb.mxu2 %v2243_v54 }
  0x4d   : > { %v3278_v5 = vld [vmem:[%s2952_s4 + $0x2c] sm:$0xf]  ;;  %v459_v6 = vrot.slane %v3189_v34, 2  ;;  %v2223_v7 = vor.u32 %v3243_v40, %v3238_v55  ;;  %v2287_v8 = vor.u32 %v3259_v61, %v3254_v60  ;;  %v3286_v9 = vld [vmem:[%s2952_s4 + $0x30] sm:$0xf]  ;;  %v460_v11 = vrot.slane %v3189_v34, 3 }
  0x4e   : > { %v3289_v10 = vld [vmem:[%s2952_s4 + $0x34] sm:$0xf]  ;;  %v461_v12 = vrot.slane %v3229_v51, 1  ;;  %1385 = vmatpush.bf16.msrb.mxu3 %v2307_v57  ;;  %1328 = vmatpush.bf16.msrb.mxu0 %v2239_v58  ;;  %v3294_v13 = vld [vmem:[%s2952_s4 + $0x38] sm:$0xf]  ;;  %v462_v14 = vrot.slane %v3229_v51, 2  ;;  %v583_v35 = vsel %vm255_vm0, %v3189_v34, %v458_v1  ;;  %v588_v41 = vsel %vm489_vm3, %v3189_v34, %v458_v1 }
  0x4f   : > { %v463_v15 = vrot.slane %v3229_v51, 3  ;;  %v464_v16 = vrot.slane %v3268_v0, 1  ;;  %v465_v17 = vrot.slane %v3268_v0, 2  ;;  %1347 = vmatpush.bf16.msrb.mxu1 %v2303_v59  ;;  %v3301_v18 = vld [vmem:[%s2952_s4 + $0x3c] sm:$0xf]  ;;  %v466_v19 = vrot.slane %v3268_v0, 3 }
  0x50   : > { %v467_v20 = vrot.slane %v3278_v5, 1  ;;  %v468_v21 = vrot.slane %v3278_v5, 2  ;;  %v469_v22 = vrot.slane %v3278_v5, 3  ;;  %v470_v23 = vrot.slane %v3286_v9, 1  ;;  %1367 = vmatpush.bf16.msrb.mxu2 %v2235_v46 }
  0x51   : > { %v471_v24 = vrot.slane %v3286_v9, 2  ;;  %v472_v25 = vrot.slane %v3286_v9, 3  ;;  %v473_v26 = vrot.slane %v3289_v10, 1  ;;  %v474_v27 = vrot.slane %v3289_v10, 2 }
  0x52   : > { %v475_v28 = vrot.slane %v3289_v10, 3  ;;  %v476_v29 = vrot.slane %v3294_v13, 1  ;;  %v477_v30 = vrot.slane %v3294_v13, 2  ;;  %1386 = vmatpush.bf16.msrb.mxu3 %v2299_v62  ;;  %1329 = vmatpush.bf16.msrb.mxu0 %v2231_v63  ;;  %v478_v31 = vrot.slane %v3294_v13, 3 }
  0x53   : > { %v479_v32 = vrot.slane %v3301_v18, 1  ;;  %v480_v33 = vrot.slane %v3301_v18, 2  ;;  %v876_v38 = vld [vmem:[#allocation1] sm:$0xff]  ;;  %v877_v39 = vld [vmem:[#allocation1 + $0x9] sm:$0xff]  ;;  %1348 = vmatpush.bf16.msrb.mxu1 %v2295_v2  ;;  %v586_v36 = vsel %vm259_vm1, %v459_v6, %v460_v11  ;;  %v589_v42 = vsel %vm491_vm4, %v459_v6, %v460_v11 }
  0x54   : > { %v595_v43 = vsel %vm255_vm0, %v3229_v51, %v461_v12  ;;  %1068 = vmatmul.bf16.vlgmr.msra.gmra.mxu0 %v876_v38  ;;  %1087 = vmatmul.bf16.vlgmr.msra.gmra.mxu1 %v877_v39  ;;  %v481_v44 = vrot.slane %v3301_v18, 3  ;;  %v3328_v45 = vsel %vm263_vm2, %v583_v35, %v586_v36  ;;  %v590_v47 = vsel %vm493_vm5, %v588_v41, %v589_v42  ;;  %v2216_v36 = vld [vmem:[%s4142_s1 + $0x38] sm:$0xf0] }
  0x55   : > { %v598_v48 = vsel %vm259_vm1, %v462_v14, %v463_v15  ;;  %1106 = vmatmul.bf16.vlgmr.msra.gmra.mxu2 %v876_v38  ;;  %1125 = vmatmul.bf16.vlgmr.msra.gmra.mxu3 %v877_v39  ;;  %v592_v37 = vrot.slane %v590_v47, 1  ;;  %v600_v49 = vsel %vm489_vm3, %v3229_v51, %v461_v12  ;;  %v601_v50 = vsel %vm491_vm4, %v462_v14, %v463_v15  ;;  %v2490_v47 = vld [vmem:[%s4142_s1 + $0x34] sm:$0xf0] }
  0x56   : > { %v3333_v34 = vsel %vm263_vm2, %v595_v43, %v598_v48  ;;  %1368 = vmatpush.bf16.msrb.mxu2 %v2227_v3  ;;  %1387 = vmatpush.bf16.msrb.mxu3 %v2291_v4  ;;  %v602_v52 = vsel %vm493_vm5, %v600_v49, %v601_v50  ;;  %v607_v53 = vsel %vm255_vm0, %v3268_v0, %v464_v16  ;;  %v756_v55 = vshrl.u32 %v3328_v45, 16  ;;  %v2214_v45 = vld [vmem:[%s4142_s1 + $0x30] sm:$0xf] }
  0x57   : > { %v610_v54 = vsel %vm259_vm1, %v465_v17, %v466_v19  ;;  %1330 = vmatpush.bf16.msrb.mxu0 %v2223_v7  ;;  %1349 = vmatpush.bf16.msrb.mxu1 %v2287_v8  ;;  %v604_v40 = vrot.slane %v602_v52, 1  ;;  %v612_v51 = vsel %vm489_vm3, %v3268_v0, %v464_v16  ;;  %v613_v58 = vsel %vm491_vm4, %v465_v17, %v466_v19  ;;  %v2278_v48 = vld [vmem:[%s4142_s1 + $0xb0] sm:$0xf] }
  0x58   : > { %v3344_v57 = vsel %vm263_vm2, %v607_v53, %v610_v54  ;;  %v614_v59 = vsel %vm493_vm5, %v612_v51, %v613_v58  ;;  %v619_v60 = vsel %vm255_vm0, %v3278_v5, %v467_v20  ;;  %v622_v61 = vsel %vm259_vm1, %v468_v21, %v469_v22  ;;  %v3452_v53 = vld [vmem:[%s4142_s1 + $0x24] sm:$0xf]  ;;  %v3457_v54 = vld [vmem:[%s4142_s1 + $0x28] sm:$0xf0] }
  0x59   : > { %v624_v46 = vsel %vm489_vm3, %v3278_v5, %v467_v20  ;;  %v616_v62 = vrot.slane %v614_v59, 1  ;;  %v3356_v63 = vsel %vm263_vm2, %v619_v60, %v622_v61  ;;  %v625_v1 = vsel %vm491_vm4, %v468_v21, %v469_v22  ;;  %v3476_v60 = vld [vmem:[%s4142_s1 + $0x20] sm:$0xf]  ;;  %v3481_v61 = vld [vmem:[%s4142_s1 + $0x24] sm:$0xf0] }
  0x5a   : > { %v631_v0 = vsel %vm255_vm0, %v3286_v9, %v470_v23  ;;  %v626_v2 = vsel %vm493_vm5, %v624_v46, %v625_v1  ;;  %v634_v3 = vsel %vm259_vm1, %v471_v24, %v472_v25  ;;  %v636_v4 = vsel %vm489_vm3, %v3286_v9, %v470_v23  ;;  %v3486_v46 = vld [vmem:[%s4142_s1 + $0xa0] sm:$0xf]  ;;  %v3501_v1 = vld [vmem:[%s4142_s1 + $0x18] sm:$0xf0] }
  0x5b   : > { %v637_v6 = vsel %vm491_vm4, %v471_v24, %v472_v25  ;;  %v628_v7 = vrot.slane %v626_v2, 1  ;;  %v635_v5 = vsel %vm263_vm2, %v631_v0, %v634_v3  ;;  %v643_v11 = vsel %vm255_vm0, %v3289_v10, %v473_v26 }
  0x5c   : > { %v638_v8 = vsel %vm493_vm5, %v636_v4, %v637_v6  ;;  %v646_v14 = vsel %vm259_vm1, %v474_v27, %v475_v28  ;;  %v648_v15 = vsel %vm489_vm3, %v3289_v10, %v473_v26  ;;  %v649_v16 = vsel %vm491_vm4, %v474_v27, %v475_v28  ;;  %v3511_v6 = vld [vmem:[%s4142_s1 + $0x94] sm:$0xf] }
  0x5d   : > { %v640_v12 = vrot.slane %v638_v8, 1  ;;  %v3375_v9 = vsel %vm263_vm2, %v643_v11, %v646_v14  ;;  %v650_v17 = vsel %vm493_vm5, %v648_v15, %v649_v16  ;;  %v655_v19 = vsel %vm255_vm0, %v3294_v13, %v476_v29  ;;  %v3526_v8 = vld [vmem:[%s4142_s1 + $0x14] sm:$0xf0]  ;;  %v3531_v11 = vld [vmem:[%s4142_s1 + $0x90] sm:$0xf] }
  0x5e   : > { %v658_v20 = vsel %vm259_vm1, %v477_v30, %v478_v31  ;;  %v652_v21 = vrot.slane %v650_v17, 1  ;;  %v660_v22 = vsel %vm489_vm3, %v3294_v13, %v476_v29  ;;  %v661_v23 = vsel %vm491_vm4, %v477_v30, %v478_v31  ;;  %v3541_v14 = vld [vmem:[%s4142_s1 + $0x4] sm:$0xf]  ;;  %v3546_v15 = vld [vmem:[%s4142_s1 + $0x8] sm:$0xf0] }
  0x5f   : > { %v3388_v10 = vsel %vm263_vm2, %v655_v19, %v658_v20  ;;  %v662_v24 = vsel %vm493_vm5, %v660_v22, %v661_v23  ;;  %v667_v25 = vsel %vm255_vm0, %v3301_v18, %v479_v32  ;;  %v670_v26 = vsel %vm259_vm1, %v480_v33, %v481_v44  ;;  %v3553_v20 = vld [vmem:[%s4142_s1 + $0x84] sm:$0xf] }
  0x60   : > { %v672_v27 = vsel %vm489_vm3, %v3301_v18, %v479_v32  ;;  %v664_v28 = vrot.slane %v662_v24, 1  ;;  %v3412_v13 = vsel %vm263_vm2, %v667_v25, %v670_v26  ;;  %v673_v29 = vsel %vm491_vm4, %v480_v33, %v481_v44  ;;  %v2489_v32 = vld [vmem:[%s4142_s1 + $0x34] sm:$0xf]  ;;  %v2280_v33 = vld [vmem:[%s4142_s1 + $0xb8] sm:$0xf0] }
  0x61   : > { %v761_v30 = vshll.u32 %v592_v37, 16  ;;  %v674_v31 = vsel %vm493_vm5, %v672_v27, %v673_v29  ;;  %v764_v35 = vshrl.u32 %v3333_v34, 16  ;;  %v769_v38 = vshll.u32 %v604_v40, 16  ;;  %v2505_v18 = vld [vmem:[%s4142_s1 + $0xb4] sm:$0xf] }
  0x62   : > { %v772_v39 = vshrl.u32 %v3344_v57, 16  ;;  %v676_v41 = vrot.slane %v674_v31, 1  ;;  %v777_v43 = vshll.u32 %v616_v62, 16  ;;  %v780_v44 = vshrl.u32 %v3356_v63, 16  ;;  %v2506_v37 = vld [vmem:[%s4142_s1 + $0xb4] sm:$0xf0] }
  0x63   : > { %v763_v42 = vsel %vm3074_vm10, %v756_v55, %v761_v30  ;;  %v771_v34 = vsel %vm3074_vm10, %v764_v35, %v769_v38  ;;  %v785_v49 = vshll.u32 %v628_v7, 16  ;;  %v788_v50 = vshrl.u32 %v635_v5, 16  ;;  %v3462_v55 = vld [vmem:[%s4142_s1 + $0xa4] sm:$0xf]  ;;  %v3467_v40 = vld [vmem:[%s4142_s1 + $0xa8] sm:$0xf0] }
  0x64   : > { %v793_v52 = vshll.u32 %v640_v12, 16  ;;  %879 = vst [vmem:[#allocation1] ss:$9 sm:$0xff] %v763_v42  ;;  %v779_v57 = vsel %vm3074_vm10, %v772_v39, %v777_v43  ;;  %v796_v51 = vshrl.u32 %v3375_v9, 16  ;;  %v801_v58 = vshll.u32 %v652_v21, 16 }
  0x65   : > { %v804_v59 = vshrl.u32 %v3388_v10, 16  ;;  %881 = vst [vmem:[#allocation1 + $0x1] ss:$9 sm:$0xff] %v771_v34  ;;  %v3491_v62 = vld [vmem:[%s4142_s1 + $0xa4] sm:$0xf0]  ;;  %v787_v0 = vsel %vm3074_vm10, %v780_v44, %v785_v49  ;;  %v809_v3 = vshll.u32 %v664_v28, 16  ;;  %v2219_v17 = vor.u32 %v2489_v32, %v2216_v36 }
  0x66   : > { %v3496_v63 = vld [vmem:[%s4142_s1 + $0x14] sm:$0xf]  ;;  %v795_v2 = vsel %vm3074_vm10, %v788_v50, %v793_v52  ;;  %v812_v4 = vshrl.u32 %v3412_v13, 16  ;;  %883 = vst [vmem:[#allocation1 + $0x2] ss:$9 sm:$0xff] %v779_v57  ;;  %v803_v16 = vsel %vm3074_vm10, %v796_v51, %v801_v58  ;;  %v817_v9 = vshll.u32 %v676_v41, 16 }
  0x67   : > { %v3516_v7 = vld [vmem:[%s4142_s1 + $0x98] sm:$0xf0]  ;;  %v3521_v5 = vld [vmem:[%s4142_s1 + $0x10] sm:$0xf]  ;;  %v3536_v12 = vld [vmem:[%s4142_s1 + $0x94] sm:$0xf0]  ;;  %v2283_v19 = vor.u32 %v2505_v18, %v2280_v33  ;;  %v811_v22 = vsel %vm3074_vm10, %v804_v59, %v809_v3  ;;  %v2215_v23 = vor.u32 %v2490_v47, %v2214_v45  ;;  %v2279_v24 = vor.u32 %v2506_v37, %v2278_v48  ;;  %1369 = vmatpush.bf16.msrb.mxu2 %v2219_v17 }
  0x68   : > { %885 = vst [vmem:[#allocation1 + $0x3] ss:$9 sm:$0xff] %v787_v0  ;;  %v3558_v21 = vld [vmem:[%s4142_s1 + $0x88] sm:$0xf0]  ;;  %v3561_v10 = vld [vmem:[%s2952_s4] sm:$0x5]  ;;  %v819_v27 = vsel %vm3074_vm10, %v812_v4, %v817_v9  ;;  %v2211_v28 = vor.u32 %v3452_v53, %v3457_v54  ;;  %v2275_v13 = vor.u32 %v3462_v55, %v3467_v40  ;;  %v2207_v30 = vor.u32 %v3481_v61, %v3476_v60 }
  0x69   : > { %887 = vst [vmem:[#allocation1 + $0x4] ss:$9 sm:$0xff] %v795_v2  ;;  %v3568_v25 = vld [vmem:[%s4142_s1] sm:$0xf]  ;;  %v3573_v26 = vld [vmem:[%s4142_s1 + $0x4] sm:$0xf0]  ;;  %1388 = vmatpush.bf16.msrb.mxu3 %v2283_v19  ;;  %1331 = vmatpush.bf16.msrb.mxu0 %v2215_v23  ;;  %v2271_v31 = vor.u32 %v3491_v62, %v3486_v46  ;;  %v2203_v35 = vor.u32 %v3496_v63, %v3501_v1 }
  0x6a   : > { %889 = vst [vmem:[#allocation1 + $0x5] ss:$9 sm:$0xff] %v803_v16  ;;  %v3584_v29 = vld [vmem:[%s4142_s1 + $0x80] sm:$0xf]  ;;  %1350 = vmatpush.bf16.msrb.mxu1 %v2279_v24  ;;  %v176_v38 = vld [vmem:[%s2952_s4 + $0x4] sm:$0x5]  ;;  %v2267_v39 = vor.u32 %v3511_v6, %v3516_v7  ;;  %v2199_v32 = vor.u32 %v3526_v8, %v3521_v5  ;;  %v2263_v36 = vor.u32 %v3536_v12, %v3531_v11 }
  0x6b   : > { %891 = vst [vmem:[#allocation1 + $0x6] ss:$9 sm:$0xff] %v811_v22  ;;  %v2195_v18 = vor.u32 %v3541_v14, %v3546_v15  ;;  %v177_v33 = vld [vmem:[%s2952_s4 + $0x8] sm:$0x5]  ;;  %v2259_v41 = vor.u32 %v3553_v20, %v3558_v21  ;;  %v2191_v42 = vor.u32 %v3573_v26, %v3568_v25  ;;  %v2255_v43 = vor.u32 %v3589_v56, %v3584_v29  ;;  %v178_v44 = vld [vmem:[%s2952_s4 + $0xc] sm:$0x5] }
  0x6c   : > { %893 = vst [vmem:[#allocation1 + $0x7] ss:$9 sm:$0xff] %v819_v27  ;;  %v3615_v45 = vld [vmem:[%s2952_s4 + $0x10] sm:$0x5]  ;;  %v207_v47 = vrot.slane %v3561_v10, 1  ;;  %1370 = vmatpush.bf16.msrb.mxu2 %v2211_v28  ;;  %v208_v37 = vrot.slane %v3561_v10, 2 }
  0x6d   : > { %1389 = vmatpush.bf16.msrb.mxu3 %v2275_v13  ;;  %v3619_v48 = vld [vmem:[%s2952_s4 + $0x14] sm:$0x5]  ;;  %v209_v34 = vrot.slane %v3561_v10, 3  ;;  %v210_v49 = vrot.slane %v176_v38, 1  ;;  %v211_v50 = vrot.slane %v176_v38, 2  ;;  %1332 = vmatpush.bf16.msrb.mxu0 %v2207_v30  ;;  %v212_v53 = vrot.slane %v176_v38, 3 }
  0x6e   : > { %1351 = vmatpush.bf16.msrb.mxu1 %v2271_v31  ;;  %v3624_v52 = vld [vmem:[%s2952_s4 + $0x18] sm:$0x5]  ;;  %v213_v54 = vrot.slane %v177_v33, 1  ;;  %v214_v55 = vrot.slane %v177_v33, 2  ;;  %v215_v40 = vrot.slane %v177_v33, 3  ;;  %v216_v51 = vrot.slane %v178_v44, 1 }
  0x6f   : > { %v3627_v57 = vld [vmem:[%s2952_s4 + $0x1c] sm:$0x5]  ;;  %v217_v58 = vrot.slane %v178_v44, 2  ;;  %v218_v59 = vrot.slane %v178_v44, 3  ;;  %v219_v60 = vrot.slane %v3615_v45, 1  ;;  %v220_v61 = vrot.slane %v3615_v45, 2 }
  0x70   : > { %v221_v46 = vrot.slane %v3615_v45, 3  ;;  %v222_v62 = vrot.slane %v3619_v48, 1  ;;  %v223_v63 = vrot.slane %v3619_v48, 2  ;;  %1371 = vmatpush.bf16.msrb.mxu2 %v2203_v35  ;;  %v224_v1 = vrot.slane %v3619_v48, 3  ;;  %v2561_v20 = vld [vmem:[%s4142_s1 + $0x274] sm:$0xf] }
  0x71   : > { %1390 = vmatpush.bf16.msrb.mxu3 %v2267_v39  ;;  %v225_v0 = vrot.slane %v3624_v52, 1  ;;  %v226_v2 = vrot.slane %v3624_v52, 2  ;;  %v227_v3 = vrot.slane %v3624_v52, 3  ;;  %1333 = vmatpush.bf16.msrb.mxu0 %v2199_v32  ;;  %v228_v7 = vrot.slane %v3627_v57, 1  ;;  %v2408_v21 = vld [vmem:[%s4142_s1 + $0x278] sm:$0xf0] }
  0x72   : > { %1352 = vmatpush.bf16.msrb.mxu1 %v2263_v36  ;;  %v229_v5 = vrot.slane %v3627_v57, 2  ;;  %v258_v8 = vsel %vm255_vm0, %v3561_v10, %v207_v47  ;;  %v262_v11 = vsel %vm259_vm1, %v208_v37, %v209_v34  ;;  %v230_v12 = vrot.slane %v3627_v57, 3  ;;  %v2577_v10 = vld [vmem:[%s4142_s1 + $0x2f4] sm:$0xf]  ;;  %v2472_v22 = vld [vmem:[%s4142_s1 + $0x2f8] sm:$0xf0] }
  0x73   : > { %v894_v4 = vld [vmem:[#allocation1] sm:$0xff]  ;;  %v895_v6 = vld [vmem:[#allocation1 + $0x9] sm:$0xff]  ;;  %v264_v14 = vsel %vm263_vm2, %v258_v8, %v262_v11  ;;  %v267_v15 = vsel %vm255_vm0, %v176_v38, %v210_v49  ;;  %v270_v16 = vsel %vm259_vm1, %v211_v50, %v212_v53  ;;  %v274_v17 = vsel %vm255_vm0, %v177_v33, %v213_v54  ;;  %v2562_v13 = vld [vmem:[%s4142_s1 + $0x274] sm:$0xf0] }
  0x74   : > { %1073 = vmatmul.bf16.gmra.mxu0 %v894_v4  ;;  %1092 = vmatmul.bf16.gmra.mxu1 %v895_v6  ;;  %v271_v9 = vsel %vm263_vm2, %v267_v15, %v270_v16  ;;  %v277_v19 = vsel %vm259_vm1, %v214_v55, %v215_v40  ;;  %1136 = vst [vmem:[#allocation1] ss:$9 sm:$0xff] %v264_v14  ;;  %v2406_v28 = vld [vmem:[%s4142_s1 + $0x270] sm:$0xf]  ;;  %v2578_v31 = vld [vmem:[%s4142_s1 + $0x2f4] sm:$0xf0] }
  0x75   : > { %1111 = vmatmul.bf16.gmra.mxu2 %v894_v4  ;;  %1130 = vmatmul.bf16.gmra.mxu3 %v895_v6  ;;  %v278_v23 = vsel %vm263_vm2, %v274_v17, %v277_v19  ;;  %v281_v24 = vsel %vm255_vm0, %v178_v44, %v216_v51  ;;  %v284_v27 = vsel %vm259_vm1, %v217_v58, %v218_v59  ;;  %v2470_v30 = vld [vmem:[%s4142_s1 + $0x2f0] sm:$0xf]  ;;  %v3690_v32 = vld [vmem:[%s4142_s1 + $0x264] sm:$0xf]  ;;  %v3695_v25 = vld [vmem:[%s4142_s1 + $0x268] sm:$0xf0] }
  0x76   : > { %1372 = vmatpush.bf16.msrb.mxu2 %v2195_v18  ;;  %1391 = vmatpush.bf16.msrb.mxu3 %v2259_v41  ;;  %1138 = vst [vmem:[#allocation1 + $0x1] ss:$9 sm:$0xff] %v271_v9  ;;  %v285_v35 = vsel %vm263_vm2, %v281_v24, %v284_v27  ;;  %v288_v38 = vsel %vm255_vm0, %v3615_v45, %v219_v60  ;;  %v3700_v26 = vld [vmem:[%s4142_s1 + $0x2e4] sm:$0xf]  ;;  %v3705_v29 = vld [vmem:[%s4142_s1 + $0x2e8] sm:$0xf0] }
  0x77   : > { %1334 = vmatpush.bf16.msrb.mxu0 %v2191_v42  ;;  %1353 = vmatpush.bf16.msrb.mxu1 %v2255_v43  ;;  %v291_v39 = vsel %vm259_vm1, %v220_v61, %v221_v46  ;;  %1140 = vst [vmem:[#allocation1 + $0x2] ss:$9 sm:$0xff] %v278_v23  ;;  %v3710_v56 = vld [vmem:[%s4142_s1 + $0x260] sm:$0xf]  ;;  %v3715_v36 = vld [vmem:[%s4142_s1 + $0x264] sm:$0xf0]  ;;  %v295_v33 = vsel %vm255_vm0, %v3619_v48, %v222_v62 }
  0x78   : > { %v292_v18 = vsel %vm263_vm2, %v288_v38, %v291_v39  ;;  %v298_v41 = vsel %vm259_vm1, %v223_v63, %v224_v1  ;;  %v302_v42 = vsel %vm255_vm0, %v3624_v52, %v225_v0  ;;  %1142 = vst [vmem:[#allocation1 + $0x3] ss:$9 sm:$0xff] %v285_v35  ;;  %v3726_v43 = vld [vmem:[%s4142_s1 + $0x2e0] sm:$0xf]  ;;  %v3731_v44 = vld [vmem:[%s4142_s1 + $0x2e4] sm:$0xf0]  ;;  %v305_v49 = vsel %vm259_vm1, %v226_v2, %v227_v3 }
  0x79   : > { %v3736_v45 = vld [vmem:[%s4142_s1 + $0x254] sm:$0xf]  ;;  %v3741_v47 = vld [vmem:[%s4142_s1 + $0x258] sm:$0xf0]  ;;  %v299_v34 = vsel %vm263_vm2, %v295_v33, %v298_v41  ;;  %v309_v50 = vsel %vm255_vm0, %v3627_v57, %v228_v7  ;;  %v312_v52 = vsel %vm259_vm1, %v229_v5, %v230_v12  ;;  %1144 = vst [vmem:[#allocation1 + $0x4] ss:$9 sm:$0xff] %v292_v18  ;;  %v306_v59 = vsel %vm263_vm2, %v302_v42, %v305_v49 }
  0x7a   : > { %v3746_v48 = vld [vmem:[%s4142_s1 + $0x2d4] sm:$0xf]  ;;  %v3751_v37 = vld [vmem:[%s4142_s1 + $0x2d8] sm:$0xf0]  ;;  %v3761_v53 = vld [vmem:[%s4142_s1 + $0x250] sm:$0xf]  ;;  %v313_v60 = vsel %vm263_vm2, %v309_v50, %v312_v52  ;;  %v2411_v61 = vor.u32 %v2561_v20, %v2408_v21  ;;  %v2475_v46 = vor.u32 %v2577_v10, %v2472_v22  ;;  %v2407_v1 = vor.u32 %v2562_v13, %v2406_v28 }
  0x7b   : > { %v3766_v54 = vld [vmem:[%s4142_s1 + $0x254] sm:$0xf0]  ;;  %v3771_v55 = vld [vmem:[%s4142_s1 + $0x2d0] sm:$0xf]  ;;  %v3781_v57 = vld [vmem:[%s4142_s1 + $0x244] sm:$0xf]  ;;  %v2471_v0 = vor.u32 %v2578_v31, %v2470_v30  ;;  %v2403_v4 = vor.u32 %v3690_v32, %v3695_v25  ;;  %v2467_v6 = vor.u32 %v3700_v26, %v3705_v29  ;;  %v2399_v7 = vor.u32 %v3715_v36, %v3710_v56 }
  0x7c   : > { %v3776_v40 = vld [vmem:[%s4142_s1 + $0x2d4] sm:$0xf0]  ;;  %v3786_v51 = vld [vmem:[%s4142_s1 + $0x248] sm:$0xf0]  ;;  %v3791_v58 = vld [vmem:[%s4142_s1 + $0x2c4] sm:$0xf]  ;;  %1733 = vmatpush.bf16.msra.mxu2 %v2411_v61  ;;  %1752 = vmatpush.bf16.msra.mxu3 %v2475_v46  ;;  %v2463_v11 = vor.u32 %v3731_v44, %v3726_v43  ;;  %v2395_v12 = vor.u32 %v3736_v45, %v3741_v47  ;;  %v2459_v14 = vor.u32 %v3746_v48, %v3751_v37 }
  0x7d   : > { %1146 = vst [vmem:[#allocation1 + $0x5] ss:$9 sm:$0xff] %v299_v34  ;;  %v3798_v62 = vld [vmem:[%s4142_s1 + $0x2c8] sm:$0xf0]  ;;  %v3803_v63 = vld [vmem:[%s4142_s1 + $0x240] sm:$0xf]  ;;  %1695 = vmatpush.bf16.msra.mxu0 %v2407_v1  ;;  %1714 = vmatpush.bf16.msra.mxu1 %v2471_v0  ;;  %v2391_v16 = vor.u32 %v3766_v54, %v3761_v53  ;;  %v2455_v9 = vor.u32 %v3776_v40, %v3771_v55 }
  0x7e   : > { %1148 = vst [vmem:[#allocation1 + $0x6] ss:$9 sm:$0xff] %v306_v59  ;;  %v3808_v2 = vld [vmem:[%s4142_s1 + $0x244] sm:$0xf0]  ;;  %v3813_v3 = vld [vmem:[%s4142_s1 + $0x2c0] sm:$0xf]  ;;  %v2387_v17 = vor.u32 %v3781_v57, %v3786_v51  ;;  %v2451_v19 = vor.u32 %v3791_v58, %v3798_v62 }
  0x7f   : > { %1150 = vst [vmem:[#allocation1 + $0x7] ss:$9 sm:$0xff] %v313_v60  ;;  %v3824_v5 = vld [vmem:[%s4142_s1 + $0x2c4] sm:$0xf0]  ;;  %v183_v8 = vld [vmem:[%s2952_s4 + $0x20] sm:$0x5]  ;;  %v2383_v10 = vor.u32 %v3808_v2, %v3803_v63 }
  0x80   : > { %v184_v15 = vld [vmem:[%s2952_s4 + $0x24] sm:$0x5]  ;;  %v185_v20 = vld [vmem:[%s2952_s4 + $0x28] sm:$0x5]  ;;  %v186_v21 = vld [vmem:[%s2952_s4 + $0x2c] sm:$0x5]  ;;  %v2447_v22 = vor.u32 %v3824_v5, %v3813_v3  ;;  %1734 = vmatpush.bf16.msra.mxu2 %v2403_v4  ;;  %1753 = vmatpush.bf16.msra.mxu3 %v2467_v6 }
  0x81   : > { %v187_v23 = vld [vmem:[%s2952_s4 + $0x30] sm:$0x5]  ;;  %v188_v24 = vld [vmem:[%s2952_s4 + $0x34] sm:$0x5]  ;;  %v231_v27 = vrot.slane %v183_v8, 1  ;;  %v232_v28 = vrot.slane %v183_v8, 2  ;;  %1696 = vmatpush.bf16.msra.mxu0 %v2399_v7  ;;  %1715 = vmatpush.bf16.msra.mxu1 %v2463_v11 }
  0x82   : > { %v189_v13 = vld [vmem:[%s2952_s4 + $0x38] sm:$0x5]  ;;  %v233_v30 = vrot.slane %v183_v8, 3  ;;  %v234_v31 = vrot.slane %v184_v15, 1  ;;  %v235_v35 = vrot.slane %v184_v15, 2  ;;  %v236_v38 = vrot.slane %v184_v15, 3 }
  0x83   : > { %v190_v39 = vld [vmem:[%s2952_s4 + $0x3c] sm:$0x5]  ;;  %v237_v32 = vrot.slane %v185_v20, 1  ;;  %v238_v25 = vrot.slane %v185_v20, 2  ;;  %v239_v26 = vrot.slane %v185_v20, 3  ;;  %v240_v29 = vrot.slane %v186_v21, 1 }
  0x84   : > { %v241_v56 = vrot.slane %v186_v21, 2  ;;  %v242_v36 = vrot.slane %v186_v21, 3  ;;  %v243_v18 = vrot.slane %v187_v23, 1  ;;  %v244_v33 = vrot.slane %v187_v23, 2  ;;  %1735 = vmatpush.bf16.msra.mxu2 %v2395_v12  ;;  %1754 = vmatpush.bf16.msra.mxu3 %v2459_v14  ;;  %v1406_v63 = vld [vmem:[%s2952_s4 + $0xc] sm:$0xa] }
  0x85   : > { %v245_v43 = vrot.slane %v187_v23, 3  ;;  %v246_v44 = vrot.slane %v188_v24, 1  ;;  %v247_v45 = vrot.slane %v188_v24, 2  ;;  %v248_v47 = vrot.slane %v188_v24, 3  ;;  %1697 = vmatpush.bf16.msra.mxu0 %v2391_v16  ;;  %1716 = vmatpush.bf16.msra.mxu1 %v2455_v9  ;;  %v1403_v2 = vld [vmem:[%s2952_s4] sm:$0xa] }
  0x86   : > { %v1151_v41 = vld [vmem:[#allocation1] sm:$0xff]  ;;  %v1152_v42 = vld [vmem:[#allocation1 + $0x9] sm:$0xff]  ;;  %v249_v48 = vrot.slane %v189_v13, 1  ;;  %v250_v37 = vrot.slane %v189_v13, 2  ;;  %v251_v34 = vrot.slane %v189_v13, 3  ;;  %v252_v49 = vrot.slane %v190_v39, 1 }
  0x87   : > { %1335 = vmatmul.bf16.vlgmr.msrb.gmra.mxu0 %v1151_v41  ;;  %1354 = vmatmul.bf16.vlgmr.msrb.gmra.mxu1 %v1152_v42  ;;  %v253_v50 = vrot.slane %v190_v39, 2  ;;  %v316_v52 = vsel %vm255_vm0, %v183_v8, %v231_v27  ;;  %v319_v53 = vsel %vm259_vm1, %v232_v28, %v233_v30  ;;  %v323_v54 = vsel %vm255_vm0, %v184_v15, %v234_v31  ;;  %v1404_v3 = vld [vmem:[%s2952_s4 + $0x4] sm:$0xa]  ;;  %v1409_v5 = vld [vmem:[%s2952_s4 + $0x18] sm:$0xa] }
  0x88   : > { %1373 = vmatmul.bf16.vlgmr.msrb.gmra.mxu2 %v1151_v41  ;;  %1392 = vmatmul.bf16.vlgmr.msrb.gmra.mxu3 %v1152_v42  ;;  %v254_v55 = vrot.slane %v190_v39, 3  ;;  %v320_v40 = vsel %vm263_vm2, %v316_v52, %v319_v53  ;;  %v326_v59 = vsel %vm259_vm1, %v235_v35, %v236_v38  ;;  %v330_v60 = vsel %vm255_vm0, %v185_v20, %v237_v32  ;;  %v2376_v20 = vld [vmem:[%s4142_s1 + $0x238] sm:$0xf0]  ;;  %v2554_v27 = vld [vmem:[%s4142_s1 + $0x234] sm:$0xf0] }
  0x89   : > { %v327_v61 = vsel %vm263_vm2, %v323_v54, %v326_v59  ;;  %v333_v46 = vsel %vm259_vm1, %v238_v25, %v239_v26  ;;  %v337_v1 = vsel %vm255_vm0, %v186_v21, %v240_v29  ;;  %1153 = vst [vmem:[#allocation1] ss:$9 sm:$0xff] %v320_v40  ;;  %v340_v4 = vsel %vm259_vm1, %v241_v56, %v242_v36  ;;  %v2569_v21 = vld [vmem:[%s4142_s1 + $0x2b4] sm:$0xf]  ;;  %v2438_v35 = vld [vmem:[%s4142_s1 + $0x2b0] sm:$0xf] }
  0x8a   : > { %v334_v0 = vsel %vm263_vm2, %v330_v60, %v333_v46  ;;  %v344_v6 = vsel %vm255_vm0, %v187_v23, %v243_v18  ;;  %v347_v7 = vsel %vm259_vm1, %v244_v33, %v245_v43  ;;  %1154 = vst [vmem:[#allocation1 + $0x1] ss:$9 sm:$0xff] %v327_v61  ;;  %v341_v8 = vsel %vm263_vm2, %v337_v1, %v340_v4  ;;  %v2440_v23 = vld [vmem:[%s4142_s1 + $0x2b8] sm:$0xf0]  ;;  %v2551_v26 = vld [vmem:[%s4142_s1 + $0x224] sm:$0xf] }
  0x8b   : > { %v348_v11 = vsel %vm263_vm2, %v344_v6, %v347_v7  ;;  %v351_v12 = vsel %vm255_vm0, %v188_v24, %v246_v44  ;;  %v354_v14 = vsel %vm259_vm1, %v247_v45, %v248_v47  ;;  %1155 = vst [vmem:[#allocation1 + $0x2] ss:$9 sm:$0xff] %v334_v0  ;;  %1736 = vmatpush.bf16.msra.mxu2 %v2387_v17  ;;  %v1405_v17 = vld [vmem:[%s2952_s4 + $0x8] sm:$0xa]  ;;  %v2374_v24 = vld [vmem:[%s4142_s1 + $0x230] sm:$0xf] }
  0x8c   : > { %1755 = vmatpush.bf16.msra.mxu3 %v2451_v19  ;;  %v355_v15 = vsel %vm263_vm2, %v351_v12, %v354_v14  ;;  %v358_v16 = vsel %vm255_vm0, %v189_v13, %v249_v48  ;;  %v361_v9 = vsel %vm259_vm1, %v250_v37, %v251_v34  ;;  %1156 = vst [vmem:[#allocation1 + $0x3] ss:$9 sm:$0xff] %v341_v8  ;;  %v2553_v19 = vld [vmem:[%s4142_s1 + $0x234] sm:$0xf]  ;;  %v2368_v29 = vld [vmem:[%s4142_s1 + $0x228] sm:$0xf0] }
  0x8d   : > { %1698 = vmatpush.bf16.msra.mxu0 %v2383_v10  ;;  %1717 = vmatpush.bf16.msra.mxu1 %v2447_v22  ;;  %v362_v57 = vsel %vm263_vm2, %v358_v16, %v361_v9  ;;  %v365_v51 = vsel %vm255_vm0, %v190_v39, %v252_v49  ;;  %v368_v58 = vsel %vm259_vm1, %v253_v50, %v254_v55  ;;  %v1410_v10 = vld [vmem:[%s2952_s4 + $0x1c] sm:$0xa]  ;;  %v2570_v39 = vld [vmem:[%s4142_s1 + $0x2b4] sm:$0xf0]  ;;  %v2567_v56 = vld [vmem:[%s4142_s1 + $0x2a4] sm:$0xf] }
  0x8e   : > { %1157 = vst [vmem:[#allocation1 + $0x4] ss:$9 sm:$0xff] %v348_v11  ;;  %v369_v62 = vsel %vm263_vm2, %v365_v51, %v368_v58  ;;  %v2379_v22 = vor.u32 %v2553_v19, %v2376_v20  ;;  %v2443_v30 = vor.u32 %v2569_v21, %v2440_v23  ;;  %v2375_v31 = vor.u32 %v2554_v27, %v2374_v24  ;;  %v1407_v36 = vld [vmem:[%s2952_s4 + $0x10] sm:$0xa]  ;;  %v2432_v33 = vld [vmem:[%s4142_s1 + $0x2a8] sm:$0xf0] }
  0x8f   : > { %1158 = vst [vmem:[#allocation1 + $0x5] ss:$9 sm:$0xff] %v355_v15  ;;  %v2439_v25 = vor.u32 %v2570_v39, %v2438_v35  ;;  %v2371_v18 = vor.u32 %v2551_v26, %v2368_v29  ;;  %v2366_v41 = vld [vmem:[%s4142_s1 + $0x220] sm:$0xf]  ;;  %v1408_v42 = vld [vmem:[%s2952_s4 + $0x14] sm:$0xa]  ;;  %v2435_v43 = vor.u32 %v2567_v56, %v2432_v33 }
  0x90   : > { %1159 = vst [vmem:[#allocation1 + $0x6] ss:$9 sm:$0xff] %v362_v57  ;;  %1737 = vmatpush.bf16.msra.mxu2 %v2379_v22  ;;  %1756 = vmatpush.bf16.msra.mxu3 %v2443_v30  ;;  %v2552_v44 = vld [vmem:[%s4142_s1 + $0x224] sm:$0xf0]  ;;  %v2430_v45 = vld [vmem:[%s4142_s1 + $0x2a0] sm:$0xf] }
  0x91   : > { %1160 = vst [vmem:[#allocation1 + $0x7] ss:$9 sm:$0xff] %v369_v62  ;;  %1699 = vmatpush.bf16.msra.mxu0 %v2375_v31  ;;  %1718 = vmatpush.bf16.msra.mxu1 %v2439_v25  ;;  %v2568_v47 = vld [vmem:[%s4142_s1 + $0x2a4] sm:$0xf0]  ;;  %v2367_v37 = vor.u32 %v2552_v44, %v2366_v41  ;;  %v2549_v49 = vld [vmem:[%s4142_s1 + $0x214] sm:$0xf] }
  0x92   : > { %1428 = vst [vmem:[#allocation1 + $0x20] sm:$0xff] %v1405_v17  ;;  %v1413_v48 = vld [vmem:[%s2952_s4 + $0x28] sm:$0xa]  ;;  %v2431_v34 = vor.u32 %v2568_v47, %v2430_v45  ;;  %v2360_v50 = vld [vmem:[%s4142_s1 + $0x218] sm:$0xf0]  ;;  %vm1792_vm0 = vcmask 1043458  }
  0x93   : > { %1432 = vst [vmem:[#allocation1 + $0x30] sm:$0xff] %v1406_v63  ;;  %v2565_v52 = vld [vmem:[%s4142_s1 + $0x294] sm:$0xf]  ;;  %v1414_v53 = vld [vmem:[%s2952_s4 + $0x2c] sm:$0xa]  ;;  %v2363_v54 = vor.u32 %v2549_v49, %v2360_v50  ;;  %vm1795_vm1 = vcmask 1045508  }
  0x94   : > { %1738 = vmatpush.bf16.msra.mxu2 %v2371_v18  ;;  %1757 = vmatpush.bf16.msra.mxu3 %v2435_v43  ;;  %v2424_v55 = vld [vmem:[%s4142_s1 + $0x298] sm:$0xf0]  ;;  %v2358_v40 = vld [vmem:[%s4142_s1 + $0x210] sm:$0xf]  ;;  %v2550_v59 = vld [vmem:[%s4142_s1 + $0x214] sm:$0xf0] }
  0x95   : > { %1700 = vmatpush.bf16.msra.mxu0 %v2367_v37  ;;  %1719 = vmatpush.bf16.msra.mxu1 %v2431_v34  ;;  %v2427_v61 = vor.u32 %v2565_v52, %v2424_v55  ;;  %v2359_v46 = vor.u32 %v2550_v59, %v2358_v40  ;;  %v2422_v1 = vld [vmem:[%s4142_s1 + $0x290] sm:$0xf]  ;;  %v2566_v0 = vld [vmem:[%s4142_s1 + $0x294] sm:$0xf0]  ;;  %v2547_v7 = vld [vmem:[%s4142_s1 + $0x204] sm:$0xf] }
  0x96   : > { %v2423_v6 = vor.u32 %v2566_v0, %v2422_v1  ;;  %v2352_v11 = vld [vmem:[%s4142_s1 + $0x208] sm:$0xf0]  ;;  %v2563_v15 = vld [vmem:[%s4142_s1 + $0x284] sm:$0xf]  ;;  %v2350_v9 = vld [vmem:[%s4142_s1 + $0x200] sm:$0xf] }
  0x97   : > { %v2355_v14 = vor.u32 %v2547_v7, %v2352_v11  ;;  %v2416_v16 = vld [vmem:[%s4142_s1 + $0x288] sm:$0xf0]  ;;  %v2548_v51 = vld [vmem:[%s4142_s1 + $0x204] sm:$0xf0]  ;;  %v2414_v58 = vld [vmem:[%s4142_s1 + $0x280] sm:$0xf] }
  0x98   : > { %v1161_v28 = vld [vmem:[#allocation1] sm:$0xff]  ;;  %v1162_v13 = vld [vmem:[#allocation1 + $0x9] sm:$0xff]  ;;  %1739 = vmatpush.bf16.msra.mxu2 %v2363_v54  ;;  %1758 = vmatpush.bf16.msra.mxu3 %v2427_v61  ;;  %v2419_v57 = vor.u32 %v2563_v15, %v2416_v16  ;;  %v2351_v63 = vor.u32 %v2548_v51, %v2350_v9  ;;  %v1418_v20 = vld [vmem:[%s2952_s4 + $0x3c] sm:$0xa]  ;;  %vm1798_vm3 = vcmask 1045504  }
  0x99   : > { %1340 = vmatmul.bf16.gmra.mxu0 %v1161_v28  ;;  %1420 = vst [vmem:[#allocation1] sm:$0xff] %v1403_v2  ;;  %v3915_v38 = vld [vmem:[#allocation1 + $0x21] ss:$2 sm:$0xff]  ;;  %1359 = vmatmul.bf16.gmra.mxu1 %v1162_v13  ;;  %v1415_v23 = vld [vmem:[%s2952_s4 + $0x30] sm:$0xa] }
  0x9a   : > { %1424 = vst [vmem:[#allocation1 + $0x10] sm:$0xff] %v1404_v3  ;;  %v3920_v32 = vld [vmem:[#allocation1 + $0x31] ss:$2 sm:$0xff]  ;;  %1378 = vmatmul.bf16.gmra.mxu2 %v1161_v28  ;;  %1397 = vmatmul.bf16.gmra.mxu3 %v1162_v13  ;;  %v2564_v62 = vld [vmem:[%s4142_s1 + $0x284] sm:$0xf0] }
  0x9b   : > { %1442 = vst [vmem:[#allocation1 + $0x20] sm:$0xff] %v1409_v5  ;;  %1701 = vmatpush.bf16.msra.mxu0 %v2359_v46  ;;  %1720 = vmatpush.bf16.msra.mxu1 %v2423_v6  ;;  %v1411_v17 = vld [vmem:[%s2952_s4 + $0x20] sm:$0xa]  ;;  %v2415_v2 = vor.u32 %v2564_v62, %v2414_v58  ;;  %v1412_v3 = vld [vmem:[%s2952_s4 + $0x24] sm:$0xa] }
  0x9c   : > { %1445 = vst [vmem:[#allocation1 + $0x30] sm:$0xff] %v1410_v10  ;;  %1740 = vmatpush.bf16.msra.mxu2 %v2355_v14  ;;  %1759 = vmatpush.bf16.msra.mxu3 %v2419_v57  ;;  %v1417_v5 = vld [vmem:[%s2952_s4 + $0x38] sm:$0xa]  ;;  %v1416_v24 = vld [vmem:[%s2952_s4 + $0x34] sm:$0xa] }
  0x9d   : > { %v1838_v15 = vld [vmem:[%s4143_s2] sm:$0x3] }
  0x9e   : > { %v1841_v57 = vperm.slane %v1838_v15, 1 }
  0x9f   : > { %1702 = vmatpush.bf16.msra.mxu0 %v2351_v63  ;;  %1721 = vmatpush.bf16.msra.mxu1 %v2415_v2 }
  0xa0   : > { %v1422_v60 = vld [vmem:[#allocation1 + $0x1] ss:$2 sm:$0xff] }
  0xa1   : > { %v1426_v4 = vld [vmem:[#allocation1 + $0x11] ss:$2 sm:$0xff]  ;;  %1436 = vst [vmem:[#allocation1] sm:$0xff] %v1407_v36 }
  0xa2   : > { %1439 = vst [vmem:[#allocation1 + $0x10] sm:$0xff] %v1408_v42  ;;  %v1443_v8 = vld [vmem:[#allocation1 + $0x21] ss:$2 sm:$0xff] }
  0xa3   : > { %v1446_v12 = vld [vmem:[#allocation1 + $0x31] ss:$2 sm:$0xff]  ;;  %1454 = vst [vmem:[#allocation1 + $0x20] sm:$0xff] %v1413_v48 }
  0xa4   : > { %1457 = vst [vmem:[#allocation1 + $0x30] sm:$0xff] %v1414_v53 }
  0xa8   : > { %v1437_v19 = vld [vmem:[#allocation1 + $0x1] ss:$2 sm:$0xff] }
  0xa9   : > { %v1440_v21 = vld [vmem:[#allocation1 + $0x11] ss:$2 sm:$0xff]  ;;  %1448 = vst [vmem:[#allocation1] sm:$0xff] %v1411_v17 }
  0xaa   : > { %1451 = vst [vmem:[#allocation1 + $0x10] sm:$0xff] %v1412_v3  ;;  %v1455_v10 = vld [vmem:[#allocation1 + $0x21] ss:$2 sm:$0xff]  ;;  %v1840_v3 = vperm.slane %v1838_v15, 0 }
  0xab   : > { %v1458_v22 = vld [vmem:[#allocation1 + $0x31] ss:$2 sm:$0xff]  ;;  %1466 = vst [vmem:[#allocation1 + $0x20] sm:$0xff] %v1417_v5  ;;  %v1842_v5 = vrot.slane %v1841_v57, 6 }
  0xac   : > { %1469 = vst [vmem:[#allocation1 + $0x30] sm:$0xff] %v1418_v20 }
  0xb0   : > { %v1449_v27 = vld [vmem:[#allocation1 + $0x1] ss:$2 sm:$0xff] }
  0xb1   : > { %v1452_v28 = vld [vmem:[#allocation1 + $0x11] ss:$2 sm:$0xff]  ;;  %1460 = vst [vmem:[#allocation1] sm:$0xff] %v1415_v23 }
  0xb2   : > { %1463 = vst [vmem:[#allocation1 + $0x10] sm:$0xff] %v1416_v24  ;;  %v1467_v13 = vld [vmem:[#allocation1 + $0x21] ss:$2 sm:$0xff] }
  0xb3   : > { %v1470_v30 = vld [vmem:[#allocation1 + $0x31] ss:$2 sm:$0xff] }
  0xb8   : > { %v1461_v31 = vld [vmem:[#allocation1 + $0x1] ss:$2 sm:$0xff] }
  0xb9   : > { %v1464_v35 = vld [vmem:[#allocation1 + $0x11] ss:$2 sm:$0xff]  ;;  %1516 = vst [vmem:[#allocation1 + $0x6] ss:$9 sm:$0xff] %v1443_v8 }
  0xba   : > { %1504 = vst [vmem:[#allocation1] ss:$9 sm:$0xff] %v1422_v60 }
  0xbb   : > { %1506 = vst [vmem:[#allocation1 + $0x1] ss:$9 sm:$0xff] %v1426_v4 }
  0xbc   : > { %1508 = vst [vmem:[#allocation1 + $0x2] ss:$9 sm:$0xff] %v3915_v38 }
  0xbd   : > { %1510 = vst [vmem:[#allocation1 + $0x3] ss:$9 sm:$0xff] %v3920_v32 }
  0xbe   : > { %1512 = vst [vmem:[#allocation1 + $0x4] ss:$9 sm:$0xff] %v1437_v19 }
  0xbf   : > { %1514 = vst [vmem:[#allocation1 + $0x5] ss:$9 sm:$0xff] %v1440_v21 }
  0xc0   : > { %1518 = vst [vmem:[#allocation1 + $0x7] ss:$9 sm:$0xff] %v1446_v12 }
  0xc7   : > { %v1519_v39 = vld [vmem:[#allocation1] sm:$0xff]  ;;  %v1520_v25 = vld [vmem:[#allocation1 + $0x9] sm:$0xff] }
  0xc8   : > { %1703 = vmatmul.bf16.vlgmr.msra.gmra.mxu0 %v1519_v39  ;;  %1722 = vmatmul.bf16.vlgmr.msra.gmra.mxu1 %v1520_v25  ;;  %1521 = vst [vmem:[#allocation1] ss:$9 sm:$0xff] %v1449_v27 }
  0xc9   : > { %1522 = vst [vmem:[#allocation1 + $0x1] ss:$9 sm:$0xff] %v1452_v28  ;;  %1741 = vmatmul.bf16.vlgmr.msra.gmra.mxu2 %v1519_v39  ;;  %1760 = vmatmul.bf16.vlgmr.msra.gmra.mxu3 %v1520_v25 }
  0xca   : > { %1523 = vst [vmem:[#allocation1 + $0x2] ss:$9 sm:$0xff] %v1455_v10 }
  0xcb   : > { %1524 = vst [vmem:[#allocation1 + $0x3] ss:$9 sm:$0xff] %v1458_v22 }
  0xcc   : > { %1525 = vst [vmem:[#allocation1 + $0x4] ss:$9 sm:$0xff] %v1461_v31 }
  0xcd   : > { %1526 = vst [vmem:[#allocation1 + $0x5] ss:$9 sm:$0xff] %v1464_v35 }
  0xce   : > { %1527 = vst [vmem:[#allocation1 + $0x6] ss:$9 sm:$0xff] %v1467_v13 }
  0xcf   : > { %1528 = vst [vmem:[#allocation1 + $0x7] ss:$9 sm:$0xff] %v1470_v30  ;;  %v4037_v30 = vsel %vm263_vm2, %v1840_v3, %v1842_v5 }
  0xd1   : > { %v1069_v32 = vpop.f32.mrf.mxu0  ;;  %v1088_v29 = vpop.f32.mrf.mxu1 }
  0xd2   : > { %v1089_v9 = vadd.f32 %v1088_v29, %v1069_v32 }
  0xd6   : > { %v1529_v38 = vld [vmem:[#allocation1] sm:$0xff]  ;;  %v1530_v26 = vld [vmem:[#allocation1 + $0x9] sm:$0xff] }
  0xd8   : > { %1708 = vmatmul.bf16.gmra.mxu0 %v1529_v38  ;;  %1727 = vmatmul.bf16.gmra.mxu1 %v1530_v26  ;;  %v1107_v56 = vpop.f32.mrf.mxu2  ;;  %v1126_v36 = vpop.f32.mrf.mxu3 }
  0xd9   : > { %1746 = vmatmul.bf16.gmra.mxu2 %v1529_v38  ;;  %1765 = vmatmul.bf16.gmra.mxu3 %v1530_v26  ;;  %v1071_v18 = vpop.f32.mrf.mxu0  ;;  %v1090_v33 = vpop.f32.mrf.mxu1  ;;  %v1127_v14 = vadd.f32 %v1126_v36, %v1107_v56 }
  0xda   : > { %v1091_v21 = vadd.f32 %v1090_v33, %v1071_v18 }
  0xe0   : > { %v1109_v41 = vpop.f32.mrf.mxu2  ;;  %v1128_v42 = vpop.f32.mrf.mxu3 }
  0xe1   : > { %v1129_v10 = vadd.f32 %v1128_v42, %v1109_v41 }
  0xf1   : > { %v1074_v43 = vpop.f32.mrf.mxu0  ;;  %v1093_v44 = vpop.f32.mrf.mxu1 }
  0xf2   : > { %v1094_v31 = vadd.f32 %v1093_v44, %v1074_v43 }
  0xf8   : > { %v4006_v45 = vpop.f32.mrf.mxu2  ;;  %v4008_v47 = vpop.f32.mrf.mxu3 }
  0xf9   : > { %v4010_v48 = vpop.f32.mrf.mxu0  ;;  %v4012_v37 = vpop.f32.mrf.mxu1  ;;  %v1132_v41 = vadd.f32 %v4008_v47, %v4006_v45 }
 0x100   : > { %v4014_v34 = vpop.f32.mrf.mxu2  ;;  %v4016_v49 = vpop.f32.mrf.mxu3 }
 0x104   : > { %v1336_v50 = vpop.f32.mrf.mxu0  ;;  %v1355_v52 = vpop.f32.mrf.mxu1 }
 0x105   : > { %v1337_v51 = vadd.f32 %v1336_v50, %v1089_v9  ;;  %v1134_v9 = vadd.f32 %v4016_v49, %v4014_v34 }
 0x107   : > { %v1356_v22 = vadd.f32 %v1355_v52, %v1337_v51 }
 0x10b   : > { %v1374_v53 = vpop.f32.mrf.mxu2  ;;  %v1393_v54 = vpop.f32.mrf.mxu3 }
 0x10c   : > { %v1338_v55 = vpop.f32.mrf.mxu0  ;;  %v1357_v40 = vpop.f32.mrf.mxu1  ;;  %v1375_v16 = vadd.f32 %v1374_v53, %v1127_v14 }
 0x10d   : > { %v1339_v24 = vadd.f32 %v1338_v55, %v1091_v21 }
 0x10e   : > { %v1394_v58 = vadd.f32 %v1393_v54, %v1375_v16  ;;  %v1096_v16 = vadd.f32 %v4012_v37, %v4010_v48 }
 0x10f   : > { %v1358_v42 = vadd.f32 %v1357_v40, %v1339_v24 }
 0x113   : > { %v1376_v59 = vpop.f32.mrf.mxu2  ;;  %v1395_v60 = vpop.f32.mrf.mxu3 }
 0x114   : > { %v1377_v27 = vadd.f32 %v1376_v59, %v1129_v10 }
 0x116   : > { %v4018_v61 = vpop.f32.mrf.mxu0  ;;  %v4020_v46 = vpop.f32.mrf.mxu1  ;;  %v1396_v43 = vadd.f32 %v1395_v60, %v1377_v27 }
 0x11d   : > { %v1379_v1 = vpop.f32.mrf.mxu2  ;;  %v4022_v0 = vpop.f32.mrf.mxu3 }
 0x11e   : > { %v4024_v4 = vpop.f32.mrf.mxu0  ;;  %v4026_v6 = vpop.f32.mrf.mxu1  ;;  %v1380_v59 = vadd.f32 %v1379_v1, %v1132_v41  ;;  %v1342_v1 = vadd.f32 %v4018_v61, %v1094_v31 }
 0x125   : > { %v4028_v7 = vpop.f32.mrf.mxu2  ;;  %v4030_v8 = vpop.f32.mrf.mxu3 }
 0x145   : > { %v1704_v11 = vpop.f32.mrf.mxu0  ;;  %v1723_v12 = vpop.f32.mrf.mxu1 }
 0x146   : > { %v1724_v63 = vadd.f32 %v1723_v12, %v1704_v11 }
 0x148   : > { %v1771_v28 = vadd.f32 %v1724_v63, %v1356_v22  ;;  %v1361_v22 = vadd.f32 %v4020_v46, %v1342_v1  ;;  %v1382_v46 = vadd.f32 %v4028_v7, %v1134_v9 }
 0x14c   : > { %v1742_v62 = vpop.f32.mrf.mxu2  ;;  %v1761_v17 = vpop.f32.mrf.mxu3 }
 0x14d   : > { %v1762_v2 = vadd.f32 %v1761_v17, %v1742_v62  ;;  %v1706_v19 = vpop.f32.mrf.mxu0  ;;  %v1725_v20 = vpop.f32.mrf.mxu1 }
 0x14e   : > { %v1726_v35 = vadd.f32 %v1725_v20, %v1706_v19 }
 0x14f   : > { %v1772_v23 = vadd.f32 %v1762_v2, %v1394_v58  ;;  %v1399_v2 = vadd.f32 %v4022_v0, %v1380_v59 }
 0x150   : > { %v1773_v12 = vadd.f32 %v1726_v35, %v1358_v42 }
 0x151   : > { %v1787_v13 = vrot.slane %v1772_v23, 6 }
 0x153   : > { %v1791_v39 = vsel %vm263_vm2, %v1771_v28, %v1787_v13  ;;  %v1793_v25 = vsel %vm1792_vm0, %v1771_v28, %v1787_v13  ;;  %v1796_v38 = vsel %vm1795_vm1, %v1771_v28, %v1787_v13  ;;  %v1799_v26 = vsel %vm1798_vm3, %v1787_v13, %v1771_v28 }
 0x154   : > { %v1794_v32 = vrot.slane %v1793_v25, 2  ;;  %v1797_v29 = vrot.slane %v1796_v38, 4  ;;  %v1800_v56 = vrot.slane %v1799_v26, 6  ;;  %v1845_v36 = vadd.f32 %v4037_v30, %v1791_v39  ;;  %v1744_v18 = vpop.f32.mrf.mxu2  ;;  %v1763_v33 = vpop.f32.mrf.mxu3 }
 0x155   : > { %v1764_v44 = vadd.f32 %v1763_v33, %v1744_v18  ;;  %v1709_v54 = vpop.f32.mrf.mxu0  ;;  %v1728_v55 = vpop.f32.mrf.mxu1  ;;  %v1344_v28 = vadd.f32 %v4024_v4, %v1096_v16 }
 0x156   : > { %v1846_v50 = vadd.f32 %v4037_v30, %v1794_v32  ;;  %v1847_v52 = vadd.f32 %v4037_v30, %v1797_v29  ;;  %v1848_v53 = vadd.f32 %v4037_v30, %v1800_v56  ;;  %vm1861_vm4 = vcmp.ge.f32.partialorder %v1845_v36, 0.0 }
 0x157   : > { %v1877_v11 = vmul.f32 0.2, %v1845_v36  ;;  %v1774_v14 = vadd.f32 %v1764_v44, %v1396_v43  ;;  %v1729_v10 = vadd.f32 %v1728_v55, %v1709_v54  ;;  %v1401_v54 = vadd.f32 %v4030_v8, %v1382_v46 }
 0x158   : > { %vm1862_vm5 = vcmp.ge.f32.partialorder %v1846_v50, 0.0  ;;  %vm1863_vm11 = vcmp.ge.f32.partialorder %v1847_v52, 0.0  ;;  %vm1864_vm12 = vcmp.ge.f32.partialorder %v1848_v53, 0.0  ;;  %v1878_v45 = vmul.f32 0.2, %v1846_v50 }
 0x159   : > { %v1879_v47 = vmul.f32 0.2, %v1847_v52  ;;  %v1880_v40 = vmul.f32 0.2, %v1848_v53  ;;  %v1893_v60 = vsel %vm1861_vm4, %v1845_v36, %v1877_v11  ;;  %v1788_v15 = vrot.slane %v1774_v14, 6 }
 0x15a   : > { %v1894_v57 = vsel %vm1862_vm5, %v1846_v50, %v1878_v45  ;;  %1909 = vst [vmem:[%s4059_s8] sm:$0xf] %v1893_v60  ;;  %v1775_v26 = vadd.f32 %v1729_v10, %v1361_v22 }
 0x15b   : > { %v1895_v51 = vsel %vm1863_vm11, %v1847_v52, %v1879_v47  ;;  %v1896_v58 = vsel %vm1864_vm12, %v1848_v53, %v1880_v40  ;;  %1910 = vst [vmem:[%s4059_s8 + $0x4] sm:$0xf] %v1894_v57  ;;  %v1801_v62 = vsel %vm263_vm2, %v1773_v12, %v1788_v15  ;;  %v1802_v48 = vsel %vm1792_vm0, %v1773_v12, %v1788_v15 }
 0x15c   : > { %1911 = vst [vmem:[%s4059_s8 + $0x8] sm:$0xf] %v1895_v51  ;;  %v1803_v37 = vrot.slane %v1802_v48, 2  ;;  %v1804_v34 = vsel %vm1795_vm1, %v1773_v12, %v1788_v15  ;;  %v1806_v49 = vsel %vm1798_vm3, %v1788_v15, %v1773_v12  ;;  %v1849_v61 = vadd.f32 %v4037_v30, %v1801_v62  ;;  %v1747_v17 = vpop.f32.mrf.mxu2  ;;  %v1766_v63 = vpop.f32.mrf.mxu3 }
 0x15d   : > { %1912 = vst [vmem:[%s4059_s8 + $0xc] sm:$0xf] %v1896_v58  ;;  %v1805_v3 = vrot.slane %v1804_v34, 4  ;;  %v1807_v5 = vrot.slane %v1806_v49, 6  ;;  %v1767_v19 = vadd.f32 %v1766_v63, %v1747_v17  ;;  %v1711_v31 = vpop.f32.mrf.mxu0  ;;  %v1730_v35 = vpop.f32.mrf.mxu1  ;;  %v1363_v53 = vadd.f32 %v4026_v6, %v1344_v28 }
 0x15e   : > { %v1850_v20 = vadd.f32 %v4037_v30, %v1803_v37  ;;  %vm1865_vm13 = vcmp.ge.f32.partialorder %v1849_v61, 0.0  ;;  %v1881_v21 = vmul.f32 0.2, %v1849_v61  ;;  %v1731_v56 = vadd.f32 %v1730_v35, %v1711_v31 }
 0x15f   : > { %v1851_v23 = vadd.f32 %v4037_v30, %v1805_v3  ;;  %v1852_v24 = vadd.f32 %v4037_v30, %v1807_v5  ;;  %v1776_v27 = vadd.f32 %v1767_v19, %v1399_v2 }
 0x160   : > { %vm1866_vm14 = vcmp.ge.f32.partialorder %v1850_v20, 0.0  ;;  %v1882_v0 = vmul.f32 0.2, %v1850_v20  ;;  %v1897_v13 = vsel %vm1865_vm13, %v1849_v61, %v1881_v21  ;;  %v1777_v45 = vadd.f32 %v1731_v56, %v1363_v53 }
 0x161   : > { %vm1867_vm15 = vcmp.ge.f32.partialorder %v1851_v23, 0.0  ;;  %vm1868_vm6 = vcmp.ge.f32.partialorder %v1852_v24, 0.0  ;;  %v1883_v39 = vmul.f32 0.2, %v1851_v23  ;;  %v1884_v25 = vmul.f32 0.2, %v1852_v24 }
 0x162   : > { %v1898_v38 = vsel %vm1866_vm14, %v1850_v20, %v1882_v0  ;;  %1913 = vst [vmem:[%s4059_s8 + $0x10] sm:$0xf] %v1897_v13  ;;  %v1789_v32 = vrot.slane %v1776_v27, 6 }
 0x163   : > { %v1899_v29 = vsel %vm1867_vm15, %v1851_v23, %v1883_v39  ;;  %v1900_v4 = vsel %vm1868_vm6, %v1852_v24, %v1884_v25  ;;  %1914 = vst [vmem:[%s4059_s8 + $0x14] sm:$0xf] %v1898_v38 }
 0x164   : > { %1915 = vst [vmem:[%s4059_s8 + $0x18] sm:$0xf] %v1899_v29  ;;  %v1808_v36 = vsel %vm263_vm2, %v1775_v26, %v1789_v32  ;;  %v1809_v18 = vsel %vm1792_vm0, %v1775_v26, %v1789_v32  ;;  %v1811_v33 = vsel %vm1795_vm1, %v1775_v26, %v1789_v32  ;;  %v1813_v41 = vsel %vm1798_vm3, %v1789_v32, %v1775_v26  ;;  %v1749_v42 = vpop.f32.mrf.mxu2  ;;  %v1768_v7 = vpop.f32.mrf.mxu3 }
 0x165   : > { %1916 = vst [vmem:[%s4059_s8 + $0x1c] sm:$0xf] %v1900_v4  ;;  %v1810_v43 = vrot.slane %v1809_v18, 2  ;;  %v1812_v44 = vrot.slane %v1811_v33, 4  ;;  %v1814_v50 = vrot.slane %v1813_v41, 6  ;;  %v1853_v52 = vadd.f32 %v4037_v30, %v1808_v36 }
 0x166   : > { %v1769_v55 = vadd.f32 %v1768_v7, %v1749_v42 }
 0x167   : > { %v1854_v59 = vadd.f32 %v4037_v30, %v1810_v43  ;;  %v1855_v11 = vadd.f32 %v4037_v30, %v1812_v44  ;;  %v1856_v12 = vadd.f32 %v4037_v30, %v1814_v50  ;;  %vm1869_vm7 = vcmp.ge.f32.partialorder %v1853_v52, 0.0 }
 0x168   : > { %v1885_v14 = vmul.f32 0.2, %v1853_v52  ;;  %v1778_v47 = vadd.f32 %v1769_v55, %v1401_v54 }
 0x169   : > { %vm1870_vm8 = vcmp.ge.f32.partialorder %v1854_v59, 0.0  ;;  %vm1871_vm9 = vcmp.ge.f32.partialorder %v1855_v11, 0.0  ;;  %vm1872_vm10 = vcmp.ge.f32.partialorder %v1856_v12, 0.0  ;;  %v1886_v6 = vmul.f32 0.2, %v1854_v59 }
 0x16a   : > { %v1887_v8 = vmul.f32 0.2, %v1855_v11  ;;  %v1888_v40 = vmul.f32 0.2, %v1856_v12  ;;  %v1901_v60 = vsel %vm1869_vm7, %v1853_v52, %v1885_v14  ;;  %v1790_v15 = vrot.slane %v1778_v47, 6 }
 0x16b   : > { %v1902_v16 = vsel %vm1870_vm8, %v1854_v59, %v1886_v6  ;;  %1917 = vst [vmem:[%s4059_s8 + $0x20] sm:$0xf] %v1901_v60 }
 0x16c   : > { %v1903_v9 = vsel %vm1871_vm9, %v1855_v11, %v1887_v8  ;;  %v1904_v1 = vsel %vm1872_vm10, %v1856_v12, %v1888_v40  ;;  %1918 = vst [vmem:[%s4059_s8 + $0x24] sm:$0xf] %v1902_v16  ;;  %v1815_v57 = vsel %vm263_vm2, %v1777_v45, %v1790_v15  ;;  %v1816_v51 = vsel %vm1792_vm0, %v1777_v45, %v1790_v15 }
 0x16d   : > { %1919 = vst [vmem:[%s4059_s8 + $0x28] sm:$0xf] %v1903_v9  ;;  %v1817_v58 = vrot.slane %v1816_v51, 2  ;;  %v1818_v62 = vsel %vm1795_vm1, %v1777_v45, %v1790_v15  ;;  %v1820_v48 = vsel %vm1798_vm3, %v1790_v15, %v1777_v45  ;;  %v1857_v37 = vadd.f32 %v4037_v30, %v1815_v57 }
 0x16e   : > { %1920 = vst [vmem:[%s4059_s8 + $0x2c] sm:$0xf] %v1904_v1  ;;  %v1819_v34 = vrot.slane %v1818_v62, 4  ;;  %v1821_v49 = vrot.slane %v1820_v48, 6 }
 0x16f   : > { %v1858_v61 = vadd.f32 %v4037_v30, %v1817_v58  ;;  %vm1873_vm2 = vcmp.ge.f32.partialorder %v1857_v37, 0.0  ;;  %v1889_v17 = vmul.f32 0.2, %v1857_v37 }
 0x170   : > { %v1859_v63 = vadd.f32 %v4037_v30, %v1819_v34  ;;  %v1860_v2 = vadd.f32 %v4037_v30, %v1821_v49 }
 0x171   : > { %vm1874_vm0 = vcmp.ge.f32.partialorder %v1858_v61, 0.0  ;;  %v1890_v3 = vmul.f32 0.2, %v1858_v61  ;;  %v1905_v5 = vsel %vm1873_vm2, %v1857_v37, %v1889_v17 }
 0x172   : > { %vm1875_vm1 = vcmp.ge.f32.partialorder %v1859_v63, 0.0  ;;  %vm1876_vm3 = vcmp.ge.f32.partialorder %v1860_v2, 0.0  ;;  %v1891_v19 = vmul.f32 0.2, %v1859_v63  ;;  %v1892_v20 = vmul.f32 0.2, %v1860_v2 }
 0x173   : > { %v1906_v21 = vsel %vm1874_vm0, %v1858_v61, %v1890_v3  ;;  %1921 = vst [vmem:[%s4059_s8 + $0x30] sm:$0xf] %v1905_v5 }
 0x174   : > { %v1907_v10 = vsel %vm1875_vm1, %v1859_v63, %v1891_v19  ;;  %v1908_v30 = vsel %vm1876_vm3, %v1860_v2, %v1892_v20  ;;  %1922 = vst [vmem:[%s4059_s8 + $0x34] sm:$0xf] %v1906_v21 }
 0x175   : > { %1923 = vst [vmem:[%s4059_s8 + $0x38] sm:$0xf] %v1907_v10 }
 0x176   : > { %1924 = vst [vmem:[%s4059_s8 + $0x3c] sm:$0xf] %v1908_v30 }
 0x177   : > { %2649 = shalt.err (!%p2646_p3)
}
 0x178   : > { %s2686_s4 = smov 64   ;;  %s2687_s5 = smov 4  }
 0x179   : > { %2581 = dma.vmem_to_hbm [thread:$0]  (%p2746_p5), %s1940_s17, 1024, %s1942_s19, %s1926_s20, %s2686_s4, %s2686_s4, %s2687_s5  }
 0x17a PF: > { %p2587_p4 = scmp.ge.s32.totalorder %s2684_s15, 2  ;;  %s1956_s6 = sand.u32 1, %s2672_s12  }
 0x17b   : > { %s1957_s7 = scalar_lea.sflag [#allocation3], %s1956_s6 }
 0x17c   : > { %p2584_p7 = pnand %p2587_p4, %p2750_p6 }
 0x17e   : > { %p2585_p8 = pneg %p2584_p7 }
 0x180   : > { %2667 = dma.done.wait (%p2585_p8), %s1957_s7, 1024  }
 0x181   : > { %2669 = vsyncadd (%p2585_p8), %s1957_s7, 4294966272  ;;  %p13_p9 = scmp.ge.s32.totalorder %s2733_s18, 4   ;;  %s4151_s12 = smov %s2676_s13 }
 0x182   : > { %s4152_s13 = smov %s2680_s14  ;;  %s4153_s14 = smov %s2744_s21 }
 0x183   : > { %s4154_s15 = smov %s2733_s18  ;;  %15 = sbr.rel (!%p13_p9) target bundleno = 3 (0x3), region = 94 }
 0x188   :  { %1963 = vsyncpa [#allocation3], 1 }
 0x189   :  { %1965 = vsyncpa [#allocation3 + $0x1], 1 }

</bundles_post_ra>
